<compile_context>
chip_gen: v5e
topology: v5e:2x2
jax: 0.10.0
libtpu: 0.0.40
codegen_flags: <defaults>
</compile_context>

<pallas_src>
import functools

import numpy as np
import jax
import jax.numpy as jnp
from jax import lax
from jax.experimental import pallas as pl
from jax.experimental.pallas import tpu as pltpu


def _ru(x, m):
    return ((x + m - 1) // m) * m


def _edge_tiles(n_rows, max_tile=512):
    rows = _ru(max(n_rows, 1), 16)
    if rows <= max_tile:
        return rows, rows
    rows = _ru(rows, max_tile)
    return rows, max_tile


# ----------------------------------------------------------------------------
# Pallas kernels
# ----------------------------------------------------------------------------
def _encoder_kernel(patches_ref, convw_ref, wt_ref, g_ref, b_ref, o_ref):
    """conv3x3 GEMM + bias + 2x2 maxpool + ReLU + FC(512->32) + ReLU, fused."""
    # conv GEMM over all 4 pooling offsets stacked along rows (bf16 MXU)
    conv = jnp.dot(patches_ref[...], convw_ref[...],
                   preferred_element_type=jnp.float32)        # (4*Nq, 8)
    nq = conv.shape[0] // 4
    pooled = jnp.maximum(jnp.maximum(conv[0:nq], conv[nq:2 * nq]),
                         jnp.maximum(conv[2 * nq:3 * nq], conv[3 * nq:4 * nq]))
    b = b_ref[...]
    pooled = jnp.maximum(pooled + b[0:1, 0:8], 0.0)           # conv bias + ReLU
    # FC: per-channel VPU contraction against the per-pixel-tiled FC weight
    wt = wt_ref[...]                                          # (Nq, 8*32)
    tmp = pooled[:, 0:1] * wt[:, 0:32]
    for c in range(1, 8):
        tmp = tmp + pooled[:, c:c + 1] * wt[:, c * 32:(c + 1) * 32]
    # per-node sum over the 64 pooled pixels via a small grouping matmul
    y = jnp.dot(g_ref[...], tmp, preferred_element_type=jnp.float32)  # (Np,32)
    y = jnp.maximum(y + b[1:2, 0:32], 0.0)
    o_ref[...] = jnp.concatenate(
        [y, jnp.zeros((y.shape[0], 96), jnp.float32)], axis=1)   # lane-dense


def _edge_kernel(xin_ref, box_ref, w_ref, b_ref, o_ref):
    """Fused per-edge tile: appearance/geom/positional MLPs (block-diagonal
    bf16 matmuls), affinityNet, optimNet edge gate (sigmoid), box IoU."""
    b = b_ref[...]
    x = xin_ref[...]                                            # (T,128) bf16
    # layer 1 of all three MLPs in one block-diagonal matmul
    h1 = jnp.dot(x, w_ref[0:128, :], preferred_element_type=jnp.float32)
    h1 = jnp.maximum(h1 + b[0:1, :], 0.0)
    # layer 2 of all three MLPs in one matmul (cols: 0=app, 1=geom, 2=pos)
    y2 = jnp.dot(h1.astype(jnp.bfloat16), w_ref[128:256, :],
                 preferred_element_type=jnp.float32) + b[1:2, :]
    x1 = y2[:, 0:1]
    x2 = y2[:, 1:2]
    posf = y2[:, 2:3]
    # affinityNet (2 -> 8 -> 1) as VPU broadcasts + lane reduce
    h2 = jnp.maximum(x1 * b[2:3, 0:8] + x2 * b[3:4, 0:8] + b[4:5, 0:8], 0.0)
    edge_emb = jnp.sum(h2 * b[5:6, 0:8], axis=-1, keepdims=True) + b[6:7, 0:1]
    # optimNet edge gate on (edge_emb, positional feature)
    gate = jax.nn.sigmoid(edge_emb * b[7:8, 0:1] + posf * b[7:8, 1:2]
                          + b[7:8, 2:3])
    # IoU of original boxes (f32, EUP reciprocal)
    bx = box_ref[...]
    xx1 = jnp.maximum(bx[:, 0:1], bx[:, 4:5])
    yy1 = jnp.maximum(bx[:, 1:2], bx[:, 5:6])
    xx2 = jnp.minimum(bx[:, 2:3], bx[:, 6:7])
    yy2 = jnp.minimum(bx[:, 3:4], bx[:, 7:8])
    inter = jnp.maximum(xx2 - xx1, 0.0) * jnp.maximum(yy2 - yy1, 0.0)
    a1 = (bx[:, 2:3] - bx[:, 0:1]) * (bx[:, 3:4] - bx[:, 1:2])
    a2 = (bx[:, 6:7] - bx[:, 4:5]) * (bx[:, 7:8] - bx[:, 5:6])
    iou = inter * pl.reciprocal(a1 + a2 - inter + 1e-9, approx=True)
    # lane-dense 128-wide output: col 0 = gate, col 1 = iou
    lane = lax.broadcasted_iota(jnp.int32, o_ref.shape, 1)
    o_ref[...] = jnp.where(lane == 0, gate, 0.0) + jnp.where(lane == 1, iou, 0.0)


def _final_kernel(nin_ref, iou_ref, w_ref, b_ref, o_ref):
    """Fused half-edge tile: optimNet node MLP on stacked [src;dst] rows,
    cosine (f32), final 2->8->1 MLP + sigmoid, lane-dense output."""
    b = b_ref[...]
    xall = nin_ref[...]                                         # (2T,128) bf16
    t = xall.shape[0] // 2
    h = jnp.dot(xall, w_ref[0:128, :], preferred_element_type=jnp.float32)
    h = jnp.maximum(h + b[0:1, :], 0.0)
    o_nodes = jnp.dot(h.astype(jnp.bfloat16), w_ref[128:256, :],
                      preferred_element_type=jnp.float32) + b[1:2, :]
    o_s = o_nodes[0:t, :]
    o_d = o_nodes[t:2 * t, :]
    dotp = jnp.sum(o_s * o_d, axis=-1, keepdims=True)
    n2s = jnp.sum(o_s * o_s, axis=-1, keepdims=True)
    n2d = jnp.sum(o_d * o_d, axis=-1, keepdims=True)
    eps = 1e-6
    cos = dotp * lax.rsqrt(jnp.maximum(n2s * n2d, eps * eps))
    iou = iou_ref[:, 0:1]
    hf = jnp.maximum(cos * b[2:3, 0:8] + iou * b[3:4, 0:8] + b[4:5, 0:8], 0.0)
    out = jax.nn.sigmoid(
        jnp.sum(hf * b[5:6, 0:8], axis=-1, keepdims=True) + b[6:7, 0:1])
    o_ref[...] = jnp.broadcast_to(out, o_ref.shape)


def _sinkhorn_kernel(sizes_ref, m_ref, o_ref, *, iters):
    # TODO(synk): reference sinkhorn() not provided; standard alternating
    # row/column normalization with a fixed iteration count is used.
    g = pl.program_id(0)
    r = sizes_ref[g, 0]
    c = sizes_ref[g, 1]
    rows = lax.broadcasted_iota(jnp.int32, m_ref.shape, 1)
    cols = lax.broadcasted_iota(jnp.int32, m_ref.shape, 2)
    valid = (rows < r) & (cols < c)
    m = jnp.where(valid, m_ref[...], 0.0)
    for it in range(iters):          # fully unrolled fixed short trip count
        exact = (it == iters - 1)    # exact reciprocal on the last iteration
        rs = jnp.sum(m, axis=2, keepdims=True)
        rs = jnp.where(rs > 0.0, rs, 1.0)
        m = m / rs if exact else m * pl.reciprocal(rs, approx=True)
        cs = jnp.sum(m, axis=1, keepdims=True)
        cs = jnp.where(cs > 0.0, cs, 1.0)
        m = m / cs if exact else m * pl.reciprocal(cs, approx=True)
    o_ref[...] = m


# ----------------------------------------------------------------------------
# Pallas-call wrappers
# ----------------------------------------------------------------------------
def _build_pool_patches(x):
    """im2col patches, stacked along rows by 2x2 pooling offset (offset-major)."""
    N, Cin, H, W = x.shape
    x_nhwc = jnp.transpose(x, (0, 2, 3, 1)).astype(jnp.float32)
    xp = jnp.pad(x_nhwc, ((0, 0), (1, 1), (1, 1), (0, 0)))
    patches = jnp.concatenate(
        [xp[:, dh:dh + H, dw:dw + W, :] for dh in range(3) for dw in range(3)],
        axis=-1)                                            # (N,H,W,9*Cin)
    offs = []
    for oh in range(2):
        for ow in range(2):
            sub = patches[:, oh::2, ow::2, :]               # (N,H/2,W/2,9Cin)
            offs.append(sub.reshape(N * (H // 2) * (W // 2), 9 * Cin))
    return jnp.concatenate(offs, axis=0)                    # (4*N*PP, 9*Cin)


def encoder_forward(pk, x):
    """EncoderCNN in ONE kernel (N is small for tracking graphs -> grid=(1,))."""
    N, Cin, H, W = x.shape
    PP = (H // 2) * (W // 2)
    Nq = N * PP
    K = 9 * Cin
    Kp = pk["conv_w"].shape[0]
    patches = _build_pool_patches(x)
    patches = jnp.pad(patches, ((0, 0), (0, Kp - K))).astype(jnp.bfloat16)
    Np = _ru(N, 8)
    wt = jnp.tile(pk["fc_wt_base"], (N, 1))                 # (Nq, 8*32) f32
    g = (jnp.arange(Nq)[None, :] // PP
         == jnp.arange(Np)[:, None]).astype(jnp.float32)    # (Np, Nq)
    return pl.pallas_call(
        _encoder_kernel,
        out_shape=jax.ShapeDtypeStruct((Np, 128), jnp.float32),
        grid=(1,),
        in_specs=[pl.BlockSpec((4 * Nq, Kp), lambda i: (0, 0)),
                  pl.BlockSpec((Kp, 8), lambda i: (0, 0)),
                  pl.BlockSpec((Nq, 256), lambda i: (0, 0)),
                  pl.BlockSpec((Np, Nq), lambda i: (0, 0)),
                  pl.BlockSpec((8, 128), lambda i: (0, 0))],
        out_specs=pl.BlockSpec((Np, 128), lambda i: (0, 0)),
        compiler_params=pltpu.CompilerParams(
            dimension_semantics=("arbitrary",),
            vmem_limit_bytes=32 * 1024 * 1024),
    )(patches, pk["conv_w"], wt, g, pk["enc_b"])


def pallas_sinkhorn_batched(mats, sizes, iters=10):
    """One launch for all graphs; per-graph valid sizes via scalar prefetch."""
    G, Rp, Cp = mats.shape
    return pl.pallas_call(
        functools.partial(_sinkhorn_kernel, iters=iters),
        out_shape=jax.ShapeDtypeStruct((G, Rp, Cp), jnp.float32),
        grid_spec=pltpu.PrefetchScalarGridSpec(
            num_scalar_prefetch=1,
            grid=(G,),
            in_specs=[pl.BlockSpec((1, Rp, Cp), lambda g, s: (g, 0, 0))],
            out_specs=pl.BlockSpec((1, Rp, Cp), lambda g, s: (g, 0, 0))),
        compiler_params=pltpu.CompilerParams(
            dimension_semantics=("parallel",),
            vmem_limit_bytes=32 * 1024 * 1024),
    )(sizes, mats.astype(jnp.float32))


# ----------------------------------------------------------------------------
# Parameters (synthetic representative sub-module weights) + packing
# ----------------------------------------------------------------------------
def init_params(key):
    ks = jax.random.split(key, 16)

    def lin(k, din, dout):
        kw, kb = jax.random.split(k)
        w = jax.random.normal(kw, (din, dout), jnp.float32) / jnp.sqrt(din)
        b = jax.random.normal(kb, (dout,), jnp.float32) * 0.01
        return w, b

    p = {}
    # EncoderCNN: conv3x3 (3->8) + ReLU + maxpool2 + FC (512->32) + ReLU
    p["conv_w"] = jax.random.normal(ks[0], (3, 3, 3, 8), jnp.float32) * 0.1
    p["conv_b"] = jnp.zeros((8,), jnp.float32)
    p["fc_w"], p["fc_b"] = lin(ks[1], 8 * 8 * 8, 32)
    # affinity_appearanceNet: 64 -> 16 -> 1
    p["app_w1"], p["app_b1"] = lin(ks[2], 64, 16)
    p["app_w2"], p["app_b2"] = lin(ks[3], 16, 1)
    # affinity_geomNet: 8 -> 16 -> 1
    p["geo_w1"], p["geo_b1"] = lin(ks[4], 8, 16)
    p["geo_w2"], p["geo_b2"] = lin(ks[5], 16, 1)
    # affinityNet: 2 -> 8 -> 1
    p["aff_w1"], p["aff_b1"] = lin(ks[6], 2, 8)
    p["aff_w2"], p["aff_b2"] = lin(ks[7], 8, 1)
    # PositionalAffinityNet: 6 -> 8 -> 1
    p["pos_w1"], p["pos_b1"] = lin(ks[8], 6, 8)
    p["pos_w2"], p["pos_b2"] = lin(ks[9], 8, 1)
    # optimNet surrogate: edge gate (2->1), node MLP (68->32->16)
    p["opt_ew"], p["opt_eb"] = lin(ks[10], 2, 1)
    p["opt_w1"], p["opt_b1"] = lin(ks[11], 32 + 32 + 4, 32)
    p["opt_w2"], p["opt_b2"] = lin(ks[12], 32, 16)
    # affinity_finalNet: 2 -> 8 -> 1
    p["fin_w1"], p["fin_b1"] = lin(ks[13], 2, 8)
    p["fin_w2"], p["fin_b2"] = lin(ks[14], 8, 1)
    return p


def pack_params(p):
    """Pack the many tiny weights into a few MXU-friendly slabs (bf16) and
    (8,128) f32 bias slabs so each kernel only DMAs 2 weight operands."""
    f32, bf16 = jnp.float32, jnp.bfloat16
    pk = {}
    # encoder
    K = 27
    Kp = _ru(K, 8)
    convw = p["conv_w"].reshape(K, 8)
    pk["conv_w"] = jnp.zeros((Kp, 8), f32).at[:K].set(convw).astype(bf16)
    PP = p["fc_w"].shape[0] // 8
    pk["fc_wt_base"] = p["fc_w"].reshape(PP, 8, 32).reshape(PP, 256).astype(f32)
    enc_b = jnp.zeros((8, 128), f32)
    enc_b = enc_b.at[0, 0:8].set(p["conv_b"])
    enc_b = enc_b.at[1, 0:32].set(p["fc_b"])
    pk["enc_b"] = enc_b
    # edge kernel: block-diagonal layer-1 / layer-2 weight slab (256,128) bf16
    w1 = jnp.zeros((128, 128), f32)
    w1 = w1.at[0:64, 0:16].set(p["app_w1"])
    w1 = w1.at[64:72, 16:32].set(p["geo_w1"])
    w1 = w1.at[72:78, 32:40].set(p["pos_w1"])
    w2 = jnp.zeros((128, 128), f32)
    w2 = w2.at[0:16, 0:1].set(p["app_w2"])
    w2 = w2.at[16:32, 1:2].set(p["geo_w2"])
    w2 = w2.at[32:40, 2:3].set(p["pos_w2"])
    pk["edge_w"] = jnp.concatenate([w1, w2], axis=0).astype(bf16)
    eb = jnp.zeros((8, 128), f32)
    eb = eb.at[0, 0:16].set(p["app_b1"])
    eb = eb.at[0, 16:32].set(p["geo_b1"])
    eb = eb.at[0, 32:40].set(p["pos_b1"])
    eb = eb.at[1, 0].set(p["app_b2"][0])
    eb = eb.at[1, 1].set(p["geo_b2"][0])
    eb = eb.at[1, 2].set(p["pos_b2"][0])
    eb = eb.at[2, 0:8].set(p["aff_w1"][0])
    eb = eb.at[3, 0:8].set(p["aff_w1"][1])
    eb = eb.at[4, 0:8].set(p["aff_b1"])
    eb = eb.at[5, 0:8].set(p["aff_w2"][:, 0])
    eb = eb.at[6, 0].set(p["aff_b2"][0])
    eb = eb.at[7, 0].set(p["opt_ew"][0, 0])
    eb = eb.at[7, 1].set(p["opt_ew"][1, 0])
    eb = eb.at[7, 2].set(p["opt_eb"][0])
    pk["edge_b"] = eb
    # final kernel: node-MLP weight slab (256,128) bf16 + bias slab
    fw1 = jnp.zeros((128, 128), f32).at[0:68, 0:32].set(p["opt_w1"])
    fw2 = jnp.zeros((128, 128), f32).at[0:32, 0:16].set(p["opt_w2"])
    pk["fin_w"] = jnp.concatenate([fw1, fw2], axis=0).astype(bf16)
    fb = jnp.zeros((8, 128), f32)
    fb = fb.at[0, 0:32].set(p["opt_b1"])
    fb = fb.at[1, 0:16].set(p["opt_b2"])
    fb = fb.at[2, 0:8].set(p["fin_w1"][0])
    fb = fb.at[3, 0:8].set(p["fin_w1"][1])
    fb = fb.at[4, 0:8].set(p["fin_b1"])
    fb = fb.at[5, 0:8].set(p["fin_w2"][:, 0])
    fb = fb.at[6, 0].set(p["fin_b2"][0])
    pk["fin_b"] = fb
    return pk


# ----------------------------------------------------------------------------
# Jitted static-shape core (numpy index arrays precomputed on host)
# ----------------------------------------------------------------------------
@functools.partial(jax.jit, static_argnames=("Rp", "Cp"))
def _forward_core(pk, x, coords, coords_original, pos_attr,
                  src, dst, src_h, dst_h, half_idx,
                  scat_g, scat_r, scat_c, gather_idx, tnum, dnum, *, Rp, Cp):
    slack = jnp.float32(-0.2)
    lam = jnp.float32(5.0)
    N = x.shape[0]

    # --- EncoderCNN (one fused kernel) ---
    emb = encoder_forward(pk, x)[:N, 0:32]                       # (N,32) f32

    # --- fused, edge-tiled per-edge kernel ---
    E = src.shape[0]
    Ep, te = _edge_tiles(E)
    xin = jnp.concatenate(
        [emb[src], emb[dst], coords[src], coords[dst], pos_attr], axis=1)
    xin = jnp.pad(xin, ((0, Ep - E), (0, 128 - xin.shape[1]))).astype(jnp.bfloat16)
    boxes = jnp.concatenate([coords_original[src], coords_original[dst]], axis=1)
    boxes = jnp.pad(boxes, ((0, Ep - E), (0, 0)))
    edge_out = pl.pallas_call(
        _edge_kernel,
        out_shape=jax.ShapeDtypeStruct((Ep, 128), jnp.float32),
        grid=(Ep // te,),
        in_specs=[pl.BlockSpec((te, 128), lambda i: (i, 0)),
                  pl.BlockSpec((te, 8), lambda i: (i, 0)),
                  pl.BlockSpec((256, 128), lambda i: (0, 0)),
                  pl.BlockSpec((8, 128), lambda i: (0, 0))],
        out_specs=pl.BlockSpec((te, 128), lambda i: (i, 0)),
        compiler_params=pltpu.CompilerParams(
            dimension_semantics=("parallel",),
            vmem_limit_bytes=32 * 1024 * 1024),
    )(xin, boxes, pk["edge_w"], pk["edge_b"])
    gate = edge_out[:E, 0:1]
    iou = edge_out[:E, 1]

    # --- optimNet surrogate: gated message passing (XLA scatter-add) ---
    # TODO(synk): reference optimNet definition not provided; `frame` unused.
    msgs = gate * emb[src]
    agg = jnp.zeros((N, 32), jnp.float32).at[dst].add(msgs)
    node_in = jnp.concatenate([emb, agg, coords], axis=1)        # (N,68)

    # --- fused, tiled half-edge kernel (node MLP + cosine + final MLP) ---
    Eh = src_h.shape[0]
    Ehp, tf = _edge_tiles(Eh)
    pad_l = 128 - node_in.shape[1]
    nis = jnp.pad(node_in[src_h], ((0, Ehp - Eh), (0, pad_l))).astype(jnp.bfloat16)
    nid = jnp.pad(node_in[dst_h], ((0, Ehp - Eh), (0, pad_l))).astype(jnp.bfloat16)
    nt = Ehp // tf
    # interleave src/dst rows at tile granularity so each grid block holds
    # [src tile ; dst tile] contiguously -> one double-height node-MLP matmul
    nin = jnp.concatenate(
        [nis.reshape(nt, tf, 128), nid.reshape(nt, tf, 128)], axis=1
    ).reshape(2 * Ehp, 128)
    iou_in = jnp.pad(iou[half_idx].reshape(-1, 1), ((0, Ehp - Eh), (0, 7)))
    fin_out = pl.pallas_call(
        _final_kernel,
        out_shape=jax.ShapeDtypeStruct((Ehp, 128), jnp.float32),
        grid=(Ehp // tf,),
        in_specs=[pl.BlockSpec((2 * tf, 128), lambda i: (i, 0)),
                  pl.BlockSpec((tf, 8), lambda i: (i, 0)),
                  pl.BlockSpec((256, 128), lambda i: (0, 0)),
                  pl.BlockSpec((8, 128), lambda i: (0, 0))],
        out_specs=pl.BlockSpec((tf, 128), lambda i: (i, 0)),
        compiler_params=pltpu.CompilerParams(
            dimension_semantics=("parallel",),
            vmem_limit_bytes=32 * 1024 * 1024),
    )(nin, iou_in, pk["fin_w"], pk["fin_b"])
    out_half = fin_out[:Eh, 0]

    # --- batched assignment-matrix build (one scatter) + ONE sinkhorn launch ---
    G = tnum.shape[0]
    slack_exp = jnp.exp(slack * lam)
    r_idx = jnp.arange(Rp).reshape(1, Rp, 1)
    c_idx = jnp.arange(Cp).reshape(1, 1, Cp)
    T3 = tnum.reshape(G, 1, 1)
    D3 = dnum.reshape(G, 1, 1)
    valid = (r_idx <= T3) & (c_idx <= D3)
    slack_mask = valid & ((r_idx == T3) | (c_idx == D3))
    mats = jnp.where(slack_mask, slack_exp, 0.0).astype(jnp.float32)
    mats = mats.at[scat_g, scat_r, scat_c].set(jnp.exp(out_half * lam))
    sizes = jnp.stack([tnum + 1, dnum + 1], axis=1).astype(jnp.int32)
    norm = pallas_sinkhorn_batched(mats, sizes, iters=10)
    normalized_output = norm.reshape(-1)[gather_idx]
    return normalized_output


# ----------------------------------------------------------------------------
# completeNet forward
# ----------------------------------------------------------------------------
def complete_net_forward(p, data):
    x = jnp.asarray(data["x"], jnp.float32)
    coords_original = jnp.asarray(data["coords_original"], jnp.float32)
    coords = jnp.asarray(data["coords"], jnp.float32)
    pos_attr = jnp.asarray(data["positional_edge_attr"], jnp.float32)
    ground_truth = jnp.asarray(data["ground_truth"])
    edge_index = np.asarray(data["edge_index"])
    edges_number = [int(v) for v in data["edges_number"]]
    track_num = [int(v) for v in data["track_num"]]
    det_num_list = [int(v) for v in data["det_num"]]
    G = len(data["idx"])

    src_np = edge_index[0].astype(np.int32)
    dst_np = edge_index[1].astype(np.int32)
    half_idx_np = np.nonzero(src_np < dst_np)[0].astype(np.int32)

    max_t = max(track_num)
    max_d = max(det_num_list)
    Rp = _ru(max_t + 1, 8)
    Cp = _ru(max_d + 1, 128)

    # host-side numpy precompute of all per-graph scatter/gather indices
    # (no per-graph XLA dispatch in the jitted core)
    scat_g, scat_r, scat_c, gather_chunks = [], [], [], []
    start1, node_off = 0, 0
    for i in range(G):
        ne1 = edges_number[i]
        T, D = track_num[i], det_num_list[i]
        es = edge_index[:, start1:start1 + ne1]
        eh = es[:, es[0] < es[1]]
        scat_g.append(np.full(eh.shape[1], i, np.int32))
        scat_r.append((eh[0] - node_off).astype(np.int32))
        scat_c.append((eh[1] - node_off - T).astype(np.int32))
        base = i * Rp * Cp
        gather_chunks.append(
            (base + np.arange(T)[:, None] * Cp + np.arange(D)[None, :])
            .reshape(-1).astype(np.int32))
        start1 += ne1
        node_off += T + D
    scat_g = jnp.asarray(np.concatenate(scat_g))
    scat_r = jnp.asarray(np.concatenate(scat_r))
    scat_c = jnp.asarray(np.concatenate(scat_c))
    gather_idx = jnp.asarray(np.concatenate(gather_chunks))
    tnum = jnp.asarray(track_num, jnp.int32)
    dnum = jnp.asarray(det_num_list, jnp.int32)

    pk = pack_params(p)
    normalized_output = _forward_core(
        pk, x, coords, coords_original, pos_attr,
        jnp.asarray(src_np), jnp.asarray(dst_np),
        jnp.asarray(src_np[half_idx_np]), jnp.asarray(dst_np[half_idx_np]),
        jnp.asarray(half_idx_np),
        scat_g, scat_r, scat_c, gather_idx, tnum, dnum, Rp=Rp, Cp=Cp)

    # --- nonzero filtering (host-side dynamic shapes, matches reference) ---
    nz = jnp.nonzero(normalized_output != 0)[0]
    normalized_output_final = normalized_output[nz]
    ground_truth_final = ground_truth[nz]
    return (normalized_output_final, normalized_output,
            ground_truth_final, ground_truth, dnum, tnum)


# ----------------------------------------------------------------------------
if __name__ == "__main__":
    key = jax.random.PRNGKey(0)
    k_x, k_c, k_co, k_pos, k_gt = jax.random.split(key, 5)

    n_track, n_det = 3, 3
    n_nodes = n_track + n_det

    x = jax.random.normal(k_x, (n_nodes, 3, 16, 16), jnp.float32)
    coords = jax.random.uniform(k_c, (n_nodes, 4), jnp.float32)
    cxy = jax.random.uniform(k_co, (n_nodes, 2), jnp.float32) * 100.0
    wh = jax.random.uniform(jax.random.fold_in(k_co, 1),
                            (n_nodes, 2), jnp.float32) * 20.0 + 5.0
    coords_original = jnp.concatenate([cxy - wh / 2, cxy + wh / 2], axis=1)

    # bipartite edges: tracks 0..2 <-> detections 3..5, both directions
    e_src, e_dst = [], []
    for t in range(n_track):
        for d in range(n_track, n_nodes):
            e_src.append(t)
            e_dst.append(d)
    for t in range(n_track):
        for d in range(n_track, n_nodes):
            e_src.append(d)
            e_dst.append(t)
    edge_index = np.array([e_src, e_dst], dtype=np.int32)
    n_edges = edge_index.shape[1]

    positional_edge_attr = jax.random.normal(k_pos, (n_edges, 6), jnp.float32)
    ground_truth = (jax.random.uniform(k_gt, (n_track * n_det,)) > 0.5
                    ).astype(jnp.float32)

    data = {
        "x": x,
        "coords": coords,
        "coords_original": coords_original,
        "edge_index": edge_index,
        "positional_edge_attr": positional_edge_attr,
        "ground_truth": ground_truth,
        "edges_number": [n_edges],
        "track_num": [n_track],
        "det_num": [n_det],
        "frame": np.array([0, 0, 0, 1, 1, 1]),
        "idx": [0],
    }

    params = init_params(jax.random.PRNGKey(42))
    outs = complete_net_forward(params, data)
    for o in outs:
        jax.block_until_ready(o)
    print("KERNEL_OK")
</pallas_src>

<mosaic_0001>
module attributes {stable_mosaic.version = 11 : i64} {
  func.func @_encoder_kernel(%arg0: i32, %arg1: memref<1536x32xbf16, #tpu.memory_space<vmem>>, %arg2: memref<32x8xbf16, #tpu.memory_space<vmem>>, %arg3: memref<384x256xf32, #tpu.memory_space<vmem>>, %arg4: memref<8x384xf32, #tpu.memory_space<vmem>>, %arg5: memref<8x128xf32, #tpu.memory_space<vmem>>, %arg6: memref<8x128xf32, #tpu.memory_space<vmem>>) attributes {dimension_semantics = [#tpu.dimension_semantics<arbitrary>], iteration_bounds = array<i64: 1>, scalar_prefetch = 0 : i64, scratch_operands = 0 : i64, tpu.core_type = #tpu.core_type<tc>, window_params = [{pipeline_mode = #tpu.pipeline_mode<synchronous>, transform_indices = @transform_0, window_bounds = array<i64: 1536, 32>}, {pipeline_mode = #tpu.pipeline_mode<synchronous>, transform_indices = @transform_1, window_bounds = array<i64: 32, 8>}, {pipeline_mode = #tpu.pipeline_mode<synchronous>, transform_indices = @transform_2, window_bounds = array<i64: 384, 256>}, {pipeline_mode = #tpu.pipeline_mode<synchronous>, transform_indices = @transform_3, window_bounds = array<i64: 8, 384>}, {pipeline_mode = #tpu.pipeline_mode<synchronous>, transform_indices = @transform_4, window_bounds = array<i64: 8, 128>}, {pipeline_mode = #tpu.pipeline_mode<synchronous>, transform_indices = @transform_5, window_bounds = array<i64: 8, 128>}]} {
    %c0 = arith.constant 0 : index
    %c0_0 = arith.constant 0 : index
    %0 = vector.load %arg1[%c0, %c0_0] : memref<1536x32xbf16, #tpu.memory_space<vmem>>, vector<1536x32xbf16>
    %c0_1 = arith.constant 0 : index
    %c0_2 = arith.constant 0 : index
    %1 = vector.load %arg2[%c0_1, %c0_2] : memref<32x8xbf16, #tpu.memory_space<vmem>>, vector<32x8xbf16>
    %cst = arith.constant dense<0.000000e+00> : vector<1536x8xf32>
    %2 = tpu.matmul %0, %1, %cst {dimension_numbers = #tpu.dot_dimension_numbers<[1], [0], [0], [1], [0, 0, 1, 1], [], []>} : vector<1536x32xbf16>, vector<32x8xbf16>, vector<1536x8xf32> -> vector<1536x8xf32>
    %3 = vector.extract_strided_slice %2 {offsets = [0, 0], sizes = [384, 8], strides = [1, 1]} : vector<1536x8xf32> to vector<384x8xf32>
    %4 = vector.extract_strided_slice %2 {offsets = [384, 0], sizes = [384, 8], strides = [1, 1]} : vector<1536x8xf32> to vector<384x8xf32>
    %5 = arith.maximumf %3, %4 : vector<384x8xf32>
    %6 = vector.extract_strided_slice %2 {offsets = [768, 0], sizes = [384, 8], strides = [1, 1]} : vector<1536x8xf32> to vector<384x8xf32>
    %7 = vector.extract_strided_slice %2 {offsets = [1152, 0], sizes = [384, 8], strides = [1, 1]} : vector<1536x8xf32> to vector<384x8xf32>
    %8 = arith.maximumf %6, %7 : vector<384x8xf32>
    %9 = arith.maximumf %5, %8 : vector<384x8xf32>
    %c0_3 = arith.constant 0 : index
    %c0_4 = arith.constant 0 : index
    %10 = vector.load %arg5[%c0_3, %c0_4] : memref<8x128xf32, #tpu.memory_space<vmem>>, vector<8x128xf32>
    %11 = vector.extract_strided_slice %10 {offsets = [0, 0], sizes = [1, 8], strides = [1, 1]} : vector<8x128xf32> to vector<1x8xf32>
    %12 = vector.broadcast %11 : vector<1x8xf32> to vector<384x8xf32>
    %13 = arith.addf %9, %12 : vector<384x8xf32>
    %cst_5 = arith.constant 0.000000e+00 : f32
    %14 = vector.broadcast %cst_5 : f32 to vector<384x8xf32>
    %15 = arith.maximumf %13, %14 : vector<384x8xf32>
    %c0_6 = arith.constant 0 : index
    %c0_7 = arith.constant 0 : index
    %16 = vector.load %arg3[%c0_6, %c0_7] : memref<384x256xf32, #tpu.memory_space<vmem>>, vector<384x256xf32>
    %17 = vector.extract_strided_slice %15 {offsets = [0, 0], sizes = [384, 1], strides = [1, 1]} : vector<384x8xf32> to vector<384x1xf32>
    %18 = vector.extract_strided_slice %16 {offsets = [0, 0], sizes = [384, 32], strides = [1, 1]} : vector<384x256xf32> to vector<384x32xf32>
    %19 = vector.broadcast %17 : vector<384x1xf32> to vector<384x32xf32>
    %20 = arith.mulf %19, %18 : vector<384x32xf32>
    %21 = vector.extract_strided_slice %15 {offsets = [0, 1], sizes = [384, 1], strides = [1, 1]} : vector<384x8xf32> to vector<384x1xf32>
    %22 = vector.extract_strided_slice %16 {offsets = [0, 32], sizes = [384, 32], strides = [1, 1]} : vector<384x256xf32> to vector<384x32xf32>
    %23 = vector.broadcast %21 : vector<384x1xf32> to vector<384x32xf32>
    %24 = arith.mulf %23, %22 : vector<384x32xf32>
    %25 = arith.addf %20, %24 : vector<384x32xf32>
    %26 = vector.extract_strided_slice %15 {offsets = [0, 2], sizes = [384, 1], strides = [1, 1]} : vector<384x8xf32> to vector<384x1xf32>
    %27 = vector.extract_strided_slice %16 {offsets = [0, 64], sizes = [384, 32], strides = [1, 1]} : vector<384x256xf32> to vector<384x32xf32>
    %28 = vector.broadcast %26 : vector<384x1xf32> to vector<384x32xf32>
    %29 = arith.mulf %28, %27 : vector<384x32xf32>
    %30 = arith.addf %25, %29 : vector<384x32xf32>
    %31 = vector.extract_strided_slice %15 {offsets = [0, 3], sizes = [384, 1], strides = [1, 1]} : vector<384x8xf32> to vector<384x1xf32>
    %32 = vector.extract_strided_slice %16 {offsets = [0, 96], sizes = [384, 32], strides = [1, 1]} : vector<384x256xf32> to vector<384x32xf32>
    %33 = vector.broadcast %31 : vector<384x1xf32> to vector<384x32xf32>
    %34 = arith.mulf %33, %32 : vector<384x32xf32>
    %35 = arith.addf %30, %34 : vector<384x32xf32>
    %36 = vector.extract_strided_slice %15 {offsets = [0, 4], sizes = [384, 1], strides = [1, 1]} : vector<384x8xf32> to vector<384x1xf32>
    %37 = vector.extract_strided_slice %16 {offsets = [0, 128], sizes = [384, 32], strides = [1, 1]} : vector<384x256xf32> to vector<384x32xf32>
    %38 = vector.broadcast %36 : vector<384x1xf32> to vector<384x32xf32>
    %39 = arith.mulf %38, %37 : vector<384x32xf32>
    %40 = arith.addf %35, %39 : vector<384x32xf32>
    %41 = vector.extract_strided_slice %15 {offsets = [0, 5], sizes = [384, 1], strides = [1, 1]} : vector<384x8xf32> to vector<384x1xf32>
    %42 = vector.extract_strided_slice %16 {offsets = [0, 160], sizes = [384, 32], strides = [1, 1]} : vector<384x256xf32> to vector<384x32xf32>
    %43 = vector.broadcast %41 : vector<384x1xf32> to vector<384x32xf32>
    %44 = arith.mulf %43, %42 : vector<384x32xf32>
    %45 = arith.addf %40, %44 : vector<384x32xf32>
    %46 = vector.extract_strided_slice %15 {offsets = [0, 6], sizes = [384, 1], strides = [1, 1]} : vector<384x8xf32> to vector<384x1xf32>
    %47 = vector.extract_strided_slice %16 {offsets = [0, 192], sizes = [384, 32], strides = [1, 1]} : vector<384x256xf32> to vector<384x32xf32>
    %48 = vector.broadcast %46 : vector<384x1xf32> to vector<384x32xf32>
    %49 = arith.mulf %48, %47 : vector<384x32xf32>
    %50 = arith.addf %45, %49 : vector<384x32xf32>
    %51 = vector.extract_strided_slice %15 {offsets = [0, 7], sizes = [384, 1], strides = [1, 1]} : vector<384x8xf32> to vector<384x1xf32>
    %52 = vector.extract_strided_slice %16 {offsets = [0, 224], sizes = [384, 32], strides = [1, 1]} : vector<384x256xf32> to vector<384x32xf32>
    %53 = vector.broadcast %51 : vector<384x1xf32> to vector<384x32xf32>
    %54 = arith.mulf %53, %52 : vector<384x32xf32>
    %55 = arith.addf %50, %54 : vector<384x32xf32>
    %c0_8 = arith.constant 0 : index
    %c0_9 = arith.constant 0 : index
    %56 = vector.load %arg4[%c0_8, %c0_9] : memref<8x384xf32, #tpu.memory_space<vmem>>, vector<8x384xf32>
    %cst_10 = arith.constant dense<0.000000e+00> : vector<8x32xf32>
    %57 = tpu.matmul %56, %55, %cst_10 {dimension_numbers = #tpu.dot_dimension_numbers<[1], [0], [0], [1], [0, 0, 1, 1], [], []>} : vector<8x384xf32>, vector<384x32xf32>, vector<8x32xf32> -> vector<8x32xf32>
    %58 = vector.extract_strided_slice %10 {offsets = [1, 0], sizes = [1, 32], strides = [1, 1]} : vector<8x128xf32> to vector<1x32xf32>
    %59 = vector.broadcast %58 : vector<1x32xf32> to vector<8x32xf32>
    %60 = arith.addf %57, %59 : vector<8x32xf32>
    %cst_11 = arith.constant 0.000000e+00 : f32
    %61 = vector.broadcast %cst_11 : f32 to vector<8x32xf32>
    %62 = arith.maximumf %60, %61 : vector<8x32xf32>
    %cst_12 = arith.constant 0.000000e+00 : f32
    %63 = vector.broadcast %cst_12 : f32 to vector<8x96xf32>
    %64 = tpu.concatenate %62, %63 in 1 : vector<8x32xf32>, vector<8x96xf32> -> vector<8x128xf32>
    %c0_13 = arith.constant 0 : index
    %c0_14 = arith.constant 0 : index
    %65 = vector.load %arg6[%c0_13, %c0_14] : memref<8x128xf32, #tpu.memory_space<vmem>>, vector<8x128xf32>
    tpu.vector_store %arg6[%c0_13, %c0_14], %64 {strides = array<i32>} : memref<8x128xf32, #tpu.memory_space<vmem>>, vector<8x128xf32>,
    return
  }
  func.func @transform_0(%arg0: i32) -> (i32, i32) {
    %c0_i32 = arith.constant 0 : i32
    %c0_i32_0 = arith.constant 0 : i32
    %c0_i32_1 = arith.constant 0 : i32
    return %c0_i32, %c0_i32_0 : i32, i32
  }
  func.func @transform_1(%arg0: i32) -> (i32, i32) {
    %c0_i32 = arith.constant 0 : i32
    %c0_i32_0 = arith.constant 0 : i32
    %c0_i32_1 = arith.constant 0 : i32
    return %c0_i32, %c0_i32_0 : i32, i32
  }
  func.func @transform_2(%arg0: i32) -> (i32, i32) {
    %c0_i32 = arith.constant 0 : i32
    %c0_i32_0 = arith.constant 0 : i32
    %c0_i32_1 = arith.constant 0 : i32
    return %c0_i32, %c0_i32_0 : i32, i32
  }
  func.func @transform_3(%arg0: i32) -> (i32, i32) {
    %c0_i32 = arith.constant 0 : i32
    %c0_i32_0 = arith.constant 0 : i32
    %c0_i32_1 = arith.constant 0 : i32
    return %c0_i32, %c0_i32_0 : i32, i32
  }
  func.func @transform_4(%arg0: i32) -> (i32, i32) {
    %c0_i32 = arith.constant 0 : i32
    %c0_i32_0 = arith.constant 0 : i32
    %c0_i32_1 = arith.constant 0 : i32
    return %c0_i32, %c0_i32_0 : i32, i32
  }
  func.func @transform_5(%arg0: i32) -> (i32, i32) {
    %c0_i32 = arith.constant 0 : i32
    %c0_i32_0 = arith.constant 0 : i32
    %c0_i32_1 = arith.constant 0 : i32
    return %c0_i32, %c0_i32_0 : i32, i32
  }
}

module attributes {stable_mosaic.version = 11 : i64} {
  func.func @_edge_kernel(%arg0: i32, %arg1: memref<32x128xbf16, #tpu.memory_space<vmem>>, %arg2: memref<32x8xf32, #tpu.memory_space<vmem>>, %arg3: memref<256x128xbf16, #tpu.memory_space<vmem>>, %arg4: memref<8x128xf32, #tpu.memory_space<vmem>>, %arg5: memref<32x128xf32, #tpu.memory_space<vmem>>) attributes {dimension_semantics = [#tpu.dimension_semantics<parallel>], iteration_bounds = array<i64: 1>, scalar_prefetch = 0 : i64, scratch_operands = 0 : i64, tpu.core_type = #tpu.core_type<tc>, window_params = [{transform_indices = @transform_0, window_bounds = array<i64: 32, 128>}, {transform_indices = @transform_1, window_bounds = array<i64: 32, 8>}, {pipeline_mode = #tpu.pipeline_mode<synchronous>, transform_indices = @transform_2, window_bounds = array<i64: 256, 128>}, {pipeline_mode = #tpu.pipeline_mode<synchronous>, transform_indices = @transform_3, window_bounds = array<i64: 8, 128>}, {transform_indices = @transform_4, window_bounds = array<i64: 32, 128>}]} {
    %c0 = arith.constant 0 : index
    %c0_0 = arith.constant 0 : index
    %0 = vector.load %arg4[%c0, %c0_0] : memref<8x128xf32, #tpu.memory_space<vmem>>, vector<8x128xf32>
    %c0_1 = arith.constant 0 : index
    %c0_2 = arith.constant 0 : index
    %1 = vector.load %arg1[%c0_1, %c0_2] : memref<32x128xbf16, #tpu.memory_space<vmem>>, vector<32x128xbf16>
    %c0_3 = arith.constant 0 : index
    %c0_4 = arith.constant 0 : index
    %2 = vector.load %arg3[%c0_3, %c0_4] : memref<256x128xbf16, #tpu.memory_space<vmem>>, vector<128x128xbf16>
    %cst = arith.constant dense<0.000000e+00> : vector<32x128xf32>
    %3 = tpu.matmul %1, %2, %cst {dimension_numbers = #tpu.dot_dimension_numbers<[1], [0], [0], [1], [0, 0, 1, 1], [], []>} : vector<32x128xbf16>, vector<128x128xbf16>, vector<32x128xf32> -> vector<32x128xf32>
    %4 = vector.extract_strided_slice %0 {offsets = [0, 0], sizes = [1, 128], strides = [1, 1]} : vector<8x128xf32> to vector<1x128xf32>
    %5 = vector.broadcast %4 : vector<1x128xf32> to vector<32x128xf32>
    %6 = arith.addf %3, %5 : vector<32x128xf32>
    %cst_5 = arith.constant 0.000000e+00 : f32
    %7 = vector.broadcast %cst_5 : f32 to vector<32x128xf32>
    %8 = arith.maximumf %6, %7 : vector<32x128xf32>
    %9 = arith.truncf %8 : vector<32x128xf32> to vector<32x128xbf16>
    %c128 = arith.constant 128 : index
    %c0_6 = arith.constant 0 : index
    %10 = vector.load %arg3[%c128, %c0_6] : memref<256x128xbf16, #tpu.memory_space<vmem>>, vector<128x128xbf16>
    %cst_7 = arith.constant dense<0.000000e+00> : vector<32x128xf32>
    %11 = tpu.matmul %9, %10, %cst_7 {dimension_numbers = #tpu.dot_dimension_numbers<[1], [0], [0], [1], [0, 0, 1, 1], [], []>} : vector<32x128xbf16>, vector<128x128xbf16>, vector<32x128xf32> -> vector<32x128xf32>
    %12 = vector.extract_strided_slice %0 {offsets = [1, 0], sizes = [1, 128], strides = [1, 1]} : vector<8x128xf32> to vector<1x128xf32>
    %13 = vector.broadcast %12 : vector<1x128xf32> to vector<32x128xf32>
    %14 = arith.addf %11, %13 : vector<32x128xf32>
    %15 = vector.extract_strided_slice %14 {offsets = [0, 0], sizes = [32, 1], strides = [1, 1]} : vector<32x128xf32> to vector<32x1xf32>
    %16 = vector.extract_strided_slice %14 {offsets = [0, 1], sizes = [32, 1], strides = [1, 1]} : vector<32x128xf32> to vector<32x1xf32>
    %17 = vector.extract_strided_slice %14 {offsets = [0, 2], sizes = [32, 1], strides = [1, 1]} : vector<32x128xf32> to vector<32x1xf32>
    %18 = vector.extract_strided_slice %0 {offsets = [2, 0], sizes = [1, 8], strides = [1, 1]} : vector<8x128xf32> to vector<1x8xf32>
    %19 = vector.broadcast %15 : vector<32x1xf32> to vector<32x8xf32>
    %20 = vector.broadcast %18 : vector<1x8xf32> to vector<32x8xf32>
    %21 = arith.mulf %19, %20 : vector<32x8xf32>
    %22 = vector.extract_strided_slice %0 {offsets = [3, 0], sizes = [1, 8], strides = [1, 1]} : vector<8x128xf32> to vector<1x8xf32>
    %23 = vector.broadcast %16 : vector<32x1xf32> to vector<32x8xf32>
    %24 = vector.broadcast %22 : vector<1x8xf32> to vector<32x8xf32>
    %25 = arith.mulf %23, %24 : vector<32x8xf32>
    %26 = arith.addf %21, %25 : vector<32x8xf32>
    %27 = vector.extract_strided_slice %0 {offsets = [4, 0], sizes = [1, 8], strides = [1, 1]} : vector<8x128xf32> to vector<1x8xf32>
    %28 = vector.broadcast %27 : vector<1x8xf32> to vector<32x8xf32>
    %29 = arith.addf %26, %28 : vector<32x8xf32>
    %cst_8 = arith.constant 0.000000e+00 : f32
    %30 = vector.broadcast %cst_8 : f32 to vector<32x8xf32>
    %31 = arith.maximumf %29, %30 : vector<32x8xf32>
    %32 = vector.extract_strided_slice %0 {offsets = [5, 0], sizes = [1, 8], strides = [1, 1]} : vector<8x128xf32> to vector<1x8xf32>
    %33 = vector.broadcast %32 : vector<1x8xf32> to vector<32x8xf32>
    %34 = arith.mulf %31, %33 : vector<32x8xf32>
    %cst_9 = arith.constant dense<0.000000e+00> : vector<32xf32>
    %35 = vector.multi_reduction <add>, %34, %cst_9 [1] : vector<32x8xf32> to vector<32xf32>
    %36 = vector.shape_cast %35 : vector<32xf32> to vector<32x1xf32>
    %37 = vector.extract_strided_slice %0 {offsets = [6, 0], sizes = [1, 1], strides = [1, 1]} : vector<8x128xf32> to vector<1x1xf32>
    %38 = vector.broadcast %37 : vector<1x1xf32> to vector<32x1xf32>
    %39 = arith.addf %36, %38 : vector<32x1xf32>
    %40 = vector.extract_strided_slice %0 {offsets = [7, 0], sizes = [1, 1], strides = [1, 1]} : vector<8x128xf32> to vector<1x1xf32>
    %41 = vector.broadcast %40 : vector<1x1xf32> to vector<32x1xf32>
    %42 = arith.mulf %39, %41 : vector<32x1xf32>
    %43 = vector.extract_strided_slice %0 {offsets = [7, 1], sizes = [1, 1], strides = [1, 1]} : vector<8x128xf32> to vector<1x1xf32>
    %44 = vector.broadcast %43 : vector<1x1xf32> to vector<32x1xf32>
    %45 = arith.mulf %17, %44 : vector<32x1xf32>
    %46 = arith.addf %42, %45 : vector<32x1xf32>
    %47 = vector.extract_strided_slice %0 {offsets = [7, 2], sizes = [1, 1], strides = [1, 1]} : vector<8x128xf32> to vector<1x1xf32>
    %48 = vector.broadcast %47 : vector<1x1xf32> to vector<32x1xf32>
    %49 = arith.addf %46, %48 : vector<32x1xf32>
    %50 = arith.negf %49 : vector<32x1xf32>
    %51 = math.exp %50 : vector<32x1xf32>
    %cst_10 = arith.constant 1.000000e+00 : f32
    %52 = vector.broadcast %cst_10 : f32 to vector<32x1xf32>
    %53 = arith.addf %52, %51 : vector<32x1xf32>
    %54 = arith.divf %52, %53 : vector<32x1xf32>
    %c0_11 = arith.constant 0 : index
    %c0_12 = arith.constant 0 : index
    %55 = vector.load %arg2[%c0_11, %c0_12] : memref<32x8xf32, #tpu.memory_space<vmem>>, vector<32x8xf32>
    %56 = vector.extract_strided_slice %55 {offsets = [0, 0], sizes = [32, 1], strides = [1, 1]} : vector<32x8xf32> to vector<32x1xf32>
    %57 = vector.extract_strided_slice %55 {offsets = [0, 4], sizes = [32, 1], strides = [1, 1]} : vector<32x8xf32> to vector<32x1xf32>
    %58 = arith.maximumf %56, %57 : vector<32x1xf32>
    %59 = vector.extract_strided_slice %55 {offsets = [0, 1], sizes = [32, 1], strides = [1, 1]} : vector<32x8xf32> to vector<32x1xf32>
    %60 = vector.extract_strided_slice %55 {offsets = [0, 5], sizes = [32, 1], strides = [1, 1]} : vector<32x8xf32> to vector<32x1xf32>
    %61 = arith.maximumf %59, %60 : vector<32x1xf32>
    %62 = vector.extract_strided_slice %55 {offsets = [0, 2], sizes = [32, 1], strides = [1, 1]} : vector<32x8xf32> to vector<32x1xf32>
    %63 = vector.extract_strided_slice %55 {offsets = [0, 6], sizes = [32, 1], strides = [1, 1]} : vector<32x8xf32> to vector<32x1xf32>
    %64 = arith.minimumf %62, %63 : vector<32x1xf32>
    %65 = vector.extract_strided_slice %55 {offsets = [0, 3], sizes = [32, 1], strides = [1, 1]} : vector<32x8xf32> to vector<32x1xf32>
    %66 = vector.extract_strided_slice %55 {offsets = [0, 7], sizes = [32, 1], strides = [1, 1]} : vector<32x8xf32> to vector<32x1xf32>
    %67 = arith.minimumf %65, %66 : vector<32x1xf32>
    %68 = arith.subf %64, %58 : vector<32x1xf32>
    %cst_13 = arith.constant 0.000000e+00 : f32
    %69 = vector.broadcast %cst_13 : f32 to vector<32x1xf32>
    %70 = arith.maximumf %68, %69 : vector<32x1xf32>
    %71 = arith.subf %67, %61 : vector<32x1xf32>
    %cst_14 = arith.constant 0.000000e+00 : f32
    %72 = vector.broadcast %cst_14 : f32 to vector<32x1xf32>
    %73 = arith.maximumf %71, %72 : vector<32x1xf32>
    %74 = arith.mulf %70, %73 : vector<32x1xf32>
    %75 = vector.extract_strided_slice %55 {offsets = [0, 2], sizes = [32, 1], strides = [1, 1]} : vector<32x8xf32> to vector<32x1xf32>
    %76 = vector.extract_strided_slice %55 {offsets = [0, 0], sizes = [32, 1], strides = [1, 1]} : vector<32x8xf32> to vector<32x1xf32>
    %77 = arith.subf %75, %76 : vector<32x1xf32>
    %78 = vector.extract_strided_slice %55 {offsets = [0, 3], sizes = [32, 1], strides = [1, 1]} : vector<32x8xf32> to vector<32x1xf32>
    %79 = vector.extract_strided_slice %55 {offsets = [0, 1], sizes = [32, 1], strides = [1, 1]} : vector<32x8xf32> to vector<32x1xf32>
    %80 = arith.subf %78, %79 : vector<32x1xf32>
    %81 = arith.mulf %77, %80 : vector<32x1xf32>
    %82 = vector.extract_strided_slice %55 {offsets = [0, 6], sizes = [32, 1], strides = [1, 1]} : vector<32x8xf32> to vector<32x1xf32>
    %83 = vector.extract_strided_slice %55 {offsets = [0, 4], sizes = [32, 1], strides = [1, 1]} : vector<32x8xf32> to vector<32x1xf32>
    %84 = arith.subf %82, %83 : vector<32x1xf32>
    %85 = vector.extract_strided_slice %55 {offsets = [0, 7], sizes = [32, 1], strides = [1, 1]} : vector<32x8xf32> to vector<32x1xf32>
    %86 = vector.extract_strided_slice %55 {offsets = [0, 5], sizes = [32, 1], strides = [1, 1]} : vector<32x8xf32> to vector<32x1xf32>
    %87 = arith.subf %85, %86 : vector<32x1xf32>
    %88 = arith.mulf %84, %87 : vector<32x1xf32>
    %89 = arith.addf %81, %88 : vector<32x1xf32>
    %90 = arith.subf %89, %74 : vector<32x1xf32>
    %cst_15 = arith.constant 9.99999971E-10 : f32
    %91 = vector.broadcast %cst_15 : f32 to vector<32x1xf32>
    %92 = arith.addf %90, %91 : vector<32x1xf32>
    %93 = tpu.reciprocal %92 {approx = true} : vector<32x1xf32> -> vector<32x1xf32>
    %94 = arith.mulf %74, %93 : vector<32x1xf32>
    %95 = tpu.iota {dimensions = array<i32: 1>} : vector<32x128xi32>
    %c0_i32 = arith.constant 0 : i32
    %96 = vector.broadcast %c0_i32 : i32 to vector<32x128xi32>
    %97 = arith.cmpi eq, %95, %96 : vector<32x128xi32>
    %cst_16 = arith.constant 0.000000e+00 : f32
    %98 = vector.shape_cast %54 : vector<32x1xf32> to vector<32x1xf32>
    %99 = vector.broadcast %98 : vector<32x1xf32> to vector<32x128xf32>
    %100 = vector.broadcast %cst_16 : f32 to vector<32x128xf32>
    %101 = arith.select %97, %99, %100 : vector<32x128xi1>, vector<32x128xf32>
    %c1_i32 = arith.constant 1 : i32
    %102 = vector.broadcast %c1_i32 : i32 to vector<32x128xi32>
    %103 = arith.cmpi eq, %95, %102 : vector<32x128xi32>
    %cst_17 = arith.constant 0.000000e+00 : f32
    %104 = vector.shape_cast %94 : vector<32x1xf32> to vector<32x1xf32>
    %105 = vector.broadcast %104 : vector<32x1xf32> to vector<32x128xf32>
    %106 = vector.broadcast %cst_17 : f32 to vector<32x128xf32>
    %107 = arith.select %103, %105, %106 : vector<32x128xi1>, vector<32x128xf32>
    %108 = arith.addf %101, %107 : vector<32x128xf32>
    %c0_18 = arith.constant 0 : index
    %c0_19 = arith.constant 0 : index
    %109 = vector.load %arg5[%c0_18, %c0_19] : memref<32x128xf32, #tpu.memory_space<vmem>>, vector<32x128xf32>
    tpu.vector_store %arg5[%c0_18, %c0_19], %108 {strides = array<i32>} : memref<32x128xf32, #tpu.memory_space<vmem>>, vector<32x128xf32>,
    return
  }
  func.func @transform_0(%arg0: i32) -> (i32, i32) {
    %c0_i32 = arith.constant 0 : i32
    %c0_i32_0 = arith.constant 0 : i32
    return %arg0, %c0_i32 : i32, i32
  }
  func.func @transform_1(%arg0: i32) -> (i32, i32) {
    %c0_i32 = arith.constant 0 : i32
    %c0_i32_0 = arith.constant 0 : i32
    return %arg0, %c0_i32 : i32, i32
  }
  func.func @transform_2(%arg0: i32) -> (i32, i32) {
    %c0_i32 = arith.constant 0 : i32
    %c0_i32_0 = arith.constant 0 : i32
    %c0_i32_1 = arith.constant 0 : i32
    return %c0_i32, %c0_i32_0 : i32, i32
  }
  func.func @transform_3(%arg0: i32) -> (i32, i32) {
    %c0_i32 = arith.constant 0 : i32
    %c0_i32_0 = arith.constant 0 : i32
    %c0_i32_1 = arith.constant 0 : i32
    return %c0_i32, %c0_i32_0 : i32, i32
  }
  func.func @transform_4(%arg0: i32) -> (i32, i32) {
    %c0_i32 = arith.constant 0 : i32
    %c0_i32_0 = arith.constant 0 : i32
    return %arg0, %c0_i32 : i32, i32
  }
}

module attributes {stable_mosaic.version = 11 : i64} {
  func.func @_final_kernel(%arg0: i32, %arg1: memref<32x128xbf16, #tpu.memory_space<vmem>>, %arg2: memref<16x8xf32, #tpu.memory_space<vmem>>, %arg3: memref<256x128xbf16, #tpu.memory_space<vmem>>, %arg4: memref<8x128xf32, #tpu.memory_space<vmem>>, %arg5: memref<16x128xf32, #tpu.memory_space<vmem>>) attributes {dimension_semantics = [#tpu.dimension_semantics<parallel>], iteration_bounds = array<i64: 1>, scalar_prefetch = 0 : i64, scratch_operands = 0 : i64, tpu.core_type = #tpu.core_type<tc>, window_params = [{transform_indices = @transform_0, window_bounds = array<i64: 32, 128>}, {transform_indices = @transform_1, window_bounds = array<i64: 16, 8>}, {pipeline_mode = #tpu.pipeline_mode<synchronous>, transform_indices = @transform_2, window_bounds = array<i64: 256, 128>}, {pipeline_mode = #tpu.pipeline_mode<synchronous>, transform_indices = @transform_3, window_bounds = array<i64: 8, 128>}, {transform_indices = @transform_4, window_bounds = array<i64: 16, 128>}]} {
    %c0 = arith.constant 0 : index
    %c0_0 = arith.constant 0 : index
    %0 = vector.load %arg4[%c0, %c0_0] : memref<8x128xf32, #tpu.memory_space<vmem>>, vector<8x128xf32>
    %c0_1 = arith.constant 0 : index
    %c0_2 = arith.constant 0 : index
    %1 = vector.load %arg1[%c0_1, %c0_2] : memref<32x128xbf16, #tpu.memory_space<vmem>>, vector<32x128xbf16>
    %c0_3 = arith.constant 0 : index
    %c0_4 = arith.constant 0 : index
    %2 = vector.load %arg3[%c0_3, %c0_4] : memref<256x128xbf16, #tpu.memory_space<vmem>>, vector<128x128xbf16>
    %cst = arith.constant dense<0.000000e+00> : vector<32x128xf32>
    %3 = tpu.matmul %1, %2, %cst {dimension_numbers = #tpu.dot_dimension_numbers<[1], [0], [0], [1], [0, 0, 1, 1], [], []>} : vector<32x128xbf16>, vector<128x128xbf16>, vector<32x128xf32> -> vector<32x128xf32>
    %4 = vector.extract_strided_slice %0 {offsets = [0, 0], sizes = [1, 128], strides = [1, 1]} : vector<8x128xf32> to vector<1x128xf32>
    %5 = vector.broadcast %4 : vector<1x128xf32> to vector<32x128xf32>
    %6 = arith.addf %3, %5 : vector<32x128xf32>
    %cst_5 = arith.constant 0.000000e+00 : f32
    %7 = vector.broadcast %cst_5 : f32 to vector<32x128xf32>
    %8 = arith.maximumf %6, %7 : vector<32x128xf32>
    %9 = arith.truncf %8 : vector<32x128xf32> to vector<32x128xbf16>
    %c128 = arith.constant 128 : index
    %c0_6 = arith.constant 0 : index
    %10 = vector.load %arg3[%c128, %c0_6] : memref<256x128xbf16, #tpu.memory_space<vmem>>, vector<128x128xbf16>
    %cst_7 = arith.constant dense<0.000000e+00> : vector<32x128xf32>
    %11 = tpu.matmul %9, %10, %cst_7 {dimension_numbers = #tpu.dot_dimension_numbers<[1], [0], [0], [1], [0, 0, 1, 1], [], []>} : vector<32x128xbf16>, vector<128x128xbf16>, vector<32x128xf32> -> vector<32x128xf32>
    %12 = vector.extract_strided_slice %0 {offsets = [1, 0], sizes = [1, 128], strides = [1, 1]} : vector<8x128xf32> to vector<1x128xf32>
    %13 = vector.broadcast %12 : vector<1x128xf32> to vector<32x128xf32>
    %14 = arith.addf %11, %13 : vector<32x128xf32>
    %15 = vector.extract_strided_slice %14 {offsets = [0, 0], sizes = [16, 128], strides = [1, 1]} : vector<32x128xf32> to vector<16x128xf32>
    %16 = vector.extract_strided_slice %14 {offsets = [16, 0], sizes = [16, 128], strides = [1, 1]} : vector<32x128xf32> to vector<16x128xf32>
    %17 = arith.mulf %15, %16 : vector<16x128xf32>
    %cst_8 = arith.constant dense<0.000000e+00> : vector<16xf32>
    %18 = vector.multi_reduction <add>, %17, %cst_8 [1] : vector<16x128xf32> to vector<16xf32>
    %19 = vector.shape_cast %18 : vector<16xf32> to vector<16x1xf32>
    %20 = arith.mulf %15, %15 : vector<16x128xf32>
    %cst_9 = arith.constant dense<0.000000e+00> : vector<16xf32>
    %21 = vector.multi_reduction <add>, %20, %cst_9 [1] : vector<16x128xf32> to vector<16xf32>
    %22 = vector.shape_cast %21 : vector<16xf32> to vector<16x1xf32>
    %23 = arith.mulf %16, %16 : vector<16x128xf32>
    %cst_10 = arith.constant dense<0.000000e+00> : vector<16xf32>
    %24 = vector.multi_reduction <add>, %23, %cst_10 [1] : vector<16x128xf32> to vector<16xf32>
    %25 = vector.shape_cast %24 : vector<16xf32> to vector<16x1xf32>
    %26 = arith.mulf %22, %25 : vector<16x1xf32>
    %cst_11 = arith.constant 9.99999996E-13 : f32
    %27 = vector.broadcast %cst_11 : f32 to vector<16x1xf32>
    %28 = arith.maximumf %26, %27 : vector<16x1xf32>
    %29 = math.rsqrt %28 : vector<16x1xf32>
    %30 = arith.mulf %19, %29 : vector<16x1xf32>
    %c0_12 = arith.constant 0 : index
    %c0_13 = arith.constant 0 : index
    %31 = vector.load %arg2[%c0_12, %c0_13] : memref<16x8xf32, #tpu.memory_space<vmem>>, vector<16x1xf32>
    %32 = vector.extract_strided_slice %0 {offsets = [2, 0], sizes = [1, 8], strides = [1, 1]} : vector<8x128xf32> to vector<1x8xf32>
    %33 = vector.broadcast %30 : vector<16x1xf32> to vector<16x8xf32>
    %34 = vector.broadcast %32 : vector<1x8xf32> to vector<16x8xf32>
    %35 = arith.mulf %33, %34 : vector<16x8xf32>
    %36 = vector.extract_strided_slice %0 {offsets = [3, 0], sizes = [1, 8], strides = [1, 1]} : vector<8x128xf32> to vector<1x8xf32>
    %37 = vector.broadcast %31 : vector<16x1xf32> to vector<16x8xf32>
    %38 = vector.broadcast %36 : vector<1x8xf32> to vector<16x8xf32>
    %39 = arith.mulf %37, %38 : vector<16x8xf32>
    %40 = arith.addf %35, %39 : vector<16x8xf32>
    %41 = vector.extract_strided_slice %0 {offsets = [4, 0], sizes = [1, 8], strides = [1, 1]} : vector<8x128xf32> to vector<1x8xf32>
    %42 = vector.broadcast %41 : vector<1x8xf32> to vector<16x8xf32>
    %43 = arith.addf %40, %42 : vector<16x8xf32>
    %cst_14 = arith.constant 0.000000e+00 : f32
    %44 = vector.broadcast %cst_14 : f32 to vector<16x8xf32>
    %45 = arith.maximumf %43, %44 : vector<16x8xf32>
    %46 = vector.extract_strided_slice %0 {offsets = [5, 0], sizes = [1, 8], strides = [1, 1]} : vector<8x128xf32> to vector<1x8xf32>
    %47 = vector.broadcast %46 : vector<1x8xf32> to vector<16x8xf32>
    %48 = arith.mulf %45, %47 : vector<16x8xf32>
    %cst_15 = arith.constant dense<0.000000e+00> : vector<16xf32>
    %49 = vector.multi_reduction <add>, %48, %cst_15 [1] : vector<16x8xf32> to vector<16xf32>
    %50 = vector.shape_cast %49 : vector<16xf32> to vector<16x1xf32>
    %51 = vector.extract_strided_slice %0 {offsets = [6, 0], sizes = [1, 1], strides = [1, 1]} : vector<8x128xf32> to vector<1x1xf32>
    %52 = vector.broadcast %51 : vector<1x1xf32> to vector<16x1xf32>
    %53 = arith.addf %50, %52 : vector<16x1xf32>
    %54 = arith.negf %53 : vector<16x1xf32>
    %55 = math.exp %54 : vector<16x1xf32>
    %cst_16 = arith.constant 1.000000e+00 : f32
    %56 = vector.broadcast %cst_16 : f32 to vector<16x1xf32>
    %57 = arith.addf %56, %55 : vector<16x1xf32>
    %58 = arith.divf %56, %57 : vector<16x1xf32>
    %59 = vector.shape_cast %58 : vector<16x1xf32> to vector<16x1xf32>
    %60 = vector.broadcast %59 : vector<16x1xf32> to vector<16x128xf32>
    %c0_17 = arith.constant 0 : index
    %c0_18 = arith.constant 0 : index
    %61 = vector.load %arg5[%c0_17, %c0_18] : memref<16x128xf32, #tpu.memory_space<vmem>>, vector<16x128xf32>
    tpu.vector_store %arg5[%c0_17, %c0_18], %60 {strides = array<i32>} : memref<16x128xf32, #tpu.memory_space<vmem>>, vector<16x128xf32>,
    return
  }
  func.func @transform_0(%arg0: i32) -> (i32, i32) {
    %c0_i32 = arith.constant 0 : i32
    %c0_i32_0 = arith.constant 0 : i32
    return %arg0, %c0_i32 : i32, i32
  }
  func.func @transform_1(%arg0: i32) -> (i32, i32) {
    %c0_i32 = arith.constant 0 : i32
    %c0_i32_0 = arith.constant 0 : i32
    return %arg0, %c0_i32 : i32, i32
  }
  func.func @transform_2(%arg0: i32) -> (i32, i32) {
    %c0_i32 = arith.constant 0 : i32
    %c0_i32_0 = arith.constant 0 : i32
    %c0_i32_1 = arith.constant 0 : i32
    return %c0_i32, %c0_i32_0 : i32, i32
  }
  func.func @transform_3(%arg0: i32) -> (i32, i32) {
    %c0_i32 = arith.constant 0 : i32
    %c0_i32_0 = arith.constant 0 : i32
    %c0_i32_1 = arith.constant 0 : i32
    return %c0_i32, %c0_i32_0 : i32, i32
  }
  func.func @transform_4(%arg0: i32) -> (i32, i32) {
    %c0_i32 = arith.constant 0 : i32
    %c0_i32_0 = arith.constant 0 : i32
    return %arg0, %c0_i32 : i32, i32
  }
}

module attributes {stable_mosaic.version = 11 : i64} {
  func.func @_sinkhorn_kernel(%arg0: i32, %arg1: memref<1x2xi32, #tpu.memory_space<smem>>, %arg2: memref<1x8x128xf32, #tpu.memory_space<vmem>>, %arg3: memref<1x8x128xf32, #tpu.memory_space<vmem>>) attributes {dimension_semantics = [#tpu.dimension_semantics<parallel>], iteration_bounds = array<i64: 1>, scalar_prefetch = 1 : i64, scratch_operands = 0 : i64, tpu.core_type = #tpu.core_type<tc>, window_params = [{transform_indices = @transform_0, window_bounds = array<i64: 1, 8, 128>}, {transform_indices = @transform_1, window_bounds = array<i64: 1, 8, 128>}]} {
    %0 = arith.index_cast %arg0 : i32 to index
    %c0 = arith.constant 0 : index
    %1 = memref.load %arg1[%0, %c0] : memref<1x2xi32, #tpu.memory_space<smem>>
    %2 = arith.index_cast %arg0 : i32 to index
    %c1 = arith.constant 1 : index
    %3 = memref.load %arg1[%2, %c1] : memref<1x2xi32, #tpu.memory_space<smem>>
    %4 = tpu.iota {dimensions = array<i32: 1>} : vector<1x8x128xi32>
    %5 = tpu.iota {dimensions = array<i32: 2>} : vector<1x8x128xi32>
    %6 = vector.broadcast %1 : i32 to vector<1x8x128xi32>
    %7 = arith.cmpi slt, %4, %6 : vector<1x8x128xi32>
    %8 = vector.broadcast %3 : i32 to vector<1x8x128xi32>
    %9 = arith.cmpi slt, %5, %8 : vector<1x8x128xi32>
    %10 = arith.andi %7, %9 : vector<1x8x128xi1>
    %c0_0 = arith.constant 0 : index
    %c0_1 = arith.constant 0 : index
    %c0_2 = arith.constant 0 : index
    %11 = vector.load %arg2[%c0_0, %c0_1, %c0_2] : memref<1x8x128xf32, #tpu.memory_space<vmem>>, vector<1x8x128xf32>
    %cst = arith.constant 0.000000e+00 : f32
    %12 = vector.broadcast %cst : f32 to vector<1x8x128xf32>
    %13 = arith.select %10, %11, %12 : vector<1x8x128xi1>, vector<1x8x128xf32>
    %cst_3 = arith.constant dense<0.000000e+00> : vector<1x8xf32>
    %14 = vector.multi_reduction <add>, %13, %cst_3 [2] : vector<1x8x128xf32> to vector<1x8xf32>
    %15 = vector.shape_cast %14 : vector<1x8xf32> to vector<1x8x1xf32>
    %cst_4 = arith.constant 0.000000e+00 : f32
    %16 = vector.broadcast %cst_4 : f32 to vector<1x8x1xf32>
    %17 = arith.cmpf ogt, %15, %16 : vector<1x8x1xf32>
    %cst_5 = arith.constant 1.000000e+00 : f32
    %18 = vector.broadcast %cst_5 : f32 to vector<1x8x1xf32>
    %19 = arith.select %17, %15, %18 : vector<1x8x1xi1>, vector<1x8x1xf32>
    %20 = tpu.reciprocal %19 {approx = true} : vector<1x8x1xf32> -> vector<1x8x1xf32>
    %21 = vector.broadcast %20 : vector<1x8x1xf32> to vector<1x8x128xf32>
    %22 = arith.mulf %13, %21 : vector<1x8x128xf32>
    %cst_6 = arith.constant dense<0.000000e+00> : vector<1x128xf32>
    %23 = vector.multi_reduction <add>, %22, %cst_6 [1] : vector<1x8x128xf32> to vector<1x128xf32>
    %24 = vector.shape_cast %23 : vector<1x128xf32> to vector<1x1x128xf32>
    %cst_7 = arith.constant 0.000000e+00 : f32
    %25 = vector.broadcast %cst_7 : f32 to vector<1x1x128xf32>
    %26 = arith.cmpf ogt, %24, %25 : vector<1x1x128xf32>
    %cst_8 = arith.constant 1.000000e+00 : f32
    %27 = vector.broadcast %cst_8 : f32 to vector<1x1x128xf32>
    %28 = arith.select %26, %24, %27 : vector<1x1x128xi1>, vector<1x1x128xf32>
    %29 = tpu.reciprocal %28 {approx = true} : vector<1x1x128xf32> -> vector<1x1x128xf32>
    %30 = vector.broadcast %29 : vector<1x1x128xf32> to vector<1x8x128xf32>
    %31 = arith.mulf %22, %30 : vector<1x8x128xf32>
    %cst_9 = arith.constant dense<0.000000e+00> : vector<1x8xf32>
    %32 = vector.multi_reduction <add>, %31, %cst_9 [2] : vector<1x8x128xf32> to vector<1x8xf32>
    %33 = vector.shape_cast %32 : vector<1x8xf32> to vector<1x8x1xf32>
    %cst_10 = arith.constant 0.000000e+00 : f32
    %34 = vector.broadcast %cst_10 : f32 to vector<1x8x1xf32>
    %35 = arith.cmpf ogt, %33, %34 : vector<1x8x1xf32>
    %cst_11 = arith.constant 1.000000e+00 : f32
    %36 = vector.broadcast %cst_11 : f32 to vector<1x8x1xf32>
    %37 = arith.select %35, %33, %36 : vector<1x8x1xi1>, vector<1x8x1xf32>
    %38 = tpu.reciprocal %37 {approx = true} : vector<1x8x1xf32> -> vector<1x8x1xf32>
    %39 = vector.broadcast %38 : vector<1x8x1xf32> to vector<1x8x128xf32>
    %40 = arith.mulf %31, %39 : vector<1x8x128xf32>
    %cst_12 = arith.constant dense<0.000000e+00> : vector<1x128xf32>
    %41 = vector.multi_reduction <add>, %40, %cst_12 [1] : vector<1x8x128xf32> to vector<1x128xf32>
    %42 = vector.shape_cast %41 : vector<1x128xf32> to vector<1x1x128xf32>
    %cst_13 = arith.constant 0.000000e+00 : f32
    %43 = vector.broadcast %cst_13 : f32 to vector<1x1x128xf32>
    %44 = arith.cmpf ogt, %42, %43 : vector<1x1x128xf32>
    %cst_14 = arith.constant 1.000000e+00 : f32
    %45 = vector.broadcast %cst_14 : f32 to vector<1x1x128xf32>
    %46 = arith.select %44, %42, %45 : vector<1x1x128xi1>, vector<1x1x128xf32>
    %47 = tpu.reciprocal %46 {approx = true} : vector<1x1x128xf32> -> vector<1x1x128xf32>
    %48 = vector.broadcast %47 : vector<1x1x128xf32> to vector<1x8x128xf32>
    %49 = arith.mulf %40, %48 : vector<1x8x128xf32>
    %cst_15 = arith.constant dense<0.000000e+00> : vector<1x8xf32>
    %50 = vector.multi_reduction <add>, %49, %cst_15 [2] : vector<1x8x128xf32> to vector<1x8xf32>
    %51 = vector.shape_cast %50 : vector<1x8xf32> to vector<1x8x1xf32>
    %cst_16 = arith.constant 0.000000e+00 : f32
    %52 = vector.broadcast %cst_16 : f32 to vector<1x8x1xf32>
    %53 = arith.cmpf ogt, %51, %52 : vector<1x8x1xf32>
    %cst_17 = arith.constant 1.000000e+00 : f32
    %54 = vector.broadcast %cst_17 : f32 to vector<1x8x1xf32>
    %55 = arith.select %53, %51, %54 : vector<1x8x1xi1>, vector<1x8x1xf32>
    %56 = tpu.reciprocal %55 {approx = true} : vector<1x8x1xf32> -> vector<1x8x1xf32>
    %57 = vector.broadcast %56 : vector<1x8x1xf32> to vector<1x8x128xf32>
    %58 = arith.mulf %49, %57 : vector<1x8x128xf32>
    %cst_18 = arith.constant dense<0.000000e+00> : vector<1x128xf32>
    %59 = vector.multi_reduction <add>, %58, %cst_18 [1] : vector<1x8x128xf32> to vector<1x128xf32>
    %60 = vector.shape_cast %59 : vector<1x128xf32> to vector<1x1x128xf32>
    %cst_19 = arith.constant 0.000000e+00 : f32
    %61 = vector.broadcast %cst_19 : f32 to vector<1x1x128xf32>
    %62 = arith.cmpf ogt, %60, %61 : vector<1x1x128xf32>
    %cst_20 = arith.constant 1.000000e+00 : f32
    %63 = vector.broadcast %cst_20 : f32 to vector<1x1x128xf32>
    %64 = arith.select %62, %60, %63 : vector<1x1x128xi1>, vector<1x1x128xf32>
    %65 = tpu.reciprocal %64 {approx = true} : vector<1x1x128xf32> -> vector<1x1x128xf32>
    %66 = vector.broadcast %65 : vector<1x1x128xf32> to vector<1x8x128xf32>
    %67 = arith.mulf %58, %66 : vector<1x8x128xf32>
    %cst_21 = arith.constant dense<0.000000e+00> : vector<1x8xf32>
    %68 = vector.multi_reduction <add>, %67, %cst_21 [2] : vector<1x8x128xf32> to vector<1x8xf32>
    %69 = vector.shape_cast %68 : vector<1x8xf32> to vector<1x8x1xf32>
    %cst_22 = arith.constant 0.000000e+00 : f32
    %70 = vector.broadcast %cst_22 : f32 to vector<1x8x1xf32>
    %71 = arith.cmpf ogt, %69, %70 : vector<1x8x1xf32>
    %cst_23 = arith.constant 1.000000e+00 : f32
    %72 = vector.broadcast %cst_23 : f32 to vector<1x8x1xf32>
    %73 = arith.select %71, %69, %72 : vector<1x8x1xi1>, vector<1x8x1xf32>
    %74 = tpu.reciprocal %73 {approx = true} : vector<1x8x1xf32> -> vector<1x8x1xf32>
    %75 = vector.broadcast %74 : vector<1x8x1xf32> to vector<1x8x128xf32>
    %76 = arith.mulf %67, %75 : vector<1x8x128xf32>
    %cst_24 = arith.constant dense<0.000000e+00> : vector<1x128xf32>
    %77 = vector.multi_reduction <add>, %76, %cst_24 [1] : vector<1x8x128xf32> to vector<1x128xf32>
    %78 = vector.shape_cast %77 : vector<1x128xf32> to vector<1x1x128xf32>
    %cst_25 = arith.constant 0.000000e+00 : f32
    %79 = vector.broadcast %cst_25 : f32 to vector<1x1x128xf32>
    %80 = arith.cmpf ogt, %78, %79 : vector<1x1x128xf32>
    %cst_26 = arith.constant 1.000000e+00 : f32
    %81 = vector.broadcast %cst_26 : f32 to vector<1x1x128xf32>
    %82 = arith.select %80, %78, %81 : vector<1x1x128xi1>, vector<1x1x128xf32>
    %83 = tpu.reciprocal %82 {approx = true} : vector<1x1x128xf32> -> vector<1x1x128xf32>
    %84 = vector.broadcast %83 : vector<1x1x128xf32> to vector<1x8x128xf32>
    %85 = arith.mulf %76, %84 : vector<1x8x128xf32>
    %cst_27 = arith.constant dense<0.000000e+00> : vector<1x8xf32>
    %86 = vector.multi_reduction <add>, %85, %cst_27 [2] : vector<1x8x128xf32> to vector<1x8xf32>
    %87 = vector.shape_cast %86 : vector<1x8xf32> to vector<1x8x1xf32>
    %cst_28 = arith.constant 0.000000e+00 : f32
    %88 = vector.broadcast %cst_28 : f32 to vector<1x8x1xf32>
    %89 = arith.cmpf ogt, %87, %88 : vector<1x8x1xf32>
    %cst_29 = arith.constant 1.000000e+00 : f32
    %90 = vector.broadcast %cst_29 : f32 to vector<1x8x1xf32>
    %91 = arith.select %89, %87, %90 : vector<1x8x1xi1>, vector<1x8x1xf32>
    %92 = tpu.reciprocal %91 {approx = true} : vector<1x8x1xf32> -> vector<1x8x1xf32>
    %93 = vector.broadcast %92 : vector<1x8x1xf32> to vector<1x8x128xf32>
    %94 = arith.mulf %85, %93 : vector<1x8x128xf32>
    %cst_30 = arith.constant dense<0.000000e+00> : vector<1x128xf32>
    %95 = vector.multi_reduction <add>, %94, %cst_30 [1] : vector<1x8x128xf32> to vector<1x128xf32>
    %96 = vector.shape_cast %95 : vector<1x128xf32> to vector<1x1x128xf32>
    %cst_31 = arith.constant 0.000000e+00 : f32
    %97 = vector.broadcast %cst_31 : f32 to vector<1x1x128xf32>
    %98 = arith.cmpf ogt, %96, %97 : vector<1x1x128xf32>
    %cst_32 = arith.constant 1.000000e+00 : f32
    %99 = vector.broadcast %cst_32 : f32 to vector<1x1x128xf32>
    %100 = arith.select %98, %96, %99 : vector<1x1x128xi1>, vector<1x1x128xf32>
    %101 = tpu.reciprocal %100 {approx = true} : vector<1x1x128xf32> -> vector<1x1x128xf32>
    %102 = vector.broadcast %101 : vector<1x1x128xf32> to vector<1x8x128xf32>
    %103 = arith.mulf %94, %102 : vector<1x8x128xf32>
    %cst_33 = arith.constant dense<0.000000e+00> : vector<1x8xf32>
    %104 = vector.multi_reduction <add>, %103, %cst_33 [2] : vector<1x8x128xf32> to vector<1x8xf32>
    %105 = vector.shape_cast %104 : vector<1x8xf32> to vector<1x8x1xf32>
    %cst_34 = arith.constant 0.000000e+00 : f32
    %106 = vector.broadcast %cst_34 : f32 to vector<1x8x1xf32>
    %107 = arith.cmpf ogt, %105, %106 : vector<1x8x1xf32>
    %cst_35 = arith.constant 1.000000e+00 : f32
    %108 = vector.broadcast %cst_35 : f32 to vector<1x8x1xf32>
    %109 = arith.select %107, %105, %108 : vector<1x8x1xi1>, vector<1x8x1xf32>
    %110 = tpu.reciprocal %109 {approx = true} : vector<1x8x1xf32> -> vector<1x8x1xf32>
    %111 = vector.broadcast %110 : vector<1x8x1xf32> to vector<1x8x128xf32>
    %112 = arith.mulf %103, %111 : vector<1x8x128xf32>
    %cst_36 = arith.constant dense<0.000000e+00> : vector<1x128xf32>
    %113 = vector.multi_reduction <add>, %112, %cst_36 [1] : vector<1x8x128xf32> to vector<1x128xf32>
    %114 = vector.shape_cast %113 : vector<1x128xf32> to vector<1x1x128xf32>
    %cst_37 = arith.constant 0.000000e+00 : f32
    %115 = vector.broadcast %cst_37 : f32 to vector<1x1x128xf32>
    %116 = arith.cmpf ogt, %114, %115 : vector<1x1x128xf32>
    %cst_38 = arith.constant 1.000000e+00 : f32
    %117 = vector.broadcast %cst_38 : f32 to vector<1x1x128xf32>
    %118 = arith.select %116, %114, %117 : vector<1x1x128xi1>, vector<1x1x128xf32>
    %119 = tpu.reciprocal %118 {approx = true} : vector<1x1x128xf32> -> vector<1x1x128xf32>
    %120 = vector.broadcast %119 : vector<1x1x128xf32> to vector<1x8x128xf32>
    %121 = arith.mulf %112, %120 : vector<1x8x128xf32>
    %cst_39 = arith.constant dense<0.000000e+00> : vector<1x8xf32>
    %122 = vector.multi_reduction <add>, %121, %cst_39 [2] : vector<1x8x128xf32> to vector<1x8xf32>
    %123 = vector.shape_cast %122 : vector<1x8xf32> to vector<1x8x1xf32>
    %cst_40 = arith.constant 0.000000e+00 : f32
    %124 = vector.broadcast %cst_40 : f32 to vector<1x8x1xf32>
    %125 = arith.cmpf ogt, %123, %124 : vector<1x8x1xf32>
    %cst_41 = arith.constant 1.000000e+00 : f32
    %126 = vector.broadcast %cst_41 : f32 to vector<1x8x1xf32>
    %127 = arith.select %125, %123, %126 : vector<1x8x1xi1>, vector<1x8x1xf32>
    %128 = tpu.reciprocal %127 {approx = true} : vector<1x8x1xf32> -> vector<1x8x1xf32>
    %129 = vector.broadcast %128 : vector<1x8x1xf32> to vector<1x8x128xf32>
    %130 = arith.mulf %121, %129 : vector<1x8x128xf32>
    %cst_42 = arith.constant dense<0.000000e+00> : vector<1x128xf32>
    %131 = vector.multi_reduction <add>, %130, %cst_42 [1] : vector<1x8x128xf32> to vector<1x128xf32>
    %132 = vector.shape_cast %131 : vector<1x128xf32> to vector<1x1x128xf32>
    %cst_43 = arith.constant 0.000000e+00 : f32
    %133 = vector.broadcast %cst_43 : f32 to vector<1x1x128xf32>
    %134 = arith.cmpf ogt, %132, %133 : vector<1x1x128xf32>
    %cst_44 = arith.constant 1.000000e+00 : f32
    %135 = vector.broadcast %cst_44 : f32 to vector<1x1x128xf32>
    %136 = arith.select %134, %132, %135 : vector<1x1x128xi1>, vector<1x1x128xf32>
    %137 = tpu.reciprocal %136 {approx = true} : vector<1x1x128xf32> -> vector<1x1x128xf32>
    %138 = vector.broadcast %137 : vector<1x1x128xf32> to vector<1x8x128xf32>
    %139 = arith.mulf %130, %138 : vector<1x8x128xf32>
    %cst_45 = arith.constant dense<0.000000e+00> : vector<1x8xf32>
    %140 = vector.multi_reduction <add>, %139, %cst_45 [2] : vector<1x8x128xf32> to vector<1x8xf32>
    %141 = vector.shape_cast %140 : vector<1x8xf32> to vector<1x8x1xf32>
    %cst_46 = arith.constant 0.000000e+00 : f32
    %142 = vector.broadcast %cst_46 : f32 to vector<1x8x1xf32>
    %143 = arith.cmpf ogt, %141, %142 : vector<1x8x1xf32>
    %cst_47 = arith.constant 1.000000e+00 : f32
    %144 = vector.broadcast %cst_47 : f32 to vector<1x8x1xf32>
    %145 = arith.select %143, %141, %144 : vector<1x8x1xi1>, vector<1x8x1xf32>
    %146 = tpu.reciprocal %145 {approx = true} : vector<1x8x1xf32> -> vector<1x8x1xf32>
    %147 = vector.broadcast %146 : vector<1x8x1xf32> to vector<1x8x128xf32>
    %148 = arith.mulf %139, %147 : vector<1x8x128xf32>
    %cst_48 = arith.constant dense<0.000000e+00> : vector<1x128xf32>
    %149 = vector.multi_reduction <add>, %148, %cst_48 [1] : vector<1x8x128xf32> to vector<1x128xf32>
    %150 = vector.shape_cast %149 : vector<1x128xf32> to vector<1x1x128xf32>
    %cst_49 = arith.constant 0.000000e+00 : f32
    %151 = vector.broadcast %cst_49 : f32 to vector<1x1x128xf32>
    %152 = arith.cmpf ogt, %150, %151 : vector<1x1x128xf32>
    %cst_50 = arith.constant 1.000000e+00 : f32
    %153 = vector.broadcast %cst_50 : f32 to vector<1x1x128xf32>
    %154 = arith.select %152, %150, %153 : vector<1x1x128xi1>, vector<1x1x128xf32>
    %155 = tpu.reciprocal %154 {approx = true} : vector<1x1x128xf32> -> vector<1x1x128xf32>
    %156 = vector.broadcast %155 : vector<1x1x128xf32> to vector<1x8x128xf32>
    %157 = arith.mulf %148, %156 : vector<1x8x128xf32>
    %cst_51 = arith.constant dense<0.000000e+00> : vector<1x8xf32>
    %158 = vector.multi_reduction <add>, %157, %cst_51 [2] : vector<1x8x128xf32> to vector<1x8xf32>
    %159 = vector.shape_cast %158 : vector<1x8xf32> to vector<1x8x1xf32>
    %cst_52 = arith.constant 0.000000e+00 : f32
    %160 = vector.broadcast %cst_52 : f32 to vector<1x8x1xf32>
    %161 = arith.cmpf ogt, %159, %160 : vector<1x8x1xf32>
    %cst_53 = arith.constant 1.000000e+00 : f32
    %162 = vector.broadcast %cst_53 : f32 to vector<1x8x1xf32>
    %163 = arith.select %161, %159, %162 : vector<1x8x1xi1>, vector<1x8x1xf32>
    %164 = tpu.reciprocal %163 {approx = true} : vector<1x8x1xf32> -> vector<1x8x1xf32>
    %165 = vector.broadcast %164 : vector<1x8x1xf32> to vector<1x8x128xf32>
    %166 = arith.mulf %157, %165 : vector<1x8x128xf32>
    %cst_54 = arith.constant dense<0.000000e+00> : vector<1x128xf32>
    %167 = vector.multi_reduction <add>, %166, %cst_54 [1] : vector<1x8x128xf32> to vector<1x128xf32>
    %168 = vector.shape_cast %167 : vector<1x128xf32> to vector<1x1x128xf32>
    %cst_55 = arith.constant 0.000000e+00 : f32
    %169 = vector.broadcast %cst_55 : f32 to vector<1x1x128xf32>
    %170 = arith.cmpf ogt, %168, %169 : vector<1x1x128xf32>
    %cst_56 = arith.constant 1.000000e+00 : f32
    %171 = vector.broadcast %cst_56 : f32 to vector<1x1x128xf32>
    %172 = arith.select %170, %168, %171 : vector<1x1x128xi1>, vector<1x1x128xf32>
    %173 = tpu.reciprocal %172 {approx = true} : vector<1x1x128xf32> -> vector<1x1x128xf32>
    %174 = vector.broadcast %173 : vector<1x1x128xf32> to vector<1x8x128xf32>
    %175 = arith.mulf %166, %174 : vector<1x8x128xf32>
    %cst_57 = arith.constant dense<0.000000e+00> : vector<1x8xf32>
    %176 = vector.multi_reduction <add>, %175, %cst_57 [2] : vector<1x8x128xf32> to vector<1x8xf32>
    %177 = vector.shape_cast %176 : vector<1x8xf32> to vector<1x8x1xf32>
    %cst_58 = arith.constant 0.000000e+00 : f32
    %178 = vector.broadcast %cst_58 : f32 to vector<1x8x1xf32>
    %179 = arith.cmpf ogt, %177, %178 : vector<1x8x1xf32>
    %cst_59 = arith.constant 1.000000e+00 : f32
    %180 = vector.broadcast %cst_59 : f32 to vector<1x8x1xf32>
    %181 = arith.select %179, %177, %180 : vector<1x8x1xi1>, vector<1x8x1xf32>
    %182 = vector.broadcast %181 : vector<1x8x1xf32> to vector<1x8x128xf32>
    %183 = arith.divf %175, %182 : vector<1x8x128xf32>
    %cst_60 = arith.constant dense<0.000000e+00> : vector<1x128xf32>
    %184 = vector.multi_reduction <add>, %183, %cst_60 [1] : vector<1x8x128xf32> to vector<1x128xf32>
    %185 = vector.shape_cast %184 : vector<1x128xf32> to vector<1x1x128xf32>
    %cst_61 = arith.constant 0.000000e+00 : f32
    %186 = vector.broadcast %cst_61 : f32 to vector<1x1x128xf32>
    %187 = arith.cmpf ogt, %185, %186 : vector<1x1x128xf32>
    %cst_62 = arith.constant 1.000000e+00 : f32
    %188 = vector.broadcast %cst_62 : f32 to vector<1x1x128xf32>
    %189 = arith.select %187, %185, %188 : vector<1x1x128xi1>, vector<1x1x128xf32>
    %190 = vector.broadcast %189 : vector<1x1x128xf32> to vector<1x8x128xf32>
    %191 = arith.divf %183, %190 : vector<1x8x128xf32>
    %c0_63 = arith.constant 0 : index
    %c0_64 = arith.constant 0 : index
    %c0_65 = arith.constant 0 : index
    %192 = vector.load %arg3[%c0_63, %c0_64, %c0_65] : memref<1x8x128xf32, #tpu.memory_space<vmem>>, vector<1x8x128xf32>
    tpu.vector_store %arg3[%c0_63, %c0_64, %c0_65], %191 {strides = array<i32>} : memref<1x8x128xf32, #tpu.memory_space<vmem>>, vector<1x8x128xf32>,
    return
  }
  func.func @transform_0(%arg0: i32, %arg1: memref<1x2xi32, #tpu.memory_space<smem>>) -> (i32, i32, i32) {
    %c0_i32 = arith.constant 0 : i32
    %c0_i32_0 = arith.constant 0 : i32
    %c0_i32_1 = arith.constant 0 : i32
    return %arg0, %c0_i32, %c0_i32_0 : i32, i32, i32
  }
  func.func @transform_1(%arg0: i32, %arg1: memref<1x2xi32, #tpu.memory_space<smem>>) -> (i32, i32, i32) {
    %c0_i32 = arith.constant 0 : i32
    %c0_i32_0 = arith.constant 0 : i32
    %c0_i32_1 = arith.constant 0 : i32
    return %arg0, %c0_i32, %c0_i32_0 : i32, i32, i32
  }
}

</mosaic_0001>

<bundles_post_ra>
// kernel: _forward_core.5
= control target key start
LH: loop header
LB: loop body
LE: loop exit
PB: predicated region body
PF: predicated region fallthrough
CT: control target
= control target key end

     0   :  { %s767_s21 = smov 124   ;;  %s768_s30 = smov 2   ;;  %vm272_vm0 = vcmask 64512   ;;  %s1063_s1 = inlined_call_operand.vmem [shape: f32[32,8], index: 1, kind: input, shape index: {}]   ;;  %s1064_s2 = inlined_call_operand.vmem [shape: bf16[256,128], index: 2, kind: input, shape index: {}]   ;;  %s1065_s3 = inlined_call_operand.vmem [shape: f32[8,128], index: 3, kind: input, shape index: {}]   ;;  %s1066_s0 = inlined_call_operand.vmem [shape: bf16[32,128], index: 0, kind: input, shape index: {}]   ;;  %s1067_s4 = inlined_call_operand.vmem [shape: f32[32,128], index: 4, kind: output, shape index: {}]  }
   0x1   :  { %v803_v0 = vld [vmem:[%s1063_s1 + $0x8] sm:$0xff]  ;;  %v808_v1 = vld [vmem:[%s1063_s1] sm:$0xff]  ;;  %v699_v2 = vld [vmem:[%s1064_s2 + $0x38] sm:$0xff]  ;;  %s769_s11 = smov 126   ;;  %s770_s14 = smov 1  }
   0x2   :  { %416 = vrot.lane.b32.xlu1 %v803_v0, %s767_s21  ;;  %414 = vrot.lane.b32.xlu0 %v808_v1, %s767_s21  ;;  %v698_v3 = vld [vmem:[%s1064_s2 + $0x30] sm:$0xff]  ;;  %v697_v5 = vld [vmem:[%s1064_s2 + $0x28] sm:$0xff]  ;;  %s771_s6 = smov 127  }
   0x3   :  { %99 = vmatpush.bf16.msra.mxu0 %v699_v2  ;;  %708 = vmatpush.bf16.msra.mxu2 %v699_v2  ;;  %v823_v4 = vld [vmem:[%s1063_s1 + $0x10] sm:$0xff]  ;;  %v833_v6 = vld [vmem:[%s1063_s1 + $0x18] sm:$0xff]  ;;  %v696_v7 = vld [vmem:[%s1064_s2 + $0x20] sm:$0xff] }
   0x4   :  { %418 = vrot.lane.b32.xlu2 %v823_v4, %s767_s21  ;;  %v847_v8 = vld [vmem:[%s1065_s3] sm:$0xff]  ;;  %v695_v9 = vld [vmem:[%s1064_s2 + $0x18] sm:$0xff]  ;;  %v694_v11 = vld [vmem:[%s1064_s2 + $0x10] sm:$0xff] }
   0x5   :  { %v853_v10 = vperm.slane %v847_v8, 7  ;;  %v693_v12 = vld [vmem:[%s1064_s2 + $0x8] sm:$0xff]  ;;  %v692_v13 = vld [vmem:[%s1064_s2] sm:$0xff]  ;;  %v707_v16 = vld [vmem:[%s1064_s2 + $0x78] sm:$0xff]  ;;  %v38_v41 = vperm.slane %v847_v8, 0 }
   0x6   :  { %v690_v14 = vld [vmem:[%s1066_s0] sm:$0xff]  ;;  %v691_v15 = vld [vmem:[%s1066_s0 + $0x8] sm:$0xff]  ;;  %189 = vmatpush.bf16.msra.mxu1 %v707_v16  ;;  %v706_v17 = vld [vmem:[%s1064_s2 + $0x70] sm:$0xff]  ;;  %716 = vmatpush.bf16.msra.mxu3 %v707_v16 }
   0x7   :  { %100 = vmatpush.bf16.msra.mxu0 %v698_v3  ;;  %709 = vmatpush.bf16.msra.mxu2 %v698_v3  ;;  %v705_v18 = vld [vmem:[%s1064_s2 + $0x68] sm:$0xff]  ;;  %v704_v19 = vld [vmem:[%s1064_s2 + $0x60] sm:$0xff]  ;;  %v703_v28 = vld [vmem:[%s1064_s2 + $0x58] sm:$0xff] }
   0x8   :  { %v702_v30 = vld [vmem:[%s1064_s2 + $0x50] sm:$0xff]  ;;  %v701_v34 = vld [vmem:[%s1064_s2 + $0x48] sm:$0xff]  ;;  %v700_v35 = vld [vmem:[%s1064_s2 + $0x40] sm:$0xff] }
   0xa   :  { %478 = vrot.lane.b32.xlu1 %v808_v1, %s768_s30  ;;  %420 = vrot.lane.b32.xlu0 %v833_v6, %s767_s21 }
   0xb   :  { %101 = vmatpush.bf16.msra.mxu0 %v697_v5  ;;  %710 = vmatpush.bf16.msra.mxu2 %v697_v5 }
   0xc   :  { %480 = vrot.lane.b32.xlu2 %v803_v0, %s768_s30  ;;  %190 = vmatpush.bf16.msra.mxu1 %v706_v17 }
   0xd   :  { %717 = vmatpush.bf16.msra.mxu3 %v706_v17 }
   0xf   :  { %102 = vmatpush.bf16.msra.mxu0 %v696_v7  ;;  %711 = vmatpush.bf16.msra.mxu2 %v696_v7 }
  0x10   :  { %191 = vmatpush.bf16.msra.mxu1 %v705_v18 }
  0x11   :  { %718 = vmatpush.bf16.msra.mxu3 %v705_v18 }
  0x12   :  { %484 = vrot.lane.b32.xlu1 %v833_v6, %s768_s30  ;;  %482 = vrot.lane.b32.xlu0 %v823_v4, %s768_s30 }
  0x13   :  { %103 = vmatpush.bf16.msra.mxu0 %v695_v9  ;;  %712 = vmatpush.bf16.msra.mxu2 %v695_v9  ;;  %v773_v9 = vmov 0  }
  0x14   :  { %323 = vrot.lane.b32.xlu2 %v853_v10, %s769_s11  ;;  %192 = vmatpush.bf16.msra.mxu1 %v704_v19 }
  0x15   :  { %719 = vmatpush.bf16.msra.mxu3 %v704_v19  ;;  %732 = vset.pattern.permute.xlu0 %v773_v9 }
  0x16   :  { %734 = vset.pattern.permute.xlu1 %v773_v9 }
  0x17   :  { %104 = vmatpush.bf16.msra.mxu0 %v694_v11  ;;  %713 = vmatpush.bf16.msra.mxu2 %v694_v11  ;;  %v140_v11 = vperm.slane %v847_v8, 1 }
  0x18   :  { %193 = vmatpush.bf16.msra.mxu1 %v703_v28 }
  0x19   :  { %720 = vmatpush.bf16.msra.mxu3 %v703_v28 }
  0x1a   :  { %296 = vrot.lane.b32.xlu1 %v853_v10, %s770_s14 }
  0x1b   :  { %105 = vmatpush.bf16.msra.mxu0 %v693_v12  ;;  %714 = vmatpush.bf16.msra.mxu2 %v693_v12 }
  0x1c   :  { %194 = vmatpush.bf16.msra.mxu1 %v702_v30 }
  0x1d   :  { %721 = vmatpush.bf16.msra.mxu3 %v702_v30 }
  0x1f   :  { %106 = vmatpush.bf16.msra.mxu0 %v692_v13  ;;  %715 = vmatpush.bf16.msra.mxu2 %v692_v13 }
  0x20   :  { %195 = vmatpush.bf16.msra.mxu1 %v701_v34 }
  0x21   :  { %722 = vmatpush.bf16.msra.mxu3 %v701_v34 }
  0x22   :  { %107 = vmatmul.bf16.vlgmr.msra.gmra.mxu0 %v690_v14  ;;  %112 = vmatmul.bf16.vlgmr.msra.gmra.mxu2 %v691_v15 }
  0x24   :  { %196 = vmatpush.bf16.msra.mxu1 %v700_v35 }
  0x25   :  { %723 = vmatpush.bf16.msra.mxu3 %v700_v35 }
  0x5e   :  { %v419_v24 = vpop.permute.xlu2 %418 }
  0x5f   :  { %v428_v25 = vmax.f32 %v823_v4, %v419_v24  ;;  %v432_v60 = vmin.f32 %v823_v4, %v419_v24 }
  0x66   :  { %v481_v38 = vpop.permute.xlu2 %480 }
  0x67   :  { %v931_v39 = vsub.f32 %v803_v0, %v481_v38  ;;  %v228_v38 = vperm.slane %v847_v8, 2 }
  0x6e   :  { %v936_v55 = vpop.permute.xlu2 %323 }
  0x74   :  { %v889_v20 = vpop.permute.xlu1 %416  ;;  %v415_v21 = vpop.permute.xlu0 %414 }
  0x75   :  { %v427_v22 = vmax.f32 %v803_v0, %v889_v20  ;;  %v426_v23 = vmax.f32 %v808_v1, %v415_v21  ;;  %v430_v56 = vmin.f32 %v808_v1, %v415_v21  ;;  %v431_v2 = vmin.f32 %v803_v0, %v889_v20 }
  0x77   :  { %440 = vrot.lane.b32.xlu1 %v427_v22, %s768_s30  ;;  %438 = vrot.lane.b32.xlu2 %v426_v23, %s768_s30 }
  0x7c   :  { %v479_v26 = vpop.permute.xlu1 %478  ;;  %v906_v29 = vpop.permute.xlu0 %420 }
  0x7d   :  { %v898_v27 = vsub.f32 %v808_v1, %v479_v26  ;;  %v429_v31 = vmax.f32 %v833_v6, %v906_v29  ;;  %v433_v23 = vmin.f32 %v833_v6, %v906_v29 }
  0x7f   :  { %498 = vrot.lane.b32.xlu1 %v898_v27, %s771_s6  ;;  %442 = vrot.lane.b32.xlu2 %v428_v25, %s768_s30 }
  0x80   :  { %444 = vrot.lane.b32.xlu0 %v429_v31, %s768_s30 }
  0x84   :  { %v485_v32 = vpop.permute.xlu1 %484  ;;  %v483_v36 = vpop.permute.xlu0 %482 }
  0x85   :  { %v915_v33 = vsub.f32 %v833_v6, %v485_v32  ;;  %v926_v37 = vsub.f32 %v823_v4, %v483_v36  ;;  %v772_v4 = vmov 1   ;;  %v249_v36 = vperm.slane %v847_v8, 3 }
  0x86   :  { %733 = vset.pattern.permute.xlu2 %v772_v4 }
  0x87   :  { %504 = vrot.lane.b32.xlu1 %v915_v33, %s771_s6  ;;  %500 = vrot.lane.b32.xlu2 %v931_v39, %s771_s6 }
  0x88   :  { %502 = vrot.lane.b32.xlu0 %v926_v37, %s771_s6 }
  0x8c   :  { %v297_v1 = vpop.permute.xlu1 %296 }
  0x9f   :  { %v108_v40 = vpop.f32.mrf.mxu0 }
  0xa0   :  { %v109_v43 = vadd.f32 %v108_v40, %v38_v41 }
  0xa2   :  { %v118_v46 = vmax.f32 %v109_v43, 0.0  ;;  %v258_v43 = vperm.slane %v847_v8, 4 }
  0xa5   :  { %v113_v42 = vpop.f32.mrf.mxu2 }
  0xa6   :  { %v114_v48 = vadd.f32 %v113_v42, %v38_v41 }
  0xa7   :  { %v110_v44 = vpop.f32.mrf.mxu0 }
  0xa8   :  { %v111_v45 = vadd.f32 %v110_v44, %v38_v41  ;;  %v120_v52 = vmax.f32 %v114_v48, 0.0  ;;  %v267_v48 = vperm.slane %v847_v8, 5 }
  0xaa   :  { %v119_v47 = vmax.f32 %v111_v45, 0.0 }
  0xac   :  { %v122_v49 = vpack.c.bf16 %v119_v47, %v118_v46 }
  0xad   :  { %v115_v50 = vpop.f32.mrf.mxu2 }
  0xae   :  { %v116_v51 = vadd.f32 %v115_v50, %v38_v41  ;;  %197 = vmatmul.bf16.vlgmr.msra.gmra.mxu1 %v122_v49 }
  0xb0   :  { %v121_v53 = vmax.f32 %v116_v51, 0.0 }
  0xb2   :  { %v123_v54 = vpack.c.bf16 %v121_v53, %v120_v52 }
  0xb4   :  { %202 = vmatmul.bf16.vlgmr.msra.gmra.mxu3 %v123_v54 }
  0xd1   :  { %v439_v57 = vpop.permute.xlu2 %438 }
  0xd2   :  { %v939_v58 = vsub.f32 %v430_v56, %v439_v57 }
  0xd4   :  { %v454_v59 = vmax.f32 %v939_v58, 0.0 }
  0xd6   :  { %462 = vrot.lane.b32.xlu1 %v454_v59, %s771_s6 }
  0xd9   :  { %v443_v61 = vpop.permute.xlu2 %442 }
  0xda   :  { %v946_v62 = vsub.f32 %v432_v60, %v443_v61 }
  0xdc   :  { %v456_v63 = vmax.f32 %v946_v62, 0.0 }
  0xde   :  { %466 = vrot.lane.b32.xlu2 %v456_v63, %s771_s6 }
  0xe1   :  { %v982_v6 = vpop.permute.xlu2 %500 }
  0xe9   :  { %v441_v3 = vpop.permute.xlu1 %440 }
  0xea   :  { %v954_v5 = vsub.f32 %v431_v2, %v441_v3 }
  0xec   :  { %v455_v7 = vmax.f32 %v954_v5, 0.0 }
  0xee   :  { %464 = vrot.lane.b32.xlu0 %v455_v7, %s771_s6 }
  0xf1   :  { %v499_v20 = vpop.permute.xlu1 %498 }
  0xf2   :  { %v967_v21 = vmul.f32 %v499_v20, %v898_v27  ;;  %v445_v25 = vpop.permute.xlu0 %444 }
  0xf3   :  { %v973_v26 = vsub.f32 %v433_v23, %v445_v25 }
  0xf5   :  { %v457_v28 = vmax.f32 %v973_v26, 0.0 }
  0xf9   :  { %v505_v35 = vpop.permute.xlu1 %504 }
  0xfa   :  { %v503_v31 = vpop.permute.xlu0 %502 }
 0x12b   :  { %v198_v12 = vpop.f32.mrf.mxu1 }
 0x12c   :  { %v199_v0 = vadd.f32 %v198_v12, %v140_v11 }
 0x12e   :  { %234 = vperm.xlu2 %733, %v199_v0   ;;  %210 = vperm.xlu0 %732, %v199_v0   ;;  %v299_v15 = vmul.f32 %v297_v1, %v199_v0 }
 0x133   :  { %v200_v13 = vpop.f32.mrf.mxu1 }
 0x134   :  { %v201_v14 = vadd.f32 %v200_v13, %v140_v11  ;;  %v774_v13 = vmov 2  }
 0x136   :  { %215 = vperm.xlu0 %732, %v201_v14   ;;  %307 = vrot.lane.b32.xlu2 %v299_v15, %s769_s11  ;;  %v300_v18 = vmul.f32 %v297_v1, %v201_v14 }
 0x137   :  { %v203_v16 = vpop.f32.mrf.mxu3 }
 0x138   :  { %v204_v17 = vadd.f32 %v203_v16, %v140_v11  ;;  %v984_v29 = vpop.permute.xlu2 %466 }
 0x13a   :  { %220 = vperm.xlu1 %734, %v204_v17   ;;  %v301_v19 = vmul.f32 %v297_v1, %v204_v17 }
 0x13e   :  { %309 = vrot.lane.b32.xlu0 %v300_v18, %s769_s11  ;;  %238 = vperm.xlu2 %733, %v201_v14  }
 0x13f   :  { %735 = vset.pattern.permute.xlu0 %v772_v4  ;;  %v205_v22 = vpop.f32.mrf.mxu3 }
 0x140   :  { %v206_v24 = vadd.f32 %v205_v22, %v140_v11 }
 0x142   :  { %311 = vrot.lane.b32.xlu1 %v301_v19, %s769_s11  ;;  %v302_v27 = vmul.f32 %v297_v1, %v206_v24 }
 0x146   :  { %518 = vrot.lane.b32.xlu0 %v967_v21, %s767_s21  ;;  %242 = vperm.xlu2 %733, %v204_v17  }
 0x148   :  { %v463_v46 = vpop.permute.xlu1 %462 }
 0x14a   :  { %225 = vperm.xlu1 %734, %v206_v24  }
 0x14e   :  { %246 = vperm.xlu0 %735, %v206_v24   ;;  %737 = vset.pattern.permute.xlu2 %v773_v9 }
 0x152   :  { %468 = vrot.lane.b32.xlu1 %v457_v28, %s771_s6 }
 0x153   :  { %736 = vset.pattern.permute.xlu1 %v774_v13 }
 0x156   :  { %313 = vrot.lane.b32.xlu0 %v302_v27, %s769_s11 }
 0x157   :  { %739 = vset.pattern.permute.xlu0 %v773_v9 }
 0x160   :  { %v988_v34 = vpop.permute.xlu0 %464 }
 0x188   :  { %v235_v30 = vpop.permute.xlu2 %234 }
 0x189   :  { %v250_v42 = vmul.f32 %v249_v36, %v235_v30  ;;  %v474_v30 = vmul.f32 %v463_v46, %v454_v59  ;;  %v1015_v59 = vmul.f32 %v982_v6, %v931_v39 }
 0x190   :  { %v986_v32 = vpop.permute.xlu2 %307 }
 0x198   :  { %v239_v40 = vpop.permute.xlu2 %238 }
 0x199   :  { %v251_v51 = vmul.f32 %v249_v36, %v239_v40 }
 0x1a0   :  { %v211_v41 = vpop.permute.xlu0 %210  ;;  %v243_v54 = vpop.permute.xlu2 %242 }
 0x1a1   :  { %v229_v44 = vmul.f32 %v228_v38, %v211_v41  ;;  %v252_v61 = vmul.f32 %v249_v36, %v243_v54  ;;  %v1002_v41 = vmul.f32 %v505_v35, %v915_v33  ;;  %v285_v35 = vperm.slane %v847_v8, 6 }
 0x1a3   :  { %v254_v45 = vadd.f32 %v250_v42, %v229_v44 }
 0x1a5   :  { %v259_v47 = vadd.f32 %v258_v43, %v254_v45 }
 0x1a7   :  { %v263_v49 = vmax.f32 %v259_v47, 0.0 }
 0x1a8   :  { %v216_v50 = vpop.permute.xlu0 %215 }
 0x1a9   :  { %v230_v52 = vmul.f32 %v228_v38, %v216_v50  ;;  %v268_v53 = vmul.f32 %v267_v48, %v263_v49 }
 0x1ab   :  { %v255_v56 = vadd.f32 %v251_v51, %v230_v52  ;;  %v273_v57 = vsel %vm272_vm0, %v268_v53, 0.0 }
 0x1ac   :  { %v221_v60 = vpop.permute.xlu1 %220  ;;  %274 = vadd.xlane.f32.xlu2 %v273_v57 }
 0x1ad   :  { %v260_v1 = vadd.f32 %v258_v43, %v255_v56  ;;  %v231_v2 = vmul.f32 %v228_v38, %v221_v60 }
 0x1af   :  { %v256_v3 = vadd.f32 %v252_v61, %v231_v2  ;;  %v264_v4 = vmax.f32 %v260_v1, 0.0 }
 0x1b0   :  { %v310_v11 = vpop.permute.xlu0 %309 }
 0x1b1   :  { %v261_v12 = vadd.f32 %v258_v43, %v256_v3  ;;  %v269_v0 = vmul.f32 %v267_v48, %v264_v4 }
 0x1b3   :  { %v276_v14 = vsel %vm272_vm0, %v269_v0, 0.0  ;;  %v265_v15 = vmax.f32 %v261_v12, 0.0 }
 0x1b4   :  { %v312_v16 = vpop.permute.xlu1 %311  ;;  %277 = vadd.xlane.f32.xlu0 %v276_v14 }
 0x1b5   :  { %v270_v17 = vmul.f32 %v267_v48, %v265_v15 }
 0x1b7   :  { %v279_v18 = vsel %vm272_vm0, %v270_v17, 0.0 }
 0x1b8   :  { %v519_v19 = vpop.permute.xlu0 %518  ;;  %280 = vadd.xlane.f32.xlu1 %v279_v18 }
 0x1b9   :  { %v530_v25 = vadd.f32 %v519_v19, %v967_v21  ;;  %v1008_v21 = vmul.f32 %v503_v31, %v926_v37 }
 0x1bb   :  { %v534_v42 = vsub.f32 %v530_v25, %v474_v30 }
 0x1bc   :  { %v226_v20 = vpop.permute.xlu1 %225 }
 0x1bd   :  { %v232_v23 = vmul.f32 %v228_v38, %v226_v20  ;;  %v538_v47 = vadd.f32 1e-09, %v534_v42 }
 0x1bf   :  { %743 = vrcp.f32 %v538_v47  ;;  %v476_v47 = vmul.f32 %v984_v29, %v456_v63 }
 0x1c0   :  { %v247_v22 = vpop.permute.xlu0 %246 }
 0x1c1   :  { %v253_v24 = vmul.f32 %v249_v36, %v247_v22 }
 0x1c3   :  { %v257_v27 = vadd.f32 %v253_v24, %v232_v23 }
 0x1c4   :  { %v469_v46 = vpop.permute.xlu1 %468 }
 0x1c5   :  { %v262_v40 = vadd.f32 %v258_v43, %v257_v27  ;;  %v744_v58 = vpop.eup %743  ;;  %v477_v42 = vmul.f32 %v469_v46, %v457_v28 }
 0x1c6   :  { %v546_v33 = vmul.f32 %v744_v58, %v474_v30 }
 0x1c7   :  { %v266_v44 = vmax.f32 %v262_v40, 0.0 }
 0x1c8   :  { %524 = vrot.lane.b32.xlu0 %v1002_v41, %s767_s21  ;;  %v314_v36 = vpop.permute.xlu0 %313 }
 0x1c9   :  { %v271_v45 = vmul.f32 %v267_v48, %v266_v44 }
 0x1cb   :  { %v282_v38 = vsel %vm272_vm0, %v271_v45, 0.0 }
 0x1cc   :  { %283 = vadd.xlane.f32.xlu2 %v282_v38 }
 0x1d1   :  { %522 = vrot.lane.b32.xlu1 %v1008_v21, %s767_s21 }
 0x1d9   :  { %580 = vperm.xlu1 %736, %v546_v33  }
 0x1e1   :  { %738 = vset.pattern.permute.xlu1 %v773_v9 }
 0x1e4   :  { %520 = vrot.lane.b32.xlu2 %v1015_v59, %s767_s21 }
 0x21f   :  { %v275_v37 = vpop.xlane.xlu2 %274 }
 0x220   :  { %v286_v31 = vadd.f32 %v285_v35, %v275_v37 }
 0x222   :  { %v291_v43 = vmul.f32 %v853_v10, %v286_v31 }
 0x224   :  { %v319_v48 = vadd.f32 %v986_v32, %v291_v43 }
 0x226   :  { %v326_v49 = vadd.f32 %v936_v55, %v319_v48 }
 0x227   :  { %v278_v9 = vpop.xlane.xlu0 %277 }
 0x228   :  { %v686_v50 = vmul.f32 -1.442695, %v326_v49  ;;  %v287_v51 = vadd.f32 %v285_v35, %v278_v9 }
 0x22a   :  { %745 = vpow2.f32 %v686_v50  ;;  %v292_v39 = vmul.f32 %v853_v10, %v287_v51 }
 0x22b   :  { %v281_v6 = vpop.xlane.xlu1 %280 }
 0x22c   :  { %v320_v52 = vadd.f32 %v310_v11, %v292_v39  ;;  %v288_v53 = vadd.f32 %v285_v35, %v281_v6 }
 0x22e   :  { %v327_v8 = vadd.f32 %v936_v55, %v320_v52  ;;  %v293_v54 = vmul.f32 %v853_v10, %v288_v53 }
 0x230   :  { %v746_v56 = vpop.eup %745  ;;  %v687_v57 = vmul.f32 -1.442695, %v327_v8  ;;  %v321_v60 = vadd.f32 %v312_v16, %v293_v54 }
 0x231   :  { %v342_v61 = vadd.f32 1.0, %v746_v56 }
 0x232   :  { %747 = vpow2.f32 %v687_v57  ;;  %v328_v32 = vadd.f32 %v936_v55, %v321_v60 }
 0x233   :  { %749 = vrcp.f32 %v342_v61  ;;  %v357_v15 = vand.u32 2147483648, %v342_v61  ;;  %v355_v16 = vand.u32 2147483647, %v342_v61  ;;  %vm351_vm2 = vweird.f32 %v342_v61 }
 0x234   :  { %v688_v1 = vmul.f32 -1.442695, %v328_v32  ;;  %v475_v32 = vmul.f32 %v988_v34, %v455_v7 }
 0x235   :  { %v358_v25 = vor.u32 1.1754944e-38, %v357_v15  ;;  %vm356_vm4 = vcmp.eq.f32.partialorder %v355_v16, 8.507059e+37  ;;  %v550_v16 = vlaneseq }
 0x236   :  { %751 = vpow2.f32 %v688_v1 }
 0x238   :  { %v748_v2 = vpop.eup %747 }
 0x239   :  { %v750_v3 = vpop.eup %749  ;;  %v343_v4 = vadd.f32 1.0, %v748_v2 }
 0x23a   :  { %v347_v12 = vmul.f32 %v750_v3, %v342_v61  ;;  %v525_v17 = vpop.permute.xlu0 %524  ;;  %vm352_vm1 = vweird.f32 %v750_v3 }
 0x23b   :  { %753 = vrcp.f32 %v343_v4  ;;  %v533_v24 = vadd.f32 %v525_v17, %v1002_v41  ;;  %vm353_vm3 = vmor %vm351_vm2, %vm352_vm1  ;;  %v372_v37 = vand.u32 2147483648, %v343_v4  ;;  %vm366_vm6 = vweird.f32 %v343_v4 }
 0x23c   :  { %v752_v11 = vpop.eup %751  ;;  %v348_v0 = vsub.f32 1.0, %v347_v12 }
 0x23d   :  { %v344_v14 = vadd.f32 1.0, %v752_v11  ;;  %v373_v29 = vor.u32 1.1754944e-38, %v372_v37 }
 0x23e   :  { %v349_v18 = vmul.f32 %v750_v3, %v348_v0 }
 0x23f   :  { %755 = vrcp.f32 %v344_v14  ;;  %v284_v19 = vpop.xlane.xlu2 %283  ;;  %v385_v49 = vand.u32 2147483647, %v344_v14  ;;  %v387_v9 = vand.u32 2147483648, %v344_v14  ;;  %vm381_vm10 = vweird.f32 %v344_v14 }
 0x240   :  { %v289_v20 = vadd.f32 %v285_v35, %v284_v19  ;;  %v350_v22 = vadd.f32 %v750_v3, %v349_v18  ;;  %v537_v35 = vsub.f32 %v533_v24, %v477_v42  ;;  %v551_v19 = vand.u32 127, %v550_v16 }
 0x241   :  { %v754_v23 = vpop.eup %753  ;;  %v388_v39 = vor.u32 1.1754944e-38, %v387_v9  ;;  %vm386_vm12 = vcmp.eq.f32.partialorder %v385_v49, 8.507059e+37 }
 0x242   :  { %v294_v27 = vmul.f32 %v853_v10, %v289_v20  ;;  %v354_v30 = vsel %vm353_vm3, %v750_v3, %v350_v22  ;;  %v362_v40 = vmul.f32 %v754_v23, %v343_v4  ;;  %vm367_vm5 = vweird.f32 %v754_v23 }
 0x243   :  { %v523_v44 = vpop.permute.xlu1 %522  ;;  %v359_v45 = vsel %vm356_vm4, %v358_v25, %v354_v30  ;;  %v370_v10 = vand.u32 2147483647, %v343_v4  ;;  %v541_v63 = vadd.f32 1e-09, %v537_v35  ;;  %vm368_vm7 = vmor %vm366_vm6, %vm367_vm5  ;;  %vm577_vm1 = vcmp.eq.s32.totalorder %v551_v19, 1 }
 0x244   :  { %v322_v38 = vadd.f32 %v314_v36, %v294_v27  ;;  %v532_v58 = vadd.f32 %v523_v44, %v1008_v21  ;;  %555 = vperm.xlu2 %737, %v359_v45   ;;  %v363_v41 = vsub.f32 1.0, %v362_v40  ;;  %vm552_vm2 = vcmp.eq.s32.totalorder %v551_v19, 0 }
 0x245   :  { %v756_v33 = vpop.eup %755  ;;  %vm371_vm8 = vcmp.eq.f32.partialorder %v370_v10, 8.507059e+37 }
 0x246   :  { %v329_v31 = vadd.f32 %v936_v55, %v322_v38  ;;  %v536_v26 = vsub.f32 %v532_v58, %v476_v47  ;;  %v364_v28 = vmul.f32 %v754_v23, %v363_v41  ;;  %v377_v43 = vmul.f32 %v756_v33, %v344_v14 }
 0x247   :  { %vm382_vm9 = vweird.f32 %v756_v33  ;;  %v521_v56 = vpop.permute.xlu2 %520 }
 0x248   :  { %v689_v46 = vmul.f32 -1.442695, %v329_v31  ;;  %v540_v48 = vadd.f32 1e-09, %v536_v26  ;;  %v365_v62 = vadd.f32 %v754_v23, %v364_v28  ;;  %v378_v21 = vsub.f32 1.0, %v377_v43  ;;  %vm383_vm11 = vmor %vm381_vm10, %vm382_vm9 }
 0x249   :  { %v531_v61 = vadd.f32 %v521_v56, %v1015_v59 }
 0x24a   :  { %757 = vpow2.f32 %v689_v46  ;;  %v369_v36 = vsel %vm368_vm7, %v754_v23, %v365_v62  ;;  %v379_v51 = vmul.f32 %v756_v33, %v378_v21 }
 0x24b   :  { %759 = vrcp.f32 %v540_v48  ;;  %v374_v50 = vsel %vm371_vm8, %v373_v29, %v369_v36  ;;  %v535_v3 = vsub.f32 %v531_v61, %v475_v32  ;;  %v581_v20 = vpop.permute.xlu1 %580 }
 0x24c   :  { %560 = vperm.xlu1 %738, %v374_v50   ;;  %v380_v55 = vadd.f32 %v756_v33, %v379_v51  ;;  %761 = vrcp.f32 %v541_v63  ;;  %v598_v23 = vsel %vm577_vm1, %v581_v20, 0.0 }
 0x24d   :  { %v539_v0 = vadd.f32 1e-09, %v535_v3 }
 0x24e   :  { %v384_v6 = vsel %vm383_vm11, %v756_v33, %v380_v55 }
 0x24f   :  { %v389_v53 = vsel %vm386_vm12, %v388_v39, %v384_v6 }
 0x250   :  { %v758_v52 = vpop.eup %757  ;;  %565 = vperm.xlu0 %739, %v389_v53  }
 0x251   :  { %v760_v8 = vpop.eup %759  ;;  %v345_v54 = vadd.f32 1.0, %v758_v52 }
 0x252   :  { %v548_v57 = vmul.f32 %v760_v8, %v476_v47  ;;  %v762_v60 = vpop.eup %761 }
 0x253   :  { %763 = vrcp.f32 %v345_v54  ;;  %v549_v1 = vmul.f32 %v762_v60, %v477_v42  ;;  %v402_v11 = vand.u32 2147483648, %v345_v54  ;;  %v400_v15 = vand.u32 2147483647, %v345_v54 }
 0x254   :  { %741 = vset.pattern.permute.xlu1 %v774_v13  ;;  %vm396_vm14 = vweird.f32 %v345_v54  ;;  %765 = vrcp.f32 %v539_v0 }
 0x255   :  { %590 = vperm.xlu1 %741, %v548_v57   ;;  %v403_v59 = vor.u32 1.1754944e-38, %v402_v11  ;;  %vm401_vm0 = vcmp.eq.f32.partialorder %v400_v15, 8.507059e+37 }
 0x258   :  { %742 = vset.pattern.permute.xlu0 %v774_v13 }
 0x259   :  { %v764_v2 = vpop.eup %763  ;;  %595 = vperm.xlu0 %742, %v549_v1  }
 0x25a   :  { %v392_v4 = vmul.f32 %v764_v2, %v345_v54  ;;  %vm397_vm13 = vweird.f32 %v764_v2  ;;  %v766_v34 = vpop.eup %765 }
 0x25b   :  { %vm398_vm15 = vmor %vm396_vm14, %vm397_vm13  ;;  %v547_v18 = vmul.f32 %v766_v34, %v475_v32 }
 0x25c   :  { %v393_v12 = vsub.f32 1.0, %v392_v4 }
 0x25e   :  { %v394_v14 = vmul.f32 %v764_v2, %v393_v12 }
 0x260   :  { %v395_v17 = vadd.f32 %v764_v2, %v394_v14 }
 0x262   :  { %v399_v5 = vsel %vm398_vm15, %v764_v2, %v395_v17 }
 0x263   :  { %v404_v7 = vsel %vm401_vm0, %v403_v59, %v399_v5 }
 0x264   :  { %570 = vperm.xlu2 %737, %v404_v7  }
 0x26c   :  { %740 = vset.pattern.permute.xlu2 %v774_v13 }
 0x26d   :  { %585 = vperm.xlu2 %740, %v547_v18  }
 0x29e   :  { %v556_v22 = vpop.permute.xlu2 %555 }
 0x29f   :  { %v573_v24 = vsel %vm552_vm2, %v556_v22, 0.0 }
 0x2a0   :  { %v602_v25 = vadd.f32 %v598_v23, %v573_v24 }
 0x2a2   :  { %606 = vst [vmem:[%s1067_s4] sm:$0xff] %v602_v25 }
 0x2be   :  { %v561_v27 = vpop.permute.xlu1 %560  ;;  %v571_v30 = vpop.permute.xlu2 %570 }
 0x2bf   :  { %v574_v44 = vsel %vm552_vm2, %v561_v27, 0.0  ;;  %v576_v35 = vsel %vm552_vm2, %v571_v30, 0.0 }
 0x2c2   :  { %v566_v40 = vpop.permute.xlu0 %565 }
 0x2c3   :  { %v575_v45 = vsel %vm552_vm2, %v566_v40, 0.0 }
 0x2c7   :  { %v591_v13 = vpop.permute.xlu1 %590  ;;  %v586_v42 = vpop.permute.xlu2 %585 }
 0x2c8   :  { %v600_v47 = vsel %vm577_vm1, %v591_v13, 0.0  ;;  %v599_v38 = vsel %vm577_vm1, %v586_v42, 0.0 }
 0x2c9   :  { %v604_v58 = vadd.f32 %v600_v47, %v575_v45  ;;  %v603_v41 = vadd.f32 %v599_v38, %v574_v44 }
 0x2cb   :  { %608 = vst [vmem:[%s1067_s4 + $0x10] sm:$0xff] %v604_v58  ;;  %v596_v33 = vpop.permute.xlu0 %595 }
 0x2cc   :  { %607 = vst [vmem:[%s1067_s4 + $0x8] sm:$0xff] %v603_v41  ;;  %v601_v10 = vsel %vm577_vm1, %v596_v33, 0.0 }
 0x2cd   :  { %v605_v37 = vadd.f32 %v601_v10, %v576_v35 }
 0x2cf   :  { %609 = vst [vmem:[%s1067_s4 + $0x18] sm:$0xff] %v605_v37 }

// kernel: _forward_core.6
= control target key start
LH: loop header
LB: loop body
LE: loop exit
PB: predicated region body
PF: predicated region fallthrough
CT: control target
= control target key end

     0   :  { %v468_v34 = vmov 0   ;;  %vm280_vm6 = vcmask 64512   ;;  %s572_s2 = inlined_call_operand.vmem [shape: bf16[256,128], index: 2, kind: input, shape index: {}]   ;;  %s573_s0 = inlined_call_operand.vmem [shape: bf16[32,128], index: 0, kind: input, shape index: {}]   ;;  %s574_s3 = inlined_call_operand.vmem [shape: f32[8,128], index: 3, kind: input, shape index: {}]   ;;  %s575_s1 = inlined_call_operand.vmem [shape: f32[16,8], index: 1, kind: input, shape index: {}]   ;;  %s576_s4 = inlined_call_operand.vmem [shape: f32[16,128], index: 4, kind: output, shape index: {}]  }
   0x1   :  { %v427_v0 = vld [vmem:[%s572_s2 + $0x38] sm:$0xff]  ;;  %v426_v1 = vld [vmem:[%s572_s2 + $0x30] sm:$0xff]  ;;  %v425_v4 = vld [vmem:[%s572_s2 + $0x28] sm:$0xff]  ;;  %453 = vset.pattern.permute.xlu0 %v468_v34  ;;  %454 = vset.pattern.permute.xlu1 %v468_v34 }
   0x2   :  { %99 = vmatpush.bf16.msra.mxu0 %v427_v0  ;;  %436 = vmatpush.bf16.msra.mxu2 %v427_v0  ;;  %v435_v2 = vld [vmem:[%s572_s2 + $0x78] sm:$0xff]  ;;  %v434_v3 = vld [vmem:[%s572_s2 + $0x70] sm:$0xff]  ;;  %v433_v5 = vld [vmem:[%s572_s2 + $0x68] sm:$0xff] }
   0x3   :  { %189 = vmatpush.bf16.msra.mxu1 %v435_v2  ;;  %444 = vmatpush.bf16.msra.mxu3 %v435_v2  ;;  %v424_v6 = vld [vmem:[%s572_s2 + $0x20] sm:$0xff]  ;;  %v423_v8 = vld [vmem:[%s572_s2 + $0x18] sm:$0xff]  ;;  %v422_v9 = vld [vmem:[%s572_s2 + $0x10] sm:$0xff] }
   0x4   :  { %v432_v7 = vld [vmem:[%s572_s2 + $0x60] sm:$0xff]  ;;  %v421_v10 = vld [vmem:[%s572_s2 + $0x8] sm:$0xff]  ;;  %v431_v14 = vld [vmem:[%s572_s2 + $0x58] sm:$0xff]  ;;  %455 = vset.pattern.permute.xlu2 %v468_v34 }
   0x5   :  { %v420_v11 = vld [vmem:[%s572_s2] sm:$0xff]  ;;  %v419_v13 = vld [vmem:[%s573_s0 + $0x8] sm:$0xff]  ;;  %v430_v15 = vld [vmem:[%s572_s2 + $0x50] sm:$0xff] }
   0x6   :  { %100 = vmatpush.bf16.msra.mxu0 %v426_v1  ;;  %437 = vmatpush.bf16.msra.mxu2 %v426_v1  ;;  %v418_v12 = vld [vmem:[%s573_s0] sm:$0xff]  ;;  %v429_v16 = vld [vmem:[%s572_s2 + $0x48] sm:$0xff] }
   0x7   :  { %190 = vmatpush.bf16.msra.mxu1 %v434_v3  ;;  %445 = vmatpush.bf16.msra.mxu3 %v434_v3  ;;  %v428_v17 = vld [vmem:[%s572_s2 + $0x40] sm:$0xff]  ;;  %v253_v51 = vld [vmem:[%s575_s1 + $0x8] sm:$0xff] }
   0x8   :  { %v551_v18 = vld [vmem:[%s574_s3] sm:$0xff] }
   0x9   :  { %v38_v20 = vperm.slane %v551_v18, 0  ;;  %v140_v35 = vperm.slane %v551_v18, 1  ;;  %v252_v50 = vld [vmem:[%s575_s1] sm:$0xff]  ;;  %v267_v2 = vperm.slane %v551_v18, 3 }
   0xa   :  { %101 = vmatpush.bf16.msra.mxu0 %v425_v4  ;;  %438 = vmatpush.bf16.msra.mxu2 %v425_v4 }
   0xb   :  { %191 = vmatpush.bf16.msra.mxu1 %v433_v5  ;;  %446 = vmatpush.bf16.msra.mxu3 %v433_v5 }
   0xe   :  { %102 = vmatpush.bf16.msra.mxu0 %v424_v6  ;;  %439 = vmatpush.bf16.msra.mxu2 %v424_v6 }
   0xf   :  { %192 = vmatpush.bf16.msra.mxu1 %v432_v7  ;;  %447 = vmatpush.bf16.msra.mxu3 %v432_v7  ;;  %v254_v7 = vperm.slane %v551_v18, 2 }
  0x12   :  { %103 = vmatpush.bf16.msra.mxu0 %v423_v8  ;;  %440 = vmatpush.bf16.msra.mxu2 %v423_v8 }
  0x13   :  { %193 = vmatpush.bf16.msra.mxu1 %v431_v14  ;;  %448 = vmatpush.bf16.msra.mxu3 %v431_v14  ;;  %v272_v14 = vperm.slane %v551_v18, 4 }
  0x16   :  { %104 = vmatpush.bf16.msra.mxu0 %v422_v9  ;;  %441 = vmatpush.bf16.msra.mxu2 %v422_v9 }
  0x17   :  { %194 = vmatpush.bf16.msra.mxu1 %v430_v15  ;;  %449 = vmatpush.bf16.msra.mxu3 %v430_v15 }
  0x1a   :  { %105 = vmatpush.bf16.msra.mxu0 %v421_v10  ;;  %442 = vmatpush.bf16.msra.mxu2 %v421_v10 }
  0x1b   :  { %195 = vmatpush.bf16.msra.mxu1 %v429_v16  ;;  %450 = vmatpush.bf16.msra.mxu3 %v429_v16 }
  0x1e   :  { %106 = vmatpush.bf16.msra.mxu0 %v420_v11  ;;  %443 = vmatpush.bf16.msra.mxu2 %v420_v11 }
  0x1f   :  { %196 = vmatpush.bf16.msra.mxu1 %v428_v17  ;;  %451 = vmatpush.bf16.msra.mxu3 %v428_v17 }
  0x21   :  { %107 = vmatmul.bf16.vlgmr.msra.gmra.mxu0 %v418_v12  ;;  %112 = vmatmul.bf16.vlgmr.msra.gmra.mxu2 %v419_v13 }
  0x9e   :  { %v108_v19 = vpop.f32.mrf.mxu0 }
  0x9f   :  { %v109_v21 = vadd.f32 %v108_v19, %v38_v20 }
  0xa1   :  { %v118_v24 = vmax.f32 %v109_v21, 0.0 }
  0xa4   :  { %v113_v22 = vpop.f32.mrf.mxu2 }
  0xa5   :  { %v114_v27 = vadd.f32 %v113_v22, %v38_v20 }
  0xa6   :  { %v110_v23 = vpop.f32.mrf.mxu0 }
  0xa7   :  { %v111_v25 = vadd.f32 %v110_v23, %v38_v20  ;;  %v120_v31 = vmax.f32 %v114_v27, 0.0 }
  0xa9   :  { %v119_v26 = vmax.f32 %v111_v25, 0.0 }
  0xab   :  { %v122_v28 = vpack.c.bf16 %v119_v26, %v118_v24 }
  0xac   :  { %v115_v29 = vpop.f32.mrf.mxu2 }
  0xad   :  { %v116_v30 = vadd.f32 %v115_v29, %v38_v20  ;;  %197 = vmatmul.bf16.vlgmr.msra.gmra.mxu1 %v122_v28  ;;  %v277_v20 = vperm.slane %v551_v18, 5 }
  0xaf   :  { %v121_v32 = vmax.f32 %v116_v30, 0.0 }
  0xb1   :  { %v123_v33 = vpack.c.bf16 %v121_v32, %v120_v31 }
  0xb3   :  { %202 = vmatmul.bf16.vlgmr.msra.gmra.mxu3 %v123_v33 }
 0x12a   :  { %v198_v36 = vpop.f32.mrf.mxu1 }
 0x12b   :  { %v199_v37 = vadd.f32 %v198_v36, %v140_v35 }
 0x12d   :  { %v214_v38 = vmul.f32 %v199_v37, %v199_v37 }
 0x12f   :  { %216 = vadd.xlane.f32.xlu0 %v214_v38 }
 0x132   :  { %v200_v39 = vpop.f32.mrf.mxu1 }
 0x133   :  { %v201_v40 = vadd.f32 %v200_v39, %v140_v35 }
 0x135   :  { %v215_v41 = vmul.f32 %v201_v40, %v201_v40 }
 0x136   :  { %v203_v42 = vpop.f32.mrf.mxu3 }
 0x137   :  { %v204_v43 = vadd.f32 %v203_v42, %v140_v35  ;;  %218 = vadd.xlane.f32.xlu0 %v215_v41 }
 0x139   :  { %v220_v44 = vmul.f32 %v204_v43, %v204_v43  ;;  %v208_v45 = vmul.f32 %v204_v43, %v199_v37 }
 0x13b   :  { %222 = vadd.xlane.f32.xlu1 %v220_v44  ;;  %210 = vadd.xlane.f32.xlu2 %v208_v45 }
 0x13e   :  { %v205_v46 = vpop.f32.mrf.mxu3 }
 0x13f   :  { %v206_v47 = vadd.f32 %v205_v46, %v140_v35  ;;  %v287_v35 = vperm.slane %v551_v18, 6 }
 0x141   :  { %v221_v48 = vmul.f32 %v206_v47, %v206_v47  ;;  %v209_v49 = vmul.f32 %v206_v47, %v201_v40 }
 0x143   :  { %224 = vadd.xlane.f32.xlu1 %v221_v48  ;;  %212 = vadd.xlane.f32.xlu2 %v209_v49 }
 0x14b   :  { %259 = vperm.xlu0 %453, %v252_v50  }
 0x15c   :  { %264 = vperm.xlu1 %454, %v253_v51  }
 0x1a2   :  { %v217_v52 = vpop.xlane.xlu0 %216 }
 0x1aa   :  { %v219_v56 = vpop.xlane.xlu0 %218 }
 0x1ae   :  { %v223_v53 = vpop.xlane.xlu1 %222  ;;  %v211_v4 = vpop.xlane.xlu2 %210 }
 0x1af   :  { %v226_v54 = vmul.f32 %v223_v53, %v217_v52 }
 0x1b1   :  { %v228_v55 = vmax.f32 %v226_v54, 1e-12 }
 0x1b3   :  { %456 = vrsqrt.f32 %v228_v55  ;;  %vm236_vm1 = vweird.f32 %v228_v55 }
 0x1b6   :  { %v225_v57 = vpop.xlane.xlu1 %224  ;;  %v213_v22 = vpop.xlane.xlu2 %212 }
 0x1b7   :  { %v227_v58 = vmul.f32 %v225_v57, %v219_v56 }
 0x1b9   :  { %v457_v59 = vpop.eup %456  ;;  %v229_v60 = vmax.f32 %v227_v58, 1e-12 }
 0x1ba   :  { %v231_v61 = vmul.f32 %v457_v59, %v228_v55  ;;  %vm237_vm0 = vweird.f32 %v457_v59 }
 0x1bb   :  { %458 = vrsqrt.f32 %v229_v60  ;;  %vm238_vm2 = vmor %vm236_vm1, %vm237_vm0  ;;  %vm246_vm4 = vweird.f32 %v229_v60 }
 0x1bc   :  { %v232_v62 = vmul.f32 %v457_v59, %v231_v61 }
 0x1bd   :  { %v260_v6 = vpop.permute.xlu0 %259 }
 0x1be   :  { %v233_v63 = vmul.f32 0.5, %v232_v62  ;;  %v268_v11 = vmul.f32 %v267_v2, %v260_v6 }
 0x1c0   :  { %v234_v0 = vsub.f32 1.5, %v233_v63 }
 0x1c1   :  { %v459_v1 = vpop.eup %458 }
 0x1c2   :  { %v235_v3 = vmul.f32 %v457_v59, %v234_v0  ;;  %v241_v5 = vmul.f32 %v459_v1, %v229_v60  ;;  %vm247_vm3 = vweird.f32 %v459_v1 }
 0x1c3   :  { %vm248_vm5 = vmor %vm246_vm4, %vm247_vm3 }
 0x1c4   :  { %v239_v8 = vsel %vm238_vm2, %v457_v59, %v235_v3  ;;  %v242_v9 = vmul.f32 %v459_v1, %v241_v5 }
 0x1c5   :  { %v250_v10 = vmul.f32 %v239_v8, %v211_v4 }
 0x1c6   :  { %v243_v12 = vmul.f32 0.5, %v242_v9 }
 0x1c7   :  { %v255_v13 = vmul.f32 %v254_v7, %v250_v10 }
 0x1c8   :  { %v244_v15 = vsub.f32 1.5, %v243_v12 }
 0x1c9   :  { %v270_v16 = vadd.f32 %v268_v11, %v255_v13 }
 0x1ca   :  { %v245_v17 = vmul.f32 %v459_v1, %v244_v15 }
 0x1cb   :  { %v273_v19 = vadd.f32 %v272_v14, %v270_v16 }
 0x1cc   :  { %v249_v21 = vsel %vm248_vm5, %v459_v1, %v245_v17 }
 0x1cd   :  { %v251_v23 = vmul.f32 %v249_v21, %v213_v22  ;;  %v275_v24 = vmax.f32 %v273_v19, 0.0 }
 0x1ce   :  { %v265_v25 = vpop.permute.xlu1 %264 }
 0x1cf   :  { %v256_v26 = vmul.f32 %v254_v7, %v251_v23  ;;  %v269_v27 = vmul.f32 %v267_v2, %v265_v25  ;;  %v278_v28 = vmul.f32 %v277_v20, %v275_v24 }
 0x1d1   :  { %v271_v29 = vadd.f32 %v269_v27, %v256_v26  ;;  %v281_v30 = vsel %vm280_vm6, %v278_v28, 0.0 }
 0x1d2   :  { %282 = vadd.xlane.f32.xlu2 %v281_v30 }
 0x1d3   :  { %v274_v31 = vadd.f32 %v272_v14, %v271_v29 }
 0x1d5   :  { %v276_v32 = vmax.f32 %v274_v31, 0.0 }
 0x1d7   :  { %v279_v33 = vmul.f32 %v277_v20, %v276_v32 }
 0x1d9   :  { %v284_v34 = vsel %vm280_vm6, %v279_v33, 0.0 }
 0x1da   :  { %285 = vadd.xlane.f32.xlu2 %v284_v34 }
 0x245   :  { %v283_v36 = vpop.xlane.xlu2 %282 }
 0x246   :  { %v288_v37 = vadd.f32 %v287_v35, %v283_v36 }
 0x248   :  { %v416_v38 = vmul.f32 -1.442695, %v288_v37 }
 0x24a   :  { %460 = vpow2.f32 %v416_v38 }
 0x24d   :  { %v286_v39 = vpop.xlane.xlu2 %285 }
 0x24e   :  { %v289_v40 = vadd.f32 %v287_v35, %v286_v39 }
 0x250   :  { %v461_v41 = vpop.eup %460  ;;  %v417_v42 = vmul.f32 -1.442695, %v289_v40 }
 0x251   :  { %v296_v43 = vadd.f32 1.0, %v461_v41 }
 0x252   :  { %462 = vpow2.f32 %v417_v42 }
 0x253   :  { %464 = vrcp.f32 %v296_v43  ;;  %v309_v49 = vand.u32 2147483648, %v296_v43  ;;  %v307_v18 = vand.u32 2147483647, %v296_v43  ;;  %vm303_vm8 = vweird.f32 %v296_v43 }
 0x255   :  { %v310_v53 = vor.u32 1.1754944e-38, %v309_v49  ;;  %vm308_vm10 = vcmp.eq.f32.partialorder %v307_v18, 8.507059e+37 }
 0x258   :  { %v463_v44 = vpop.eup %462 }
 0x259   :  { %v465_v45 = vpop.eup %464  ;;  %v297_v46 = vadd.f32 1.0, %v463_v44 }
 0x25a   :  { %v299_v47 = vmul.f32 %v465_v45, %v296_v43  ;;  %vm304_vm7 = vweird.f32 %v465_v45 }
 0x25b   :  { %466 = vrcp.f32 %v297_v46  ;;  %vm305_vm9 = vmor %vm303_vm8, %vm304_vm7  ;;  %v324_v58 = vand.u32 2147483648, %v297_v46  ;;  %v322_v60 = vand.u32 2147483647, %v297_v46  ;;  %vm318_vm12 = vweird.f32 %v297_v46 }
 0x25c   :  { %v300_v48 = vsub.f32 1.0, %v299_v47 }
 0x25d   :  { %v325_v62 = vor.u32 1.1754944e-38, %v324_v58  ;;  %vm323_vm14 = vcmp.eq.f32.partialorder %v322_v60, 8.507059e+37 }
 0x25e   :  { %v301_v50 = vmul.f32 %v465_v45, %v300_v48 }
 0x260   :  { %v302_v51 = vadd.f32 %v465_v45, %v301_v50 }
 0x261   :  { %v467_v52 = vpop.eup %466 }
 0x262   :  { %v306_v54 = vsel %vm305_vm9, %v465_v45, %v302_v51  ;;  %v314_v55 = vmul.f32 %v467_v52, %v297_v46  ;;  %vm319_vm11 = vweird.f32 %v467_v52 }
 0x263   :  { %v311_v56 = vsel %vm308_vm10, %v310_v53, %v306_v54  ;;  %vm320_vm13 = vmor %vm318_vm12, %vm319_vm11 }
 0x264   :  { %330 = vperm.xlu2 %455, %v311_v56   ;;  %v315_v57 = vsub.f32 1.0, %v314_v55 }
 0x266   :  { %v316_v59 = vmul.f32 %v467_v52, %v315_v57 }
 0x268   :  { %v317_v61 = vadd.f32 %v467_v52, %v316_v59 }
 0x26a   :  { %v321_v63 = vsel %vm320_vm13, %v467_v52, %v317_v61 }
 0x26b   :  { %v326_v0 = vsel %vm323_vm14, %v325_v62, %v321_v63 }
 0x26c   :  { %335 = vperm.xlu1 %454, %v326_v0  }
 0x2be   :  { %v331_v1 = vpop.permute.xlu2 %330 }
 0x2bf   :  { %338 = vst [vmem:[%s576_s4] sm:$0xff] %v331_v1 }
 0x2de   :  { %v336_v2 = vpop.permute.xlu1 %335 }
 0x2df   :  { %339 = vst [vmem:[%s576_s4 + $0x8] sm:$0xff] %v336_v2 }

// kernel: _forward_core.4
= control target key start
LH: loop header
LB: loop body
LE: loop exit
PB: predicated region body
PF: predicated region fallthrough
CT: control target
= control target key end

     0   :  { %vm709_vm0 = vcmask 261120   ;;  %v10198_v46 = vmov 2   ;;  %v10194_v47 = vmov 1   ;;  %v10196_v48 = vmov 0   ;;  %s6234_s24 = smov 96   ;;  %s6235_s25 = smov 64   ;;  %s10188_s1 = inlined_call_operand.vmem [shape: bf16[32,8], index: 1, kind: input, shape index: {}]   ;;  %s10189_s0 = inlined_call_operand.vmem [shape: bf16[1536,32], index: 0, kind: input, shape index: {}]   ;;  %s10190_s4 = inlined_call_operand.vmem [shape: f32[8,128], index: 4, kind: input, shape index: {}]   ;;  %s10191_s2 = inlined_call_operand.vmem [shape: f32[384,256], index: 2, kind: input, shape index: {}]   ;;  %s10192_s3 = inlined_call_operand.vmem [shape: f32[8,384], index: 3, kind: input, shape index: {}]   ;;  %s10193_s5 = inlined_call_operand.vmem [shape: f32[8,128], index: 5, kind: output, shape index: {}]  }
   0x1   :  { %v5937_v0 = vld [vmem:[%s10188_s1 + $0x8] sm:$0xff]  ;;  %v5936_v1 = vld [vmem:[%s10188_s1] sm:$0xff]  ;;  %v5866_v3 = vld [vmem:[%s10189_s0 + $0xd0] sm:$0xff]  ;;  %5957 = vset.pattern.permute.xlu2 %v10198_v46  ;;  %5956 = vset.pattern.permute.xlu1 %v10194_v47  ;;  %s6237_s9 = smov 32  }
   0x2   :  { %1004 = vmatpush.bf16.msra.mxu0 %v5937_v0  ;;  %5938 = vmatpush.bf16.msra.mxu1 %v5937_v0  ;;  %v5840_v2 = vld [vmem:[%s10189_s0] sm:$0xff]  ;;  %v5891_v4 = vld [vmem:[%s10189_s0 + $0x198] sm:$0xff]  ;;  %v5841_v6 = vld [vmem:[%s10189_s0 + $0x8] sm:$0xff] }
   0x3   :  { %5939 = vmatpush.bf16.msra.mxu2 %v5937_v0  ;;  %5940 = vmatpush.bf16.msra.mxu3 %v5937_v0  ;;  %v5915_v5 = vld [vmem:[%s10189_s0 + $0x258] sm:$0xff]  ;;  %v5892_v8 = vld [vmem:[%s10189_s0 + $0x1a0] sm:$0xff]  ;;  %v5842_v10 = vld [vmem:[%s10189_s0 + $0x10] sm:$0xff] }
   0x4   :  { %v5867_v7 = vld [vmem:[%s10189_s0 + $0xd8] sm:$0xff]  ;;  %v5916_v9 = vld [vmem:[%s10189_s0 + $0x260] sm:$0xff]  ;;  %v5893_v12 = vld [vmem:[%s10189_s0 + $0x1a8] sm:$0xff]  ;;  %5955 = vset.pattern.permute.xlu0 %v10196_v48 }
   0x5   :  { %v5868_v11 = vld [vmem:[%s10189_s0 + $0xe0] sm:$0xff]  ;;  %v5917_v13 = vld [vmem:[%s10189_s0 + $0x268] sm:$0xff]  ;;  %v5843_v14 = vld [vmem:[%s10189_s0 + $0x18] sm:$0xff] }
   0x6   :  { %1005 = vmatpush.bf16.msra.mxu0 %v5936_v1  ;;  %5941 = vmatpush.bf16.msra.mxu1 %v5936_v1  ;;  %v5869_v15 = vld [vmem:[%s10189_s0 + $0xe8] sm:$0xff]  ;;  %v5894_v16 = vld [vmem:[%s10189_s0 + $0x1b0] sm:$0xff]  ;;  %v5844_v18 = vld [vmem:[%s10189_s0 + $0x20] sm:$0xff] }
   0x7   :  { %5942 = vmatpush.bf16.msra.mxu2 %v5936_v1  ;;  %5943 = vmatpush.bf16.msra.mxu3 %v5936_v1  ;;  %v5918_v17 = vld [vmem:[%s10189_s0 + $0x270] sm:$0xff]  ;;  %v5895_v20 = vld [vmem:[%s10189_s0 + $0x1b8] sm:$0xff]  ;;  %v5845_v22 = vld [vmem:[%s10189_s0 + $0x28] sm:$0xff] }
   0x8   :  { %v5870_v19 = vld [vmem:[%s10189_s0 + $0xf0] sm:$0xff]  ;;  %v5919_v21 = vld [vmem:[%s10189_s0 + $0x278] sm:$0xff]  ;;  %v5896_v24 = vld [vmem:[%s10189_s0 + $0x1c0] sm:$0xff] }
   0x9   :  { %5744 = vmatmul.msk.bf16.vlgmr.msra.gmra.mxu0 %vm709_vm0, %v5840_v2  ;;  %5770 = vmatmul.msk.bf16.vlgmr.msra.gmra.mxu1 %vm709_vm0, %v5866_v3  ;;  %v5871_v23 = vld [vmem:[%s10189_s0 + $0xf8] sm:$0xff]  ;;  %v5920_v25 = vld [vmem:[%s10189_s0 + $0x280] sm:$0xff]  ;;  %v5846_v26 = vld [vmem:[%s10189_s0 + $0x30] sm:$0xff] }
   0xa   :  { %5795 = vmatmul.msk.bf16.vlgmr.msra.gmra.mxu2 %vm709_vm0, %v5891_v4  ;;  %5819 = vmatmul.msk.bf16.vlgmr.msra.gmra.mxu3 %vm709_vm0, %v5915_v5  ;;  %v5872_v27 = vld [vmem:[%s10189_s0 + $0x100] sm:$0xff]  ;;  %v5897_v28 = vld [vmem:[%s10189_s0 + $0x1c8] sm:$0xff]  ;;  %v5847_v29 = vld [vmem:[%s10189_s0 + $0x38] sm:$0xff] }
   0xb   :  { %v5873_v30 = vld [vmem:[%s10189_s0 + $0x108] sm:$0xff]  ;;  %v5898_v32 = vld [vmem:[%s10189_s0 + $0x1d0] sm:$0xff]  ;;  %v5848_v33 = vld [vmem:[%s10189_s0 + $0x40] sm:$0xff] }
   0xc   :  { %v5921_v31 = vld [vmem:[%s10189_s0 + $0x288] sm:$0xff]  ;;  %v5874_v34 = vld [vmem:[%s10189_s0 + $0x110] sm:$0xff]  ;;  %v5899_v36 = vld [vmem:[%s10189_s0 + $0x1d8] sm:$0xff] }
   0xd   :  { %v5922_v37 = vld [vmem:[%s10189_s0 + $0x290] sm:$0xff]  ;;  %v5849_v40 = vld [vmem:[%s10189_s0 + $0x48] sm:$0xff]  ;;  %v5875_v41 = vld [vmem:[%s10189_s0 + $0x118] sm:$0xff] }
   0xe   :  { %v5900_v43 = vld [vmem:[%s10189_s0 + $0x1e0] sm:$0xff]  ;;  %v5923_v49 = vld [vmem:[%s10189_s0 + $0x298] sm:$0xff]  ;;  %v5850_v51 = vld [vmem:[%s10189_s0 + $0x50] sm:$0xff] }
   0xf   :  { %v5876_v52 = vld [vmem:[%s10189_s0 + $0x120] sm:$0xff]  ;;  %v5901_v54 = vld [vmem:[%s10189_s0 + $0x1e8] sm:$0xff]  ;;  %v5851_v0 = vld [vmem:[%s10189_s0 + $0x58] sm:$0xff] }
  0x10   :  { %v1631_v62 = vld [vmem:[%s10190_s4] sm:$0xff]  ;;  %v5877_v1 = vld [vmem:[%s10189_s0 + $0x128] sm:$0xff]  ;;  %v5902_v3 = vld [vmem:[%s10189_s0 + $0x1f0] sm:$0xff] }
  0x11   :  { %v5889_v56 = vld [vmem:[%s10189_s0 + $0x188] sm:$0xff] }
  0x19   :  { %5745 = vmatmul.msk.bf16.gmra.mxu0 %vm709_vm0, %v5841_v6  ;;  %5771 = vmatmul.msk.bf16.gmra.mxu1 %vm709_vm0, %v5867_v7  ;;  %v6481_v6 = vperm.slane %v1631_v62, 0  ;;  %v5904_v62 = vld [vmem:[%s10189_s0 + $0x200] sm:$0xff] }
  0x1a   :  { %5796 = vmatmul.msk.bf16.gmra.mxu2 %vm709_vm0, %v5892_v8  ;;  %5820 = vmatmul.msk.bf16.gmra.mxu3 %vm709_vm0, %v5916_v9 }
  0x29   :  { %5746 = vmatmul.msk.bf16.gmra.mxu0 %vm709_vm0, %v5842_v10  ;;  %5772 = vmatmul.msk.bf16.gmra.mxu1 %vm709_vm0, %v5868_v11 }
  0x2a   :  { %5797 = vmatmul.msk.bf16.gmra.mxu2 %vm709_vm0, %v5893_v12  ;;  %5821 = vmatmul.msk.bf16.gmra.mxu3 %vm709_vm0, %v5917_v13 }
  0x39   :  { %5747 = vmatmul.msk.bf16.gmra.mxu0 %vm709_vm0, %v5843_v14  ;;  %5773 = vmatmul.msk.bf16.gmra.mxu1 %vm709_vm0, %v5869_v15 }
  0x3a   :  { %5798 = vmatmul.msk.bf16.gmra.mxu2 %vm709_vm0, %v5894_v16  ;;  %5822 = vmatmul.msk.bf16.gmra.mxu3 %vm709_vm0, %v5918_v17 }
  0x49   :  { %5748 = vmatmul.msk.bf16.gmra.mxu0 %vm709_vm0, %v5844_v18  ;;  %5774 = vmatmul.msk.bf16.gmra.mxu1 %vm709_vm0, %v5870_v19  ;;  %v5924_v19 = vld [vmem:[%s10189_s0 + $0x2a0] sm:$0xff] }
  0x4a   :  { %5799 = vmatmul.msk.bf16.gmra.mxu2 %vm709_vm0, %v5895_v20  ;;  %5823 = vmatmul.msk.bf16.gmra.mxu3 %vm709_vm0, %v5919_v21 }
  0x59   :  { %5749 = vmatmul.msk.bf16.gmra.mxu0 %vm709_vm0, %v5845_v22  ;;  %5775 = vmatmul.msk.bf16.gmra.mxu1 %vm709_vm0, %v5871_v23 }
  0x5a   :  { %5800 = vmatmul.msk.bf16.gmra.mxu2 %vm709_vm0, %v5896_v24  ;;  %5824 = vmatmul.msk.bf16.gmra.mxu3 %vm709_vm0, %v5920_v25  ;;  %v5852_v24 = vld [vmem:[%s10189_s0 + $0x60] sm:$0xff]  ;;  %v5878_v25 = vld [vmem:[%s10189_s0 + $0x130] sm:$0xff] }
  0x69   :  { %5750 = vmatmul.msk.bf16.gmra.mxu0 %vm709_vm0, %v5846_v26  ;;  %5776 = vmatmul.msk.bf16.gmra.mxu1 %vm709_vm0, %v5872_v27  ;;  %v5903_v27 = vld [vmem:[%s10189_s0 + $0x1f8] sm:$0xff] }
  0x6a   :  { %5801 = vmatmul.msk.bf16.gmra.mxu2 %vm709_vm0, %v5897_v28  ;;  %5825 = vmatmul.msk.bf16.gmra.mxu3 %vm709_vm0, %v5921_v31 }
  0x79   :  { %5751 = vmatmul.msk.bf16.gmra.mxu0 %vm709_vm0, %v5847_v29  ;;  %5777 = vmatmul.msk.bf16.gmra.mxu1 %vm709_vm0, %v5873_v30 }
  0x7a   :  { %5802 = vmatmul.msk.bf16.gmra.mxu2 %vm709_vm0, %v5898_v32  ;;  %5826 = vmatmul.msk.bf16.gmra.mxu3 %vm709_vm0, %v5922_v37 }
  0x86   :  { %v6408_v35 = vpop.f32.mrf.mxu0  ;;  %v6422_v39 = vpop.f32.mrf.mxu1 }
  0x89   :  { %5752 = vmatmul.msk.bf16.gmra.mxu0 %vm709_vm0, %v5848_v33  ;;  %5778 = vmatmul.msk.bf16.gmra.mxu1 %vm709_vm0, %v5874_v34 }
  0x8a   :  { %5803 = vmatmul.msk.bf16.gmra.mxu2 %vm709_vm0, %v5899_v36  ;;  %5827 = vmatmul.msk.bf16.gmra.mxu3 %vm709_vm0, %v5923_v49 }
  0x8d   :  { %v1262_v50 = vpop.f32.mrf.mxu2  ;;  %v1382_v61 = vpop.f32.mrf.mxu3 }
  0x8e   :  { %v6420_v38 = vpop.f32.mrf.mxu0  ;;  %v6438_v44 = vpop.f32.mrf.mxu1  ;;  %v1541_v63 = vmax.f32 %v1262_v50, %v1382_v61 }
  0x95   :  { %v1264_v57 = vpop.f32.mrf.mxu2  ;;  %v1384_v10 = vpop.f32.mrf.mxu3 }
  0x96   :  { %v6430_v42 = vpop.f32.mrf.mxu0  ;;  %v1142_v55 = vpop.f32.mrf.mxu1  ;;  %v1542_v13 = vmax.f32 %v1264_v57, %v1384_v10 }
  0x99   :  { %5753 = vmatmul.msk.bf16.gmra.mxu0 %vm709_vm0, %v5849_v40  ;;  %5779 = vmatmul.msk.bf16.gmra.mxu1 %vm709_vm0, %v5875_v41 }
  0x9a   :  { %5804 = vmatmul.msk.bf16.gmra.mxu2 %vm709_vm0, %v5900_v43  ;;  %5828 = vmatmul.msk.bf16.gmra.mxu3 %vm709_vm0, %v5924_v19 }
  0x9d   :  { %v1267_v4 = vpop.f32.mrf.mxu2  ;;  %v1387_v18 = vpop.f32.mrf.mxu3 }
  0x9e   :  { %v6440_v45 = vpop.f32.mrf.mxu0  ;;  %v1144_v60 = vpop.f32.mrf.mxu1  ;;  %v1543_v22 = vmax.f32 %v1267_v4, %v1387_v18 }
  0xa5   :  { %v1269_v15 = vpop.f32.mrf.mxu2  ;;  %v1389_v31 = vpop.f32.mrf.mxu3 }
  0xa6   :  { %v6455_v53 = vpop.f32.mrf.mxu0  ;;  %v1147_v8 = vpop.f32.mrf.mxu1  ;;  %v1544_v37 = vmax.f32 %v1269_v15, %v1389_v31  ;;  %v5855_v31 = vld [vmem:[%s10189_s0 + $0x78] sm:$0xff] }
  0xa9   :  { %5754 = vmatmul.msk.bf16.gmra.mxu0 %vm709_vm0, %v5850_v51  ;;  %5780 = vmatmul.msk.bf16.gmra.mxu1 %vm709_vm0, %v5876_v52  ;;  %v5853_v52 = vld [vmem:[%s10189_s0 + $0x68] sm:$0xff] }
  0xaa   :  { %5805 = vmatmul.msk.bf16.gmra.mxu2 %vm709_vm0, %v5901_v54  ;;  %v5879_v54 = vld [vmem:[%s10189_s0 + $0x138] sm:$0xff] }
  0xad   :  { %v1272_v29 = vpop.f32.mrf.mxu2  ;;  %v1392_v43 = vpop.f32.mrf.mxu3 }
  0xae   :  { %v6465_v58 = vpop.f32.mrf.mxu0  ;;  %v1149_v20 = vpop.f32.mrf.mxu1  ;;  %v1545_v50 = vmax.f32 %v1272_v29, %v1392_v43 }
  0xb5   :  { %v1274_v41 = vpop.f32.mrf.mxu2 }
  0xb6   :  { %v1022_v2 = vpop.f32.mrf.mxu0  ;;  %v1152_v34 = vpop.f32.mrf.mxu1 }
  0xb7   :  { %v1493_v5 = vmax.f32 %v1022_v2, %v1142_v55 }
  0xb9   :  { %v1589_v7 = vmax.f32 %v1493_v5, %v1541_v63  ;;  %5755 = vmatmul.msk.bf16.gmra.mxu0 %vm709_vm0, %v5851_v0  ;;  %5781 = vmatmul.msk.bf16.gmra.mxu1 %vm709_vm0, %v5877_v1  ;;  %v5925_v63 = vld [vmem:[%s10189_s0 + $0x2a8] sm:$0xff] }
  0xba   :  { %5806 = vmatmul.msk.bf16.gmra.mxu2 %vm709_vm0, %v5902_v3  ;;  %5829 = vmatmul.msk.bf16.gmra.mxu3 %vm709_vm0, %v5925_v63  ;;  %v1394_v3 = vpop.f32.mrf.mxu3 }
  0xbb   :  { %v1639_v9 = vadd.f32 %v6481_v6, %v1589_v7 }
  0xbd   :  { %v6487_v11 = vmax.f32 %v1639_v9, 0.0  ;;  %v1277_v2 = vpop.f32.mrf.mxu2 }
  0xbe   :  { %v1024_v12 = vpop.f32.mrf.mxu0  ;;  %v1154_v57 = vpop.f32.mrf.mxu1 }
  0xbf   :  { %10348 = vst [vmem:[#allocation2_spill] sm:$0xff] %v6487_v11  ;;  %v1494_v14 = vmax.f32 %v1024_v12, %v1144_v60  ;;  %2618 = vperm.xlu2 %5957, %v6487_v11   ;;  %2138 = vperm.xlu1 %5956, %v6487_v11   ;;  %v5854_v12 = vld [vmem:[%s10189_s0 + $0x70] sm:$0xff] }
  0xc0   :  { %1857 = vperm.xlu0 %5955, %v6487_v11  }
  0xc1   :  { %v1590_v16 = vmax.f32 %v1494_v14, %v1542_v13  ;;  %v5880_v13 = vld [vmem:[%s10189_s0 + $0x140] sm:$0xff] }
  0xc2   :  { %v1397_v14 = vpop.f32.mrf.mxu3 }
  0xc3   :  { %v1640_v17 = vadd.f32 %v6481_v6, %v1590_v16 }
  0xc5   :  { %v6496_v21 = vmax.f32 %v1640_v17, 0.0  ;;  %v1279_v15 = vpop.f32.mrf.mxu2  ;;  %v1547_v17 = vmax.f32 %v1277_v2, %v1397_v14 }
  0xc6   :  { %v1027_v23 = vpop.f32.mrf.mxu0  ;;  %v1157_v7 = vpop.f32.mrf.mxu1 }
  0xc7   :  { %v1495_v26 = vmax.f32 %v1027_v23, %v1147_v8  ;;  %5959 = vset.pattern.permute.xlu2 %v10194_v47  ;;  %5958 = vset.pattern.permute.xlu1 %v10196_v48  ;;  %v1546_v8 = vmax.f32 %v1274_v41, %v1394_v3  ;;  %v5905_v23 = vld [vmem:[%s10189_s0 + $0x208] sm:$0xff] }
  0xc8   :  { %5960 = vset.pattern.permute.xlu0 %v10198_v46  ;;  %2142 = vperm.xlu2 %5959, %v6496_v21  }
  0xc9   :  { %v1591_v28 = vmax.f32 %v1495_v26, %v1543_v22  ;;  %2622 = vperm.xlu0 %5960, %v6496_v21   ;;  %1862 = vperm.xlu1 %5958, %v6496_v21  }
  0xca   :  { %5756 = vmatmul.msk.bf16.gmra.mxu0 %vm709_vm0, %v5852_v24  ;;  %5782 = vmatmul.msk.bf16.gmra.mxu1 %vm709_vm0, %v5878_v25  ;;  %v1399_v26 = vpop.f32.mrf.mxu3 }
  0xcb   :  { %v1641_v30 = vadd.f32 %v6481_v6, %v1591_v28  ;;  %5807 = vmatmul.msk.bf16.gmra.mxu2 %vm709_vm0, %v5903_v27 }
  0xcd   :  { %v6518_v32 = vmax.f32 %v1641_v30, 0.0  ;;  %v1282_v27 = vpop.f32.mrf.mxu2  ;;  %v1548_v30 = vmax.f32 %v1279_v15, %v1399_v26 }
  0xce   :  { %v1029_v33 = vpop.f32.mrf.mxu0  ;;  %v1159_v19 = vpop.f32.mrf.mxu1 }
  0xcf   :  { %v1496_v36 = vmax.f32 %v1029_v33, %v1149_v20 }
  0xd0   :  { %5961 = vset.pattern.permute.xlu2 %v10196_v48 }
  0xd1   :  { %5962 = vset.pattern.permute.xlu0 %v10194_v47  ;;  %5963 = vset.pattern.permute.xlu1 %v10198_v46  ;;  %v1592_v40 = vmax.f32 %v1496_v36, %v1544_v37  ;;  %v5926_v36 = vld [vmem:[%s10189_s0 + $0x2b0] sm:$0xff] }
  0xd2   :  { %2626 = vperm.xlu1 %5963, %v6518_v32   ;;  %2146 = vperm.xlu0 %5962, %v6518_v32   ;;  %v1402_v41 = vpop.f32.mrf.mxu3 }
  0xd3   :  { %1867 = vperm.xlu2 %5961, %v6518_v32   ;;  %v1642_v49 = vadd.f32 %v6481_v6, %v1592_v40  ;;  %5830 = vmatmul.msk.bf16.gmra.mxu3 %vm709_vm0, %v5926_v36 }
  0xd5   :  { %v6533_v60 = vmax.f32 %v1642_v49, 0.0 }
  0xd6   :  { %v1032_v51 = vpop.f32.mrf.mxu0  ;;  %v1162_v33 = vpop.f32.mrf.mxu1 }
  0xd7   :  { %v1497_v55 = vmax.f32 %v1032_v51, %v1152_v34  ;;  %v5881_v34 = vld [vmem:[%s10189_s0 + $0x148] sm:$0xff]  ;;  %v1284_v51 = vpop.f32.mrf.mxu2 }
  0xd9   :  { %v1593_v61 = vmax.f32 %v1497_v55, %v1545_v50  ;;  %v1549_v50 = vmax.f32 %v1282_v27, %v1402_v41  ;;  %v5906_v55 = vld [vmem:[%s10189_s0 + $0x210] sm:$0xff]  ;;  %v5883_v27 = vld [vmem:[%s10189_s0 + $0x158] sm:$0xff] }
  0xda   :  { %5757 = vmatmul.msk.bf16.gmra.mxu0 %vm709_vm0, %v5853_v52  ;;  %5783 = vmatmul.msk.bf16.gmra.mxu1 %vm709_vm0, %v5879_v54  ;;  %v1404_v63 = vpop.f32.mrf.mxu3 }
  0xdb   :  { %5965 = vset.pattern.permute.xlu1 %v10194_v47  ;;  %5964 = vset.pattern.permute.xlu0 %v10196_v48  ;;  %v1643_v0 = vadd.f32 %v6481_v6, %v1593_v61  ;;  %v1550_v2 = vmax.f32 %v1284_v51, %v1404_v63  ;;  %v5858_v63 = vld [vmem:[%s10189_s0 + $0x90] sm:$0xff] }
  0xdc   :  { %5966 = vset.pattern.permute.xlu2 %v10198_v46  ;;  %2150 = vperm.xlu1 %5965, %v6533_v60  }
  0xdd   :  { %2630 = vperm.xlu2 %5966, %v6533_v60   ;;  %1872 = vperm.xlu0 %5964, %v6533_v60   ;;  %v6552_v5 = vmax.f32 %v1643_v0, 0.0  ;;  %v5856_v0 = vld [vmem:[%s10189_s0 + $0x80] sm:$0xff] }
  0xde   :  { %v1034_v1 = vpop.f32.mrf.mxu0  ;;  %5808 = vmatmul.msk.bf16.gmra.mxu2 %vm709_vm0, %v5904_v62 }
  0xdf   :  { %v1498_v4 = vmax.f32 %v1034_v1, %v1154_v57  ;;  %v1164_v57 = vpop.f32.mrf.mxu1  ;;  %v1287_v1 = vpop.f32.mrf.mxu2 }
  0xe1   :  { %v1594_v9 = vmax.f32 %v1498_v4, %v1546_v8 }
  0xe3   :  { %v1644_v16 = vadd.f32 %v6481_v6, %v1594_v9 }
  0xe4   :  { %5967 = vset.pattern.permute.xlu1 %v10196_v48 }
  0xe5   :  { %5968 = vset.pattern.permute.xlu2 %v10194_v47  ;;  %5969 = vset.pattern.permute.xlu0 %v10198_v46  ;;  %v6569_v20 = vmax.f32 %v1644_v16, 0.0 }
  0xe6   :  { %2634 = vperm.xlu0 %5969, %v6552_v5   ;;  %2154 = vperm.xlu2 %5968, %v6552_v5   ;;  %v1037_v10 = vpop.f32.mrf.mxu0 }
  0xe7   :  { %1877 = vperm.xlu1 %5967, %v6552_v5   ;;  %v1499_v18 = vmax.f32 %v1037_v10, %v1157_v7  ;;  %v5882_v7 = vld [vmem:[%s10189_s0 + $0x150] sm:$0xff]  ;;  %v1167_v8 = vpop.f32.mrf.mxu1  ;;  %v1289_v16 = vpop.f32.mrf.mxu2 }
  0xe9   :  { %v1595_v22 = vmax.f32 %v1499_v18, %v1547_v17 }
  0xea   :  { %5758 = vmatmul.msk.bf16.gmra.mxu0 %vm709_vm0, %v5854_v12  ;;  %5784 = vmatmul.msk.bf16.gmra.mxu1 %vm709_vm0, %v5880_v13  ;;  %v1407_v12 = vpop.f32.mrf.mxu3 }
  0xeb   :  { %v1645_v25 = vadd.f32 %v6481_v6, %v1595_v22  ;;  %v1551_v15 = vmax.f32 %v1287_v1, %v1407_v12  ;;  %v5884_v1 = vld [vmem:[%s10189_s0 + $0x160] sm:$0xff] }
  0xed   :  { %v6582_v29 = vmax.f32 %v1645_v25, 0.0 }
  0xee   :  { %5971 = vset.pattern.permute.xlu0 %v10194_v47  ;;  %5970 = vset.pattern.permute.xlu2 %v10196_v48  ;;  %v1039_v24 = vpop.f32.mrf.mxu0 }
  0xef   :  { %5972 = vset.pattern.permute.xlu1 %v10198_v46  ;;  %2158 = vperm.xlu0 %5971, %v6569_v20   ;;  %v1500_v28 = vmax.f32 %v1039_v24, %v1159_v19  ;;  %v5907_v19 = vld [vmem:[%s10189_s0 + $0x218] sm:$0xff]  ;;  %v1169_v22 = vpop.f32.mrf.mxu1  ;;  %v5857_v24 = vld [vmem:[%s10189_s0 + $0x88] sm:$0xff] }
  0xf0   :  { %2638 = vperm.xlu1 %5972, %v6569_v20   ;;  %1882 = vperm.xlu2 %5970, %v6569_v20  }
  0xf1   :  { %5809 = vmatmul.msk.bf16.gmra.mxu2 %vm709_vm0, %v5905_v23  ;;  %v1596_v37 = vmax.f32 %v1500_v28, %v1548_v30 }
  0xf2   :  { %v1409_v26 = vpop.f32.mrf.mxu3 }
  0xf3   :  { %v1646_v43 = vadd.f32 %v6481_v6, %v1596_v37 }
  0xf5   :  { %v6603_v52 = vmax.f32 %v1646_v43, 0.0 }
  0xf6   :  { %v1042_v40 = vpop.f32.mrf.mxu0 }
  0xf7   :  { %5973 = vset.pattern.permute.xlu0 %v10196_v48  ;;  %v1501_v49 = vmax.f32 %v1042_v40, %v1162_v33  ;;  %v5927_v33 = vld [vmem:[%s10189_s0 + $0x2b8] sm:$0xff]  ;;  %v1172_v40 = vpop.f32.mrf.mxu1 }
  0xf8   :  { %5974 = vset.pattern.permute.xlu1 %v10194_v47  ;;  %5975 = vset.pattern.permute.xlu2 %v10198_v46 }
  0xf9   :  { %2642 = vperm.xlu2 %5975, %v6582_v29   ;;  %2162 = vperm.xlu1 %5974, %v6582_v29   ;;  %v1597_v54 = vmax.f32 %v1501_v49, %v1549_v50 }
  0xfa   :  { %1887 = vperm.xlu0 %5973, %v6582_v29   ;;  %5759 = vmatmul.msk.bf16.gmra.mxu0 %vm709_vm0, %v5855_v31  ;;  %v1552_v31 = vmax.f32 %v1289_v16, %v1409_v26  ;;  %v1412_v43 = vpop.f32.mrf.mxu3 }
  0xfb   :  { %5785 = vmatmul.msk.bf16.gmra.mxu1 %vm709_vm0, %v5881_v34  ;;  %v1647_v62 = vadd.f32 %v6481_v6, %v1597_v54  ;;  %v1292_v34 = vpop.f32.mrf.mxu2  ;;  %5831 = vmatmul.msk.bf16.gmra.mxu3 %vm709_vm0, %v5927_v33 }
  0xfc   :  { %v1553_v51 = vmax.f32 %v1292_v34, %v1412_v43  ;;  %v5859_v34 = vld [vmem:[%s10189_s0 + $0x98] sm:$0xff] }
  0xfd   :  { %v6619_v4 = vmax.f32 %v1647_v62, 0.0  ;;  %v5908_v62 = vld [vmem:[%s10189_s0 + $0x220] sm:$0xff] }
  0xfe   :  { %v1044_v61 = vpop.f32.mrf.mxu0 }
  0xff   :  { %v1502_v3 = vmax.f32 %v1044_v61, %v1164_v57 }
 0x101   :  { %5977 = vset.pattern.permute.xlu2 %v10194_v47  ;;  %5976 = vset.pattern.permute.xlu1 %v10196_v48  ;;  %v1598_v9 = vmax.f32 %v1502_v3, %v1550_v2 }
 0x102   :  { %5978 = vset.pattern.permute.xlu0 %v10198_v46  ;;  %2166 = vperm.xlu2 %5977, %v6603_v52  }
 0x103   :  { %2646 = vperm.xlu0 %5978, %v6603_v52   ;;  %1892 = vperm.xlu1 %5976, %v6603_v52   ;;  %v1648_v13 = vadd.f32 %v6481_v6, %v1598_v9 }
 0x104   :  { %5810 = vmatmul.msk.bf16.gmra.mxu2 %vm709_vm0, %v5906_v55  ;;  %v1294_v55 = vpop.f32.mrf.mxu2 }
 0x105   :  { %v6633_v17 = vmax.f32 %v1648_v13, 0.0 }
 0x106   :  { %v1047_v10 = vpop.f32.mrf.mxu0 }
 0x107   :  { %v1503_v14 = vmax.f32 %v1047_v10, %v1167_v8 }
 0x109   :  { %v1599_v18 = vmax.f32 %v1503_v14, %v1551_v15  ;;  %v5928_v14 = vld [vmem:[%s10189_s0 + $0x2c0] sm:$0xff] }
 0x10a   :  { %5979 = vset.pattern.permute.xlu2 %v10196_v48  ;;  %5760 = vmatmul.msk.bf16.gmra.mxu0 %vm709_vm0, %v5856_v0  ;;  %v1174_v0 = vpop.f32.mrf.mxu1 }
 0x10b   :  { %5980 = vset.pattern.permute.xlu0 %v10194_v47  ;;  %5981 = vset.pattern.permute.xlu1 %v10198_v46  ;;  %v1649_v25 = vadd.f32 %v6481_v6, %v1599_v18 }
 0x10c   :  { %2650 = vperm.xlu1 %5981, %v6619_v4   ;;  %2170 = vperm.xlu0 %5980, %v6619_v4   ;;  %v1297_v13 = vpop.f32.mrf.mxu2 }
 0x10d   :  { %1897 = vperm.xlu2 %5979, %v6619_v4   ;;  %5786 = vmatmul.msk.bf16.gmra.mxu1 %vm709_vm0, %v5882_v7  ;;  %v6658_v36 = vmax.f32 %v1649_v25, 0.0  ;;  %v1414_v7 = vpop.f32.mrf.mxu3 }
 0x10e   :  { %v1049_v23 = vpop.f32.mrf.mxu0  ;;  %v1554_v12 = vmax.f32 %v1294_v55, %v1414_v7  ;;  %5832 = vmatmul.msk.bf16.gmra.mxu3 %vm709_vm0, %v5928_v14  ;;  %v5860_v14 = vld [vmem:[%s10189_s0 + $0xa0] sm:$0xff] }
 0x10f   :  { %v1504_v30 = vmax.f32 %v1049_v23, %v1169_v22 }
 0x111   :  { %v1600_v37 = vmax.f32 %v1504_v30, %v1552_v31 }
 0x113   :  { %v1650_v49 = vadd.f32 %v6481_v6, %v1600_v37 }
 0x114   :  { %5983 = vset.pattern.permute.xlu1 %v10194_v47  ;;  %5982 = vset.pattern.permute.xlu0 %v10196_v48  ;;  %v1299_v31 = vpop.f32.mrf.mxu2 }
 0x115   :  { %5984 = vset.pattern.permute.xlu2 %v10198_v46  ;;  %2174 = vperm.xlu1 %5983, %v6633_v17   ;;  %v6671_v57 = vmax.f32 %v1650_v49, 0.0  ;;  %v1417_v23 = vpop.f32.mrf.mxu3 }
 0x116   :  { %2654 = vperm.xlu2 %5984, %v6633_v17   ;;  %1902 = vperm.xlu0 %5982, %v6633_v17   ;;  %v1052_v41 = vpop.f32.mrf.mxu0  ;;  %v1555_v25 = vmax.f32 %v1297_v13, %v1417_v23 }
 0x117   :  { %5811 = vmatmul.msk.bf16.gmra.mxu2 %vm709_vm0, %v5907_v19  ;;  %v1505_v50 = vmax.f32 %v1052_v41, %v1172_v40  ;;  %v1177_v19 = vpop.f32.mrf.mxu1  ;;  %v5885_v40 = vld [vmem:[%s10189_s0 + $0x168] sm:$0xff] }
 0x119   :  { %v6652_v28 = vpop.permute.xlu2 %2618  ;;  %v1601_v61 = vmax.f32 %v1505_v50, %v1553_v51 }
 0x11a   :  { %5761 = vmatmul.msk.bf16.gmra.mxu0 %vm709_vm0, %v5857_v24 }
 0x11b   :  { %v1651_v2 = vadd.f32 %v6481_v6, %v1601_v61 }
 0x11d   :  { %5985 = vset.pattern.permute.xlu1 %v10196_v48  ;;  %5787 = vmatmul.msk.bf16.gmra.mxu1 %vm709_vm0, %v5883_v27  ;;  %v6694_v9 = vmax.f32 %v1651_v2, 0.0  ;;  %v5909_v27 = vld [vmem:[%s10189_s0 + $0x228] sm:$0xff]  ;;  %v1419_v50 = vpop.f32.mrf.mxu3 }
 0x11e   :  { %5986 = vset.pattern.permute.xlu2 %v10194_v47  ;;  %5987 = vset.pattern.permute.xlu0 %v10198_v46  ;;  %v1054_v3 = vpop.f32.mrf.mxu0 }
 0x11f   :  { %2658 = vperm.xlu0 %5987, %v6658_v36   ;;  %2178 = vperm.xlu2 %5986, %v6658_v36   ;;  %v1506_v10 = vmax.f32 %v1054_v3, %v1174_v0  ;;  %v1179_v51 = vpop.f32.mrf.mxu1  ;;  %v1556_v0 = vmax.f32 %v1299_v31, %v1419_v50 }
 0x120   :  { %1907 = vperm.xlu1 %5985, %v6658_v36  }
 0x121   :  { %v1602_v16 = vmax.f32 %v1506_v10, %v1554_v12  ;;  %v5910_v10 = vld [vmem:[%s10189_s0 + $0x230] sm:$0xff]  ;;  %v1741_v12 = vld [vmem:[%s10191_s2 + $0x60] sm:$0xff] }
 0x122   :  { %v6669_v54 = vpop.permute.xlu2 %2142  ;;  %v2791_v23 = vmul.f32 %v6652_v28, %v1741_v12 }
 0x123   :  { %v1652_v26 = vadd.f32 %v6481_v6, %v1602_v16 }
 0x125   :  { %v6717_v37 = vmax.f32 %v1652_v26, 0.0 }
 0x126   :  { %v1057_v22 = vpop.f32.mrf.mxu0 }
 0x127   :  { %5989 = vset.pattern.permute.xlu0 %v10194_v47  ;;  %5988 = vset.pattern.permute.xlu2 %v10196_v48  ;;  %v1507_v24 = vmax.f32 %v1057_v22, %v1177_v19  ;;  %v1182_v16 = vpop.f32.mrf.mxu1  ;;  %v5886_v22 = vld [vmem:[%s10189_s0 + $0x170] sm:$0xff] }
 0x128   :  { %5990 = vset.pattern.permute.xlu1 %v10198_v46  ;;  %2182 = vperm.xlu0 %5989, %v6671_v57  }
 0x129   :  { %2662 = vperm.xlu1 %5990, %v6671_v57   ;;  %1912 = vperm.xlu2 %5988, %v6671_v57   ;;  %v1603_v33 = vmax.f32 %v1507_v24, %v1555_v25 }
 0x12a   :  { %5812 = vmatmul.msk.bf16.gmra.mxu2 %vm709_vm0, %v5908_v62  ;;  %5762 = vmatmul.msk.bf16.gmra.mxu0 %vm709_vm0, %v5858_v63 }
 0x12b   :  { %v1653_v49 = vadd.f32 %v6481_v6, %v1603_v33  ;;  %v1422_v33 = vpop.f32.mrf.mxu3 }
 0x12d   :  { %5788 = vmatmul.msk.bf16.gmra.mxu1 %vm709_vm0, %v5884_v1  ;;  %v6692_v8 = vpop.permute.xlu2 %1867  ;;  %v6736_v62 = vmax.f32 %v1653_v49, 0.0  ;;  %v1302_v1 = vpop.f32.mrf.mxu2 }
 0x12e   :  { %10349 = vst [vmem:[#allocation3_spill] sm:$0xff] %v6692_v8  ;;  %v1059_v55 = vpop.f32.mrf.mxu0 }
 0x12f   :  { %v1508_v63 = vmax.f32 %v1059_v55, %v1179_v51  ;;  %v1184_v51 = vpop.f32.mrf.mxu1  ;;  %v1743_v55 = vld [vmem:[%s10191_s2 + $0x70] sm:$0xff] }
 0x130   :  { %5991 = vset.pattern.permute.xlu0 %v10196_v48 }
 0x131   :  { %5992 = vset.pattern.permute.xlu1 %v10194_v47  ;;  %5993 = vset.pattern.permute.xlu2 %v10198_v46  ;;  %v2139_v15 = vpop.permute.xlu1 %2138  ;;  %v1604_v2 = vmax.f32 %v1508_v63, %v1556_v0  ;;  %v5911_v0 = vld [vmem:[%s10189_s0 + $0x238] sm:$0xff] }
 0x132   :  { %2666 = vperm.xlu2 %5993, %v6694_v9   ;;  %2186 = vperm.xlu1 %5992, %v6694_v9   ;;  %v6704_v18 = vpop.permute.xlu0 %1857  ;;  %v2311_v24 = vmul.f32 %v2139_v15, %v1741_v12  ;;  %v1557_v15 = vmax.f32 %v1302_v1, %v1422_v33 }
 0x133   :  { %10350 = vst [vmem:[#allocation4_spill] sm:$0xff] %v6704_v18  ;;  %1917 = vperm.xlu0 %5991, %v6694_v9   ;;  %v1654_v13 = vadd.f32 %v6481_v6, %v1604_v2 }
 0x135   :  { %v1304_v25 = vpop.f32.mrf.mxu2  ;;  %v6765_v26 = vmax.f32 %v1654_v13, 0.0 }
 0x136   :  { %v1062_v31 = vpop.f32.mrf.mxu0 }
 0x137   :  { %v6712_v30 = vpop.permute.xlu2 %2630  ;;  %v1509_v28 = vmax.f32 %v1062_v31, %v1182_v16  ;;  %v1424_v16 = vpop.f32.mrf.mxu3 }
 0x138   :  { %v1558_v33 = vmax.f32 %v1304_v25, %v1424_v16  ;;  %v5912_v25 = vld [vmem:[%s10189_s0 + $0x240] sm:$0xff] }
 0x139   :  { %v1605_v49 = vmax.f32 %v1509_v28, %v1557_v15 }
 0x13a   :  { %5813 = vmatmul.msk.bf16.gmra.mxu2 %vm709_vm0, %v5909_v27  ;;  %5995 = vset.pattern.permute.xlu2 %v10194_v47  ;;  %v5929_v27 = vld [vmem:[%s10189_s0 + $0x2c8] sm:$0xff] }
 0x13b   :  { %5994 = vset.pattern.permute.xlu1 %v10196_v48  ;;  %5996 = vset.pattern.permute.xlu0 %v10198_v46  ;;  %v2623_v41 = vpop.permute.xlu0 %2622  ;;  %v6726_v43 = vpop.permute.xlu1 %1862  ;;  %v1655_v2 = vadd.f32 %v6481_v6, %v1605_v49  ;;  %v1745_v49 = vld [vmem:[%s10191_s2 + $0x80] sm:$0xff] }
 0x13c   :  { %10351 = vst [vmem:[#allocation5_spill] sm:$0xff] %v6726_v43  ;;  %2670 = vperm.xlu0 %5996, %v6717_v37   ;;  %2190 = vperm.xlu2 %5995, %v6717_v37   ;;  %v2792_v63 = vmul.f32 %v2623_v41, %v1743_v55  ;;  %v5861_v41 = vld [vmem:[%s10189_s0 + $0xa8] sm:$0xff]  ;;  %v10364_v43 = vmov 0  }
 0x13d   :  { %1922 = vperm.xlu1 %5994, %v6717_v37   ;;  %5763 = vmatmul.msk.bf16.gmra.mxu0 %vm709_vm0, %v5859_v34  ;;  %v1307_v1 = vpop.f32.mrf.mxu2  ;;  %v6804_v13 = vmax.f32 %v1655_v2, 0.0 }
 0x13e   :  { %5789 = vmatmul.msk.bf16.gmra.mxu1 %vm709_vm0, %v5885_v40  ;;  %5833 = vmatmul.msk.bf16.gmra.mxu3 %vm709_vm0, %v5929_v27  ;;  %v1187_v27 = vpop.f32.mrf.mxu1 }
 0x13f   :  { %10355 = vst [vmem:[#allocation9_spill] sm:$0xff] %v6804_v13  ;;  %v1427_v2 = vpop.f32.mrf.mxu3 }
 0x140   :  { %v6734_v61 = vpop.permute.xlu2 %2154 }
 0x144   :  { %5998 = vset.pattern.permute.xlu0 %v10194_v47  ;;  %5997 = vset.pattern.permute.xlu2 %v10196_v48  ;;  %v6742_v3 = vpop.permute.xlu1 %2626  ;;  %v6744_v7 = vpop.permute.xlu0 %2146 }
 0x145   :  { %5999 = vset.pattern.permute.xlu1 %v10198_v46  ;;  %2194 = vperm.xlu0 %5998, %v6736_v62  }
 0x146   :  { %2674 = vperm.xlu1 %5999, %v6736_v62   ;;  %1927 = vperm.xlu2 %5997, %v6736_v62  }
 0x14a   :  { %5814 = vmatmul.msk.bf16.gmra.mxu2 %vm709_vm0, %v5910_v10  ;;  %v6759_v19 = vpop.permute.xlu2 %1882 }
 0x14b   :  { %10352 = vst [vmem:[#allocation6_spill] sm:$0xff] %v6759_v19 }
 0x14d   :  { %6000 = vset.pattern.permute.xlu0 %v10196_v48  ;;  %5764 = vmatmul.msk.bf16.gmra.mxu0 %vm709_vm0, %v5860_v14  ;;  %v2312_v14 = vmul.f32 %v6669_v54, %v1743_v55  ;;  %v6819_v54 = vpop.f32.mrf.mxu2  ;;  %v2793_v55 = vmul.f32 %v6742_v3, %v1745_v49  ;;  %v1559_v3 = vmax.f32 %v1307_v1, %v1427_v2  ;;  %v5888_v1 = vld [vmem:[%s10189_s0 + $0x180] sm:$0xff] }
 0x14e   :  { %2413 = vrot.lane.b32.xlu1 %v2311_v24, %s6234_s24  ;;  %2893 = vrot.lane.b32.xlu2 %v2791_v23, %s6235_s25  ;;  %v6776_v34 = vpop.permute.xlu1 %2150  ;;  %v1064_v23 = vpop.f32.mrf.mxu0 }
 0x14f   :  { %1932 = vperm.xlu0 %6000, %v6765_v26   ;;  %5790 = vmatmul.msk.bf16.gmra.mxu1 %vm709_vm0, %v5886_v22  ;;  %v6778_v40 = vpop.permute.xlu0 %1872  ;;  %v5887_v22 = vld [vmem:[%s10189_s0 + $0x178] sm:$0xff]  ;;  %v1510_v31 = vmax.f32 %v1064_v23, %v1184_v51 }
 0x150   :  { %10353 = vst [vmem:[#allocation7_spill] sm:$0xff] %v6778_v40  ;;  %6001 = vset.pattern.permute.xlu1 %v10194_v47  ;;  %6002 = vset.pattern.permute.xlu2 %v10198_v46 }
 0x153   :  { %v6783_v50 = vpop.permute.xlu2 %2642 }
 0x156   :  { %2678 = vperm.xlu2 %6002, %v6765_v26   ;;  %2198 = vperm.xlu1 %6001, %v6765_v26   ;;  %v1067_v51 = vpop.f32.mrf.mxu0 }
 0x157   :  { %2895 = vrot.lane.b32.xlu0 %v2792_v63, %s6235_s25  ;;  %v2313_v63 = vmul.f32 %v6744_v7, %v1745_v49  ;;  %v1511_v16 = vmax.f32 %v1067_v51, %v1187_v27 }
 0x158   :  { %v6795_v10 = vpop.permute.xlu0 %2634  ;;  %6005 = vset.pattern.permute.xlu0 %v10198_v46 }
 0x159   :  { %v6798_v12 = vpop.permute.xlu1 %1877 }
 0x15a   :  { %10354 = vst [vmem:[#allocation8_spill] sm:$0xff] %v6798_v12  ;;  %5815 = vmatmul.msk.bf16.gmra.mxu2 %vm709_vm0, %v5911_v0  ;;  %v1606_v0 = vmax.f32 %v1510_v31, %v1558_v33  ;;  %v6847_v31 = vpop.f32.mrf.mxu2  ;;  %v1607_v33 = vmax.f32 %v1511_v16, %v1559_v3 }
 0x15c   :  { %v6810_v24 = vpop.permute.xlu2 %2166  ;;  %v1656_v7 = vadd.f32 %v6481_v6, %v1606_v0 }
 0x15d   :  { %5765 = vmatmul.msk.bf16.gmra.mxu0 %vm709_vm0, %v5861_v41 }
 0x15e   :  { %2415 = vrot.lane.b32.xlu2 %v2312_v14, %s6234_s24  ;;  %6003 = vset.pattern.permute.xlu1 %v10196_v48  ;;  %v1189_v14 = vpop.f32.mrf.mxu1  ;;  %v6854_v27 = vmax.f32 %v1656_v7, 0.0 }
 0x15f   :  { %2682 = vperm.xlu0 %6005, %v6804_v13   ;;  %1937 = vperm.xlu1 %6003, %v6804_v13  }
 0x160   :  { %5791 = vmatmul.msk.bf16.gmra.mxu1 %vm709_vm0, %v5887_v22  ;;  %6004 = vset.pattern.permute.xlu2 %v10194_v47  ;;  %v5862_v22 = vld [vmem:[%s10189_s0 + $0xb0] sm:$0xff]  ;;  %10358 = vst [vmem:[#allocation12_spill] sm:$0xff] %v6854_v27 }
 0x161   :  { %v6823_v15 = vpop.permute.xlu0 %2158 }
 0x162   :  { %v6821_v28 = vpop.permute.xlu1 %2638 }
 0x166   :  { %2202 = vperm.xlu2 %6004, %v6804_v13   ;;  %v1192_v2 = vpop.f32.mrf.mxu1 }
 0x167   :  { %2417 = vrot.lane.b32.xlu0 %v2313_v63, %s6234_s24  ;;  %2897 = vrot.lane.b32.xlu1 %v2793_v55, %s6235_s25  ;;  %v6836_v41 = vpop.permute.xlu2 %1897  ;;  %v5930_v55 = vld [vmem:[%s10189_s0 + $0x2d0] sm:$0xff]  ;;  %v1657_v63 = vadd.f32 %v6481_v6, %v1607_v33  ;;  %v6880_v33 = vpop.f32.mrf.mxu2 }
 0x168   :  { %10356 = vst [vmem:[#allocation10_spill] sm:$0xff] %v6836_v41  ;;  %6007 = vset.pattern.permute.xlu0 %v10194_v47  ;;  %6008 = vset.pattern.permute.xlu1 %v10198_v46 }
 0x169   :  { %5834 = vmatmul.msk.bf16.gmra.mxu3 %vm709_vm0, %v5930_v55  ;;  %v6872_v51 = vmax.f32 %v1657_v63, 0.0  ;;  %v1429_v55 = vpop.f32.mrf.mxu3 }
 0x16a   :  { %5816 = vmatmul.msk.bf16.gmra.mxu2 %vm709_vm0, %v5912_v25  ;;  %v1747_v25 = vld [vmem:[%s10191_s2 + $0x90] sm:$0xff] }
 0x16b   :  { %v6845_v23 = vpop.permute.xlu1 %2162  ;;  %10359 = vst [vmem:[#allocation13_spill] sm:$0xff] %v6872_v51  ;;  %v2314_v16 = vmul.f32 %v6776_v34, %v1747_v25  ;;  %v1069_v34 = vpop.f32.mrf.mxu0 }
 0x16c   :  { %v6849_v49 = vpop.permute.xlu0 %1887 }
 0x16d   :  { %10357 = vst [vmem:[#allocation11_spill] sm:$0xff] %v6849_v49  ;;  %5766 = vmatmul.msk.bf16.gmra.mxu0 %vm709_vm0, %v5862_v22  ;;  %v2794_v22 = vmul.f32 %v6712_v30, %v1747_v25  ;;  %v5863_v30 = vld [vmem:[%s10189_s0 + $0xb8] sm:$0xff]  ;;  %v1512_v25 = vmax.f32 %v1069_v34, %v1189_v14 }
 0x16e   :  { %6006 = vset.pattern.permute.xlu2 %v10196_v48  ;;  %v1194_v59 = vpop.f32.mrf.mxu1 }
 0x16f   :  { %2686 = vperm.xlu1 %6008, %v6854_v27   ;;  %2206 = vperm.xlu0 %6007, %v6854_v27  }
 0x170   :  { %1942 = vperm.xlu2 %6006, %v6854_v27   ;;  %5792 = vmatmul.msk.bf16.gmra.mxu1 %vm709_vm0, %v5888_v1  ;;  %v6866_v0 = vpop.permute.xlu2 %2654  ;;  %v5913_v1 = vld [vmem:[%s10189_s0 + $0x248] sm:$0xff] }
 0x171   :  { %v1432_v18 = vpop.f32.mrf.mxu3 }
 0x172   :  { %v1561_v8 = vmax.f32 %v6847_v31, %v1432_v18 }
 0x175   :  { %v6875_v3 = vpop.permute.xlu0 %2646  ;;  %v6877_v7 = vpop.permute.xlu1 %1892 }
 0x176   :  { %10360 = vst [vmem:[#allocation14_spill] sm:$0xff] %v6877_v7 }
 0x177   :  { %2419 = vrot.lane.b32.xlu1 %v2314_v16, %s6234_s24  ;;  %6009 = vset.pattern.permute.xlu0 %v10196_v48  ;;  %v1560_v16 = vmax.f32 %v6819_v54, %v1429_v55  ;;  %v6911_v54 = vpop.f32.mrf.mxu2 }
 0x178   :  { %2899 = vrot.lane.b32.xlu2 %v2794_v22, %s6235_s25  ;;  %1947 = vperm.xlu0 %6009, %v6872_v51   ;;  %v1749_v22 = vld [vmem:[%s10191_s2 + $0xa0] sm:$0xff] }
 0x179   :  { %v6889_v63 = vpop.permute.xlu2 %2178  ;;  %6010 = vset.pattern.permute.xlu1 %v10194_v47  ;;  %6011 = vset.pattern.permute.xlu2 %v10198_v46  ;;  %v2795_v47 = vmul.f32 %v6795_v10, %v1749_v22  ;;  %v1608_v48 = vmax.f32 %v1512_v25, %v1560_v16  ;;  %v2315_v34 = vmul.f32 %v6734_v61, %v1749_v22  ;;  %v5914_v16 = vld [vmem:[%s10189_s0 + $0x250] sm:$0xff] }
 0x17a   :  { %5817 = vmatmul.msk.bf16.gmra.mxu2 %vm709_vm0, %v5913_v1  ;;  %v10361_v1 = vmov 2  }
 0x17b   :  { %v1658_v55 = vadd.f32 %v6481_v6, %v1608_v48 }
 0x17d   :  { %5767 = vmatmul.msk.bf16.gmra.mxu0 %vm709_vm0, %v5863_v30  ;;  %v6921_v30 = vpop.f32.mrf.mxu1  ;;  %v6923_v25 = vmax.f32 %v1658_v55, 0.0  ;;  %v10366_v55 = vmov 1  }
 0x17e   :  { %v6906_v46 = vpop.permute.xlu1 %2650  ;;  %v6908_v14 = vpop.permute.xlu0 %2170 }
 0x17f   :  { %2210 = vperm.xlu1 %6010, %v6872_v51   ;;  %10363 = vst [vmem:[#allocation16_spill] sm:$0xff] %v6923_v25  ;;  %v6944_v40 = vpop.f32.mrf.mxu2 }
 0x180   :  { %2690 = vperm.xlu2 %6011, %v6872_v51   ;;  %2901 = vrot.lane.b32.xlu0 %v2795_v47, %s6235_s25  ;;  %v5931_v47 = vld [vmem:[%s10189_s0 + $0x2d8] sm:$0xff] }
 0x181   :  { %5793 = vmatmul.msk.bf16.gmra.mxu1 %vm709_vm0, %v5889_v56  ;;  %6014 = vset.pattern.permute.xlu0 %v10361_v1  ;;  %v1072_v56 = vpop.f32.mrf.mxu0 }
 0x182   :  { %v1513_v48 = vmax.f32 %v1072_v56, %v1192_v2  ;;  %5835 = vmatmul.msk.bf16.gmra.mxu3 %vm709_vm0, %v5931_v47  ;;  %v1751_v2 = vld [vmem:[%s10191_s2 + $0xb0] sm:$0xff]  ;;  %v1434_v47 = vpop.f32.mrf.mxu3 }
 0x183   :  { %v6918_v10 = vpop.permute.xlu2 %1912  ;;  %v2316_v56 = vmul.f32 %v6823_v15, %v1751_v2  ;;  %v2796_v12 = vmul.f32 %v6821_v28, %v1751_v2  ;;  %v1562_v2 = vmax.f32 %v6880_v33, %v1434_v47  ;;  %v1753_v33 = vld [vmem:[%s10191_s2 + $0xc0] sm:$0xff] }
 0x184   :  { %10362 = vst [vmem:[#allocation15_spill] sm:$0xff] %v6918_v10  ;;  %v5864_v10 = vld [vmem:[%s10189_s0 + $0xc0] sm:$0xff]  ;;  %v1609_v18 = vmax.f32 %v1513_v48, %v1561_v8  ;;  %v2797_v47 = vmul.f32 %v6783_v50, %v1753_v33 }
 0x186   :  { %v1659_v8 = vadd.f32 %v6481_v6, %v1609_v18 }
 0x187   :  { %6012 = vset.pattern.permute.xlu1 %v10364_v43  ;;  %v6935_v61 = vpop.permute.xlu1 %2174  ;;  %v1322_v7 = vpop.f32.mrf.mxu2 }
 0x188   :  { %2421 = vrot.lane.b32.xlu2 %v2315_v34, %s6234_s24  ;;  %2694 = vperm.xlu0 %6014, %v6923_v25   ;;  %v6937_v22 = vpop.permute.xlu0 %1902  ;;  %v5890_v34 = vld [vmem:[%s10189_s0 + $0x190] sm:$0xff]  ;;  %v6972_v18 = vmax.f32 %v1659_v8, 0.0 }
 0x189   :  { %10365 = vst [vmem:[#allocation17_spill] sm:$0xff] %v6937_v22  ;;  %1952 = vperm.xlu1 %6012, %v6923_v25   ;;  %6013 = vset.pattern.permute.xlu2 %v10366_v55  ;;  %v1074_v28 = vpop.f32.mrf.mxu0 }
 0x18a   :  { %5818 = vmatmul.msk.bf16.gmra.mxu2 %vm709_vm0, %v5914_v16  ;;  %v6959_v16 = vpop.f32.mrf.mxu1  ;;  %v1514_v15 = vmax.f32 %v1074_v28, %v1194_v59  ;;  %10368 = vst [vmem:[#allocation19_spill] sm:$0xff] %v6972_v18  ;;  %v2317_v28 = vmul.f32 %v6845_v23, %v1753_v33  ;;  %v1437_v22 = vpop.f32.mrf.mxu3 }
 0x18b   :  { %v1563_v50 = vmax.f32 %v6911_v54, %v1437_v22 }
 0x18c   :  { %v6948_v31 = vpop.permute.xlu2 %2666  ;;  %v1610_v19 = vmax.f32 %v1514_v15, %v1562_v2 }
 0x18d   :  { %5768 = vmatmul.msk.bf16.gmra.mxu0 %vm709_vm0, %v5864_v10 }
 0x18e   :  { %v1660_v8 = vadd.f32 %v6481_v6, %v1610_v19 }
 0x190   :  { %2214 = vperm.xlu2 %6013, %v6923_v25   ;;  %2423 = vrot.lane.b32.xlu0 %v2316_v56, %s6234_s24  ;;  %v6995_v15 = vmax.f32 %v1660_v8, 0.0  ;;  %v1755_v8 = vld [vmem:[%s10191_s2 + $0xd0] sm:$0xff] }
 0x191   :  { %2903 = vrot.lane.b32.xlu1 %v2796_v12, %s6235_s25  ;;  %5794 = vmatmul.msk.bf16.gmra.mxu1 %vm709_vm0, %v5890_v34  ;;  %v6966_v10 = vpop.permute.xlu0 %2658  ;;  %v5865_v12 = vld [vmem:[%s10189_s0 + $0xc8] sm:$0xff]  ;;  %v1077_v49 = vpop.f32.mrf.mxu0 }
 0x192   :  { %v6968_v48 = vpop.permute.xlu1 %1907  ;;  %6016 = vset.pattern.permute.xlu0 %v10366_v55  ;;  %6017 = vset.pattern.permute.xlu1 %v10361_v1  ;;  %10369 = vst [vmem:[#allocation20_spill] sm:$0xff] %v6995_v15  ;;  %v1515_v19 = vmax.f32 %v1077_v49, %v6921_v30  ;;  %v2798_v49 = vmul.f32 %v6875_v3, %v1755_v8 }
 0x193   :  { %10367 = vst [vmem:[#allocation18_spill] sm:$0xff] %v6968_v48  ;;  %v5932_v48 = vld [vmem:[%s10189_s0 + $0x2e0] sm:$0xff] }
 0x194   :  { %5836 = vmatmul.msk.bf16.gmra.mxu3 %vm709_vm0, %v5932_v48  ;;  %v1611_v33 = vmax.f32 %v1515_v19, %v1563_v50 }
 0x196   :  { %v6975_v56 = vpop.permute.xlu2 %2190  ;;  %v1661_v30 = vadd.f32 %v6481_v6, %v1611_v33 }
 0x198   :  { %6015 = vset.pattern.permute.xlu2 %v10364_v43  ;;  %2218 = vperm.xlu0 %6016, %v6972_v18   ;;  %v7026_v22 = vmax.f32 %v1661_v30, 0.0 }
 0x199   :  { %2698 = vperm.xlu1 %6017, %v6972_v18   ;;  %1957 = vperm.xlu2 %6015, %v6972_v18   ;;  %v1079_v19 = vpop.f32.mrf.mxu0 }
 0x19a   :  { %v6986_v34 = vpop.permute.xlu0 %2182  ;;  %10373 = vst [vmem:[#allocation24_spill] sm:$0xff] %v7026_v22  ;;  %v1516_v33 = vmax.f32 %v1079_v19, %v6959_v16 }
 0x19b   :  { %v6984_v59 = vpop.permute.xlu1 %2662 }
 0x19d   :  { %5769 = vmatmul.msk.bf16.gmra.mxu0 %vm709_vm0, %v5865_v12 }
 0x1a0   :  { %v6997_v2 = vpop.permute.xlu2 %1927  ;;  %6018 = vset.pattern.permute.xlu0 %v10364_v43 }
 0x1a1   :  { %10370 = vst [vmem:[#allocation21_spill] sm:$0xff] %v6997_v2  ;;  %2425 = vrot.lane.b32.xlu1 %v2317_v28, %s6234_s24  ;;  %2905 = vrot.lane.b32.xlu2 %v2797_v47, %s6235_s25  ;;  %v2318_v47 = vmul.f32 %v6810_v24, %v1755_v8  ;;  %v1439_v28 = vpop.f32.mrf.mxu3  ;;  %v1757_v8 = vld [vmem:[%s10191_s2 + $0xe0] sm:$0xff]  ;;  %v1082_v16 = vpop.f32.mrf.mxu0 }
 0x1a2   :  { %1962 = vperm.xlu0 %6018, %v6995_v15   ;;  %6019 = vset.pattern.permute.xlu1 %v10366_v55  ;;  %v1564_v24 = vmax.f32 %v6944_v40, %v1439_v28  ;;  %v1202_v40 = vpop.f32.mrf.mxu1 }
 0x1a3   :  { %6020 = vset.pattern.permute.xlu2 %v10361_v1  ;;  %v1517_v28 = vmax.f32 %v1082_v16, %v1202_v40 }
 0x1a4   :  { %v7011_v23 = vpop.permute.xlu1 %2186 }
 0x1a5   :  { %v7013_v12 = vpop.permute.xlu0 %1917 }
 0x1a6   :  { %10371 = vst [vmem:[#allocation22_spill] sm:$0xff] %v7013_v12  ;;  %v1612_v12 = vmax.f32 %v1516_v33, %v1564_v24 }
 0x1a8   :  { %v7019_v54 = vpop.permute.xlu2 %2893 }
 0x1a9   :  { %10372 = vst [vmem:[#allocation23_spill] sm:$0xff] %v7019_v54  ;;  %2702 = vperm.xlu2 %6020, %v6995_v15   ;;  %2222 = vperm.xlu1 %6019, %v6995_v15   ;;  %v1442_v30 = vpop.f32.mrf.mxu3  ;;  %v2319_v54 = vmul.f32 %v6908_v14, %v1757_v8  ;;  %v5933_v14 = vld [vmem:[%s10189_s0 + $0x2e8] sm:$0xff] }
 0x1aa   :  { %2907 = vrot.lane.b32.xlu0 %v2798_v49, %s6235_s25  ;;  %v1565_v19 = vmax.f32 %v1322_v7, %v1442_v30  ;;  %5837 = vmatmul.msk.bf16.gmra.mxu3 %vm709_vm0, %v5933_v14  ;;  %v1759_v30 = vld [vmem:[%s10191_s2 + $0xf0] sm:$0xff] }
 0x1ab   :  { %6023 = vset.pattern.permute.xlu0 %v10361_v1  ;;  %v2320_v40 = vmul.f32 %v6935_v61, %v1759_v30  ;;  %v1084_v61 = vpop.f32.mrf.mxu0 }
 0x1ac   :  { %v1613_v33 = vmax.f32 %v1517_v28, %v1565_v19  ;;  %v2800_v28 = vmul.f32 %v6866_v0, %v1759_v30 }
 0x1ae   :  { %v7028_v48 = vpop.permute.xlu0 %2670 }
 0x1af   :  { %v7031_v3 = vpop.permute.xlu1 %1922 }
 0x1b0   :  { %10374 = vst [vmem:[#allocation25_spill] sm:$0xff] %v7031_v3  ;;  %v7033_v50 = vpop.permute.xlu2 %2678 }
 0x1b1   :  { %2427 = vrot.lane.b32.xlu2 %v2318_v47, %s6234_s24  ;;  %6021 = vset.pattern.permute.xlu1 %v10364_v43  ;;  %v2799_v47 = vmul.f32 %v6906_v46, %v1757_v8  ;;  %v1662_v46 = vadd.f32 %v6481_v6, %v1612_v12  ;;  %v1663_v12 = vadd.f32 %v6481_v6, %v1613_v33  ;;  %v1324_v33 = vpop.f32.mrf.mxu2 }
 0x1b2   :  { %2706 = vperm.xlu0 %6023, %v7026_v22   ;;  %1967 = vperm.xlu1 %6021, %v7026_v22  }
 0x1b3   :  { %6022 = vset.pattern.permute.xlu2 %v10366_v55  ;;  %v7063_v24 = vmax.f32 %v1662_v46, 0.0  ;;  %v1444_v46 = vpop.f32.mrf.mxu3 }
 0x1b4   :  { %v1566_v30 = vmax.f32 %v1324_v33, %v1444_v46 }
 0x1b5   :  { %10376 = vst [vmem:[#allocation27_spill] sm:$0xff] %v7063_v24 }
 0x1b7   :  { %v7045_v49 = vpop.permute.xlu0 %2194 }
 0x1b8   :  { %v7049_v3 = vpop.permute.xlu1 %2674  ;;  %v7051_v2 = vpop.permute.xlu2 %2415 }
 0x1b9   :  { %10375 = vst [vmem:[#allocation26_spill] sm:$0xff] %v7051_v2  ;;  %2226 = vperm.xlu2 %6022, %v7026_v22   ;;  %v1327_v33 = vpop.f32.mrf.mxu2 }
 0x1ba   :  { %2429 = vrot.lane.b32.xlu0 %v2319_v54, %s6234_s24  ;;  %2909 = vrot.lane.b32.xlu1 %v2799_v47, %s6235_s25  ;;  %v7079_v47 = vmax.f32 %v1663_v12, 0.0  ;;  %v1204_v12 = vpop.f32.mrf.mxu1 }
 0x1bb   :  { %6025 = vset.pattern.permute.xlu0 %v10366_v55  ;;  %6026 = vset.pattern.permute.xlu1 %v10361_v1  ;;  %v1518_v0 = vmax.f32 %v1084_v61, %v1204_v12  ;;  %v1087_v61 = vpop.f32.mrf.mxu0 }
 0x1bc   :  { %10379 = vst [vmem:[#allocation30_spill] sm:$0xff] %v7079_v47 }
 0x1c0   :  { %v7065_v54 = vpop.permute.xlu1 %2413  ;;  %v7067_v8 = vpop.permute.xlu2 %2202 }
 0x1c1   :  { %10377 = vst [vmem:[#allocation28_spill] sm:$0xff] %v7065_v54  ;;  %6024 = vset.pattern.permute.xlu2 %v10364_v43  ;;  %v7070_v7 = vpop.permute.xlu0 %1932  ;;  %v1761_v54 = vld [vmem:[%s10191_s2 + $0x100] sm:$0xff] }
 0x1c2   :  { %10378 = vst [vmem:[#allocation29_spill] sm:$0xff] %v7070_v7  ;;  %2710 = vperm.xlu1 %6026, %v7063_v24   ;;  %2230 = vperm.xlu0 %6025, %v7063_v24   ;;  %v1207_v12 = vpop.f32.mrf.mxu1 }
 0x1c3   :  { %1972 = vperm.xlu2 %6024, %v7063_v24  }
 0x1c8   :  { %v7082_v16 = vpop.permute.xlu1 %2198 }
 0x1c9   :  { %v7085_v19 = vpop.permute.xlu0 %2895 }
 0x1ca   :  { %10380 = vst [vmem:[#allocation31_spill] sm:$0xff] %v7085_v19  ;;  %v7087_v14 = vpop.permute.xlu2 %1942  ;;  %2431 = vrot.lane.b32.xlu1 %v2320_v40, %s6234_s24  ;;  %6027 = vset.pattern.permute.xlu0 %v10364_v43  ;;  %v2801_v40 = vmul.f32 %v6966_v10, %v1761_v54  ;;  %v1614_v19 = vmax.f32 %v1518_v0, %v1566_v30  ;;  %v5934_v10 = vld [vmem:[%s10189_s0 + $0x2f0] sm:$0xff] }
 0x1cb   :  { %10381 = vst [vmem:[#allocation32_spill] sm:$0xff] %v7087_v14  ;;  %2911 = vrot.lane.b32.xlu2 %v2800_v28, %s6235_s25  ;;  %1977 = vperm.xlu0 %6027, %v7079_v47   ;;  %v2321_v0 = vmul.f32 %v6889_v63, %v1761_v54  ;;  %v1763_v54 = vld [vmem:[%s10191_s2 + $0x110] sm:$0xff] }
 0x1cc   :  { %6028 = vset.pattern.permute.xlu1 %v10366_v55  ;;  %6029 = vset.pattern.permute.xlu2 %v10361_v1  ;;  %v1664_v46 = vadd.f32 %v6481_v6, %v1614_v19  ;;  %v1519_v19 = vmax.f32 %v1087_v61, %v1207_v12  ;;  %v1209_v61 = vpop.f32.mrf.mxu1 }
 0x1cd   :  { %5838 = vmatmul.msk.bf16.gmra.mxu3 %vm709_vm0, %v5934_v10 }
 0x1ce   :  { %v7115_v30 = vmax.f32 %v1664_v46, 0.0  ;;  %v2322_v46 = vmul.f32 %v6986_v34, %v1763_v54  ;;  %v1329_v34 = vpop.f32.mrf.mxu2 }
 0x1d0   :  { %10384 = vst [vmem:[#allocation35_spill] sm:$0xff] %v7115_v30 }
 0x1d1   :  { %v7099_v2 = vpop.permute.xlu0 %2682  ;;  %v7101_v28 = vpop.permute.xlu1 %1937 }
 0x1d2   :  { %10382 = vst [vmem:[#allocation33_spill] sm:$0xff] %v7101_v28  ;;  %v7103_v14 = vpop.permute.xlu2 %2899  ;;  %2234 = vperm.xlu1 %6028, %v7079_v47   ;;  %v1447_v28 = vpop.f32.mrf.mxu3 }
 0x1d3   :  { %10383 = vst [vmem:[#allocation34_spill] sm:$0xff] %v7103_v14  ;;  %2714 = vperm.xlu2 %6029, %v7079_v47   ;;  %2913 = vrot.lane.b32.xlu0 %v2801_v40, %s6235_s25  ;;  %v1567_v41 = vmax.f32 %v1327_v33, %v1447_v28  ;;  %v2802_v28 = vmul.f32 %v6984_v59, %v1763_v54 }
 0x1d4   :  { %6032 = vset.pattern.permute.xlu0 %v10361_v1 }
 0x1d5   :  { %v1615_v63 = vmax.f32 %v1519_v19, %v1567_v41 }
 0x1d7   :  { %v1665_v12 = vadd.f32 %v6481_v6, %v1615_v63 }
 0x1d9   :  { %v7117_v14 = vpop.permute.xlu0 %2417  ;;  %v7119_v40 = vpop.permute.xlu1 %2897  ;;  %v7145_v59 = vmax.f32 %v1665_v12, 0.0  ;;  %v1765_v12 = vld [vmem:[%s10191_s2 + $0x120] sm:$0xff] }
 0x1da   :  { %10385 = vst [vmem:[#allocation36_spill] sm:$0xff] %v7117_v14  ;;  %v7121_v7 = vpop.permute.xlu2 %2690  ;;  %6030 = vset.pattern.permute.xlu1 %v10364_v43  ;;  %v1449_v41 = vpop.f32.mrf.mxu3 }
 0x1db   :  { %10386 = vst [vmem:[#allocation37_spill] sm:$0xff] %v7119_v40  ;;  %2433 = vrot.lane.b32.xlu2 %v2321_v0, %s6234_s24  ;;  %2718 = vperm.xlu0 %6032, %v7115_v30   ;;  %v1089_v0 = vpop.f32.mrf.mxu0  ;;  %v1568_v54 = vmax.f32 %v1329_v34, %v1449_v41 }
 0x1dc   :  { %1982 = vperm.xlu1 %6030, %v7115_v30   ;;  %6031 = vset.pattern.permute.xlu2 %v10366_v55  ;;  %v1520_v19 = vmax.f32 %v1089_v0, %v1209_v61  ;;  %10388 = vst [vmem:[#allocation39_spill] sm:$0xff] %v7145_v59  ;;  %v1332_v61 = vpop.f32.mrf.mxu2  ;;  %v2803_v0 = vmul.f32 %v6948_v31, %v1765_v12 }
 0x1e1   :  { %v7132_v10 = vpop.permute.xlu1 %2686  ;;  %v7134_v40 = vpop.permute.xlu0 %2206 }
 0x1e2   :  { %v7137_v33 = vpop.permute.xlu2 %2421 }
 0x1e3   :  { %10387 = vst [vmem:[#allocation38_spill] sm:$0xff] %v7137_v33  ;;  %2238 = vperm.xlu2 %6031, %v7115_v30   ;;  %2435 = vrot.lane.b32.xlu0 %v2322_v46, %s6234_s24  ;;  %v1616_v46 = vmax.f32 %v1520_v19, %v1568_v54  ;;  %v2323_v19 = vmul.f32 %v7011_v23, %v1765_v12  ;;  %v1092_v30 = vpop.f32.mrf.mxu0  ;;  %v1767_v23 = vld [vmem:[%s10191_s2 + $0x130] sm:$0xff] }
 0x1e4   :  { %2915 = vrot.lane.b32.xlu1 %v2802_v28, %s6235_s25  ;;  %6034 = vset.pattern.permute.xlu0 %v10366_v55  ;;  %v5935_v28 = vld [vmem:[%s10189_s0 + $0x2f8] sm:$0xff] }
 0x1e5   :  { %6035 = vset.pattern.permute.xlu1 %v10361_v1  ;;  %v1666_v41 = vadd.f32 %v6481_v6, %v1616_v46  ;;  %5839 = vmatmul.msk.bf16.gmra.mxu3 %vm709_vm0, %v5935_v28  ;;  %v1452_v46 = vpop.f32.mrf.mxu3 }
 0x1e6   :  { %v1569_v24 = vmax.f32 %v1332_v61, %v1452_v46 }
 0x1e9   :  { %v7147_v14 = vpop.permute.xlu1 %2419 }
 0x1ea   :  { %10389 = vst [vmem:[#allocation40_spill] sm:$0xff] %v7147_v14  ;;  %v7149_v63 = vpop.permute.xlu2 %2214  ;;  %v7151_v33 = vpop.permute.xlu0 %1947 }
 0x1eb   :  { %10390 = vst [vmem:[#allocation41_spill] sm:$0xff] %v7151_v33  ;;  %6033 = vset.pattern.permute.xlu2 %v10364_v43  ;;  %2242 = vperm.xlu0 %6034, %v7145_v59   ;;  %v1212_v14 = vpop.f32.mrf.mxu1  ;;  %v7171_v33 = vmax.f32 %v1666_v41, 0.0  ;;  %v2804_v41 = vmul.f32 %v7028_v48, %v1767_v23  ;;  %v1094_v61 = vpop.f32.mrf.mxu0  ;;  %v2324_v48 = vmul.f32 %v6975_v56, %v1767_v23  ;;  %v1769_v56 = vld [vmem:[%s10191_s2 + $0x140] sm:$0xff] }
 0x1ec   :  { %2722 = vperm.xlu1 %6035, %v7145_v59   ;;  %1987 = vperm.xlu2 %6033, %v7145_v59   ;;  %v1521_v28 = vmax.f32 %v1092_v30, %v1212_v14 }
 0x1ed   :  { %10392 = vst [vmem:[#allocation43_spill] sm:$0xff] %v7171_v33 }
 0x1ee   :  { %v1617_v31 = vmax.f32 %v1521_v28, %v1569_v24  ;;  %v1334_v24 = vpop.f32.mrf.mxu2  ;;  %v1454_v28 = vpop.f32.mrf.mxu3 }
 0x1f0   :  { %v1667_v14 = vadd.f32 %v6481_v6, %v1617_v31 }
 0x1f1   :  { %v7165_v34 = vpop.permute.xlu1 %2210 }
 0x1f2   :  { %v7169_v54 = vpop.permute.xlu0 %2901  ;;  %v7196_v46 = vmax.f32 %v1667_v14, 0.0 }
 0x1f3   :  { %10391 = vst [vmem:[#allocation42_spill] sm:$0xff] %v7169_v54  ;;  %v7173_v59 = vpop.permute.xlu2 %1957  ;;  %6036 = vset.pattern.permute.xlu0 %v10364_v43  ;;  %v1214_v30 = vpop.f32.mrf.mxu1 }
 0x1f4   :  { %10393 = vst [vmem:[#allocation44_spill] sm:$0xff] %v7173_v59  ;;  %2437 = vrot.lane.b32.xlu1 %v2323_v19, %s6234_s24  ;;  %2917 = vrot.lane.b32.xlu2 %v2803_v0, %s6235_s25  ;;  %v1522_v31 = vmax.f32 %v1094_v61, %v1214_v30  ;;  %v1097_v30 = vpop.f32.mrf.mxu0 }
 0x1f5   :  { %1992 = vperm.xlu0 %6036, %v7171_v33   ;;  %6037 = vset.pattern.permute.xlu1 %v10366_v55  ;;  %10396 = vst [vmem:[#allocation47_spill] sm:$0xff] %v7196_v46 }
 0x1f6   :  { %6038 = vset.pattern.permute.xlu2 %v10361_v1  ;;  %v1457_v14 = vpop.f32.mrf.mxu3  ;;  %v1337_v22 = vpop.f32.mrf.mxu2 }
 0x1fa   :  { %v7184_v12 = vpop.permute.xlu0 %2694 }
 0x1fb   :  { %v7187_v19 = vpop.permute.xlu1 %1952  ;;  %v7189_v0 = vpop.permute.xlu2 %2905 }
 0x1fc   :  { %10394 = vst [vmem:[#allocation45_spill] sm:$0xff] %v7187_v19  ;;  %2726 = vperm.xlu2 %6038, %v7171_v33   ;;  %2246 = vperm.xlu1 %6037, %v7171_v33  }
 0x1fd   :  { %10395 = vst [vmem:[#allocation46_spill] sm:$0xff] %v7189_v0  ;;  %2919 = vrot.lane.b32.xlu0 %v2804_v41, %s6235_s25  ;;  %v1570_v41 = vmax.f32 %v1334_v24, %v1454_v28  ;;  %v1217_v24 = vpop.f32.mrf.mxu1  ;;  %v1571_v28 = vmax.f32 %v1337_v22, %v1457_v14 }
 0x1fe   :  { %6041 = vset.pattern.permute.xlu0 %v10361_v1  ;;  %v1523_v61 = vmax.f32 %v1097_v30, %v1217_v24 }
 0x202   :  { %v7199_v54 = vpop.permute.xlu0 %2423 }
 0x203   :  { %10397 = vst [vmem:[#allocation48_spill] sm:$0xff] %v7199_v54  ;;  %v7201_v0 = vpop.permute.xlu1 %2903  ;;  %v7203_v19 = vpop.permute.xlu2 %2702  ;;  %v1618_v54 = vmax.f32 %v1522_v31, %v1570_v41 }
 0x204   :  { %10398 = vst [vmem:[#allocation49_spill] sm:$0xff] %v7201_v0  ;;  %2439 = vrot.lane.b32.xlu2 %v2324_v48, %s6234_s24  ;;  %6039 = vset.pattern.permute.xlu1 %v10364_v43  ;;  %v2805_v0 = vmul.f32 %v7049_v3, %v1769_v56  ;;  %v2325_v48 = vmul.f32 %v7045_v49, %v1769_v56 }
 0x205   :  { %2730 = vperm.xlu0 %6041, %v7196_v46   ;;  %1997 = vperm.xlu1 %6039, %v7196_v46   ;;  %v1668_v3 = vadd.f32 %v6481_v6, %v1618_v54  ;;  %v1619_v49 = vmax.f32 %v1523_v61, %v1571_v28  ;;  %v1771_v54 = vld [vmem:[%s10191_s2 + $0x150] sm:$0xff]  ;;  %v1459_v28 = vpop.f32.mrf.mxu3 }
 0x206   :  { %6040 = vset.pattern.permute.xlu2 %v10366_v55  ;;  %v2326_v14 = vmul.f32 %v7082_v16, %v1771_v54  ;;  %v2806_v30 = vmul.f32 %v7033_v50, %v1771_v54  ;;  %v1099_v16 = vpop.f32.mrf.mxu0 }
 0x207   :  { %v7227_v31 = vmax.f32 %v1668_v3, 0.0  ;;  %v1669_v22 = vadd.f32 %v6481_v6, %v1619_v49  ;;  %v1339_v49 = vpop.f32.mrf.mxu2 }
 0x208   :  { %v1572_v54 = vmax.f32 %v1339_v49, %v1459_v28 }
 0x209   :  { %10400 = vst [vmem:[#allocation51_spill] sm:$0xff] %v7227_v31 }
 0x20a   :  { %v7213_v23 = vpop.permute.xlu0 %2218 }
 0x20b   :  { %v7217_v59 = vpop.permute.xlu1 %2698  ;;  %v7219_v33 = vpop.permute.xlu2 %2427 }
 0x20c   :  { %10399 = vst [vmem:[#allocation50_spill] sm:$0xff] %v7219_v33  ;;  %2250 = vperm.xlu2 %6040, %v7196_v46  }
 0x20d   :  { %2441 = vrot.lane.b32.xlu0 %v2325_v48, %s6234_s24  ;;  %2921 = vrot.lane.b32.xlu1 %v2805_v0, %s6235_s25  ;;  %v7243_v0 = vmax.f32 %v1669_v22, 0.0  ;;  %v1219_v22 = vpop.f32.mrf.mxu1 }
 0x20e   :  { %6043 = vset.pattern.permute.xlu0 %v10366_v55  ;;  %6044 = vset.pattern.permute.xlu1 %v10361_v1  ;;  %v1524_v50 = vmax.f32 %v1099_v16, %v1219_v22 }
 0x20f   :  { %10403 = vst [vmem:[#allocation54_spill] sm:$0xff] %v7243_v0  ;;  %v1342_v22 = vpop.f32.mrf.mxu2 }
 0x213   :  { %v7229_v41 = vpop.permute.xlu1 %2425  ;;  %v7231_v56 = vpop.permute.xlu2 %2226 }
 0x214   :  { %10401 = vst [vmem:[#allocation52_spill] sm:$0xff] %v7229_v41  ;;  %6042 = vset.pattern.permute.xlu2 %v10364_v43  ;;  %v7234_v48 = vpop.permute.xlu0 %1962  ;;  %v1773_v41 = vld [vmem:[%s10191_s2 + $0x160] sm:$0xff] }
 0x215   :  { %10402 = vst [vmem:[#allocation53_spill] sm:$0xff] %v7234_v48  ;;  %2734 = vperm.xlu1 %6044, %v7227_v31   ;;  %2254 = vperm.xlu0 %6043, %v7227_v31   ;;  %v1222_v49 = vpop.f32.mrf.mxu1  ;;  %v2327_v16 = vmul.f32 %v7067_v8, %v1773_v41 }
 0x216   :  { %2002 = vperm.xlu2 %6042, %v7227_v31  }
 0x21b   :  { %v7246_v24 = vpop.permute.xlu1 %2222 }
 0x21c   :  { %v7249_v61 = vpop.permute.xlu0 %2907 }
 0x21d   :  { %10404 = vst [vmem:[#allocation55_spill] sm:$0xff] %v7249_v61  ;;  %v7251_v3 = vpop.permute.xlu2 %1972  ;;  %2443 = vrot.lane.b32.xlu1 %v2326_v14, %s6234_s24  ;;  %6045 = vset.pattern.permute.xlu0 %v10364_v43  ;;  %v2807_v14 = vmul.f32 %v7099_v2, %v1773_v41  ;;  %v1102_v2 = vpop.f32.mrf.mxu0 }
 0x21e   :  { %10405 = vst [vmem:[#allocation56_spill] sm:$0xff] %v7251_v3  ;;  %2923 = vrot.lane.b32.xlu2 %v2806_v30, %s6235_s25  ;;  %2007 = vperm.xlu0 %6045, %v7243_v0   ;;  %v1620_v3 = vmax.f32 %v1524_v50, %v1572_v54  ;;  %v1224_v41 = vpop.f32.mrf.mxu1 }
 0x21f   :  { %6046 = vset.pattern.permute.xlu1 %v10366_v55  ;;  %6047 = vset.pattern.permute.xlu2 %v10361_v1 }
 0x220   :  { %v1670_v28 = vadd.f32 %v6481_v6, %v1620_v3  ;;  %v1344_v3 = vpop.f32.mrf.mxu2 }
 0x222   :  { %v7275_v50 = vmax.f32 %v1670_v28, 0.0  ;;  %v1775_v28 = vld [vmem:[%s10191_s2 + $0x170] sm:$0xff] }
 0x224   :  { %v7263_v61 = vpop.permute.xlu0 %2706  ;;  %v7265_v30 = vpop.permute.xlu1 %1967  ;;  %10408 = vst [vmem:[#allocation59_spill] sm:$0xff] %v7275_v50 }
 0x225   :  { %10406 = vst [vmem:[#allocation57_spill] sm:$0xff] %v7265_v30  ;;  %v7267_v48 = vpop.permute.xlu2 %2911  ;;  %2258 = vperm.xlu1 %6046, %v7243_v0   ;;  %v1462_v30 = vpop.f32.mrf.mxu3 }
 0x226   :  { %10407 = vst [vmem:[#allocation58_spill] sm:$0xff] %v7267_v48  ;;  %2738 = vperm.xlu2 %6047, %v7243_v0   ;;  %2925 = vrot.lane.b32.xlu0 %v2807_v14, %s6235_s25  ;;  %v1525_v14 = vmax.f32 %v1102_v2, %v1222_v49  ;;  %v1573_v31 = vmax.f32 %v1342_v22, %v1462_v30 }
 0x227   :  { %6050 = vset.pattern.permute.xlu0 %v10361_v1  ;;  %v2808_v49 = vmul.f32 %v7132_v10, %v1775_v28 }
 0x228   :  { %v1621_v8 = vmax.f32 %v1525_v14, %v1573_v31 }
 0x22a   :  { %v1671_v2 = vadd.f32 %v6481_v6, %v1621_v8 }
 0x22c   :  { %v7277_v54 = vpop.permute.xlu0 %2429  ;;  %v7279_v48 = vpop.permute.xlu1 %2909  ;;  %v7305_v14 = vmax.f32 %v1671_v2, 0.0 }
 0x22d   :  { %10409 = vst [vmem:[#allocation60_spill] sm:$0xff] %v7277_v54  ;;  %v7281_v33 = vpop.permute.xlu2 %2714  ;;  %6048 = vset.pattern.permute.xlu1 %v10364_v43  ;;  %v1464_v31 = vpop.f32.mrf.mxu3 }
 0x22e   :  { %10410 = vst [vmem:[#allocation61_spill] sm:$0xff] %v7279_v48  ;;  %2445 = vrot.lane.b32.xlu2 %v2327_v16, %s6234_s24  ;;  %2742 = vperm.xlu0 %6050, %v7275_v50   ;;  %v2328_v48 = vmul.f32 %v7134_v40, %v1775_v28  ;;  %v1104_v40 = vpop.f32.mrf.mxu0  ;;  %v1574_v10 = vmax.f32 %v1344_v3, %v1464_v31 }
 0x22f   :  { %2012 = vperm.xlu1 %6048, %v7275_v50   ;;  %6049 = vset.pattern.permute.xlu2 %v10366_v55  ;;  %v1526_v16 = vmax.f32 %v1104_v40, %v1224_v41  ;;  %10412 = vst [vmem:[#allocation63_spill] sm:$0xff] %v7305_v14  ;;  %v1777_v41 = vld [vmem:[%s10191_s2 + $0x180] sm:$0xff] }
 0x230   :  { %v2809_v2 = vmul.f32 %v7121_v7, %v1777_v41  ;;  %v2329_v31 = vmul.f32 %v7165_v34, %v1777_v41  ;;  %v1779_v41 = vld [vmem:[%s10191_s2 + $0x190] sm:$0xff] }
 0x231   :  { %v1622_v46 = vmax.f32 %v1526_v16, %v1574_v10 }
 0x233   :  { %v1672_v3 = vadd.f32 %v6481_v6, %v1622_v46 }
 0x234   :  { %v7292_v54 = vpop.permute.xlu1 %2710  ;;  %v7294_v30 = vpop.permute.xlu0 %2230 }
 0x235   :  { %v7297_v22 = vpop.permute.xlu2 %2433  ;;  %v7327_v16 = vmax.f32 %v1672_v3, 0.0 }
 0x236   :  { %10411 = vst [vmem:[#allocation62_spill] sm:$0xff] %v7297_v22  ;;  %2262 = vperm.xlu2 %6049, %v7275_v50   ;;  %2447 = vrot.lane.b32.xlu0 %v2328_v48, %s6234_s24  ;;  %v1227_v50 = vpop.f32.mrf.mxu1  ;;  %v1347_v48 = vpop.f32.mrf.mxu2 }
 0x237   :  { %2927 = vrot.lane.b32.xlu1 %v2808_v49, %s6235_s25  ;;  %6052 = vset.pattern.permute.xlu0 %v10366_v55  ;;  %10416 = vst [vmem:[#allocation67_spill] sm:$0xff] %v7327_v16 }
 0x238   :  { %6053 = vset.pattern.permute.xlu1 %v10361_v1 }
 0x23c   :  { %v7307_v28 = vpop.permute.xlu1 %2431 }
 0x23d   :  { %10413 = vst [vmem:[#allocation64_spill] sm:$0xff] %v7307_v28  ;;  %v7309_v22 = vpop.permute.xlu2 %2238  ;;  %v7311_v8 = vpop.permute.xlu0 %1977 }
 0x23e   :  { %10414 = vst [vmem:[#allocation65_spill] sm:$0xff] %v7311_v8  ;;  %6051 = vset.pattern.permute.xlu2 %v10364_v43  ;;  %2266 = vperm.xlu0 %6052, %v7305_v14   ;;  %v1107_v8 = vpop.f32.mrf.mxu0  ;;  %v1467_v28 = vpop.f32.mrf.mxu3 }
 0x23f   :  { %2746 = vperm.xlu1 %6053, %v7305_v14   ;;  %2017 = vperm.xlu2 %6051, %v7305_v14   ;;  %v1229_v46 = vpop.f32.mrf.mxu1  ;;  %v1349_v14 = vpop.f32.mrf.mxu2  ;;  %v1527_v0 = vmax.f32 %v1107_v8, %v1227_v50  ;;  %v1575_v7 = vmax.f32 %v1347_v48, %v1467_v28 }
 0x241   :  { %v1623_v34 = vmax.f32 %v1527_v0, %v1575_v7 }
 0x243   :  { %v1673_v50 = vadd.f32 %v6481_v6, %v1623_v34 }
 0x244   :  { %v7321_v49 = vpop.permute.xlu1 %2234 }
 0x245   :  { %v7325_v40 = vpop.permute.xlu0 %2913  ;;  %v7352_v48 = vmax.f32 %v1673_v50, 0.0  ;;  %v1781_v50 = vld [vmem:[%s10191_s2 + $0x1a0] sm:$0xff] }
 0x246   :  { %10415 = vst [vmem:[#allocation66_spill] sm:$0xff] %v7325_v40  ;;  %v7329_v10 = vpop.permute.xlu2 %1987  ;;  %6054 = vset.pattern.permute.xlu0 %v10364_v43  ;;  %v1109_v8 = vpop.f32.mrf.mxu0 }
 0x247   :  { %10417 = vst [vmem:[#allocation68_spill] sm:$0xff] %v7329_v10  ;;  %2449 = vrot.lane.b32.xlu1 %v2329_v31, %s6234_s24  ;;  %2929 = vrot.lane.b32.xlu2 %v2809_v2, %s6235_s25  ;;  %v2810_v31 = vmul.f32 %v7184_v12, %v1779_v41  ;;  %v1232_v0 = vpop.f32.mrf.mxu1  ;;  %v1352_v28 = vpop.f32.mrf.mxu2  ;;  %v2330_v12 = vmul.f32 %v7149_v63, %v1779_v41 }
 0x248   :  { %2022 = vperm.xlu0 %6054, %v7327_v16   ;;  %6055 = vset.pattern.permute.xlu1 %v10366_v55  ;;  %10420 = vst [vmem:[#allocation71_spill] sm:$0xff] %v7352_v48  ;;  %v1469_v7 = vpop.f32.mrf.mxu3  ;;  %v1528_v34 = vmax.f32 %v1109_v8, %v1229_v46 }
 0x249   :  { %6056 = vset.pattern.permute.xlu2 %v10361_v1 }
 0x24d   :  { %v7340_v3 = vpop.permute.xlu0 %2718 }
 0x24e   :  { %v7343_v2 = vpop.permute.xlu1 %1982  ;;  %v7345_v10 = vpop.permute.xlu2 %2917 }
 0x24f   :  { %10418 = vst [vmem:[#allocation69_spill] sm:$0xff] %v7343_v2  ;;  %2750 = vperm.xlu2 %6056, %v7327_v16   ;;  %2270 = vperm.xlu1 %6055, %v7327_v16   ;;  %v1234_v63 = vpop.f32.mrf.mxu1  ;;  %v1354_v41 = vpop.f32.mrf.mxu2  ;;  %v2331_v16 = vmul.f32 %v7213_v23, %v1781_v50 }
 0x250   :  { %10419 = vst [vmem:[#allocation70_spill] sm:$0xff] %v7345_v10  ;;  %2931 = vrot.lane.b32.xlu0 %v2810_v31, %s6235_s25  ;;  %v1576_v31 = vmax.f32 %v1349_v14, %v1469_v7  ;;  %v1112_v14 = vpop.f32.mrf.mxu0 }
 0x251   :  { %6059 = vset.pattern.permute.xlu0 %v10361_v1  ;;  %v1529_v46 = vmax.f32 %v1112_v14, %v1232_v0 }
 0x252   :  { %v1624_v18 = vmax.f32 %v1528_v34, %v1576_v31 }
 0x255   :  { %v7355_v40 = vpop.permute.xlu0 %2435 }
 0x256   :  { %10421 = vst [vmem:[#allocation72_spill] sm:$0xff] %v7355_v40  ;;  %v7357_v10 = vpop.permute.xlu1 %2915  ;;  %v7359_v2 = vpop.permute.xlu2 %2726 }
 0x257   :  { %10422 = vst [vmem:[#allocation73_spill] sm:$0xff] %v7357_v10  ;;  %2451 = vrot.lane.b32.xlu2 %v2330_v12, %s6234_s24  ;;  %6057 = vset.pattern.permute.xlu1 %v10364_v43  ;;  %v1472_v40 = vpop.f32.mrf.mxu3  ;;  %v2811_v12 = vmul.f32 %v7217_v59, %v1781_v50  ;;  %v1674_v59 = vadd.f32 %v6481_v6, %v1624_v18  ;;  %v1237_v50 = vpop.f32.mrf.mxu1  ;;  %v1783_v18 = vld [vmem:[%s10191_s2 + $0x1b0] sm:$0xff] }
 0x258   :  { %2754 = vperm.xlu0 %6059, %v7352_v48   ;;  %2027 = vperm.xlu1 %6057, %v7352_v48   ;;  %v1577_v8 = vmax.f32 %v1352_v28, %v1472_v40  ;;  %v1357_v0 = vpop.f32.mrf.mxu2 }
 0x259   :  { %6058 = vset.pattern.permute.xlu2 %v10366_v55  ;;  %v7383_v7 = vmax.f32 %v1674_v59, 0.0 }
 0x25a   :  { %v1625_v23 = vmax.f32 %v1529_v46, %v1577_v8  ;;  %v2812_v46 = vmul.f32 %v7203_v19, %v1783_v18 }
 0x25b   :  { %10424 = vst [vmem:[#allocation75_spill] sm:$0xff] %v7383_v7 }
 0x25c   :  { %v1675_v40 = vadd.f32 %v6481_v6, %v1625_v23 }
 0x25d   :  { %v7369_v10 = vpop.permute.xlu0 %2242 }
 0x25e   :  { %v7373_v47 = vpop.permute.xlu1 %2722  ;;  %v7375_v25 = vpop.permute.xlu2 %2439  ;;  %v7399_v28 = vmax.f32 %v1675_v40, 0.0 }
 0x25f   :  { %10423 = vst [vmem:[#allocation74_spill] sm:$0xff] %v7375_v25  ;;  %2274 = vperm.xlu2 %6058, %v7352_v48   ;;  %v1474_v59 = vpop.f32.mrf.mxu3  ;;  %v1239_v23 = vpop.f32.mrf.mxu1 }
 0x260   :  { %2453 = vrot.lane.b32.xlu0 %v2331_v16, %s6234_s24  ;;  %2933 = vrot.lane.b32.xlu1 %v2811_v12, %s6235_s25  ;;  %10427 = vst [vmem:[#allocation78_spill] sm:$0xff] %v7399_v28  ;;  %v2332_v12 = vmul.f32 %v7246_v24, %v1783_v18  ;;  %v1359_v40 = vpop.f32.mrf.mxu2  ;;  %v1114_v24 = vpop.f32.mrf.mxu0  ;;  %v1578_v18 = vmax.f32 %v1354_v41, %v1474_v59 }
 0x261   :  { %6061 = vset.pattern.permute.xlu0 %v10366_v55  ;;  %6062 = vset.pattern.permute.xlu1 %v10361_v1  ;;  %v1530_v19 = vmax.f32 %v1114_v24, %v1234_v63 }
 0x266   :  { %v7385_v34 = vpop.permute.xlu1 %2437  ;;  %v7387_v31 = vpop.permute.xlu2 %2250 }
 0x267   :  { %10425 = vst [vmem:[#allocation76_spill] sm:$0xff] %v7385_v34  ;;  %6060 = vset.pattern.permute.xlu2 %v10364_v43  ;;  %v7390_v16 = vpop.permute.xlu0 %1992  ;;  %v1626_v34 = vmax.f32 %v1530_v19, %v1578_v18  ;;  %v7430_v41 = vpop.f32.mrf.mxu1 }
 0x268   :  { %10426 = vst [vmem:[#allocation77_spill] sm:$0xff] %v7390_v16  ;;  %2758 = vperm.xlu1 %6062, %v7383_v7   ;;  %2278 = vperm.xlu0 %6061, %v7383_v7   ;;  %v1117_v59 = vpop.f32.mrf.mxu0 }
 0x269   :  { %2032 = vperm.xlu2 %6060, %v7383_v7   ;;  %v1676_v63 = vadd.f32 %v6481_v6, %v1626_v34 }
 0x26b   :  { %v7435_v19 = vmax.f32 %v1676_v63, 0.0 }
 0x26d   :  { %10432 = vst [vmem:[#allocation83_spill] sm:$0xff] %v7435_v19 }
 0x26e   :  { %v7402_v14 = vpop.permute.xlu1 %2246 }
 0x26f   :  { %v7405_v8 = vpop.permute.xlu0 %2919 }
 0x270   :  { %10428 = vst [vmem:[#allocation79_spill] sm:$0xff] %v7405_v8  ;;  %v7407_v16 = vpop.permute.xlu2 %2002  ;;  %2455 = vrot.lane.b32.xlu1 %v2332_v12, %s6234_s24  ;;  %6063 = vset.pattern.permute.xlu0 %v10364_v43 }
 0x271   :  { %10429 = vst [vmem:[#allocation80_spill] sm:$0xff] %v7407_v16  ;;  %2935 = vrot.lane.b32.xlu2 %v2812_v46, %s6235_s25  ;;  %2037 = vperm.xlu0 %6063, %v7399_v28   ;;  %v1785_v16 = vld [vmem:[%s10191_s2 + $0x1c0] sm:$0xff] }
 0x272   :  { %6064 = vset.pattern.permute.xlu1 %v10366_v55  ;;  %6065 = vset.pattern.permute.xlu2 %v10361_v1  ;;  %v2813_v12 = vmul.f32 %v7263_v61, %v1785_v16  ;;  %v7432_v61 = vpop.f32.mrf.mxu2  ;;  %v2333_v24 = vmul.f32 %v7231_v56, %v1785_v16  ;;  %v7448_v16 = vpop.f32.mrf.mxu1 }
 0x277   :  { %v7419_v8 = vpop.permute.xlu0 %2730  ;;  %v7421_v46 = vpop.permute.xlu1 %1997 }
 0x278   :  { %10430 = vst [vmem:[#allocation81_spill] sm:$0xff] %v7421_v46  ;;  %v7423_v25 = vpop.permute.xlu2 %2923  ;;  %2282 = vperm.xlu1 %6064, %v7399_v28  }
 0x279   :  { %10431 = vst [vmem:[#allocation82_spill] sm:$0xff] %v7423_v25  ;;  %2762 = vperm.xlu2 %6065, %v7399_v28   ;;  %2937 = vrot.lane.b32.xlu0 %v2813_v12, %s6235_s25  ;;  %v1477_v25 = vpop.f32.mrf.mxu3  ;;  %v1531_v12 = vmax.f32 %v1117_v59, %v1237_v50 }
 0x27a   :  { %6068 = vset.pattern.permute.xlu0 %v10361_v1  ;;  %v1579_v34 = vmax.f32 %v1357_v0, %v1477_v25  ;;  %v7450_v63 = vpop.f32.mrf.mxu2 }
 0x27c   :  { %v1627_v56 = vmax.f32 %v1531_v12, %v1579_v34 }
 0x27e   :  { %v1677_v12 = vadd.f32 %v6481_v6, %v1627_v56 }
 0x27f   :  { %v7437_v18 = vpop.permute.xlu0 %2441  ;;  %v7439_v46 = vpop.permute.xlu1 %2921 }
 0x280   :  { %10433 = vst [vmem:[#allocation84_spill] sm:$0xff] %v7437_v18  ;;  %v7441_v7 = vpop.permute.xlu2 %2738  ;;  %6066 = vset.pattern.permute.xlu1 %v10364_v43  ;;  %v7469_v48 = vmax.f32 %v1677_v12, 0.0 }
 0x281   :  { %10434 = vst [vmem:[#allocation85_spill] sm:$0xff] %v7439_v46  ;;  %2457 = vrot.lane.b32.xlu2 %v2333_v24, %s6234_s24  ;;  %2766 = vperm.xlu0 %6068, %v7435_v19   ;;  %v1787_v46 = vld [vmem:[%s10191_s2 + $0x1d0] sm:$0xff]  ;;  %v1479_v34 = vpop.f32.mrf.mxu3 }
 0x282   :  { %2042 = vperm.xlu1 %6066, %v7435_v19   ;;  %6067 = vset.pattern.permute.xlu2 %v10366_v55  ;;  %v2334_v50 = vmul.f32 %v7294_v30, %v1787_v46  ;;  %v2814_v59 = vmul.f32 %v7292_v54, %v1787_v46  ;;  %v1119_v30 = vpop.f32.mrf.mxu0  ;;  %10436 = vst [vmem:[#allocation87_spill] sm:$0xff] %v7469_v48 }
 0x283   :  { %v1532_v18 = vmax.f32 %v1119_v30, %v1239_v23  ;;  %v1580_v54 = vmax.f32 %v1359_v40, %v1479_v34  ;;  %v7488_v23 = vld [vmem:[%s10191_s2 + $0x1e0] sm:$0xff] }
 0x284   :  { %10439 = vst [vmem:[#allocation90_spill] sm:$0xff] %v7488_v23  ;;  %v2335_v34 = vmul.f32 %v7321_v49, %v7488_v23 }
 0x287   :  { %v7456_v25 = vpop.permute.xlu1 %2734  ;;  %v7458_v0 = vpop.permute.xlu0 %2254 }
 0x288   :  { %v7461_v24 = vpop.permute.xlu2 %2445 }
 0x289   :  { %10435 = vst [vmem:[#allocation86_spill] sm:$0xff] %v7461_v24  ;;  %2286 = vperm.xlu2 %6067, %v7435_v19   ;;  %2459 = vrot.lane.b32.xlu0 %v2334_v50, %s6234_s24  ;;  %v7477_v19 = vpop.f32.mrf.mxu1  ;;  %v7479_v50 = vpop.f32.mrf.mxu2 }
 0x28a   :  { %2939 = vrot.lane.b32.xlu1 %v2814_v59, %s6235_s25  ;;  %6070 = vset.pattern.permute.xlu0 %v10366_v55  ;;  %v1628_v59 = vmax.f32 %v1532_v18, %v1580_v54  ;;  %v2815_v18 = vmul.f32 %v7281_v33, %v7488_v23  ;;  %v1122_v33 = vpop.f32.mrf.mxu0  ;;  %v1482_v49 = vpop.f32.mrf.mxu3 }
 0x28b   :  { %6071 = vset.pattern.permute.xlu1 %v10361_v1 }
 0x28c   :  { %v1678_v40 = vadd.f32 %v6481_v6, %v1628_v59 }
 0x28e   :  { %v7499_v54 = vmax.f32 %v1678_v40, 0.0  ;;  %v1533_v40 = vmax.f32 %v1122_v33, %v7430_v41 }
 0x28f   :  { %v7471_v46 = vpop.permute.xlu1 %2443 }
 0x290   :  { %10437 = vst [vmem:[#allocation88_spill] sm:$0xff] %v7471_v46  ;;  %v7473_v24 = vpop.permute.xlu2 %2262  ;;  %v7475_v56 = vpop.permute.xlu0 %2007 }
 0x291   :  { %10438 = vst [vmem:[#allocation89_spill] sm:$0xff] %v7475_v56  ;;  %6069 = vset.pattern.permute.xlu2 %v10364_v43  ;;  %2290 = vperm.xlu0 %6070, %v7469_v48   ;;  %v7506_v59 = vpop.f32.mrf.mxu1  ;;  %v7508_v46 = vpop.f32.mrf.mxu2 }
 0x292   :  { %2770 = vperm.xlu1 %6071, %v7469_v48   ;;  %2047 = vperm.xlu2 %6069, %v7469_v48   ;;  %10441 = vst [vmem:[#allocation92_spill] sm:$0xff] %v7499_v54 }
 0x297   :  { %v7491_v12 = vpop.permute.xlu1 %2258 }
 0x298   :  { %v7497_v30 = vpop.permute.xlu0 %2925 }
 0x299   :  { %10440 = vst [vmem:[#allocation91_spill] sm:$0xff] %v7497_v30  ;;  %v7501_v56 = vpop.permute.xlu2 %2017  ;;  %6072 = vset.pattern.permute.xlu0 %v10364_v43  ;;  %v7532_v41 = vpop.f32.mrf.mxu2 }
 0x29a   :  { %10442 = vst [vmem:[#allocation93_spill] sm:$0xff] %v7501_v56  ;;  %2461 = vrot.lane.b32.xlu1 %v2335_v34, %s6234_s24  ;;  %2941 = vrot.lane.b32.xlu2 %v2815_v18, %s6235_s25  ;;  %v1581_v56 = vmax.f32 %v7432_v61, %v1482_v49  ;;  %v7518_v18 = vld [vmem:[%s10191_s2 + $0x1f0] sm:$0xff]  ;;  %v7535_v33 = vpop.f32.mrf.mxu1 }
 0x29b   :  { %2052 = vperm.xlu0 %6072, %v7499_v54   ;;  %6073 = vset.pattern.permute.xlu1 %v10366_v55  ;;  %10443 = vst [vmem:[#allocation94_spill] sm:$0xff] %v7518_v18  ;;  %v2816_v30 = vmul.f32 %v7340_v3, %v7518_v18  ;;  %v1124_v3 = vpop.f32.mrf.mxu0 }
 0x29c   :  { %6074 = vset.pattern.permute.xlu2 %v10361_v1  ;;  %v1629_v23 = vmax.f32 %v1533_v40, %v1581_v56  ;;  %v2336_v56 = vmul.f32 %v7309_v22, %v7518_v18  ;;  %v1534_v22 = vmax.f32 %v1124_v3, %v7448_v16 }
 0x29e   :  { %v1679_v61 = vadd.f32 %v6481_v6, %v1629_v23 }
 0x2a0   :  { %v7520_v34 = vpop.permute.xlu0 %2742  ;;  %v7541_v40 = vmax.f32 %v1679_v61, 0.0 }
 0x2a1   :  { %v7524_v48 = vpop.permute.xlu1 %2012  ;;  %v7526_v28 = vpop.permute.xlu2 %2929 }
 0x2a2   :  { %10444 = vst [vmem:[#allocation95_spill] sm:$0xff] %v7524_v48  ;;  %2774 = vperm.xlu2 %6074, %v7499_v54   ;;  %2294 = vperm.xlu1 %6073, %v7499_v54   ;;  %v7554_v61 = vpop.f32.mrf.mxu2 }
 0x2a3   :  { %10445 = vst [vmem:[#allocation96_spill] sm:$0xff] %v7526_v28  ;;  %2943 = vrot.lane.b32.xlu0 %v2816_v30, %s6235_s25  ;;  %v1484_v30 = vpop.f32.mrf.mxu3 }
 0x2a4   :  { %6077 = vset.pattern.permute.xlu0 %v10361_v1  ;;  %10447 = vst [vmem:[#allocation98_spill] sm:$0xff] %v7541_v40  ;;  %v1582_v23 = vmax.f32 %v7450_v63, %v1484_v30  ;;  %v1127_v30 = vpop.f32.mrf.mxu0 }
 0x2a6   :  { %v1630_v16 = vmax.f32 %v1534_v22, %v1582_v23  ;;  %v1487_v22 = vmax.f32 %v6408_v35, %v1127_v30 }
 0x2a8   :  { %v7539_v49 = vpop.permute.xlu0 %2447 }
 0x2a9   :  { %10446 = vst [vmem:[#allocation97_spill] sm:$0xff] %v7539_v49  ;;  %v7543_v48 = vpop.permute.xlu1 %2927  ;;  %v7545_v28 = vpop.permute.xlu2 %2750 }
 0x2aa   :  { %10448 = vst [vmem:[#allocation99_spill] sm:$0xff] %v7543_v48  ;;  %2463 = vrot.lane.b32.xlu2 %v2336_v56, %s6234_s24  ;;  %6075 = vset.pattern.permute.xlu1 %v10364_v43  ;;  %v7556_v48 = vpop.f32.mrf.mxu1  ;;  %v7561_v56 = vld [vmem:[%s10191_s2 + $0x200] sm:$0xff]  ;;  %v1377_v27 = vpop.f32.mrf.mxu2 }
 0x2ab   :  { %2778 = vperm.xlu0 %6077, %v7541_v40   ;;  %2057 = vperm.xlu1 %6075, %v7541_v40   ;;  %10449 = vst [vmem:[#allocation100_spill] sm:$0xff] %v7561_v56  ;;  %v2817_v18 = vmul.f32 %v7373_v47, %v7561_v56  ;;  %v2337_v54 = vmul.f32 %v7369_v10, %v7561_v56 }
 0x2ac   :  { %6076 = vset.pattern.permute.xlu2 %v10366_v55  ;;  %v1680_v47 = vadd.f32 %v6481_v6, %v1630_v16  ;;  %v1535_v10 = vmax.f32 %v7477_v19, %v7479_v50  ;;  %v7598_v50 = vld [vmem:[%s10191_s2 + $0x210] sm:$0xff] }
 0x2ad   :  { %v2338_v16 = vmul.f32 %v7402_v14, %v7598_v50 }
 0x2ae   :  { %v7582_v23 = vmax.f32 %v1680_v47, 0.0 }
 0x2b0   :  { %v7563_v49 = vpop.permute.xlu0 %2266  ;;  %10451 = vst [vmem:[#allocation102_spill] sm:$0xff] %v7582_v23 }
 0x2b1   :  { %v7569_v3 = vpop.permute.xlu1 %2746  ;;  %v7571_v63 = vpop.permute.xlu2 %2451 }
 0x2b2   :  { %10450 = vst [vmem:[#allocation101_spill] sm:$0xff] %v7571_v63  ;;  %2298 = vperm.xlu2 %6076, %v7541_v40   ;;  %v1257_v40 = vpop.f32.mrf.mxu1 }
 0x2b3   :  { %2465 = vrot.lane.b32.xlu0 %v2337_v54, %s6234_s24  ;;  %2945 = vrot.lane.b32.xlu1 %v2817_v18, %s6235_s25  ;;  %v1583_v54 = vmax.f32 %v1487_v22, %v1535_v10  ;;  %v1539_v19 = vmax.f32 %v1257_v40, %v1377_v27  ;;  %v10454_v10 = vmax.f32 %v6455_v53, %v6422_v39  ;;  %v1129_v40 = vpop.f32.mrf.mxu0 }
 0x2b4   :  { %6079 = vset.pattern.permute.xlu0 %v10366_v55  ;;  %6080 = vset.pattern.permute.xlu1 %v10361_v1  ;;  %v1536_v39 = vmax.f32 %v7506_v59, %v7508_v46 }
 0x2b5   :  { %v1633_v35 = vadd.f32 %v6481_v6, %v1583_v54  ;;  %v1587_v22 = vmax.f32 %v10454_v10, %v1539_v19  ;;  %v2818_v54 = vmul.f32 %v7359_v2, %v7598_v50  ;;  %v1488_v2 = vmax.f32 %v6420_v38, %v1129_v40 }
 0x2b7   :  { %v7604_v47 = vmax.f32 %v1633_v35, 0.0  ;;  %v1637_v53 = vadd.f32 %v6481_v6, %v1587_v22  ;;  %v1584_v35 = vmax.f32 %v1488_v2, %v1536_v39  ;;  %v7641_v22 = vld [vmem:[%s10191_s2 + $0x220] sm:$0xff] }
 0x2b9   :  { %v7584_v63 = vpop.permute.xlu1 %2449  ;;  %v7586_v56 = vpop.permute.xlu2 %2274  ;;  %v7623_v14 = vmax.f32 %v1637_v53, 0.0  ;;  %v1634_v38 = vadd.f32 %v6481_v6, %v1584_v35  ;;  %v10462_v53 = vmax.f32 %v6465_v58, %v6438_v44 }
 0x2ba   :  { %10452 = vst [vmem:[#allocation103_spill] sm:$0xff] %v7584_v63  ;;  %6078 = vset.pattern.permute.xlu2 %v10364_v43  ;;  %v7589_v18 = vpop.permute.xlu0 %2022 }
 0x2bb   :  { %10453 = vst [vmem:[#allocation104_spill] sm:$0xff] %v7589_v18  ;;  %2782 = vperm.xlu1 %6080, %v7582_v23   ;;  %2302 = vperm.xlu0 %6079, %v7582_v23   ;;  %v7636_v59 = vmax.f32 %v1634_v38, 0.0  ;;  %v1132_v38 = vpop.f32.mrf.mxu0 }
 0x2bc   :  { %2062 = vperm.xlu2 %6078, %v7582_v23  }
 0x2bd   :  { %10459 = vst [vmem:[#allocation109_spill] sm:$0xff] %v7636_v59 }
 0x2c1   :  { %v7602_v30 = vpop.permute.xlu1 %2270 }
 0x2c2   :  { %v7611_v27 = vpop.permute.xlu0 %2931 }
 0x2c3   :  { %10455 = vst [vmem:[#allocation105_spill] sm:$0xff] %v7611_v27  ;;  %v7613_v18 = vpop.permute.xlu2 %2032  ;;  %2467 = vrot.lane.b32.xlu1 %v2338_v16, %s6234_s24  ;;  %6081 = vset.pattern.permute.xlu0 %v10364_v43 }
 0x2c4   :  { %10456 = vst [vmem:[#allocation106_spill] sm:$0xff] %v7613_v18  ;;  %2947 = vrot.lane.b32.xlu2 %v2818_v54, %s6235_s25  ;;  %1827 = vperm.xlu0 %6081, %v7604_v47   ;;  %v1259_v54 = vpop.f32.mrf.mxu1  ;;  %v1379_v18 = vpop.f32.mrf.mxu2 }
 0x2c5   :  { %v1540_v46 = vmax.f32 %v1259_v54, %v1379_v18 }
 0x2c7   :  { %v1588_v2 = vmax.f32 %v10462_v53, %v1540_v46  ;;  %v1489_v46 = vmax.f32 %v6430_v42, %v1132_v38  ;;  %v7680_v53 = vld [vmem:[%s10191_s2 + $0x230] sm:$0xff] }
 0x2c9   :  { %v1638_v44 = vadd.f32 %v6481_v6, %v1588_v2 }
 0x2ca   :  { %v7625_v19 = vpop.permute.xlu0 %2754  ;;  %v7627_v10 = vpop.permute.xlu1 %2027 }
 0x2cb   :  { %10457 = vst [vmem:[#allocation107_spill] sm:$0xff] %v7627_v10  ;;  %v7629_v16 = vpop.permute.xlu2 %2935  ;;  %2594 = vperm.xlu1 %6080, %v7604_v47   ;;  %v2819_v10 = vmul.f32 %v7419_v8, %v7641_v22  ;;  %v7665_v8 = vmax.f32 %v1638_v44, 0.0 }
 0x2cc   :  { %10458 = vst [vmem:[#allocation108_spill] sm:$0xff] %v7629_v16  ;;  %1847 = vperm.xlu2 %6078, %v7623_v14   ;;  %6082 = vset.pattern.permute.xlu0 %v10366_v55  ;;  %v2820_v16 = vmul.f32 %v7456_v25, %v7680_v53 }
 0x2cd   :  { %2114 = vperm.xlu0 %6082, %v7604_v47  }
 0x2d2   :  { %v7643_v40 = vpop.permute.xlu0 %2453  ;;  %v7645_v39 = vpop.permute.xlu1 %2933 }
 0x2d3   :  { %10460 = vst [vmem:[#allocation110_spill] sm:$0xff] %v7643_v40  ;;  %v7652_v35 = vpop.permute.xlu2 %2762  ;;  %6087 = vset.pattern.permute.xlu1 %v10366_v55 }
 0x2d4   :  { %10461 = vst [vmem:[#allocation111_spill] sm:$0xff] %v7645_v39  ;;  %6083 = vset.pattern.permute.xlu2 %v10366_v55  ;;  %2118 = vperm.xlu1 %6087, %v7636_v59  }
 0x2d5   :  { %2130 = vperm.xlu2 %6083, %v7623_v14   ;;  %2949 = vrot.lane.b32.xlu0 %v2819_v10, %s6235_s25  ;;  %v1537_v10 = vmax.f32 %v7535_v33, %v7532_v41  ;;  %v2339_v41 = vmul.f32 %v7387_v31, %v7641_v22  ;;  %v1134_v31 = vpop.f32.mrf.mxu0 }
 0x2d6   :  { %6085 = vset.pattern.permute.xlu0 %v10364_v43 }
 0x2d7   :  { %v1585_v44 = vmax.f32 %v1489_v46, %v1537_v10  ;;  %v2340_v10 = vmul.f32 %v7458_v0, %v7680_v53  ;;  %v1538_v46 = vmax.f32 %v7556_v48, %v7554_v61 }
 0x2d9   :  { %v1635_v42 = vadd.f32 %v6481_v6, %v1585_v44  ;;  %v7719_v44 = vld [vmem:[%s10191_s2 + $0x240] sm:$0xff] }
 0x2da   :  { %v7661_v58 = vpop.permute.xlu1 %2758  ;;  %v7663_v18 = vpop.permute.xlu0 %2278  ;;  %v2341_v0 = vmul.f32 %v7491_v12, %v7719_v44  ;;  %v7739_v12 = vld [vmem:[%s10191_s2 + $0x250] sm:$0xff] }
 0x2db   :  { %v7667_v54 = vpop.permute.xlu2 %2457  ;;  %v7701_v33 = vmax.f32 %v1635_v42, 0.0 }
 0x2dc   :  { %10463 = vst [vmem:[#allocation112_spill] sm:$0xff] %v7667_v54  ;;  %6090 = vset.pattern.permute.xlu1 %v10361_v1 }
 0x2dd   :  { %6084 = vset.pattern.permute.xlu2 %v10361_v1  ;;  %2614 = vperm.xlu1 %6090, %v7665_v8  }
 0x2de   :  { %2610 = vperm.xlu2 %6084, %v7623_v14   ;;  %1832 = vperm.xlu0 %6085, %v7636_v59  }
 0x2e2   :  { %v7682_v2 = vpop.permute.xlu1 %2455 }
 0x2e3   :  { %10464 = vst [vmem:[#allocation113_spill] sm:$0xff] %v7682_v2  ;;  %v7686_v39 = vpop.permute.xlu2 %2286  ;;  %v7688_v27 = vpop.permute.xlu0 %2037  ;;  %v10511_v2 = vld [vmem:[#allocation16_spill] sm:$0xff] }
 0x2e4   :  { %10465 = vst [vmem:[#allocation114_spill] sm:$0xff] %v7688_v27 }
 0x2e5   :  { %2951 = vrot.lane.b32.xlu1 %v2820_v16, %s6235_s25 }
 0x2e6   :  { %2469 = vrot.lane.b32.xlu2 %v2339_v41, %s6234_s24  ;;  %6088 = vset.pattern.permute.xlu0 %v10366_v55 }
 0x2e7   :  { %2134 = vperm.xlu0 %6088, %v7665_v8   ;;  %6086 = vset.pattern.permute.xlu2 %v10364_v43 }
 0x2e8   :  { %6091 = vset.pattern.permute.xlu1 %v10364_v43  ;;  %v1490_v43 = vmax.f32 %v6440_v45, %v1134_v31 }
 0x2ea   :  { %v7699_v25 = vpop.permute.xlu1 %2282  ;;  %v1586_v41 = vmax.f32 %v1490_v43, %v1538_v46  ;;  %v6236_v46 = vmov 3  }
 0x2eb   :  { %v7703_v38 = vpop.permute.xlu0 %2937 }
 0x2ec   :  { %10466 = vst [vmem:[#allocation115_spill] sm:$0xff] %v7703_v38  ;;  %v7705_v16 = vpop.permute.xlu2 %2047  ;;  %v1636_v45 = vadd.f32 %v6481_v6, %v1586_v41  ;;  %v2822_v6 = vmul.f32 %v7520_v34, %v7739_v12  ;;  %v7754_v41 = vld [vmem:[%s10191_s2 + $0x260] sm:$0xff] }
 0x2ed   :  { %10467 = vst [vmem:[#allocation116_spill] sm:$0xff] %v7705_v16  ;;  %1837 = vperm.xlu1 %6091, %v7701_v33   ;;  %v2343_v34 = vmul.f32 %v7563_v49, %v7754_v41 }
 0x2ee   :  { %1852 = vperm.xlu2 %6086, %v7665_v8   ;;  %v7732_v48 = vmax.f32 %v1636_v45, 0.0 }
 0x2ef   :  { %2471 = vrot.lane.b32.xlu0 %v2340_v10, %s6234_s24 }
 0x2f0   :  { %6093 = vset.pattern.permute.xlu0 %v10361_v1 }
 0x2f3   :  { %v2767_v42 = vpop.permute.xlu0 %2766 }
 0x2f4   :  { %v7723_v27 = vpop.permute.xlu1 %2042  ;;  %v7725_v16 = vpop.permute.xlu2 %2941 }
 0x2f5   :  { %10468 = vst [vmem:[#allocation117_spill] sm:$0xff] %v7723_v27  ;;  %2473 = vrot.lane.b32.xlu1 %v2341_v0, %s6234_s24  ;;  %v7771_v27 = vld [vmem:[%s10191_s2 + $0x280] sm:$0xff] }
 0x2f6   :  { %10469 = vst [vmem:[#allocation118_spill] sm:$0xff] %v7725_v16  ;;  %6089 = vset.pattern.permute.xlu2 %v10361_v1 }
 0x2f7   :  { %2598 = vperm.xlu2 %6089, %v7636_v59   ;;  %2602 = vperm.xlu0 %6093, %v7701_v33  }
 0x2fb   :  { %v7734_v61 = vpop.permute.xlu0 %2459 }
 0x2fc   :  { %10470 = vst [vmem:[#allocation119_spill] sm:$0xff] %v7734_v61  ;;  %v7741_v31 = vpop.permute.xlu1 %2939  ;;  %v7743_v10 = vpop.permute.xlu2 %2774 }
 0x2fd   :  { %10471 = vst [vmem:[#allocation120_spill] sm:$0xff] %v7741_v31  ;;  %1842 = vperm.xlu1 %6091, %v7732_v48  }
 0x2ff   :  { %6092 = vset.pattern.permute.xlu2 %v10366_v55  ;;  %2955 = vrot.lane.b32.xlu0 %v2822_v6, %s6235_s25  ;;  %v2821_v6 = vmul.f32 %v7441_v7, %v7719_v44 }
 0x300   :  { %2122 = vperm.xlu2 %6092, %v7701_v33   ;;  %6097 = vset.pattern.permute.xlu0 %v6236_v46 }
 0x303   :  { %v2291_v43 = vpop.permute.xlu0 %2290 }
 0x304   :  { %v7756_v0 = vpop.permute.xlu1 %2770  ;;  %v7758_v45 = vpop.permute.xlu2 %2463 }
 0x305   :  { %10472 = vst [vmem:[#allocation121_spill] sm:$0xff] %v7758_v45  ;;  %6094 = vset.pattern.permute.xlu1 %v10366_v55  ;;  %v2825_v55 = vmul.f32 %v7625_v19, %v7771_v27  ;;  %v2823_v19 = vmul.f32 %v7569_v3, %v7754_v41 }
 0x306   :  { %2126 = vperm.xlu1 %6094, %v7732_v48  }
 0x307   :  { %2477 = vrot.lane.b32.xlu0 %v2343_v34, %s6234_s24  ;;  %v2342_v34 = vmul.f32 %v7473_v24, %v7739_v12 }
 0x308   :  { %2953 = vrot.lane.b32.xlu2 %v2821_v6, %s6235_s25  ;;  %v7790_v6 = vld [vmem:[%s10191_s2 + $0x290] sm:$0xff] }
 0x309   :  { %6096 = vset.pattern.permute.xlu2 %v6236_v46  ;;  %v2346_v24 = vmul.f32 %v7663_v18, %v7790_v6 }
 0x30c   :  { %v7773_v16 = vpop.permute.xlu1 %2461  ;;  %v7775_v49 = vpop.permute.xlu2 %2298 }
 0x30d   :  { %10473 = vst [vmem:[#allocation122_spill] sm:$0xff] %v7773_v16  ;;  %v7779_v7 = vpop.permute.xlu0 %2052 }
 0x30e   :  { %10474 = vst [vmem:[#allocation123_spill] sm:$0xff] %v7779_v7  ;;  %6095 = vset.pattern.permute.xlu1 %v10361_v1 }
 0x30f   :  { %2961 = vrot.lane.b32.xlu0 %v2825_v55, %s6235_s25  ;;  %2606 = vperm.xlu1 %6095, %v7732_v48  }
 0x310   :  { %2475 = vrot.lane.b32.xlu2 %v2342_v34, %s6234_s24  ;;  %v7808_v34 = vld [vmem:[%s10191_s2 + $0x270] sm:$0xff] }
 0x311   :  { %v2344_v3 = vmul.f32 %v7602_v30, %v7808_v34 }
 0x314   :  { %v7792_v31 = vpop.permute.xlu1 %2294 }
 0x315   :  { %v7798_v1 = vpop.permute.xlu0 %2943 }
 0x316   :  { %10475 = vst [vmem:[#allocation124_spill] sm:$0xff] %v7798_v1  ;;  %v7800_v55 = vpop.permute.xlu2 %2062  ;;  %v2824_v1 = vmul.f32 %v7545_v28, %v7808_v34  ;;  %v2345_v28 = vmul.f32 %v7586_v56, %v7771_v27 }
 0x317   :  { %10476 = vst [vmem:[#allocation125_spill] sm:$0xff] %v7800_v55  ;;  %2483 = vrot.lane.b32.xlu0 %v2346_v24, %s6234_s24  ;;  %2957 = vrot.lane.b32.xlu1 %v2823_v19, %s6235_s25  ;;  %v10514_v55 = vld [vmem:[#allocation30_spill] sm:$0xff] }
 0x318   :  { %3074 = vperm.xlu2 %6096, %v7604_v47   ;;  %6098 = vset.pattern.permute.xlu1 %v6236_v46  ;;  %v7824_v46 = vld [vmem:[%s10191_s2 + $0x2b0] sm:$0xff] }
 0x319   :  { %v2828_v30 = vmul.f32 %v2767_v42, %v7824_v46  ;;  %v2826_v42 = vmul.f32 %v7661_v58, %v7790_v6  ;;  %v7857_v58 = vld [vmem:[%s10191_s2 + $0x2e0] sm:$0xff] }
 0x31a   :  { %v2351_v7 = vmul.f32 %v7775_v49, %v7857_v58 }
 0x31d   :  { %v2779_v18 = vpop.permute.xlu0 %2778  ;;  %v7812_v38 = vpop.permute.xlu1 %2057 }
 0x31e   :  { %10477 = vst [vmem:[#allocation126_spill] sm:$0xff] %v7812_v38  ;;  %v7816_v24 = vpop.permute.xlu2 %2947 }
 0x31f   :  { %10478 = vst [vmem:[#allocation127_spill] sm:$0xff] %v7816_v24  ;;  %3078 = vperm.xlu0 %6097, %v7636_v59   ;;  %2479 = vrot.lane.b32.xlu1 %v2344_v3, %s6234_s24 }
 0x320   :  { %2959 = vrot.lane.b32.xlu2 %v2824_v1, %s6235_s25  ;;  %v7841_v1 = vld [vmem:[%s10191_s2 + $0x2c0] sm:$0xff] }
 0x321   :  { %v2349_v3 = vmul.f32 %v2291_v43, %v7841_v1 }
 0x325   :  { %v7827_v19 = vpop.permute.xlu0 %2465  ;;  %v7829_v54 = vpop.permute.xlu1 %2945 }
 0x326   :  { %10479 = vst [vmem:[#allocation128_spill] sm:$0xff] %v7827_v19  ;;  %v7833_v24 = vpop.permute.xlu2 %1847 }
 0x327   :  { %10480 = vst [vmem:[#allocation129_spill] sm:$0xff] %v7829_v54  ;;  %2967 = vrot.lane.b32.xlu0 %v2828_v30, %s6235_s25  ;;  %3082 = vperm.xlu1 %6098, %v7701_v33   ;;  %v7852_v30 = vld [vmem:[%s10191_s2 + $0x2a0] sm:$0xff] }
 0x328   :  { %10481 = vst [vmem:[#allocation130_spill] sm:$0xff] %v7833_v24  ;;  %2481 = vrot.lane.b32.xlu2 %v2345_v28, %s6234_s24  ;;  %v2347_v43 = vmul.f32 %v7699_v25, %v7852_v30  ;;  %v2831_v28 = vmul.f32 %v2779_v18, %v7857_v58  ;;  %v7874_v25 = vld [vmem:[%s10191_s2 + $0x2f0] sm:$0xff] }
 0x32d   :  { %v2783_v54 = vpop.permute.xlu1 %2782  ;;  %v2303_v56 = vpop.permute.xlu0 %2302 }
 0x32e   :  { %v2352_v18 = vmul.f32 %v2303_v56, %v7874_v25  ;;  %v2829_v56 = vmul.f32 %v7756_v0, %v7841_v1 }
 0x32f   :  { %v2131_v19 = vpop.permute.xlu2 %2130  ;;  %2489 = vrot.lane.b32.xlu0 %v2349_v3, %s6234_s24  ;;  %2963 = vrot.lane.b32.xlu1 %v2826_v42, %s6235_s25  ;;  %v2827_v42 = vmul.f32 %v7652_v35, %v7852_v30  ;;  %v2348_v35 = vmul.f32 %v7686_v39, %v7824_v46 }
 0x330   :  { %3086 = vperm.xlu2 %6096, %v7732_v48  }
 0x335   :  { %v7862_v3 = vpop.permute.xlu1 %2467 }
 0x336   :  { %10482 = vst [vmem:[#allocation131_spill] sm:$0xff] %v7862_v3  ;;  %v7866_v24 = vpop.permute.xlu0 %1827 }
 0x337   :  { %10483 = vst [vmem:[#allocation132_spill] sm:$0xff] %v7866_v24  ;;  %2973 = vrot.lane.b32.xlu0 %v2831_v28, %s6235_s25  ;;  %2485 = vrot.lane.b32.xlu1 %v2347_v43, %s6234_s24  ;;  %v7887_v28 = vld [vmem:[%s10191_s2 + $0x40] sm:$0xff]  ;;  %v10520_v24 = vld [vmem:[#allocation43_spill] sm:$0xff] }
 0x338   :  { %v2611_v16 = vpop.permute.xlu2 %2610  ;;  %2965 = vrot.lane.b32.xlu2 %v2827_v42, %s6235_s25 }
 0x339   :  { %v2789_v42 = vmul.f32 %v2611_v16, %v7887_v28 }
 0x33d   :  { %v2595_v3 = vpop.permute.xlu1 %2594 }
 0x33f   :  { %2495 = vrot.lane.b32.xlu0 %v2352_v18, %s6234_s24  ;;  %v2115_v45 = vpop.permute.xlu0 %2114  ;;  %3090 = vperm.xlu1 %6098, %v7623_v14  }
 0x340   :  { %v7881_v43 = vpop.permute.xlu2 %2469  ;;  %2487 = vrot.lane.b32.xlu2 %v2348_v35, %s6234_s24  ;;  %v7902_v35 = vld [vmem:[%s10191_s2 + $0x2d0] sm:$0xff] }
 0x341   :  { %10484 = vst [vmem:[#allocation133_spill] sm:$0xff] %v7881_v43  ;;  %v2350_v0 = vmul.f32 %v7792_v31, %v7902_v35  ;;  %v2830_v16 = vmul.f32 %v7743_v10, %v7902_v35  ;;  %v7922_v31 = vld [vmem:[%s10191_s2 + $0x50] sm:$0xff] }
 0x346   :  { %v2119_v39 = vpop.permute.xlu1 %2118 }
 0x347   :  { %2889 = vrot.lane.b32.xlu0 %v2789_v42, %s6235_s25  ;;  %v7893_v18 = vpop.permute.xlu0 %2949  ;;  %2969 = vrot.lane.b32.xlu1 %v2829_v56, %s6235_s25 }
 0x348   :  { %10485 = vst [vmem:[#allocation134_spill] sm:$0xff] %v7893_v18  ;;  %v7896_v43 = vpop.permute.xlu2 %1852  ;;  %3094 = vperm.xlu2 %6096, %v7665_v8  }
 0x349   :  { %10486 = vst [vmem:[#allocation135_spill] sm:$0xff] %v7896_v43  ;;  %v2832_v43 = vmul.f32 %v2783_v54, %v7874_v25  ;;  %v7928_v54 = vld [vmem:[%s10191_s2] sm:$0xff] }
 0x34a   :  { %v2305_v49 = vmul.f32 %v2115_v45, %v7928_v54 }
 0x34f   :  { %v2615_v42 = vpop.permute.xlu1 %2614  ;;  %2491 = vrot.lane.b32.xlu1 %v2350_v0, %s6234_s24 }
 0x350   :  { %v7909_v18 = vpop.permute.xlu0 %1832  ;;  %2971 = vrot.lane.b32.xlu2 %v2830_v16, %s6235_s25  ;;  %v2790_v45 = vmul.f32 %v2615_v42, %v7922_v31 }
 0x351   :  { %10487 = vst [vmem:[#allocation136_spill] sm:$0xff] %v7909_v18  ;;  %v2599_v56 = vpop.permute.xlu2 %2598 }
 0x357   :  { %v7915_v61 = vpop.permute.xlu1 %2951  ;;  %2975 = vrot.lane.b32.xlu1 %v2832_v43, %s6235_s25 }
 0x358   :  { %10488 = vst [vmem:[#allocation137_spill] sm:$0xff] %v7915_v61  ;;  %2493 = vrot.lane.b32.xlu2 %v2351_v7, %s6234_s24  ;;  %v2309_v7 = vmul.f32 %v2131_v19, %v7887_v28  ;;  %v2785_v19 = vmul.f32 %v2595_v3, %v7928_v54 }
 0x359   :  { %v2135_v10 = vpop.permute.xlu0 %2134 }
 0x35a   :  { %v2310_v0 = vmul.f32 %v2135_v10, %v7922_v31  ;;  %v2123_v16 = vpop.permute.xlu2 %2122  ;;  %v7940_v10 = vld [vmem:[%s10191_s2 + $0x10] sm:$0xff] }
 0x35b   :  { %v2786_v61 = vmul.f32 %v2599_v56, %v7940_v10 }
 0x35c   :  { %2411 = vrot.lane.b32.xlu0 %v2310_v0, %s6234_s24 }
 0x35f   :  { %v7933_v43 = vpop.permute.xlu1 %1837  ;;  %2401 = vrot.lane.b32.xlu1 %v2305_v49, %s6234_s24  ;;  %v7953_v49 = vld [vmem:[%s10191_s2 + $0x20] sm:$0xff] }
 0x360   :  { %10489 = vst [vmem:[#allocation138_spill] sm:$0xff] %v7933_v43  ;;  %2409 = vrot.lane.b32.xlu2 %v2309_v7, %s6234_s24  ;;  %v10515_v43 = vld [vmem:[#allocation19_spill] sm:$0xff] }
 0x361   :  { %v7942_v18 = vpop.permute.xlu0 %2471 }
 0x362   :  { %10490 = vst [vmem:[#allocation139_spill] sm:$0xff] %v7942_v18  ;;  %v7945_v0 = vpop.permute.xlu2 %2953  ;;  %v2307_v18 = vmul.f32 %v2123_v16, %v7953_v49 }
 0x363   :  { %10491 = vst [vmem:[#allocation140_spill] sm:$0xff] %v7945_v0 }
 0x364   :  { %2883 = vrot.lane.b32.xlu0 %v2786_v61, %s6235_s25  ;;  %v2306_v61 = vmul.f32 %v2119_v39, %v7940_v10 }
 0x367   :  { %v7955_v7 = vpop.permute.xlu1 %2473  ;;  %2891 = vrot.lane.b32.xlu1 %v2790_v45, %s6235_s25 }
 0x368   :  { %10492 = vst [vmem:[#allocation141_spill] sm:$0xff] %v7955_v7  ;;  %2881 = vrot.lane.b32.xlu2 %v2785_v19, %s6235_s25 }
 0x369   :  { %v2603_v56 = vpop.permute.xlu0 %2602 }
 0x36a   :  { %v7960_v0 = vpop.permute.xlu2 %2475  ;;  %v2787_v16 = vmul.f32 %v2603_v56, %v7953_v49 }
 0x36b   :  { %10493 = vst [vmem:[#allocation142_spill] sm:$0xff] %v7960_v0 }
 0x36c   :  { %2405 = vrot.lane.b32.xlu0 %v2307_v18, %s6234_s24 }
 0x36f   :  { %3102 = vperm.xlu1 %6098, %v6496_v21   ;;  %v7965_v3 = vpop.permute.xlu1 %1842 }
 0x370   :  { %10494 = vst [vmem:[#allocation143_spill] sm:$0xff] %v7965_v3  ;;  %2403 = vrot.lane.b32.xlu2 %v2306_v61, %s6234_s24  ;;  %v7983_v61 = vld [vmem:[%s10191_s2 + $0x30] sm:$0xff] }
 0x371   :  { %v7968_v42 = vpop.permute.xlu0 %2955 }
 0x372   :  { %10495 = vst [vmem:[#allocation144_spill] sm:$0xff] %v7968_v42  ;;  %v7970_v45 = vpop.permute.xlu2 %3074 }
 0x374   :  { %3098 = vperm.xlu0 %6097, %v6487_v11  }
 0x377   :  { %2885 = vrot.lane.b32.xlu1 %v2787_v16, %s6235_s25 }
 0x378   :  { %3106 = vperm.xlu2 %6096, %v6518_v32   ;;  %v2127_v18 = vpop.permute.xlu1 %2126 }
 0x379   :  { %v7976_v39 = vpop.permute.xlu0 %2477  ;;  %v2308_v7 = vmul.f32 %v2127_v18, %v7983_v61 }
 0x37a   :  { %10496 = vst [vmem:[#allocation145_spill] sm:$0xff] %v7976_v39  ;;  %v7978_v19 = vpop.permute.xlu2 %2959 }
 0x37b   :  { %10497 = vst [vmem:[#allocation146_spill] sm:$0xff] %v7978_v19 }
 0x37c   :  { %3110 = vperm.xlu0 %6097, %v6533_v60  }
 0x37f   :  { %2407 = vrot.lane.b32.xlu1 %v2308_v7, %s6234_s24 }
 0x381   :  { %v7988_v56 = vpop.permute.xlu0 %2961  ;;  %v2607_v16 = vpop.permute.xlu1 %2606 }
 0x382   :  { %10498 = vst [vmem:[#allocation147_spill] sm:$0xff] %v7988_v56  ;;  %v7990_v42 = vpop.permute.xlu2 %2481  ;;  %v2788_v0 = vmul.f32 %v2607_v16, %v7983_v61 }
 0x383   :  { %10499 = vst [vmem:[#allocation148_spill] sm:$0xff] %v7990_v42 }
 0x384   :  { %3122 = vperm.xlu0 %6097, %v6582_v29   ;;  %2887 = vrot.lane.b32.xlu2 %v2788_v0, %s6235_s25 }
 0x387   :  { %3114 = vperm.xlu1 %6098, %v6552_v5  }
 0x389   :  { %v7996_v39 = vpop.permute.xlu1 %2957  ;;  %v7998_v19 = vpop.permute.xlu0 %2483 }
 0x38a   :  { %10500 = vst [vmem:[#allocation149_spill] sm:$0xff] %v7996_v39  ;;  %v8000_v18 = vpop.permute.xlu2 %3086 }
 0x38b   :  { %10501 = vst [vmem:[#allocation150_spill] sm:$0xff] %v7998_v19 }
 0x38c   :  { %3134 = vperm.xlu0 %6097, %v6633_v17   ;;  %3118 = vperm.xlu2 %6096, %v6569_v20  }
 0x38f   :  { %3126 = vperm.xlu1 %6098, %v6603_v52  }
 0x391   :  { %v8005_v7 = vpop.permute.xlu1 %2479  ;;  %v8009_v56 = vpop.permute.xlu0 %3078 }
 0x392   :  { %10502 = vst [vmem:[#allocation151_spill] sm:$0xff] %v8005_v7  ;;  %v8007_v16 = vpop.permute.xlu2 %2965 }
 0x393   :  { %10503 = vst [vmem:[#allocation152_spill] sm:$0xff] %v8007_v16 }
 0x394   :  { %3146 = vperm.xlu0 %6097, %v6694_v9   ;;  %3130 = vperm.xlu2 %6096, %v6619_v4  }
 0x397   :  { %3138 = vperm.xlu1 %6098, %v6658_v36  }
 0x399   :  { %v8014_v0 = vpop.permute.xlu1 %3082  ;;  %v8020_v42 = vpop.permute.xlu0 %2967 }
 0x39a   :  { %v8016_v39 = vpop.permute.xlu2 %2487  ;;  %10505 = vst [vmem:[#allocation154_spill] sm:$0xff] %v8020_v42  ;;  %v10510_v42 = vld [vmem:[#allocation12_spill] sm:$0xff] }
 0x39b   :  { %10504 = vst [vmem:[#allocation153_spill] sm:$0xff] %v8016_v39 }
 0x39c   :  { %3158 = vperm.xlu0 %6097, %v6765_v26   ;;  %3142 = vperm.xlu2 %6096, %v6671_v57  }
 0x39f   :  { %3150 = vperm.xlu1 %6098, %v6717_v37  }
 0x3a1   :  { %v8023_v7 = vpop.permute.xlu1 %2963  ;;  %v8030_v16 = vpop.permute.xlu0 %2489 }
 0x3a2   :  { %10506 = vst [vmem:[#allocation155_spill] sm:$0xff] %v8023_v7  ;;  %v8025_v19 = vpop.permute.xlu2 %3094 }
 0x3a3   :  { %10507 = vst [vmem:[#allocation156_spill] sm:$0xff] %v8030_v16  ;;  %v10516_v16 = vld [vmem:[#allocation24_spill] sm:$0xff] }
 0x3a4   :  { %3170 = vperm.xlu0 %6097, %v6872_v51   ;;  %3154 = vperm.xlu2 %6096, %v6736_v62   ;;  %v10526_v51 = vld [vmem:[#allocation39_spill] sm:$0xff] }
 0x3a7   :  { %3162 = vperm.xlu1 %6098, %v6804_v13   ;;  %v10532_v13 = vld [vmem:[#allocation51_spill] sm:$0xff] }
 0x3a9   :  { %v8032_v39 = vpop.permute.xlu1 %2485  ;;  %v8039_v40 = vpop.permute.xlu0 %2973 }
 0x3aa   :  { %10508 = vst [vmem:[#allocation157_spill] sm:$0xff] %v8032_v39  ;;  %v8034_v38 = vpop.permute.xlu2 %2971 }
 0x3ab   :  { %10509 = vst [vmem:[#allocation158_spill] sm:$0xff] %v8034_v38 }
 0x3ac   :  { %3182 = vperm.xlu0 %6097, %v6995_v15   ;;  %3166 = vperm.xlu2 %6096, %v10510_v42   ;;  %10512 = vst [vmem:[#allocation12_spill] sm:$0xff] %v8039_v40  ;;  %v10521_v15 = vld [vmem:[#allocation27_spill] sm:$0xff] }
 0x3af   :  { %3174 = vperm.xlu1 %6098, %v10511_v2   ;;  %v10522_v2 = vld [vmem:[#allocation35_spill] sm:$0xff] }
 0x3b1   :  { %v3091_v7 = vpop.permute.xlu1 %3090  ;;  %v8050_v3 = vpop.permute.xlu0 %2495 }
 0x3b2   :  { %v8041_v63 = vpop.permute.xlu2 %2493  ;;  %10519 = vst [vmem:[#allocation161_spill] sm:$0xff] %v8050_v3 }
 0x3b3   :  { %10513 = vst [vmem:[#allocation159_spill] sm:$0xff] %v8041_v63 }
 0x3b4   :  { %3194 = vperm.xlu0 %6097, %v10514_v55   ;;  %3178 = vperm.xlu2 %6096, %v10515_v43   ;;  %v10525_v55 = vld [vmem:[#allocation54_spill] sm:$0xff] }
 0x3b7   :  { %3186 = vperm.xlu1 %6098, %v10516_v16  }
 0x3b9   :  { %v8046_v39 = vpop.permute.xlu1 %2969  ;;  %v8061_v16 = vpop.permute.xlu0 %2889 }
 0x3ba   :  { %10517 = vst [vmem:[#allocation19_spill] sm:$0xff] %v8046_v39  ;;  %v8048_v38 = vpop.permute.xlu2 %2409  ;;  %v10528_v39 = vld [vmem:[#allocation47_spill] sm:$0xff] }
 0x3bb   :  { %10518 = vst [vmem:[#allocation160_spill] sm:$0xff] %v8048_v38 }
 0x3bc   :  { %3206 = vperm.xlu0 %6097, %v10520_v24   ;;  %3190 = vperm.xlu2 %6096, %v10521_v15   ;;  %10527 = vst [vmem:[#allocation163_spill] sm:$0xff] %v8061_v16  ;;  %v10531_v24 = vld [vmem:[#allocation67_spill] sm:$0xff] }
 0x3bf   :  { %3198 = vperm.xlu1 %6098, %v10522_v2  }
 0x3c1   :  { %v8055_v40 = vpop.permute.xlu1 %2491 }
 0x3c2   :  { %10523 = vst [vmem:[#allocation27_spill] sm:$0xff] %v8055_v40  ;;  %v8057_v63 = vpop.permute.xlu2 %2881  ;;  %v10534_v40 = vld [vmem:[#allocation59_spill] sm:$0xff] }
 0x3c3   :  { %10524 = vst [vmem:[#allocation162_spill] sm:$0xff] %v8057_v63 }
 0x3c4   :  { %3218 = vperm.xlu0 %6097, %v10525_v55   ;;  %3202 = vperm.xlu2 %6096, %v10526_v51   ;;  %v10536_v55 = vld [vmem:[#allocation78_spill] sm:$0xff]  ;;  %v10537_v51 = vld [vmem:[#allocation63_spill] sm:$0xff] }
 0x3c7   :  { %3210 = vperm.xlu1 %6098, %v10528_v39  }
 0x3c9   :  { %v8064_v38 = vpop.permute.xlu1 %2975 }
 0x3ca   :  { %10529 = vst [vmem:[#allocation164_spill] sm:$0xff] %v8064_v38  ;;  %v8066_v3 = vpop.permute.xlu2 %2403  ;;  %v10539_v38 = vld [vmem:[#allocation71_spill] sm:$0xff] }
 0x3cb   :  { %10530 = vst [vmem:[#allocation165_spill] sm:$0xff] %v8066_v3 }
 0x3cc   :  { %3230 = vperm.xlu0 %6097, %v10531_v24   ;;  %3214 = vperm.xlu2 %6096, %v10532_v13   ;;  %v10541_v24 = vld [vmem:[#allocation92_spill] sm:$0xff]  ;;  %v10542_v13 = vld [vmem:[#allocation75_spill] sm:$0xff] }
 0x3ce   :  { %v8070_v2 = vpop.permute.xlu0 %2411 }
 0x3cf   :  { %10533 = vst [vmem:[#allocation166_spill] sm:$0xff] %v8070_v2  ;;  %3222 = vperm.xlu1 %6098, %v10534_v40  }
 0x3d1   :  { %v8073_v63 = vpop.permute.xlu1 %2401 }
 0x3d2   :  { %10535 = vst [vmem:[#allocation167_spill] sm:$0xff] %v8073_v63  ;;  %v3107_v16 = vpop.permute.xlu2 %3106  ;;  %v10545_v63 = vld [vmem:[#allocation83_spill] sm:$0xff] }
 0x3d4   :  { %3242 = vperm.xlu0 %6097, %v10536_v55   ;;  %3226 = vperm.xlu2 %6096, %v10537_v51   ;;  %v3265_v51 = vmul.f32 %v7970_v45, %v7928_v54  ;;  %v3266_v54 = vmul.f32 %v8009_v56, %v7940_v10 }
 0x3d6   :  { %v8077_v39 = vpop.permute.xlu0 %2883 }
 0x3d7   :  { %10538 = vst [vmem:[#allocation168_spill] sm:$0xff] %v8077_v39  ;;  %3234 = vperm.xlu1 %6098, %v10539_v38   ;;  %v10546_v39 = vld [vmem:[#allocation87_spill] sm:$0xff] }
 0x3d9   :  { %v8080_v3 = vpop.permute.xlu1 %2891 }
 0x3da   :  { %10540 = vst [vmem:[#allocation169_spill] sm:$0xff] %v8080_v3 }
 0x3dc   :  { %3254 = vperm.xlu0 %6097, %v10541_v24   ;;  %3238 = vperm.xlu2 %6096, %v10542_v13   ;;  %v10547_v24 = vld [vmem:[#allocation98_spill] sm:$0xff] }
 0x3de   :  { %v8084_v2 = vpop.permute.xlu0 %2405  ;;  %v8086_v40 = vpop.permute.xlu2 %2887 }
 0x3df   :  { %10543 = vst [vmem:[#allocation170_spill] sm:$0xff] %v8084_v2  ;;  %3246 = vperm.xlu1 %6098, %v10545_v63   ;;  %v3268_v2 = vmul.f32 %v8000_v18, %v7983_v61  ;;  %v6111_v61 = vld [vmem:[%s10191_s2 + $0x60] sm:$0xff] }
 0x3e0   :  { %10544 = vst [vmem:[#allocation171_spill] sm:$0xff] %v8086_v40 }
 0x3e1   :  { %v3103_v55 = vpop.permute.xlu1 %3102 }
 0x3e4   :  { %3361 = vrot.lane.b32.xlu0 %v3265_v51, %s6237_s9  ;;  %3250 = vperm.xlu2 %6096, %v10546_v39  }
 0x3e6   :  { %v3099_v3 = vpop.permute.xlu0 %3098  ;;  %v3119_v38 = vpop.permute.xlu2 %3118 }
 0x3e7   :  { %3258 = vperm.xlu1 %6098, %v10547_v24   ;;  %v3267_v24 = vmul.f32 %v8014_v0, %v7953_v49  ;;  %v3271_v18 = vmul.f32 %v6111_v61, %v3099_v3  ;;  %v6112_v49 = vld [vmem:[%s10191_s2 + $0x90] sm:$0xff] }
 0x3e9   :  { %v8094_v13 = vpop.permute.xlu1 %2885 }
 0x3ea   :  { %10548 = vst [vmem:[#allocation172_spill] sm:$0xff] %v8094_v13  ;;  %v3270_v13 = vmul.f32 %v8025_v19, %v7922_v31  ;;  %v6114_v31 = vld [vmem:[%s10191_s2 + $0x80] sm:$0xff] }
 0x3eb   :  { %v3273_v19 = vmul.f32 %v6114_v31, %v3107_v16  ;;  %v6117_v16 = vld [vmem:[%s10191_s2 + $0xb0] sm:$0xff] }
 0x3ec   :  { %3367 = vrot.lane.b32.xlu0 %v3268_v2, %s6237_s9  ;;  %3262 = vperm.xlu2 %6096, %v7582_v23   ;;  %v3269_v2 = vmul.f32 %v3091_v7, %v7887_v28 }
 0x3ee   :  { %v3111_v45 = vpop.permute.xlu0 %3110  ;;  %v3131_v51 = vpop.permute.xlu2 %3130 }
 0x3ef   :  { %3363 = vrot.lane.b32.xlu1 %v3266_v54, %s6237_s9  ;;  %v3274_v0 = vmul.f32 %v6112_v49, %v3111_v45  ;;  %v6115_v45 = vld [vmem:[%s10191_s2 + $0xc0] sm:$0xff] }
 0x3f1   :  { %v8103_v40 = vpop.permute.xlu1 %2407 }
 0x3f2   :  { %10549 = vst [vmem:[#allocation173_spill] sm:$0xff] %v8103_v40  ;;  %v6238_v40 = vmov 4  }
 0x3f3   :  { %6099 = vset.pattern.permute.xlu0 %v6238_v40  ;;  %6100 = vset.pattern.permute.xlu1 %v6238_v40 }
 0x3f4   :  { %3373 = vrot.lane.b32.xlu0 %v3271_v18, %s6237_s9  ;;  %3365 = vrot.lane.b32.xlu2 %v3267_v24, %s6237_s9  ;;  %v6113_v24 = vld [vmem:[%s10191_s2 + $0x70] sm:$0xff] }
 0x3f5   :  { %v3272_v28 = vmul.f32 %v6113_v24, %v3103_v55  ;;  %v6116_v55 = vld [vmem:[%s10191_s2 + $0xa0] sm:$0xff]  ;;  %v3276_v24 = vmul.f32 %v6117_v16, %v3119_v38  ;;  %6101 = vset.pattern.permute.xlu2 %v6238_v40 }
 0x3f6   :  { %v3123_v10 = vpop.permute.xlu0 %3122  ;;  %v3143_v56 = vpop.permute.xlu2 %3142  ;;  %v6120_v38 = vld [vmem:[%s10191_s2 + $0xe0] sm:$0xff] }
 0x3f7   :  { %3369 = vrot.lane.b32.xlu1 %v3269_v2, %s6237_s9 }
 0x3f9   :  { %v3115_v54 = vpop.permute.xlu1 %3114 }
 0x3fa   :  { %v3275_v18 = vmul.f32 %v6116_v55, %v3115_v54  ;;  %v6119_v54 = vld [vmem:[%s10191_s2 + $0xd0] sm:$0xff]  ;;  %v3279_v55 = vmul.f32 %v6120_v38, %v3131_v51 }
 0x3fb   :  { %v6123_v51 = vld [vmem:[%s10191_s2 + $0x110] sm:$0xff] }
 0x3fc   :  { %3379 = vrot.lane.b32.xlu0 %v3274_v0, %s6237_s9  ;;  %3371 = vrot.lane.b32.xlu2 %v3270_v13, %s6237_s9  ;;  %v3277_v13 = vmul.f32 %v6115_v45, %v3123_v10  ;;  %v6118_v10 = vld [vmem:[%s10191_s2 + $0xf0] sm:$0xff] }
 0x3fe   :  { %v3135_v3 = vpop.permute.xlu0 %3134  ;;  %v3155_v7 = vpop.permute.xlu2 %3154 }
 0x3ff   :  { %3375 = vrot.lane.b32.xlu1 %v3272_v28, %s6237_s9  ;;  %v3280_v28 = vmul.f32 %v6118_v10, %v3135_v3  ;;  %v6121_v3 = vld [vmem:[%s10191_s2 + $0x120] sm:$0xff] }
 0x401   :  { %v3127_v61 = vpop.permute.xlu1 %3126 }
 0x402   :  { %v3278_v31 = vmul.f32 %v6119_v54, %v3127_v61  ;;  %v6122_v61 = vld [vmem:[%s10191_s2 + $0x100] sm:$0xff]  ;;  %v3282_v54 = vmul.f32 %v6123_v51, %v3143_v56 }
 0x403   :  { %v6126_v56 = vld [vmem:[%s10191_s2 + $0x140] sm:$0xff] }
 0x404   :  { %3385 = vrot.lane.b32.xlu0 %v3277_v13, %s6237_s9  ;;  %3377 = vrot.lane.b32.xlu2 %v3273_v19, %s6237_s9 }
 0x406   :  { %v3147_v2 = vpop.permute.xlu0 %3146  ;;  %v3167_v49 = vpop.permute.xlu2 %3166 }
 0x407   :  { %3381 = vrot.lane.b32.xlu1 %v3275_v18, %s6237_s9  ;;  %v3283_v18 = vmul.f32 %v6121_v3, %v3147_v2  ;;  %v6124_v2 = vld [vmem:[%s10191_s2 + $0x150] sm:$0xff] }
 0x409   :  { %v3139_v0 = vpop.permute.xlu1 %3138 }
 0x40a   :  { %v3281_v16 = vmul.f32 %v6122_v61, %v3139_v0  ;;  %v6125_v0 = vld [vmem:[%s10191_s2 + $0x130] sm:$0xff]  ;;  %v3285_v61 = vmul.f32 %v6126_v56, %v3155_v7 }
 0x40b   :  { %v6129_v7 = vld [vmem:[%s10191_s2 + $0x170] sm:$0xff] }
 0x40c   :  { %3391 = vrot.lane.b32.xlu0 %v3280_v28, %s6237_s9  ;;  %3383 = vrot.lane.b32.xlu2 %v3276_v24, %s6237_s9 }
 0x40e   :  { %v3159_v19 = vpop.permute.xlu0 %3158  ;;  %v3179_v45 = vpop.permute.xlu2 %3178 }
 0x40f   :  { %3387 = vrot.lane.b32.xlu1 %v3278_v31, %s6237_s9  ;;  %v3286_v31 = vmul.f32 %v6124_v2, %v3159_v19  ;;  %v6127_v19 = vld [vmem:[%s10191_s2 + $0x180] sm:$0xff] }
 0x411   :  { %v3151_v13 = vpop.permute.xlu1 %3150 }
 0x412   :  { %v3284_v38 = vmul.f32 %v6125_v0, %v3151_v13  ;;  %v6128_v13 = vld [vmem:[%s10191_s2 + $0x160] sm:$0xff]  ;;  %v3288_v0 = vmul.f32 %v6129_v7, %v3167_v49 }
 0x413   :  { %v6132_v49 = vld [vmem:[%s10191_s2 + $0x1a0] sm:$0xff] }
 0x414   :  { %3397 = vrot.lane.b32.xlu0 %v3283_v18, %s6237_s9  ;;  %3389 = vrot.lane.b32.xlu2 %v3279_v55, %s6237_s9 }
 0x416   :  { %v3171_v24 = vpop.permute.xlu0 %3170  ;;  %v3191_v10 = vpop.permute.xlu2 %3190 }
 0x417   :  { %3393 = vrot.lane.b32.xlu1 %v3281_v16, %s6237_s9  ;;  %v3289_v16 = vmul.f32 %v6127_v19, %v3171_v24  ;;  %v6130_v24 = vld [vmem:[%s10191_s2 + $0x1b0] sm:$0xff] }
 0x419   :  { %v3163_v28 = vpop.permute.xlu1 %3162 }
 0x41a   :  { %v3287_v51 = vmul.f32 %v6128_v13, %v3163_v28  ;;  %v6131_v28 = vld [vmem:[%s10191_s2 + $0x190] sm:$0xff]  ;;  %v3291_v13 = vmul.f32 %v6132_v49, %v3179_v45 }
 0x41b   :  { %v6134_v45 = vld [vmem:[%s10191_s2 + $0x1d0] sm:$0xff] }
 0x41c   :  { %3403 = vrot.lane.b32.xlu0 %v3286_v31, %s6237_s9  ;;  %3395 = vrot.lane.b32.xlu2 %v3282_v54, %s6237_s9 }
 0x41e   :  { %v3183_v55 = vpop.permute.xlu0 %3182  ;;  %v3203_v3 = vpop.permute.xlu2 %3202 }
 0x41f   :  { %3399 = vrot.lane.b32.xlu1 %v3284_v38, %s6237_s9  ;;  %v3292_v38 = vmul.f32 %v6130_v24, %v3183_v55  ;;  %v10550_v55 = vld [vmem:[#allocation90_spill] sm:$0xff] }
 0x421   :  { %v3175_v18 = vpop.permute.xlu1 %3174 }
 0x422   :  { %v3290_v56 = vmul.f32 %v6131_v28, %v3175_v18  ;;  %v6133_v18 = vld [vmem:[%s10191_s2 + $0x1c0] sm:$0xff]  ;;  %v3294_v28 = vmul.f32 %v6134_v45, %v3191_v10 }
 0x424   :  { %3409 = vrot.lane.b32.xlu0 %v3289_v16, %s6237_s9  ;;  %3401 = vrot.lane.b32.xlu2 %v3285_v61, %s6237_s9 }
 0x426   :  { %v3195_v54 = vpop.permute.xlu0 %3194  ;;  %v3215_v2 = vpop.permute.xlu2 %3214 }
 0x427   :  { %3405 = vrot.lane.b32.xlu1 %v3287_v51, %s6237_s9  ;;  %v3295_v51 = vmul.f32 %v3195_v54, %v10550_v55  ;;  %v3300_v45 = vmul.f32 %v3215_v2, %v7680_v53 }
 0x429   :  { %v3187_v31 = vpop.permute.xlu1 %3186 }
 0x42a   :  { %v3293_v7 = vmul.f32 %v6133_v18, %v3187_v31 }
 0x42c   :  { %3415 = vrot.lane.b32.xlu0 %v3292_v38, %s6237_s9  ;;  %3407 = vrot.lane.b32.xlu2 %v3288_v0, %s6237_s9 }
 0x42e   :  { %v3207_v61 = vpop.permute.xlu0 %3206  ;;  %v3227_v19 = vpop.permute.xlu2 %3226 }
 0x42f   :  { %3411 = vrot.lane.b32.xlu1 %v3290_v56, %s6237_s9  ;;  %v3298_v54 = vmul.f32 %v3207_v61, %v7598_v50  ;;  %v10551_v56 = vld [vmem:[#allocation94_spill] sm:$0xff]  ;;  %v3303_v40 = vmul.f32 %v3227_v19, %v7754_v41 }
 0x431   :  { %v3199_v16 = vpop.permute.xlu1 %3198 }
 0x432   :  { %v3296_v49 = vmul.f32 %v3199_v16, %v10551_v56 }
 0x434   :  { %3421 = vrot.lane.b32.xlu0 %v3295_v51, %s6237_s9  ;;  %3413 = vrot.lane.b32.xlu2 %v3291_v13, %s6237_s9  ;;  %v10552_v51 = vld [vmem:[#allocation100_spill] sm:$0xff] }
 0x435   :  { %v3297_v18 = vmul.f32 %v3203_v3, %v10552_v51 }
 0x436   :  { %v3219_v0 = vpop.permute.xlu0 %3218  ;;  %v3239_v24 = vpop.permute.xlu2 %3238 }
 0x437   :  { %3417 = vrot.lane.b32.xlu1 %v3293_v7, %s6237_s9  ;;  %v3301_v7 = vmul.f32 %v3219_v0, %v7719_v44 }
 0x439   :  { %v3211_v38 = vpop.permute.xlu1 %3210 }
 0x43a   :  { %v3299_v50 = vmul.f32 %v3211_v38, %v7641_v22 }
 0x43c   :  { %3427 = vrot.lane.b32.xlu0 %v3298_v54, %s6237_s9  ;;  %3419 = vrot.lane.b32.xlu2 %v3294_v28, %s6237_s9  ;;  %v3306_v54 = vmul.f32 %v3239_v24, %v7790_v6 }
 0x43e   :  { %v3231_v13 = vpop.permute.xlu0 %3230  ;;  %v3251_v31 = vpop.permute.xlu2 %3250 }
 0x43f   :  { %3423 = vrot.lane.b32.xlu1 %v3296_v49, %s6237_s9  ;;  %v3304_v3 = vmul.f32 %v3231_v13, %v7808_v34  ;;  %v3309_v49 = vmul.f32 %v3251_v31, %v7841_v1 }
 0x441   :  { %v3223_v55 = vpop.permute.xlu1 %3222 }
 0x442   :  { %v3302_v44 = vmul.f32 %v3223_v55, %v7739_v12 }
 0x444   :  { %3433 = vrot.lane.b32.xlu0 %v3301_v7, %s6237_s9  ;;  %3425 = vrot.lane.b32.xlu2 %v3297_v18, %s6237_s9 }
 0x446   :  { %v3243_v10 = vpop.permute.xlu0 %3242  ;;  %v3263_v61 = vpop.permute.xlu2 %3262 }
 0x447   :  { %3429 = vrot.lane.b32.xlu1 %v3299_v50, %s6237_s9  ;;  %v3307_v38 = vmul.f32 %v3243_v10, %v7852_v30  ;;  %v3312_v13 = vmul.f32 %v3263_v61, %v7874_v25 }
 0x449   :  { %v3235_v16 = vpop.permute.xlu1 %3234 }
 0x44a   :  { %v3305_v53 = vmul.f32 %v3235_v16, %v7771_v27 }
 0x44c   :  { %3439 = vrot.lane.b32.xlu0 %v3304_v3, %s6237_s9  ;;  %3431 = vrot.lane.b32.xlu2 %v3300_v45, %s6237_s9 }
 0x44e   :  { %v3255_v0 = vpop.permute.xlu0 %3254  ;;  %v8226_v28 = vpop.permute.xlu2 %3365 }
 0x44f   :  { %10553 = vst [vmem:[#allocation90_spill] sm:$0xff] %v8226_v28  ;;  %3435 = vrot.lane.b32.xlu1 %v3302_v44, %s6237_s9  ;;  %v3310_v56 = vmul.f32 %v3255_v0, %v7902_v35  ;;  %v8548_v28 = vld [vmem:[%s10191_s2 + $0x78] sm:$0xff] }
 0x450   :  { %10671 = vst [vmem:[#allocation268_spill] sm:$0xff] %v8548_v28 }
 0x451   :  { %v3247_v22 = vpop.permute.xlu1 %3246 }
 0x452   :  { %v3308_v41 = vmul.f32 %v3247_v22, %v7824_v46 }
 0x454   :  { %3445 = vrot.lane.b32.xlu0 %v3307_v38, %s6237_s9  ;;  %3437 = vrot.lane.b32.xlu2 %v3303_v40, %s6237_s9 }
 0x456   :  { %v8234_v34 = vpop.permute.xlu0 %3361  ;;  %v8236_v2 = vpop.permute.xlu2 %3371 }
 0x457   :  { %10554 = vst [vmem:[#allocation94_spill] sm:$0xff] %v8234_v34  ;;  %3441 = vrot.lane.b32.xlu1 %v3305_v53, %s6237_s9  ;;  %v8562_v34 = vld [vmem:[%s10191_s2 + $0xa8] sm:$0xff] }
 0x458   :  { %10555 = vst [vmem:[#allocation100_spill] sm:$0xff] %v8236_v2  ;;  %v10592_v2 = vld [vmem:[#allocation16_spill] sm:$0xff] }
 0x459   :  { %v3259_v12 = vpop.permute.xlu1 %3258  ;;  %10672 = vst [vmem:[#allocation269_spill] sm:$0xff] %v8562_v34 }
 0x45a   :  { %v3311_v6 = vmul.f32 %v3259_v12, %v7857_v58 }
 0x45c   :  { %3451 = vrot.lane.b32.xlu0 %v3310_v56, %s6237_s9  ;;  %3443 = vrot.lane.b32.xlu2 %v3306_v54, %s6237_s9 }
 0x45e   :  { %v8244_v30 = vpop.permute.xlu0 %3367  ;;  %v8246_v27 = vpop.permute.xlu2 %3377 }
 0x45f   :  { %10556 = vst [vmem:[#allocation174_spill] sm:$0xff] %v8244_v30  ;;  %3447 = vrot.lane.b32.xlu1 %v3308_v41, %s6237_s9 }
 0x460   :  { %10557 = vst [vmem:[#allocation175_spill] sm:$0xff] %v8246_v27  ;;  %v10597_v27 = vld [vmem:[#allocation51_spill] sm:$0xff] }
 0x461   :  { %v8249_v19 = vpop.permute.xlu1 %3363 }
 0x462   :  { %10558 = vst [vmem:[#allocation176_spill] sm:$0xff] %v8249_v19  ;;  %v10589_v19 = vld [vmem:[#allocation13_spill] sm:$0xff] }
 0x464   :  { %3554 = vperm.xlu0 %6099, %v7604_v47   ;;  %3449 = vrot.lane.b32.xlu2 %v3309_v49, %s6237_s9  ;;  %v10586_v49 = vld [vmem:[#allocation9_spill] sm:$0xff] }
 0x466   :  { %v8255_v35 = vpop.permute.xlu0 %3373  ;;  %v8257_v24 = vpop.permute.xlu2 %3383 }
 0x467   :  { %10559 = vst [vmem:[#allocation177_spill] sm:$0xff] %v8255_v35  ;;  %3453 = vrot.lane.b32.xlu1 %v3311_v6, %s6237_s9 }
 0x468   :  { %10560 = vst [vmem:[#allocation178_spill] sm:$0xff] %v8257_v24 }
 0x469   :  { %v8260_v46 = vpop.permute.xlu1 %3369 }
 0x46a   :  { %10561 = vst [vmem:[#allocation179_spill] sm:$0xff] %v8260_v46  ;;  %v10591_v46 = vld [vmem:[#allocation39_spill] sm:$0xff] }
 0x46c   :  { %3574 = vperm.xlu0 %6099, %v7665_v8   ;;  %3455 = vrot.lane.b32.xlu2 %v3312_v13, %s6237_s9 }
 0x46e   :  { %v8265_v1 = vpop.permute.xlu0 %3379  ;;  %v8267_v31 = vpop.permute.xlu2 %3389 }
 0x46f   :  { %10562 = vst [vmem:[#allocation180_spill] sm:$0xff] %v8265_v1  ;;  %3558 = vperm.xlu1 %6100, %v7636_v59   ;;  %v10601_v1 = vld [vmem:[#allocation30_spill] sm:$0xff] }
 0x470   :  { %10563 = vst [vmem:[#allocation181_spill] sm:$0xff] %v8267_v31 }
 0x471   :  { %v8270_v58 = vpop.permute.xlu1 %3375 }
 0x472   :  { %10564 = vst [vmem:[#allocation182_spill] sm:$0xff] %v8270_v58  ;;  %v10595_v58 = vld [vmem:[#allocation20_spill] sm:$0xff] }
 0x474   :  { %3586 = vperm.xlu0 %6099, %v6518_v32   ;;  %3562 = vperm.xlu2 %6101, %v7701_v33  }
 0x476   :  { %v8274_v55 = vpop.permute.xlu0 %3385  ;;  %v8276_v51 = vpop.permute.xlu2 %3395 }
 0x477   :  { %10565 = vst [vmem:[#allocation183_spill] sm:$0xff] %v8274_v55  ;;  %3566 = vperm.xlu1 %6100, %v7732_v48  }
 0x478   :  { %10566 = vst [vmem:[#allocation184_spill] sm:$0xff] %v8276_v51 }
 0x479   :  { %v8279_v25 = vpop.permute.xlu1 %3381 }
 0x47a   :  { %10567 = vst [vmem:[#allocation185_spill] sm:$0xff] %v8279_v25  ;;  %v10603_v25 = vld [vmem:[#allocation63_spill] sm:$0xff] }
 0x47c   :  { %3598 = vperm.xlu0 %6099, %v6569_v20   ;;  %3570 = vperm.xlu2 %6101, %v7623_v14  }
 0x47e   :  { %v8283_v18 = vpop.permute.xlu0 %3391  ;;  %v8285_v7 = vpop.permute.xlu2 %3401 }
 0x47f   :  { %10568 = vst [vmem:[#allocation186_spill] sm:$0xff] %v8283_v18  ;;  %3578 = vperm.xlu1 %6100, %v6487_v11  }
 0x480   :  { %10569 = vst [vmem:[#allocation187_spill] sm:$0xff] %v8285_v7  ;;  %v10609_v7 = vld [vmem:[#allocation75_spill] sm:$0xff] }
 0x481   :  { %v8288_v50 = vpop.permute.xlu1 %3387 }
 0x482   :  { %10570 = vst [vmem:[#allocation188_spill] sm:$0xff] %v8288_v50 }
 0x484   :  { %3610 = vperm.xlu0 %6099, %v6619_v4   ;;  %3582 = vperm.xlu2 %6101, %v6496_v21  }
 0x486   :  { %v8292_v10 = vpop.permute.xlu0 %3397  ;;  %v8294_v61 = vpop.permute.xlu2 %3407 }
 0x487   :  { %10571 = vst [vmem:[#allocation189_spill] sm:$0xff] %v8292_v10  ;;  %3590 = vperm.xlu1 %6100, %v6533_v60  }
 0x488   :  { %10572 = vst [vmem:[#allocation190_spill] sm:$0xff] %v8294_v61 }
 0x489   :  { %v8297_v16 = vpop.permute.xlu1 %3393 }
 0x48a   :  { %10573 = vst [vmem:[#allocation191_spill] sm:$0xff] %v8297_v16 }
 0x48c   :  { %3622 = vperm.xlu0 %6099, %v6671_v57   ;;  %3594 = vperm.xlu2 %6101, %v6552_v5  }
 0x48e   :  { %v8301_v45 = vpop.permute.xlu0 %3403  ;;  %v8303_v3 = vpop.permute.xlu2 %3413 }
 0x48f   :  { %10574 = vst [vmem:[#allocation192_spill] sm:$0xff] %v8301_v45  ;;  %3602 = vperm.xlu1 %6100, %v6582_v29  }
 0x490   :  { %10575 = vst [vmem:[#allocation193_spill] sm:$0xff] %v8303_v3 }
 0x491   :  { %v8306_v44 = vpop.permute.xlu1 %3399 }
 0x492   :  { %10576 = vst [vmem:[#allocation194_spill] sm:$0xff] %v8306_v44 }
 0x494   :  { %3634 = vperm.xlu0 %6099, %v6736_v62   ;;  %3606 = vperm.xlu2 %6101, %v6603_v52  }
 0x496   :  { %v8310_v0 = vpop.permute.xlu0 %3409  ;;  %v8312_v22 = vpop.permute.xlu2 %3419 }
 0x497   :  { %10577 = vst [vmem:[#allocation195_spill] sm:$0xff] %v8310_v0  ;;  %3614 = vperm.xlu1 %6100, %v6633_v17  }
 0x498   :  { %10578 = vst [vmem:[#allocation196_spill] sm:$0xff] %v8312_v22  ;;  %v6239_v22 = vmov 5  }
 0x499   :  { %v8315_v40 = vpop.permute.xlu1 %3405 }
 0x49a   :  { %10579 = vst [vmem:[#allocation197_spill] sm:$0xff] %v8315_v40 }
 0x49c   :  { %3646 = vperm.xlu0 %6099, %v10510_v42   ;;  %3618 = vperm.xlu2 %6101, %v6658_v36  }
 0x49e   :  { %v8319_v38 = vpop.permute.xlu0 %3415  ;;  %v8321_v53 = vpop.permute.xlu2 %3425 }
 0x49f   :  { %10580 = vst [vmem:[#allocation198_spill] sm:$0xff] %v8319_v38  ;;  %3626 = vperm.xlu1 %6100, %v6694_v9  }
 0x4a0   :  { %10581 = vst [vmem:[#allocation199_spill] sm:$0xff] %v8321_v53 }
 0x4a1   :  { %v8324_v12 = vpop.permute.xlu1 %3411 }
 0x4a2   :  { %10582 = vst [vmem:[#allocation200_spill] sm:$0xff] %v8324_v12 }
 0x4a4   :  { %3658 = vperm.xlu0 %6099, %v10515_v43   ;;  %3630 = vperm.xlu2 %6101, %v6717_v37  }
 0x4a6   :  { %v8328_v54 = vpop.permute.xlu0 %3421  ;;  %v8330_v56 = vpop.permute.xlu2 %3431 }
 0x4a7   :  { %10583 = vst [vmem:[#allocation201_spill] sm:$0xff] %v8328_v54  ;;  %3638 = vperm.xlu1 %6100, %v6765_v26   ;;  %v10627_v54 = vld [vmem:[#allocation92_spill] sm:$0xff] }
 0x4a8   :  { %10584 = vst [vmem:[#allocation202_spill] sm:$0xff] %v8330_v56 }
 0x4a9   :  { %v8333_v41 = vpop.permute.xlu1 %3417 }
 0x4aa   :  { %10585 = vst [vmem:[#allocation203_spill] sm:$0xff] %v8333_v41 }
 0x4ac   :  { %3670 = vperm.xlu0 %6099, %v10521_v15   ;;  %3642 = vperm.xlu2 %6101, %v10586_v49  }
 0x4ae   :  { %v8337_v6 = vpop.permute.xlu0 %3427  ;;  %v8339_v13 = vpop.permute.xlu2 %3437 }
 0x4af   :  { %10587 = vst [vmem:[#allocation9_spill] sm:$0xff] %v8337_v6  ;;  %3650 = vperm.xlu1 %6100, %v10589_v19   ;;  %v10598_v6 = vld [vmem:[#allocation24_spill] sm:$0xff] }
 0x4b0   :  { %10588 = vst [vmem:[#allocation204_spill] sm:$0xff] %v8339_v13 }
 0x4b1   :  { %v8342_v53 = vpop.permute.xlu1 %3423 }
 0x4b2   :  { %10590 = vst [vmem:[#allocation205_spill] sm:$0xff] %v8342_v53 }
 0x4b4   :  { %3682 = vperm.xlu0 %6099, %v10591_v46   ;;  %3654 = vperm.xlu2 %6101, %v10592_v2  }
 0x4b6   :  { %v8346_v56 = vpop.permute.xlu0 %3433  ;;  %v8348_v35 = vpop.permute.xlu2 %3443 }
 0x4b7   :  { %10593 = vst [vmem:[#allocation206_spill] sm:$0xff] %v8346_v56  ;;  %3662 = vperm.xlu1 %6100, %v10595_v58   ;;  %v10604_v56 = vld [vmem:[#allocation35_spill] sm:$0xff] }
 0x4b8   :  { %10594 = vst [vmem:[#allocation207_spill] sm:$0xff] %v8348_v35 }
 0x4b9   :  { %v8351_v16 = vpop.permute.xlu1 %3429 }
 0x4ba   :  { %10596 = vst [vmem:[#allocation208_spill] sm:$0xff] %v8351_v16  ;;  %v10607_v16 = vld [vmem:[#allocation43_spill] sm:$0xff] }
 0x4bc   :  { %3694 = vperm.xlu0 %6099, %v10597_v27   ;;  %3666 = vperm.xlu2 %6101, %v10598_v6  }
 0x4be   :  { %v8355_v13 = vpop.permute.xlu0 %3439  ;;  %v8357_v51 = vpop.permute.xlu2 %3449 }
 0x4bf   :  { %10599 = vst [vmem:[#allocation209_spill] sm:$0xff] %v8355_v13  ;;  %3674 = vperm.xlu1 %6100, %v10601_v1   ;;  %v10610_v13 = vld [vmem:[#allocation47_spill] sm:$0xff] }
 0x4c0   :  { %10600 = vst [vmem:[#allocation210_spill] sm:$0xff] %v8357_v51 }
 0x4c1   :  { %v8360_v10 = vpop.permute.xlu1 %3435 }
 0x4c2   :  { %10602 = vst [vmem:[#allocation211_spill] sm:$0xff] %v8360_v10  ;;  %v10613_v10 = vld [vmem:[#allocation54_spill] sm:$0xff] }
 0x4c4   :  { %3706 = vperm.xlu0 %6099, %v10603_v25   ;;  %3678 = vperm.xlu2 %6101, %v10604_v56  }
 0x4c6   :  { %v8364_v35 = vpop.permute.xlu0 %3445  ;;  %v8366_v44 = vpop.permute.xlu2 %3455 }
 0x4c7   :  { %10605 = vst [vmem:[#allocation212_spill] sm:$0xff] %v8364_v35  ;;  %3686 = vperm.xlu1 %6100, %v10607_v16   ;;  %v10615_v35 = vld [vmem:[#allocation59_spill] sm:$0xff] }
 0x4c8   :  { %10606 = vst [vmem:[#allocation213_spill] sm:$0xff] %v8366_v44  ;;  %v8539_v44 = vld [vmem:[%s10191_s2 + $0x48] sm:$0xff] }
 0x4c9   :  { %v8369_v24 = vpop.permute.xlu1 %3441  ;;  %10670 = vst [vmem:[#allocation267_spill] sm:$0xff] %v8539_v44 }
 0x4ca   :  { %10608 = vst [vmem:[#allocation214_spill] sm:$0xff] %v8369_v24  ;;  %v10618_v24 = vld [vmem:[#allocation67_spill] sm:$0xff] }
 0x4cc   :  { %3718 = vperm.xlu0 %6099, %v10609_v7   ;;  %3690 = vperm.xlu2 %6101, %v10610_v13  }
 0x4ce   :  { %v8373_v55 = vpop.permute.xlu0 %3451  ;;  %v8375_v45 = vpop.permute.xlu2 %3562 }
 0x4cf   :  { %10611 = vst [vmem:[#allocation215_spill] sm:$0xff] %v8373_v55  ;;  %3698 = vperm.xlu1 %6100, %v10613_v10   ;;  %v10620_v55 = vld [vmem:[#allocation71_spill] sm:$0xff] }
 0x4d0   :  { %10612 = vst [vmem:[#allocation216_spill] sm:$0xff] %v8375_v45 }
 0x4d1   :  { %v8378_v51 = vpop.permute.xlu1 %3447 }
 0x4d2   :  { %10614 = vst [vmem:[#allocation217_spill] sm:$0xff] %v8378_v51  ;;  %v10623_v51 = vld [vmem:[#allocation78_spill] sm:$0xff] }
 0x4d4   :  { %3730 = vperm.xlu0 %6099, %v10546_v39   ;;  %3702 = vperm.xlu2 %6101, %v10615_v35  }
 0x4d6   :  { %v8382_v50 = vpop.permute.xlu0 %3554  ;;  %v8384_v40 = vpop.permute.xlu2 %3570 }
 0x4d7   :  { %10616 = vst [vmem:[#allocation218_spill] sm:$0xff] %v8382_v50  ;;  %3710 = vperm.xlu1 %6100, %v10618_v24  }
 0x4d8   :  { %10617 = vst [vmem:[#allocation219_spill] sm:$0xff] %v8384_v40 }
 0x4d9   :  { %v8387_v61 = vpop.permute.xlu1 %3453 }
 0x4da   :  { %10619 = vst [vmem:[#allocation220_spill] sm:$0xff] %v8387_v61 }
 0x4dc   :  { %3742 = vperm.xlu0 %6099, %v7582_v23   ;;  %3714 = vperm.xlu2 %6101, %v10620_v55  }
 0x4de   :  { %v8391_v12 = vpop.permute.xlu0 %3574  ;;  %v8393_v41 = vpop.permute.xlu2 %3582 }
 0x4df   :  { %10621 = vst [vmem:[#allocation221_spill] sm:$0xff] %v8391_v12  ;;  %3722 = vperm.xlu1 %6100, %v10623_v51   ;;  %v10629_v12 = vld [vmem:[#allocation98_spill] sm:$0xff] }
 0x4e0   :  { %10622 = vst [vmem:[#allocation222_spill] sm:$0xff] %v8393_v41 }
 0x4e1   :  { %v8396_v38 = vpop.permute.xlu1 %3558 }
 0x4e2   :  { %10624 = vst [vmem:[#allocation223_spill] sm:$0xff] %v8396_v38 }
 0x4e4   :  { %6104 = vset.pattern.permute.xlu0 %v6239_v22  ;;  %3726 = vperm.xlu2 %6101, %v10545_v63  }
 0x4e5   :  { %3850 = vperm.xlu0 %6104, %v7701_v33  }
 0x4e6   :  { %v8400_v40 = vpop.permute.xlu0 %3586  ;;  %v8402_v61 = vpop.permute.xlu2 %3594 }
 0x4e7   :  { %10625 = vst [vmem:[#allocation224_spill] sm:$0xff] %v8400_v40  ;;  %3734 = vperm.xlu1 %6100, %v10627_v54  }
 0x4e8   :  { %10626 = vst [vmem:[#allocation225_spill] sm:$0xff] %v8402_v61 }
 0x4e9   :  { %v8405_v0 = vpop.permute.xlu1 %3566 }
 0x4ea   :  { %10628 = vst [vmem:[#allocation226_spill] sm:$0xff] %v8405_v0  ;;  %v8557_v0 = vld [vmem:[%s10191_s2 + $0x8] sm:$0xff] }
 0x4ec   :  { %3738 = vperm.xlu2 %6101, %v10629_v12  }
 0x4ed   :  { %3870 = vperm.xlu0 %6104, %v6496_v21  }
 0x4ee   :  { %v8409_v41 = vpop.permute.xlu0 %3598  ;;  %v8411_v38 = vpop.permute.xlu2 %3606 }
 0x4ef   :  { %10630 = vst [vmem:[#allocation227_spill] sm:$0xff] %v8409_v41  ;;  %6102 = vset.pattern.permute.xlu1 %v6239_v22 }
 0x4f0   :  { %10631 = vst [vmem:[#allocation228_spill] sm:$0xff] %v8411_v38  ;;  %3842 = vperm.xlu1 %6102, %v7604_v47  }
 0x4f1   :  { %v8414_v3 = vpop.permute.xlu1 %3578 }
 0x4f2   :  { %10632 = vst [vmem:[#allocation229_spill] sm:$0xff] %v8414_v3 }
 0x4f4   :  { %6103 = vset.pattern.permute.xlu2 %v6239_v22 }
 0x4f5   :  { %3882 = vperm.xlu0 %6104, %v6552_v5   ;;  %3846 = vperm.xlu2 %6103, %v7636_v59  }
 0x4f6   :  { %v8418_v40 = vpop.permute.xlu0 %3610  ;;  %v8420_v61 = vpop.permute.xlu2 %3618 }
 0x4f7   :  { %10633 = vst [vmem:[#allocation230_spill] sm:$0xff] %v8418_v40 }
 0x4f8   :  { %10634 = vst [vmem:[#allocation231_spill] sm:$0xff] %v8420_v61  ;;  %3854 = vperm.xlu1 %6102, %v7732_v48  }
 0x4f9   :  { %v8423_v18 = vpop.permute.xlu1 %3590 }
 0x4fa   :  { %10635 = vst [vmem:[#allocation232_spill] sm:$0xff] %v8423_v18 }
 0x4fd   :  { %3894 = vperm.xlu0 %6104, %v6603_v52   ;;  %3858 = vperm.xlu2 %6103, %v7623_v14  }
 0x4fe   :  { %v8427_v41 = vpop.permute.xlu0 %3622  ;;  %v8429_v3 = vpop.permute.xlu2 %3630 }
 0x4ff   :  { %10636 = vst [vmem:[#allocation233_spill] sm:$0xff] %v8427_v41 }
 0x500   :  { %10637 = vst [vmem:[#allocation234_spill] sm:$0xff] %v8429_v3  ;;  %3862 = vperm.xlu1 %6102, %v7665_v8  }
 0x501   :  { %v8432_v22 = vpop.permute.xlu1 %3602 }
 0x502   :  { %10638 = vst [vmem:[#allocation235_spill] sm:$0xff] %v8432_v22 }
 0x505   :  { %3906 = vperm.xlu0 %6104, %v6658_v36   ;;  %3866 = vperm.xlu2 %6103, %v6487_v11  }
 0x506   :  { %v8436_v61 = vpop.permute.xlu0 %3634  ;;  %v8438_v38 = vpop.permute.xlu2 %3642 }
 0x507   :  { %10639 = vst [vmem:[#allocation236_spill] sm:$0xff] %v8436_v61 }
 0x508   :  { %10640 = vst [vmem:[#allocation237_spill] sm:$0xff] %v8438_v38  ;;  %3874 = vperm.xlu1 %6102, %v6518_v32  }
 0x509   :  { %v8441_v18 = vpop.permute.xlu1 %3614 }
 0x50a   :  { %10641 = vst [vmem:[#allocation238_spill] sm:$0xff] %v8441_v18 }
 0x50d   :  { %3918 = vperm.xlu0 %6104, %v6717_v37   ;;  %3878 = vperm.xlu2 %6103, %v6533_v60  }
 0x50e   :  { %v8445_v41 = vpop.permute.xlu0 %3646  ;;  %v8447_v3 = vpop.permute.xlu2 %3654 }
 0x50f   :  { %10642 = vst [vmem:[#allocation239_spill] sm:$0xff] %v8445_v41 }
 0x510   :  { %10643 = vst [vmem:[#allocation240_spill] sm:$0xff] %v8447_v3  ;;  %3886 = vperm.xlu1 %6102, %v6569_v20  }
 0x511   :  { %v8450_v22 = vpop.permute.xlu1 %3626 }
 0x512   :  { %10644 = vst [vmem:[#allocation241_spill] sm:$0xff] %v8450_v22 }
 0x515   :  { %3930 = vperm.xlu0 %6104, %v10586_v49   ;;  %3890 = vperm.xlu2 %6103, %v6582_v29  }
 0x516   :  { %v8454_v61 = vpop.permute.xlu0 %3658  ;;  %v8456_v38 = vpop.permute.xlu2 %3666 }
 0x517   :  { %10645 = vst [vmem:[#allocation242_spill] sm:$0xff] %v8454_v61 }
 0x518   :  { %10646 = vst [vmem:[#allocation243_spill] sm:$0xff] %v8456_v38  ;;  %3898 = vperm.xlu1 %6102, %v6619_v4  }
 0x519   :  { %v8459_v40 = vpop.permute.xlu1 %3638 }
 0x51a   :  { %10647 = vst [vmem:[#allocation244_spill] sm:$0xff] %v8459_v40 }
 0x51d   :  { %3942 = vperm.xlu0 %6104, %v10592_v2   ;;  %3902 = vperm.xlu2 %6103, %v6633_v17  }
 0x51e   :  { %v8463_v3 = vpop.permute.xlu0 %3670  ;;  %v8465_v41 = vpop.permute.xlu2 %3678 }
 0x51f   :  { %10648 = vst [vmem:[#allocation245_spill] sm:$0xff] %v8463_v3 }
 0x520   :  { %10649 = vst [vmem:[#allocation246_spill] sm:$0xff] %v8465_v41  ;;  %3910 = vperm.xlu1 %6102, %v6671_v57  }
 0x521   :  { %v8468_v22 = vpop.permute.xlu1 %3650 }
 0x522   :  { %10650 = vst [vmem:[#allocation247_spill] sm:$0xff] %v8468_v22 }
 0x525   :  { %3954 = vperm.xlu0 %6104, %v10598_v6   ;;  %3914 = vperm.xlu2 %6103, %v6694_v9  }
 0x526   :  { %v8472_v61 = vpop.permute.xlu0 %3682  ;;  %v8474_v38 = vpop.permute.xlu2 %3690 }
 0x527   :  { %10651 = vst [vmem:[#allocation248_spill] sm:$0xff] %v8472_v61 }
 0x528   :  { %10652 = vst [vmem:[#allocation249_spill] sm:$0xff] %v8474_v38  ;;  %3922 = vperm.xlu1 %6102, %v6736_v62  }
 0x529   :  { %v8477_v40 = vpop.permute.xlu1 %3662 }
 0x52a   :  { %10653 = vst [vmem:[#allocation250_spill] sm:$0xff] %v8477_v40 }
 0x52d   :  { %3966 = vperm.xlu0 %6104, %v10604_v56   ;;  %3926 = vperm.xlu2 %6103, %v6765_v26  }
 0x52e   :  { %v8481_v18 = vpop.permute.xlu0 %3694  ;;  %v8483_v3 = vpop.permute.xlu2 %3702 }
 0x52f   :  { %10654 = vst [vmem:[#allocation251_spill] sm:$0xff] %v8481_v18 }
 0x530   :  { %10655 = vst [vmem:[#allocation252_spill] sm:$0xff] %v8483_v3  ;;  %3934 = vperm.xlu1 %6102, %v10510_v42  }
 0x531   :  { %v8486_v22 = vpop.permute.xlu1 %3674 }
 0x532   :  { %10656 = vst [vmem:[#allocation253_spill] sm:$0xff] %v8486_v22  ;;  %v8530_v22 = vld [vmem:[%s10191_s2 + $0x18] sm:$0xff] }
 0x533   :  { %10669 = vst [vmem:[#allocation266_spill] sm:$0xff] %v8530_v22 }
 0x535   :  { %3978 = vperm.xlu0 %6104, %v10610_v13   ;;  %3938 = vperm.xlu2 %6103, %v10589_v19  }
 0x536   :  { %v8490_v61 = vpop.permute.xlu0 %3706  ;;  %v8492_v38 = vpop.permute.xlu2 %3714 }
 0x537   :  { %10657 = vst [vmem:[#allocation254_spill] sm:$0xff] %v8490_v61 }
 0x538   :  { %10658 = vst [vmem:[#allocation255_spill] sm:$0xff] %v8492_v38  ;;  %3946 = vperm.xlu1 %6102, %v10515_v43  }
 0x539   :  { %v8495_v40 = vpop.permute.xlu1 %3686 }
 0x53a   :  { %10659 = vst [vmem:[#allocation256_spill] sm:$0xff] %v8495_v40 }
 0x53d   :  { %3990 = vperm.xlu0 %6104, %v10615_v35   ;;  %3950 = vperm.xlu2 %6103, %v10595_v58  }
 0x53e   :  { %v8499_v18 = vpop.permute.xlu0 %3718  ;;  %v8501_v3 = vpop.permute.xlu2 %3726 }
 0x53f   :  { %10660 = vst [vmem:[#allocation257_spill] sm:$0xff] %v8499_v18 }
 0x540   :  { %10661 = vst [vmem:[#allocation258_spill] sm:$0xff] %v8501_v3  ;;  %3958 = vperm.xlu1 %6102, %v10521_v15  }
 0x541   :  { %v8504_v31 = vpop.permute.xlu1 %3698 }
 0x542   :  { %10662 = vst [vmem:[#allocation259_spill] sm:$0xff] %v8504_v31 }
 0x545   :  { %4002 = vperm.xlu0 %6104, %v10620_v55   ;;  %3962 = vperm.xlu2 %6103, %v10601_v1  }
 0x546   :  { %v8508_v61 = vpop.permute.xlu0 %3730  ;;  %v8510_v38 = vpop.permute.xlu2 %3738 }
 0x547   :  { %10663 = vst [vmem:[#allocation260_spill] sm:$0xff] %v8508_v61 }
 0x548   :  { %10664 = vst [vmem:[#allocation261_spill] sm:$0xff] %v8510_v38  ;;  %3970 = vperm.xlu1 %6102, %v10591_v46  }
 0x549   :  { %v8513_v40 = vpop.permute.xlu1 %3710 }
 0x54a   :  { %10665 = vst [vmem:[#allocation262_spill] sm:$0xff] %v8513_v40 }
 0x54d   :  { %4014 = vperm.xlu0 %6104, %v10545_v63   ;;  %3974 = vperm.xlu2 %6103, %v10607_v16  }
 0x54e   :  { %v8517_v18 = vpop.permute.xlu0 %3742 }
 0x54f   :  { %10666 = vst [vmem:[#allocation263_spill] sm:$0xff] %v8517_v18  ;;  %v3847_v3 = vpop.permute.xlu2 %3846 }
 0x550   :  { %3982 = vperm.xlu1 %6102, %v10597_v27   ;;  %v4034_v53 = vmul.f32 %v3847_v3, %v8530_v22 }
 0x551   :  { %v8520_v31 = vpop.permute.xlu1 %3722 }
 0x552   :  { %10667 = vst [vmem:[#allocation264_spill] sm:$0xff] %v8520_v31 }
 0x555   :  { %4026 = vperm.xlu0 %6104, %v10629_v12   ;;  %3986 = vperm.xlu2 %6103, %v10613_v10  }
 0x557   :  { %v3851_v61 = vpop.permute.xlu0 %3850  ;;  %v3859_v38 = vpop.permute.xlu2 %3858 }
 0x558   :  { %3994 = vperm.xlu1 %6102, %v10603_v25   ;;  %v4037_v18 = vmul.f32 %v3859_v38, %v8539_v44 }
 0x559   :  { %v8525_v40 = vpop.permute.xlu1 %3734 }
 0x55a   :  { %10668 = vst [vmem:[#allocation265_spill] sm:$0xff] %v8525_v40 }
 0x55d   :  { %4131 = vrot.lane.b32.xlu0 %v4034_v53, %s6234_s24  ;;  %3998 = vperm.xlu2 %6103, %v10618_v24  }
 0x55f   :  { %v3871_v31 = vpop.permute.xlu0 %3870  ;;  %v3867_v41 = vpop.permute.xlu2 %3866 }
 0x560   :  { %4006 = vperm.xlu1 %6102, %v10609_v7   ;;  %v4040_v30 = vmul.f32 %v3871_v31, %v8548_v28  ;;  %v8569_v28 = vld [vmem:[%s10191_s2 + $0x28] sm:$0xff] }
 0x561   :  { %10673 = vst [vmem:[#allocation270_spill] sm:$0xff] %v8569_v28  ;;  %v4035_v44 = vmul.f32 %v3851_v61, %v8569_v28  ;;  %v8590_v61 = vld [vmem:[%s10191_s2 + $0x58] sm:$0xff] }
 0x562   :  { %v3843_v40 = vpop.permute.xlu1 %3842  ;;  %10675 = vst [vmem:[#allocation272_spill] sm:$0xff] %v8590_v61 }
 0x563   :  { %v4033_v31 = vmul.f32 %v3843_v40, %v8557_v0  ;;  %v8578_v40 = vld [vmem:[%s10191_s2 + $0x38] sm:$0xff] }
 0x565   :  { %4137 = vrot.lane.b32.xlu0 %v4037_v18, %s6234_s24  ;;  %4010 = vperm.xlu2 %6103, %v10623_v51  }
 0x567   :  { %v3883_v3 = vpop.permute.xlu0 %3882  ;;  %v3879_v53 = vpop.permute.xlu2 %3878 }
 0x568   :  { %4018 = vperm.xlu1 %6102, %v10546_v39  }
 0x56a   :  { %v3855_v45 = vpop.permute.xlu1 %3854 }
 0x56d   :  { %4143 = vrot.lane.b32.xlu0 %v4040_v30, %s6234_s24  ;;  %4022 = vperm.xlu2 %6103, %v10627_v54   ;;  %v4043_v30 = vmul.f32 %v3883_v3, %v8562_v34  ;;  %v8583_v3 = vld [vmem:[%s10191_s2 + $0xd8] sm:$0xff] }
 0x56e   :  { %10674 = vst [vmem:[#allocation271_spill] sm:$0xff] %v8583_v3 }
 0x56f   :  { %v3895_v38 = vpop.permute.xlu0 %3894  ;;  %v3891_v18 = vpop.permute.xlu2 %3890 }
 0x570   :  { %4030 = vperm.xlu1 %6102, %v7582_v23  }
 0x572   :  { %v3863_v50 = vpop.permute.xlu1 %3862 }
 0x575   :  { %4149 = vrot.lane.b32.xlu0 %v4043_v30, %s6234_s24  ;;  %4129 = vrot.lane.b32.xlu2 %v4033_v31, %s6234_s24  ;;  %v4036_v30 = vmul.f32 %v3855_v45, %v8578_v40  ;;  %v4046_v31 = vmul.f32 %v3895_v38, %v8583_v3  ;;  %v8599_v45 = vld [vmem:[%s10191_s2 + $0x68] sm:$0xff] }
 0x576   :  { %v8604_v38 = vld [vmem:[%s10191_s2 + $0x108] sm:$0xff] }
 0x577   :  { %v3907_v22 = vpop.permute.xlu0 %3906  ;;  %v3903_v23 = vpop.permute.xlu2 %3902  ;;  %10676 = vst [vmem:[#allocation273_spill] sm:$0xff] %v8604_v38 }
 0x578   :  { %4133 = vrot.lane.b32.xlu1 %v4035_v44, %s6234_s24  ;;  %v4038_v44 = vmul.f32 %v3863_v50, %v8590_v61  ;;  %v8611_v50 = vld [vmem:[%s10191_s2 + $0x88] sm:$0xff] }
 0x579   :  { %10677 = vst [vmem:[#allocation274_spill] sm:$0xff] %v8611_v50 }
 0x57a   :  { %v3875_v34 = vpop.permute.xlu1 %3874 }
 0x57d   :  { %4155 = vrot.lane.b32.xlu0 %v4046_v31, %s6234_s24  ;;  %4135 = vrot.lane.b32.xlu2 %v4036_v30, %s6234_s24  ;;  %v4039_v31 = vmul.f32 %v3867_v41, %v8599_v45  ;;  %v4049_v30 = vmul.f32 %v3907_v22, %v8604_v38  ;;  %v8620_v41 = vld [vmem:[%s10191_s2 + $0x98] sm:$0xff] }
 0x57e   :  { %10678 = vst [vmem:[#allocation275_spill] sm:$0xff] %v8620_v41  ;;  %v8625_v22 = vld [vmem:[%s10191_s2 + $0x138] sm:$0xff] }
 0x57f   :  { %v3919_v28 = vpop.permute.xlu0 %3918  ;;  %v3915_v12 = vpop.permute.xlu2 %3914  ;;  %10679 = vst [vmem:[#allocation276_spill] sm:$0xff] %v8625_v22 }
 0x580   :  { %4139 = vrot.lane.b32.xlu1 %v4038_v44, %s6234_s24  ;;  %v4041_v44 = vmul.f32 %v3875_v34, %v8611_v50  ;;  %v8632_v34 = vld [vmem:[%s10191_s2 + $0xb8] sm:$0xff] }
 0x581   :  { %10680 = vst [vmem:[#allocation277_spill] sm:$0xff] %v8632_v34 }
 0x582   :  { %v3887_v3 = vpop.permute.xlu1 %3886 }
 0x585   :  { %4161 = vrot.lane.b32.xlu0 %v4049_v30, %s6234_s24  ;;  %4141 = vrot.lane.b32.xlu2 %v4039_v31, %s6234_s24  ;;  %v4042_v30 = vmul.f32 %v3879_v53, %v8620_v41  ;;  %v4052_v31 = vmul.f32 %v3919_v28, %v8625_v22  ;;  %v8641_v53 = vld [vmem:[%s10191_s2 + $0xc8] sm:$0xff] }
 0x586   :  { %10681 = vst [vmem:[#allocation278_spill] sm:$0xff] %v8641_v53  ;;  %v8646_v28 = vld [vmem:[%s10191_s2 + $0x168] sm:$0xff] }
 0x587   :  { %v3931_v61 = vpop.permute.xlu0 %3930  ;;  %v3927_v39 = vpop.permute.xlu2 %3926  ;;  %10682 = vst [vmem:[#allocation279_spill] sm:$0xff] %v8646_v28 }
 0x588   :  { %4145 = vrot.lane.b32.xlu1 %v4041_v44, %s6234_s24  ;;  %v4044_v44 = vmul.f32 %v3887_v3, %v8632_v34  ;;  %v8653_v3 = vld [vmem:[%s10191_s2 + $0xe8] sm:$0xff] }
 0x589   :  { %10683 = vst [vmem:[#allocation280_spill] sm:$0xff] %v8653_v3 }
 0x58a   :  { %v3899_v38 = vpop.permute.xlu1 %3898 }
 0x58d   :  { %4167 = vrot.lane.b32.xlu0 %v4052_v31, %s6234_s24  ;;  %4147 = vrot.lane.b32.xlu2 %v4042_v30, %s6234_s24  ;;  %v4045_v31 = vmul.f32 %v3891_v18, %v8641_v53  ;;  %v4055_v30 = vmul.f32 %v3931_v61, %v8646_v28  ;;  %v8662_v18 = vld [vmem:[%s10191_s2 + $0xf8] sm:$0xff] }
 0x58e   :  { %10684 = vst [vmem:[#allocation281_spill] sm:$0xff] %v8662_v18  ;;  %v8667_v61 = vld [vmem:[%s10191_s2 + $0x198] sm:$0xff] }
 0x58f   :  { %v3943_v50 = vpop.permute.xlu0 %3942  ;;  %v3939_v63 = vpop.permute.xlu2 %3938  ;;  %10685 = vst [vmem:[#allocation282_spill] sm:$0xff] %v8667_v61 }
 0x590   :  { %4151 = vrot.lane.b32.xlu1 %v4044_v44, %s6234_s24  ;;  %v4047_v44 = vmul.f32 %v3899_v38, %v8653_v3  ;;  %v8674_v38 = vld [vmem:[%s10191_s2 + $0x118] sm:$0xff] }
 0x591   :  { %10686 = vst [vmem:[#allocation283_spill] sm:$0xff] %v8674_v38 }
 0x592   :  { %v3911_v22 = vpop.permute.xlu1 %3910 }
 0x595   :  { %4173 = vrot.lane.b32.xlu0 %v4055_v30, %s6234_s24  ;;  %4153 = vrot.lane.b32.xlu2 %v4045_v31, %s6234_s24  ;;  %v4048_v30 = vmul.f32 %v3903_v23, %v8662_v18  ;;  %v4058_v31 = vmul.f32 %v3943_v50, %v8667_v61  ;;  %v8683_v23 = vld [vmem:[%s10191_s2 + $0x128] sm:$0xff] }
 0x596   :  { %10687 = vst [vmem:[#allocation284_spill] sm:$0xff] %v8683_v23  ;;  %v8688_v50 = vld [vmem:[%s10191_s2 + $0x1c8] sm:$0xff] }
 0x597   :  { %v3955_v34 = vpop.permute.xlu0 %3954  ;;  %v3951_v41 = vpop.permute.xlu2 %3950  ;;  %10688 = vst [vmem:[#allocation285_spill] sm:$0xff] %v8688_v50 }
 0x598   :  { %4157 = vrot.lane.b32.xlu1 %v4047_v44, %s6234_s24  ;;  %v4050_v44 = vmul.f32 %v3911_v22, %v8674_v38  ;;  %v8695_v22 = vld [vmem:[%s10191_s2 + $0x148] sm:$0xff] }
 0x599   :  { %10689 = vst [vmem:[#allocation286_spill] sm:$0xff] %v8695_v22 }
 0x59a   :  { %v3923_v28 = vpop.permute.xlu1 %3922 }
 0x59d   :  { %4179 = vrot.lane.b32.xlu0 %v4058_v31, %s6234_s24  ;;  %4159 = vrot.lane.b32.xlu2 %v4048_v30, %s6234_s24  ;;  %v4051_v31 = vmul.f32 %v3915_v12, %v8683_v23  ;;  %v4061_v30 = vmul.f32 %v3955_v34, %v8688_v50  ;;  %v8704_v12 = vld [vmem:[%s10191_s2 + $0x158] sm:$0xff] }
 0x59e   :  { %10690 = vst [vmem:[#allocation287_spill] sm:$0xff] %v8704_v12  ;;  %v8709_v34 = vld [vmem:[%s10191_s2 + $0x1f8] sm:$0xff] }
 0x59f   :  { %v3967_v3 = vpop.permute.xlu0 %3966  ;;  %v3963_v53 = vpop.permute.xlu2 %3962  ;;  %10691 = vst [vmem:[#allocation288_spill] sm:$0xff] %v8709_v34 }
 0x5a0   :  { %4163 = vrot.lane.b32.xlu1 %v4050_v44, %s6234_s24  ;;  %v4053_v44 = vmul.f32 %v3923_v28, %v8695_v22  ;;  %v8716_v28 = vld [vmem:[%s10191_s2 + $0x178] sm:$0xff] }
 0x5a1   :  { %10692 = vst [vmem:[#allocation289_spill] sm:$0xff] %v8716_v28 }
 0x5a2   :  { %v3935_v61 = vpop.permute.xlu1 %3934 }
 0x5a5   :  { %4185 = vrot.lane.b32.xlu0 %v4061_v30, %s6234_s24  ;;  %4165 = vrot.lane.b32.xlu2 %v4051_v31, %s6234_s24  ;;  %v4054_v30 = vmul.f32 %v3927_v39, %v8704_v12  ;;  %v4064_v31 = vmul.f32 %v3967_v3, %v8709_v34  ;;  %v8725_v39 = vld [vmem:[%s10191_s2 + $0x188] sm:$0xff] }
 0x5a6   :  { %10693 = vst [vmem:[#allocation290_spill] sm:$0xff] %v8725_v39  ;;  %v8730_v3 = vld [vmem:[%s10191_s2 + $0x228] sm:$0xff] }
 0x5a7   :  { %v3979_v38 = vpop.permute.xlu0 %3978  ;;  %v3975_v18 = vpop.permute.xlu2 %3974  ;;  %10694 = vst [vmem:[#allocation291_spill] sm:$0xff] %v8730_v3 }
 0x5a8   :  { %4169 = vrot.lane.b32.xlu1 %v4053_v44, %s6234_s24  ;;  %v4056_v44 = vmul.f32 %v3935_v61, %v8716_v28  ;;  %v8737_v61 = vld [vmem:[%s10191_s2 + $0x1a8] sm:$0xff] }
 0x5a9   :  { %10695 = vst [vmem:[#allocation292_spill] sm:$0xff] %v8737_v61 }
 0x5aa   :  { %v3947_v50 = vpop.permute.xlu1 %3946 }
 0x5ad   :  { %4191 = vrot.lane.b32.xlu0 %v4064_v31, %s6234_s24  ;;  %4171 = vrot.lane.b32.xlu2 %v4054_v30, %s6234_s24  ;;  %v4057_v31 = vmul.f32 %v3939_v63, %v8725_v39  ;;  %v4067_v30 = vmul.f32 %v3979_v38, %v8730_v3  ;;  %v8746_v63 = vld [vmem:[%s10191_s2 + $0x1b8] sm:$0xff] }
 0x5ae   :  { %10696 = vst [vmem:[#allocation293_spill] sm:$0xff] %v8746_v63  ;;  %v8751_v38 = vld [vmem:[%s10191_s2 + $0x258] sm:$0xff] }
 0x5af   :  { %v3991_v22 = vpop.permute.xlu0 %3990  ;;  %v3987_v23 = vpop.permute.xlu2 %3986  ;;  %10697 = vst [vmem:[#allocation294_spill] sm:$0xff] %v8751_v38 }
 0x5b0   :  { %4175 = vrot.lane.b32.xlu1 %v4056_v44, %s6234_s24  ;;  %v4059_v44 = vmul.f32 %v3947_v50, %v8737_v61  ;;  %v6240_v50 = vmov 6  }
 0x5b1   :  { %6106 = vset.pattern.permute.xlu0 %v6240_v50  ;;  %6105 = vset.pattern.permute.xlu2 %v6240_v50 }
 0x5b2   :  { %v3959_v34 = vpop.permute.xlu1 %3958  ;;  %6107 = vset.pattern.permute.xlu1 %v6240_v50  ;;  %v8779_v50 = vld [vmem:[%s10191_s2 + $0x208] sm:$0xff] }
 0x5b3   :  { %10701 = vst [vmem:[#allocation298_spill] sm:$0xff] %v8779_v50 }
 0x5b5   :  { %4197 = vrot.lane.b32.xlu0 %v4067_v30, %s6234_s24  ;;  %4177 = vrot.lane.b32.xlu2 %v4057_v31, %s6234_s24  ;;  %v4060_v30 = vmul.f32 %v3951_v41, %v8746_v63  ;;  %v4070_v31 = vmul.f32 %v3991_v22, %v8751_v38  ;;  %v8767_v41 = vld [vmem:[%s10191_s2 + $0x1e8] sm:$0xff] }
 0x5b6   :  { %10699 = vst [vmem:[#allocation296_spill] sm:$0xff] %v8767_v41  ;;  %v8772_v22 = vld [vmem:[%s10191_s2 + $0x288] sm:$0xff] }
 0x5b7   :  { %v4003_v28 = vpop.permute.xlu0 %4002  ;;  %v3999_v12 = vpop.permute.xlu2 %3998  ;;  %10700 = vst [vmem:[#allocation297_spill] sm:$0xff] %v8772_v22 }
 0x5b8   :  { %4181 = vrot.lane.b32.xlu1 %v4059_v44, %s6234_s24  ;;  %v8758_v44 = vld [vmem:[%s10191_s2 + $0x1d8] sm:$0xff] }
 0x5b9   :  { %10698 = vst [vmem:[#allocation295_spill] sm:$0xff] %v8758_v44  ;;  %v4062_v61 = vmul.f32 %v3959_v34, %v8758_v44  ;;  %v4073_v34 = vmul.f32 %v4003_v28, %v8772_v22  ;;  %v8793_v28 = vld [vmem:[%s10191_s2 + $0x2b8] sm:$0xff] }
 0x5ba   :  { %v3971_v3 = vpop.permute.xlu1 %3970  ;;  %10702 = vst [vmem:[#allocation299_spill] sm:$0xff] %v8793_v28 }
 0x5bd   :  { %4203 = vrot.lane.b32.xlu0 %v4070_v31, %s6234_s24  ;;  %4183 = vrot.lane.b32.xlu2 %v4060_v30, %s6234_s24  ;;  %v4063_v30 = vmul.f32 %v3963_v53, %v8767_v41  ;;  %v8788_v53 = vld [vmem:[%s10191_s2 + $0x218] sm:$0xff] }
 0x5bf   :  { %v4015_v39 = vpop.permute.xlu0 %4014  ;;  %v4011_v7 = vpop.permute.xlu2 %4010 }
 0x5c0   :  { %4187 = vrot.lane.b32.xlu1 %v4062_v61, %s6234_s24  ;;  %v4065_v61 = vmul.f32 %v3971_v3, %v8779_v50  ;;  %v8800_v3 = vld [vmem:[%s10191_s2 + $0x238] sm:$0xff] }
 0x5c1   :  { %10703 = vst [vmem:[#allocation300_spill] sm:$0xff] %v8800_v3 }
 0x5c2   :  { %v3983_v31 = vpop.permute.xlu1 %3982 }
 0x5c5   :  { %4209 = vrot.lane.b32.xlu0 %v4073_v34, %s6234_s24  ;;  %4189 = vrot.lane.b32.xlu2 %v4063_v30, %s6234_s24  ;;  %v4066_v34 = vmul.f32 %v3975_v18, %v8788_v53  ;;  %v4076_v30 = vmul.f32 %v4015_v39, %v8793_v28  ;;  %v8813_v18 = vld [vmem:[%s10191_s2 + $0x248] sm:$0xff] }
 0x5c6   :  { %v8818_v39 = vld [vmem:[%s10191_s2 + $0x2e8] sm:$0xff] }
 0x5c7   :  { %v4027_v38 = vpop.permute.xlu0 %4026  ;;  %v4023_v44 = vpop.permute.xlu2 %4022  ;;  %10705 = vst [vmem:[#allocation302_spill] sm:$0xff] %v8818_v39 }
 0x5c8   :  { %4193 = vrot.lane.b32.xlu1 %v4065_v61, %s6234_s24  ;;  %v4068_v61 = vmul.f32 %v3983_v31, %v8800_v3  ;;  %v4079_v31 = vmul.f32 %v4027_v38, %v8818_v39 }
 0x5ca   :  { %v3995_v22 = vpop.permute.xlu1 %3994 }
 0x5cd   :  { %4215 = vrot.lane.b32.xlu0 %v4076_v30, %s6234_s24  ;;  %4195 = vrot.lane.b32.xlu2 %v4066_v34, %s6234_s24  ;;  %v4069_v34 = vmul.f32 %v3987_v23, %v8813_v18  ;;  %v8838_v23 = vld [vmem:[%s10191_s2 + $0x278] sm:$0xff] }
 0x5ce   :  { %10708 = vst [vmem:[#allocation305_spill] sm:$0xff] %v8838_v23  ;;  %v4072_v39 = vmul.f32 %v3999_v12, %v8838_v23  ;;  %v8857_v12 = vld [vmem:[%s10191_s2 + $0x2a8] sm:$0xff] }
 0x5cf   :  { %v8805_v50 = vpop.permute.xlu0 %4131  ;;  %v8807_v41 = vpop.permute.xlu2 %4129 }
 0x5d0   :  { %10704 = vst [vmem:[#allocation301_spill] sm:$0xff] %v8805_v50  ;;  %4199 = vrot.lane.b32.xlu1 %v4068_v61, %s6234_s24  ;;  %v8825_v50 = vld [vmem:[%s10191_s2 + $0x268] sm:$0xff] }
 0x5d1   :  { %10706 = vst [vmem:[#allocation303_spill] sm:$0xff] %v8825_v50  ;;  %v4071_v61 = vmul.f32 %v3995_v22, %v8825_v50  ;;  %v4075_v50 = vmul.f32 %v4011_v7, %v8857_v12  ;;  %v8876_v7 = vld [vmem:[%s10191_s2 + $0x2d8] sm:$0xff] }
 0x5d2   :  { %v4007_v30 = vpop.permute.xlu1 %4006 }
 0x5d5   :  { %4221 = vrot.lane.b32.xlu0 %v4079_v31, %s6234_s24  ;;  %4201 = vrot.lane.b32.xlu2 %v4069_v34, %s6234_s24  ;;  %v8844_v34 = vld [vmem:[%s10191_s2 + $0x298] sm:$0xff] }
 0x5d6   :  { %v4074_v22 = vmul.f32 %v4007_v30, %v8844_v34 }
 0x5d7   :  { %v8830_v28 = vpop.permute.xlu0 %4137  ;;  %v8832_v3 = vpop.permute.xlu2 %4135 }
 0x5d8   :  { %10707 = vst [vmem:[#allocation304_spill] sm:$0xff] %v8830_v28  ;;  %4205 = vrot.lane.b32.xlu1 %v4071_v61, %s6234_s24 }
 0x5da   :  { %v4019_v38 = vpop.permute.xlu1 %4018 }
 0x5dd   :  { %4326 = vperm.xlu0 %6106, %v7636_v59   ;;  %4207 = vrot.lane.b32.xlu2 %v4072_v39, %s6234_s24  ;;  %v8863_v39 = vld [vmem:[%s10191_s2 + $0x2c8] sm:$0xff]  ;;  %v4078_v59 = vmul.f32 %v4023_v44, %v8876_v7 }
 0x5de   :  { %v4077_v30 = vmul.f32 %v4019_v38, %v8863_v39 }
 0x5df   :  { %v8849_v31 = vpop.permute.xlu0 %4143  ;;  %v8851_v61 = vpop.permute.xlu2 %4141 }
 0x5e0   :  { %10709 = vst [vmem:[#allocation306_spill] sm:$0xff] %v8849_v31  ;;  %4211 = vrot.lane.b32.xlu1 %v4074_v22, %s6234_s24 }
 0x5e1   :  { %10710 = vst [vmem:[#allocation307_spill] sm:$0xff] %v8851_v61 }
 0x5e2   :  { %v4031_v28 = vpop.permute.xlu1 %4030 }
 0x5e5   :  { %4346 = vperm.xlu0 %6106, %v6487_v11   ;;  %4213 = vrot.lane.b32.xlu2 %v4075_v50, %s6234_s24  ;;  %v8884_v50 = vld [vmem:[%s10191_s2 + $0x2f8] sm:$0xff] }
 0x5e6   :  { %v4080_v38 = vmul.f32 %v4031_v28, %v8884_v50 }
 0x5e7   :  { %v8868_v22 = vpop.permute.xlu0 %4149  ;;  %v8870_v61 = vpop.permute.xlu2 %4147 }
 0x5e8   :  { %10711 = vst [vmem:[#allocation308_spill] sm:$0xff] %v8868_v22  ;;  %4217 = vrot.lane.b32.xlu1 %v4077_v30, %s6234_s24 }
 0x5e9   :  { %10712 = vst [vmem:[#allocation309_spill] sm:$0xff] %v8870_v61 }
 0x5ea   :  { %v8878_v31 = vpop.permute.xlu1 %4133 }
 0x5ed   :  { %4358 = vperm.xlu0 %6106, %v6533_v60   ;;  %4219 = vrot.lane.b32.xlu2 %v4078_v59, %s6234_s24 }
 0x5ef   :  { %v8889_v30 = vpop.permute.xlu0 %4155  ;;  %v8891_v61 = vpop.permute.xlu2 %4153 }
 0x5f0   :  { %10713 = vst [vmem:[#allocation310_spill] sm:$0xff] %v8889_v30  ;;  %4223 = vrot.lane.b32.xlu1 %v4080_v38, %s6234_s24 }
 0x5f1   :  { %10714 = vst [vmem:[#allocation311_spill] sm:$0xff] %v8891_v61 }
 0x5f2   :  { %v8894_v22 = vpop.permute.xlu1 %4139 }
 0x5f3   :  { %10715 = vst [vmem:[#allocation312_spill] sm:$0xff] %v8894_v22 }
 0x5f5   :  { %4370 = vperm.xlu0 %6106, %v6582_v29   ;;  %4322 = vperm.xlu2 %6105, %v7604_v47  }
 0x5f7   :  { %v8898_v44 = vpop.permute.xlu0 %4161  ;;  %v8900_v11 = vpop.permute.xlu2 %4159 }
 0x5f8   :  { %10716 = vst [vmem:[#allocation313_spill] sm:$0xff] %v8898_v44  ;;  %4330 = vperm.xlu1 %6107, %v7701_v33  }
 0x5f9   :  { %10717 = vst [vmem:[#allocation314_spill] sm:$0xff] %v8900_v11 }
 0x5fa   :  { %v8903_v59 = vpop.permute.xlu1 %4145 }
 0x5fb   :  { %10718 = vst [vmem:[#allocation315_spill] sm:$0xff] %v8903_v59 }
 0x5fd   :  { %4382 = vperm.xlu0 %6106, %v6633_v17   ;;  %4334 = vperm.xlu2 %6105, %v7732_v48  }
 0x5ff   :  { %v8907_v28 = vpop.permute.xlu0 %4167  ;;  %v8909_v38 = vpop.permute.xlu2 %4165 }
 0x600   :  { %10719 = vst [vmem:[#allocation316_spill] sm:$0xff] %v8907_v28  ;;  %4338 = vperm.xlu1 %6107, %v7623_v14  }
 0x601   :  { %10720 = vst [vmem:[#allocation317_spill] sm:$0xff] %v8909_v38 }
 0x602   :  { %v8912_v22 = vpop.permute.xlu1 %4151 }
 0x603   :  { %10721 = vst [vmem:[#allocation318_spill] sm:$0xff] %v8912_v22 }
 0x605   :  { %4394 = vperm.xlu0 %6106, %v6694_v9   ;;  %4342 = vperm.xlu2 %6105, %v7665_v8  }
 0x607   :  { %v8916_v44 = vpop.permute.xlu0 %4173  ;;  %v8918_v61 = vpop.permute.xlu2 %4171 }
 0x608   :  { %10722 = vst [vmem:[#allocation319_spill] sm:$0xff] %v8916_v44  ;;  %4350 = vperm.xlu1 %6107, %v6496_v21  }
 0x609   :  { %10723 = vst [vmem:[#allocation320_spill] sm:$0xff] %v8918_v61 }
 0x60a   :  { %v8921_v59 = vpop.permute.xlu1 %4157 }
 0x60b   :  { %10724 = vst [vmem:[#allocation321_spill] sm:$0xff] %v8921_v59 }
 0x60d   :  { %4406 = vperm.xlu0 %6106, %v6765_v26   ;;  %4354 = vperm.xlu2 %6105, %v6518_v32  }
 0x60f   :  { %v8925_v38 = vpop.permute.xlu0 %4179  ;;  %v8927_v28 = vpop.permute.xlu2 %4177 }
 0x610   :  { %10725 = vst [vmem:[#allocation322_spill] sm:$0xff] %v8925_v38  ;;  %4362 = vperm.xlu1 %6107, %v6552_v5  }
 0x611   :  { %10726 = vst [vmem:[#allocation323_spill] sm:$0xff] %v8927_v28 }
 0x612   :  { %v8930_v22 = vpop.permute.xlu1 %4163 }
 0x613   :  { %10727 = vst [vmem:[#allocation324_spill] sm:$0xff] %v8930_v22 }
 0x615   :  { %4418 = vperm.xlu0 %6106, %v10589_v19   ;;  %4366 = vperm.xlu2 %6105, %v6569_v20   ;;  %v10767_v19 = vld [vmem:[#allocation287_spill] sm:$0xff] }
 0x617   :  { %v8934_v61 = vpop.permute.xlu0 %4185  ;;  %v8936_v30 = vpop.permute.xlu2 %4183 }
 0x618   :  { %10728 = vst [vmem:[#allocation325_spill] sm:$0xff] %v8934_v61  ;;  %4374 = vperm.xlu1 %6107, %v6603_v52  }
 0x619   :  { %10729 = vst [vmem:[#allocation326_spill] sm:$0xff] %v8936_v30 }
 0x61a   :  { %v8939_v44 = vpop.permute.xlu1 %4169 }
 0x61b   :  { %10730 = vst [vmem:[#allocation327_spill] sm:$0xff] %v8939_v44 }
 0x61d   :  { %4430 = vperm.xlu0 %6106, %v10595_v58   ;;  %4378 = vperm.xlu2 %6105, %v6619_v4  }
 0x61f   :  { %v8943_v59 = vpop.permute.xlu0 %4191  ;;  %v8945_v28 = vpop.permute.xlu2 %4189 }
 0x620   :  { %10731 = vst [vmem:[#allocation328_spill] sm:$0xff] %v8943_v59  ;;  %4386 = vperm.xlu1 %6107, %v6658_v36  }
 0x621   :  { %10732 = vst [vmem:[#allocation329_spill] sm:$0xff] %v8945_v28 }
 0x622   :  { %v8948_v22 = vpop.permute.xlu1 %4175 }
 0x623   :  { %10733 = vst [vmem:[#allocation330_spill] sm:$0xff] %v8948_v22 }
 0x625   :  { %4442 = vperm.xlu0 %6106, %v10601_v1   ;;  %4390 = vperm.xlu2 %6105, %v6671_v57   ;;  %v10758_v1 = vld [vmem:[#allocation102_spill] sm:$0xff] }
 0x627   :  { %v8952_v38 = vpop.permute.xlu0 %4197  ;;  %v8954_v30 = vpop.permute.xlu2 %4195 }
 0x628   :  { %10734 = vst [vmem:[#allocation331_spill] sm:$0xff] %v8952_v38  ;;  %4398 = vperm.xlu1 %6107, %v6717_v37  }
 0x629   :  { %10735 = vst [vmem:[#allocation332_spill] sm:$0xff] %v8954_v30 }
 0x62a   :  { %v8957_v44 = vpop.permute.xlu1 %4181 }
 0x62b   :  { %10736 = vst [vmem:[#allocation333_spill] sm:$0xff] %v8957_v44 }
 0x62d   :  { %4454 = vperm.xlu0 %6106, %v10607_v16   ;;  %4402 = vperm.xlu2 %6105, %v6736_v62  }
 0x62f   :  { %v8961_v11 = vpop.permute.xlu0 %4203  ;;  %v8963_v61 = vpop.permute.xlu2 %4201 }
 0x630   :  { %10737 = vst [vmem:[#allocation334_spill] sm:$0xff] %v8961_v11  ;;  %4410 = vperm.xlu1 %6107, %v10586_v49  }
 0x631   :  { %10738 = vst [vmem:[#allocation335_spill] sm:$0xff] %v8963_v61 }
 0x632   :  { %v8966_v22 = vpop.permute.xlu1 %4187 }
 0x633   :  { %10739 = vst [vmem:[#allocation336_spill] sm:$0xff] %v8966_v22 }
 0x635   :  { %4466 = vperm.xlu0 %6106, %v10613_v10   ;;  %4414 = vperm.xlu2 %6105, %v10510_v42  }
 0x637   :  { %v8970_v30 = vpop.permute.xlu0 %4209  ;;  %v8972_v38 = vpop.permute.xlu2 %4207 }
 0x638   :  { %10740 = vst [vmem:[#allocation337_spill] sm:$0xff] %v8970_v30  ;;  %4422 = vperm.xlu1 %6107, %v10592_v2  }
 0x639   :  { %10741 = vst [vmem:[#allocation338_spill] sm:$0xff] %v8972_v38 }
 0x63a   :  { %v8975_v44 = vpop.permute.xlu1 %4193 }
 0x63b   :  { %10742 = vst [vmem:[#allocation339_spill] sm:$0xff] %v8975_v44 }
 0x63d   :  { %4478 = vperm.xlu0 %6106, %v10618_v24   ;;  %4426 = vperm.xlu2 %6105, %v10515_v43  }
 0x63f   :  { %v8979_v61 = vpop.permute.xlu0 %4215  ;;  %v8981_v11 = vpop.permute.xlu2 %4213 }
 0x640   :  { %10743 = vst [vmem:[#allocation340_spill] sm:$0xff] %v8979_v61  ;;  %4434 = vperm.xlu1 %6107, %v10598_v6  }
 0x641   :  { %10744 = vst [vmem:[#allocation341_spill] sm:$0xff] %v8981_v11 }
 0x642   :  { %v8984_v22 = vpop.permute.xlu1 %4199 }
 0x643   :  { %10745 = vst [vmem:[#allocation342_spill] sm:$0xff] %v8984_v22 }
 0x645   :  { %4490 = vperm.xlu0 %6106, %v10623_v51   ;;  %4438 = vperm.xlu2 %6105, %v10521_v15   ;;  %v10755_v51 = vld [vmem:[#allocation87_spill] sm:$0xff] }
 0x647   :  { %v8988_v38 = vpop.permute.xlu0 %4221  ;;  %v8990_v30 = vpop.permute.xlu2 %4219 }
 0x648   :  { %10746 = vst [vmem:[#allocation343_spill] sm:$0xff] %v8988_v38  ;;  %4446 = vperm.xlu1 %6107, %v10604_v56  }
 0x649   :  { %10747 = vst [vmem:[#allocation344_spill] sm:$0xff] %v8990_v30 }
 0x64a   :  { %v8993_v44 = vpop.permute.xlu1 %4205 }
 0x64b   :  { %10748 = vst [vmem:[#allocation345_spill] sm:$0xff] %v8993_v44 }
 0x64d   :  { %4502 = vperm.xlu0 %6106, %v10627_v54   ;;  %4450 = vperm.xlu2 %6105, %v10591_v46   ;;  %v10759_v46 = vld [vmem:[#allocation266_spill] sm:$0xff] }
 0x64f   :  { %v4327_v11 = vpop.permute.xlu0 %4326  ;;  %v4323_v61 = vpop.permute.xlu2 %4322 }
 0x650   :  { %4458 = vperm.xlu1 %6107, %v10610_v13   ;;  %v4513_v28 = vmul.f32 %v4323_v61, %v8557_v0  ;;  %v10752_v13 = vld [vmem:[#allocation75_spill] sm:$0xff] }
 0x652   :  { %v8998_v22 = vpop.permute.xlu1 %4211 }
 0x653   :  { %10749 = vst [vmem:[#allocation346_spill] sm:$0xff] %v8998_v22 }
 0x655   :  { %4609 = vrot.lane.b32.xlu0 %v4513_v28, %s6235_s25  ;;  %4462 = vperm.xlu2 %6105, %v10597_v27   ;;  %v10761_v27 = vld [vmem:[#allocation281_spill] sm:$0xff] }
 0x657   :  { %v4347_v30 = vpop.permute.xlu0 %4346  ;;  %v4335_v38 = vpop.permute.xlu2 %4334 }
 0x658   :  { %4470 = vperm.xlu1 %6107, %v10615_v35   ;;  %v4516_v59 = vmul.f32 %v4335_v38, %v8578_v40  ;;  %v4519_v28 = vmul.f32 %v4347_v30, %v8599_v45  ;;  %v10753_v35 = vld [vmem:[#allocation83_spill] sm:$0xff]  ;;  %v10757_v30 = vld [vmem:[#allocation278_spill] sm:$0xff] }
 0x65a   :  { %v9004_v44 = vpop.permute.xlu1 %4217 }
 0x65b   :  { %10750 = vst [vmem:[#allocation347_spill] sm:$0xff] %v9004_v44 }
 0x65d   :  { %4615 = vrot.lane.b32.xlu0 %v4516_v59, %s6235_s25  ;;  %4474 = vperm.xlu2 %6105, %v10603_v25   ;;  %v10754_v59 = vld [vmem:[#allocation275_spill] sm:$0xff]  ;;  %v10764_v25 = vld [vmem:[#allocation284_spill] sm:$0xff] }
 0x65f   :  { %v4359_v16 = vpop.permute.xlu0 %4358  ;;  %v4343_v22 = vpop.permute.xlu2 %4342 }
 0x660   :  { %4482 = vperm.xlu1 %6107, %v10620_v55   ;;  %v4522_v24 = vmul.f32 %v4359_v16, %v10754_v59  ;;  %v10760_v16 = vld [vmem:[#allocation270_spill] sm:$0xff] }
 0x662   :  { %v9010_v61 = vpop.permute.xlu1 %4223 }
 0x663   :  { %10751 = vst [vmem:[#allocation348_spill] sm:$0xff] %v9010_v61  ;;  %v10756_v61 = vld [vmem:[#allocation98_spill] sm:$0xff] }
 0x665   :  { %4621 = vrot.lane.b32.xlu0 %v4519_v28, %s6235_s25  ;;  %4486 = vperm.xlu2 %6105, %v10752_v13  }
 0x667   :  { %v4371_v10 = vpop.permute.xlu0 %4370  ;;  %v4355_v44 = vpop.permute.xlu2 %4354 }
 0x668   :  { %4494 = vperm.xlu1 %6107, %v10753_v35   ;;  %v4525_v28 = vmul.f32 %v4371_v10, %v10757_v30  ;;  %v4514_v35 = vmul.f32 %v4327_v11, %v10759_v46  ;;  %v10762_v10 = vld [vmem:[#allocation267_spill] sm:$0xff]  ;;  %v10763_v46 = vld [vmem:[#allocation272_spill] sm:$0xff] }
 0x669   :  { %v4518_v2 = vmul.f32 %v4343_v22, %v10763_v46 }
 0x66a   :  { %v4331_v38 = vpop.permute.xlu1 %4330 }
 0x66b   :  { %v4515_v59 = vmul.f32 %v4331_v38, %v10760_v16 }
 0x66d   :  { %4627 = vrot.lane.b32.xlu0 %v4522_v24, %s6235_s25  ;;  %4498 = vperm.xlu2 %6105, %v10755_v51  }
 0x66f   :  { %v4383_v55 = vpop.permute.xlu0 %4382  ;;  %v4367_v54 = vpop.permute.xlu2 %4366 }
 0x670   :  { %4506 = vperm.xlu1 %6107, %v10756_v61   ;;  %v4528_v58 = vmul.f32 %v4383_v55, %v10761_v27  ;;  %v10765_v27 = vld [vmem:[#allocation268_spill] sm:$0xff] }
 0x672   :  { %v4339_v45 = vpop.permute.xlu1 %4338 }
 0x673   :  { %v4517_v30 = vmul.f32 %v4339_v45, %v10762_v10 }
 0x675   :  { %4633 = vrot.lane.b32.xlu0 %v4525_v28, %s6235_s25  ;;  %4510 = vperm.xlu2 %6105, %v10758_v1  }
 0x677   :  { %v4395_v56 = vpop.permute.xlu0 %4394  ;;  %v4379_v6 = vpop.permute.xlu2 %4378 }
 0x678   :  { %4611 = vrot.lane.b32.xlu1 %v4514_v35, %s6235_s25  ;;  %v4531_v35 = vmul.f32 %v4395_v56, %v10764_v25  ;;  %v10768_v25 = vld [vmem:[#allocation269_spill] sm:$0xff] }
 0x67a   :  { %v4351_v24 = vpop.permute.xlu1 %4350 }
 0x67b   :  { %v4520_v55 = vmul.f32 %v4351_v24, %v10765_v27  ;;  %v10769_v24 = vld [vmem:[#allocation277_spill] sm:$0xff]  ;;  %v10770_v27 = vld [vmem:[#allocation290_spill] sm:$0xff] }
 0x67d   :  { %4639 = vrot.lane.b32.xlu0 %v4528_v58, %s6235_s25  ;;  %4613 = vrot.lane.b32.xlu2 %v4515_v59, %s6235_s25  ;;  %v10766_v59 = vld [vmem:[#allocation274_spill] sm:$0xff] }
 0x67e   :  { %v4521_v10 = vmul.f32 %v4355_v44, %v10766_v59 }
 0x67f   :  { %v4407_v28 = vpop.permute.xlu0 %4406  ;;  %v4391_v61 = vpop.permute.xlu2 %4390 }
 0x680   :  { %4617 = vrot.lane.b32.xlu1 %v4517_v30, %s6235_s25  ;;  %v4534_v30 = vmul.f32 %v4407_v28, %v10767_v19  ;;  %v10771_v19 = vld [vmem:[#allocation271_spill] sm:$0xff] }
 0x682   :  { %v4363_v11 = vpop.permute.xlu1 %4362 }
 0x683   :  { %v4523_v56 = vmul.f32 %v4363_v11, %v10768_v25 }
 0x685   :  { %4645 = vrot.lane.b32.xlu0 %v4531_v35, %s6235_s25  ;;  %4619 = vrot.lane.b32.xlu2 %v4518_v2, %s6235_s25  ;;  %v4524_v35 = vmul.f32 %v4367_v54, %v10769_v24  ;;  %v10773_v54 = vld [vmem:[#allocation273_spill] sm:$0xff] }
 0x687   :  { %v4419_v58 = vpop.permute.xlu0 %4418  ;;  %v4403_v38 = vpop.permute.xlu2 %4402 }
 0x688   :  { %4623 = vrot.lane.b32.xlu1 %v4520_v55, %s6235_s25  ;;  %v4537_v55 = vmul.f32 %v4419_v58, %v10770_v27  ;;  %v6241_v27 = vmov 7  }
 0x689   :  { %6108 = vset.pattern.permute.xlu0 %v6241_v27  ;;  %6109 = vset.pattern.permute.xlu1 %v6241_v27 }
 0x68a   :  { %v4375_v45 = vpop.permute.xlu1 %4374  ;;  %6110 = vset.pattern.permute.xlu2 %v6241_v27  ;;  %v10784_v27 = vld [vmem:[#allocation285_spill] sm:$0xff] }
 0x68b   :  { %v4526_v44 = vmul.f32 %v4375_v45, %v10771_v19  ;;  %v10775_v19 = vld [vmem:[#allocation296_spill] sm:$0xff] }
 0x68d   :  { %4651 = vrot.lane.b32.xlu0 %v4534_v30, %s6235_s25  ;;  %4625 = vrot.lane.b32.xlu2 %v4521_v10, %s6235_s25  ;;  %v10772_v10 = vld [vmem:[#allocation280_spill] sm:$0xff] }
 0x68e   :  { %v4527_v30 = vmul.f32 %v4379_v6, %v10772_v10  ;;  %v10776_v6 = vld [vmem:[#allocation276_spill] sm:$0xff] }
 0x68f   :  { %v4431_v22 = vpop.permute.xlu0 %4430  ;;  %v4415_v46 = vpop.permute.xlu2 %4414 }
 0x690   :  { %4629 = vrot.lane.b32.xlu1 %v4523_v56, %s6235_s25  ;;  %v4540_v25 = vmul.f32 %v4431_v22, %v8746_v63  ;;  %v10786_v63 = vld [vmem:[#allocation218_spill] sm:$0xff] }
 0x692   :  { %v4387_v2 = vpop.permute.xlu1 %4386 }
 0x693   :  { %v4529_v58 = vmul.f32 %v4387_v2, %v10773_v54 }
 0x695   :  { %4657 = vrot.lane.b32.xlu0 %v4537_v55, %s6235_s25  ;;  %4631 = vrot.lane.b32.xlu2 %v4524_v35, %s6235_s25  ;;  %v10774_v35 = vld [vmem:[#allocation283_spill] sm:$0xff] }
 0x696   :  { %v4530_v55 = vmul.f32 %v4391_v61, %v10774_v35  ;;  %v10778_v61 = vld [vmem:[#allocation279_spill] sm:$0xff] }
 0x697   :  { %v4443_v28 = vpop.permute.xlu0 %4442  ;;  %v4427_v59 = vpop.permute.xlu2 %4426 }
 0x698   :  { %4635 = vrot.lane.b32.xlu1 %v4526_v44, %s6235_s25  ;;  %v4543_v44 = vmul.f32 %v4443_v28, %v10775_v19 }
 0x69a   :  { %v4399_v11 = vpop.permute.xlu1 %4398 }
 0x69b   :  { %v4532_v22 = vmul.f32 %v4399_v11, %v10776_v6 }
 0x69d   :  { %4663 = vrot.lane.b32.xlu0 %v4540_v25, %s6235_s25  ;;  %4637 = vrot.lane.b32.xlu2 %v4527_v30, %s6235_s25  ;;  %v10777_v30 = vld [vmem:[#allocation286_spill] sm:$0xff] }
 0x69e   :  { %v4533_v54 = vmul.f32 %v4403_v38, %v10777_v30 }
 0x69f   :  { %v4455_v56 = vpop.permute.xlu0 %4454  ;;  %v4439_v24 = vpop.permute.xlu2 %4438 }
 0x6a0   :  { %4641 = vrot.lane.b32.xlu1 %v4529_v58, %s6235_s25  ;;  %v4546_v58 = vmul.f32 %v4455_v56, %v8788_v53  ;;  %v10780_v53 = vld [vmem:[#allocation282_spill] sm:$0xff] }
 0x6a2   :  { %v4411_v45 = vpop.permute.xlu1 %4410 }
 0x6a3   :  { %v4535_v28 = vmul.f32 %v4411_v45, %v10778_v61 }
 0x6a5   :  { %4669 = vrot.lane.b32.xlu0 %v4543_v44, %s6235_s25  ;;  %4643 = vrot.lane.b32.xlu2 %v4530_v55, %s6235_s25  ;;  %v10779_v55 = vld [vmem:[#allocation289_spill] sm:$0xff] }
 0x6a6   :  { %v4536_v6 = vmul.f32 %v4415_v46, %v10779_v55  ;;  %v6135_v46 = vld [vmem:[%s10191_s2] sm:$0xff] }
 0x6a7   :  { %v4467_v10 = vpop.permute.xlu0 %4466  ;;  %v4451_v25 = vpop.permute.xlu2 %4450 }
 0x6a8   :  { %4647 = vrot.lane.b32.xlu1 %v4532_v22, %s6235_s25  ;;  %v4549_v22 = vmul.f32 %v4467_v10, %v8813_v18  ;;  %v10781_v18 = vld [vmem:[#allocation132_spill] sm:$0xff] }
 0x6a9   :  { %v2065_v10 = vmul.f32 %v6135_v46, %v10781_v18  ;;  %v3745_v46 = vmul.f32 %v10786_v63, %v8557_v0  ;;  %v10791_v63 = vld [vmem:[#allocation288_spill] sm:$0xff] }
 0x6aa   :  { %v4423_v2 = vpop.permute.xlu1 %4422 }
 0x6ab   :  { %v4538_v38 = vmul.f32 %v4423_v2, %v10780_v53  ;;  %v10785_v53 = vld [vmem:[#allocation162_spill] sm:$0xff] }
 0x6ad   :  { %4675 = vrot.lane.b32.xlu0 %v4546_v58, %s6235_s25  ;;  %4649 = vrot.lane.b32.xlu2 %v4533_v54, %s6235_s25  ;;  %v10782_v54 = vld [vmem:[#allocation292_spill] sm:$0xff] }
 0x6ae   :  { %v4539_v58 = vmul.f32 %v4427_v59, %v10782_v54  ;;  %v6136_v59 = vld [vmem:[%s10191_s2 + $0x30] sm:$0xff]  ;;  %v10790_v54 = vld [vmem:[#allocation173_spill] sm:$0xff] }
 0x6af   :  { %v4479_v35 = vpop.permute.xlu0 %4478  ;;  %v9066_v44 = vpop.permute.xlu2 %4462 }
 0x6b0   :  { %4653 = vrot.lane.b32.xlu1 %v4535_v28, %s6235_s25  ;;  %v4552_v61 = vmul.f32 %v4479_v35, %v8838_v23  ;;  %v10783_v28 = vld [vmem:[#allocation167_spill] sm:$0xff] }
 0x6b1   :  { %v2545_v55 = vadd.f32 %v10783_v28, %v2065_v10  ;;  %v10787_v35 = vld [vmem:[#allocation143_spill] sm:$0xff]  ;;  %v10788_v10 = vld [vmem:[#allocation94_spill] sm:$0xff] }
 0x6b2   :  { %v4435_v11 = vpop.permute.xlu1 %4434  ;;  %v2068_v18 = vmul.f32 %v6136_v59, %v10787_v35  ;;  %v10789_v28 = vld [vmem:[#allocation295_spill] sm:$0xff] }
 0x6b3   :  { %v4541_v2 = vmul.f32 %v4435_v11, %v10784_v27  ;;  %v4542_v11 = vmul.f32 %v4439_v24, %v10789_v28  ;;  %v10792_v35 = vld [vmem:[#allocation171_spill] sm:$0xff] }
 0x6b5   :  { %4681 = vrot.lane.b32.xlu0 %v4549_v22, %s6235_s25  ;;  %4655 = vrot.lane.b32.xlu2 %v4536_v6, %s6235_s25 }
 0x6b7   :  { %v4491_v56 = vpop.permute.xlu0 %4490  ;;  %v9074_v45 = vpop.permute.xlu2 %4474 }
 0x6b8   :  { %4659 = vrot.lane.b32.xlu1 %v4538_v38, %s6235_s25  ;;  %v3025_v38 = vadd.f32 %v10785_v53, %v2545_v55  ;;  %v4555_v23 = vmul.f32 %v4491_v56, %v8857_v12  ;;  %v2548_v55 = vadd.f32 %v10790_v54, %v2068_v18  ;;  %v10795_v56 = vld [vmem:[#allocation174_spill] sm:$0xff] }
 0x6ba   :  { %v4447_v30 = vpop.permute.xlu1 %4446 }
 0x6bd   :  { %4687 = vrot.lane.b32.xlu0 %v4552_v61, %s6235_s25  ;;  %4661 = vrot.lane.b32.xlu2 %v4539_v58, %s6235_s25  ;;  %v3505_v61 = vadd.f32 %v10788_v10, %v3025_v38  ;;  %v3028_v38 = vadd.f32 %v10792_v35, %v2548_v55  ;;  %v10793_v10 = vld [vmem:[#allocation226_spill] sm:$0xff] }
 0x6be   :  { %v3748_v24 = vmul.f32 %v10793_v10, %v8578_v40  ;;  %v10798_v40 = vld [vmem:[#allocation170_spill] sm:$0xff]  ;;  %v10801_v10 = vld [vmem:[#allocation216_spill] sm:$0xff] }
 0x6bf   :  { %v4503_v6 = vpop.permute.xlu0 %4502  ;;  %v4487_v22 = vpop.permute.xlu2 %4486  ;;  %v3793_v53 = vadd.f32 %v3745_v46, %v3505_v61  ;;  %v3508_v54 = vadd.f32 %v10795_v56, %v3028_v38  ;;  %v10796_v46 = vld [vmem:[#allocation298_spill] sm:$0xff]  ;;  %v3747_v56 = vmul.f32 %v10801_v10, %v10760_v16 }
 0x6c0   :  { %4665 = vrot.lane.b32.xlu1 %v4541_v2, %s6235_s25  ;;  %v4544_v2 = vmul.f32 %v4447_v30, %v10791_v63  ;;  %v4545_v18 = vmul.f32 %v4451_v25, %v10796_v46  ;;  %v6137_v30 = vld [vmem:[%s10191_s2 + $0x20] sm:$0xff] }
 0x6c1   :  { %v4273_v0 = vadd.f32 %v8807_v41, %v3793_v53  ;;  %v4558_v41 = vmul.f32 %v4503_v6, %v8876_v7  ;;  %v10797_v61 = vld [vmem:[#allocation138_spill] sm:$0xff]  ;;  %v3796_v55 = vadd.f32 %v3748_v24, %v3508_v54  ;;  %v10800_v6 = vld [vmem:[#allocation172_spill] sm:$0xff] }
 0x6c2   :  { %v4459_v58 = vpop.permute.xlu1 %4458  ;;  %v10803_v24 = vld [vmem:[#allocation90_spill] sm:$0xff] }
 0x6c3   :  { %v4276_v53 = vadd.f32 %v8832_v3, %v3796_v55 }
 0x6c5   :  { %4693 = vrot.lane.b32.xlu0 %v4555_v23, %s6235_s25  ;;  %4667 = vrot.lane.b32.xlu2 %v4542_v11, %s6235_s25  ;;  %v2067_v11 = vmul.f32 %v6137_v30, %v10797_v61  ;;  %v10805_v61 = vld [vmem:[#allocation294_spill] sm:$0xff] }
 0x6c7   :  { %v4610_v27 = vpop.permute.xlu0 %4609  ;;  %v4499_v59 = vpop.permute.xlu2 %4498 }
 0x6c8   :  { %v9106_v28 = vadd.f32 %v4610_v27, %v4273_v0  ;;  %4671 = vrot.lane.b32.xlu1 %v4544_v2, %s6235_s25  ;;  %v2547_v27 = vadd.f32 %v10798_v40, %v2067_v11  ;;  %v10799_v0 = vld [vmem:[#allocation291_spill] sm:$0xff] }
 0x6c9   :  { %v4547_v2 = vmul.f32 %v4459_v58, %v10799_v0 }
 0x6ca   :  { %10794 = vst [vmem:[#allocation75_spill] sm:$0xff] %v9106_v28  ;;  %v4471_v23 = vpop.permute.xlu1 %4470  ;;  %v3027_v38 = vadd.f32 %v10800_v6, %v2547_v27 }
 0x6cb   :  { %v4550_v11 = vmul.f32 %v4471_v23, %v10805_v61 }
 0x6cc   :  { %v3507_v54 = vadd.f32 %v10803_v24, %v3027_v38 }
 0x6cd   :  { %4699 = vrot.lane.b32.xlu0 %v4558_v41, %s6235_s25  ;;  %4673 = vrot.lane.b32.xlu2 %v4545_v18, %s6235_s25  ;;  %v10804_v41 = vld [vmem:[#allocation300_spill] sm:$0xff] }
 0x6ce   :  { %v4548_v30 = vmul.f32 %v9066_v44, %v10804_v41  ;;  %v3795_v3 = vadd.f32 %v3747_v56, %v3507_v54  ;;  %v4557_v56 = vmul.f32 %v4499_v59, %v8863_v39 }
 0x6cf   :  { %v4616_v25 = vpop.permute.xlu0 %4615  ;;  %v4511_v35 = vpop.permute.xlu2 %4510 }
 0x6d0   :  { %v9124_v46 = vadd.f32 %v4616_v25, %v4276_v53  ;;  %4677 = vrot.lane.b32.xlu1 %v4547_v2, %s6235_s25  ;;  %v4275_v58 = vadd.f32 %v8878_v31, %v3795_v3  ;;  %v10808_v53 = vld [vmem:[#allocation303_spill] sm:$0xff]  ;;  %v4554_v25 = vmul.f32 %v4487_v22, %v8844_v34  ;;  %v10816_v22 = vld [vmem:[#allocation302_spill] sm:$0xff]  ;;  %v4560_v41 = vmul.f32 %v4511_v35, %v8884_v50 }
 0x6d1   :  { %v4551_v44 = vmul.f32 %v9074_v45, %v10808_v53  ;;  %v10812_v45 = vld [vmem:[#allocation299_spill] sm:$0xff] }
 0x6d2   :  { %10802 = vst [vmem:[#allocation275_spill] sm:$0xff] %v9124_v46  ;;  %v4483_v18 = vpop.permute.xlu1 %4482  ;;  %v10859_v46 = vld [vmem:[#allocation67_spill] sm:$0xff] }
 0x6d5   :  { %4802 = vperm.xlu0 %6108, %v7604_v47   ;;  %4679 = vrot.lane.b32.xlu2 %v4548_v30, %s6235_s25  ;;  %v10809_v47 = vld [vmem:[#allocation297_spill] sm:$0xff] }
 0x6d6   :  { %v4553_v0 = vmul.f32 %v4483_v18, %v10809_v47  ;;  %v10820_v30 = vld [vmem:[#allocation109_spill] sm:$0xff] }
 0x6d7   :  { %v9134_v16 = vpop.permute.xlu0 %4621  ;;  %v4614_v55 = vpop.permute.xlu2 %4613 }
 0x6d8   :  { %10806 = vst [vmem:[#allocation87_spill] sm:$0xff] %v9134_v16  ;;  %v9136_v40 = vadd.f32 %v4614_v55, %v4275_v58  ;;  %4683 = vrot.lane.b32.xlu1 %v4550_v11, %s6235_s25  ;;  %v10826_v55 = vld [vmem:[#allocation2_spill] sm:$0xff] }
 0x6da   :  { %10807 = vst [vmem:[#allocation278_spill] sm:$0xff] %v9136_v40  ;;  %v4495_v27 = vpop.permute.xlu1 %4494 }
 0x6db   :  { %v4556_v6 = vmul.f32 %v4495_v27, %v10812_v45 }
 0x6dd   :  { %4822 = vperm.xlu0 %6108, %v7665_v8   ;;  %4685 = vrot.lane.b32.xlu2 %v4551_v44, %s6235_s25  ;;  %v10838_v44 = vld [vmem:[#allocation13_spill] sm:$0xff] }
 0x6df   :  { %v9144_v31 = vpop.permute.xlu0 %4627  ;;  %v9146_v23 = vpop.permute.xlu2 %4619 }
 0x6e0   :  { %10810 = vst [vmem:[#allocation102_spill] sm:$0xff] %v9144_v31  ;;  %4689 = vrot.lane.b32.xlu1 %v4553_v0, %s6235_s25  ;;  %v10840_v0 = vld [vmem:[#allocation16_spill] sm:$0xff] }
 0x6e1   :  { %10811 = vst [vmem:[#allocation266_spill] sm:$0xff] %v9146_v23  ;;  %v10862_v23 = vld [vmem:[#allocation47_spill] sm:$0xff] }
 0x6e2   :  { %v4507_v2 = vpop.permute.xlu1 %4506 }
 0x6e5   :  { %4834 = vperm.xlu0 %6108, %v6518_v32   ;;  %4691 = vrot.lane.b32.xlu2 %v4554_v25, %s6235_s25  ;;  %v4559_v32 = vmul.f32 %v4507_v2, %v10816_v22  ;;  %v10843_v25 = vld [vmem:[#allocation20_spill] sm:$0xff] }
 0x6e7   :  { %v9153_v8 = vpop.permute.xlu0 %4633  ;;  %v9155_v38 = vpop.permute.xlu2 %4625 }
 0x6e8   :  { %10813 = vst [vmem:[#allocation270_spill] sm:$0xff] %v9153_v8  ;;  %4695 = vrot.lane.b32.xlu1 %v4556_v6, %s6235_s25  ;;  %v10846_v6 = vld [vmem:[#allocation24_spill] sm:$0xff] }
 0x6e9   :  { %10814 = vst [vmem:[#allocation281_spill] sm:$0xff] %v9155_v38 }
 0x6ea   :  { %v9158_v10 = vpop.permute.xlu1 %4611 }
 0x6eb   :  { %10815 = vst [vmem:[#allocation267_spill] sm:$0xff] %v9158_v10 }
 0x6ed   :  { %4846 = vperm.xlu0 %6108, %v6569_v20   ;;  %4697 = vrot.lane.b32.xlu2 %v4557_v56, %s6235_s25 }
 0x6ef   :  { %v9164_v24 = vpop.permute.xlu0 %4639  ;;  %v9166_v54 = vpop.permute.xlu2 %4631 }
 0x6f0   :  { %10817 = vst [vmem:[#allocation272_spill] sm:$0xff] %v9166_v54  ;;  %4701 = vrot.lane.b32.xlu1 %v4559_v32, %s6235_s25 }
 0x6f2   :  { %v9169_v18 = vpop.permute.xlu1 %4617 }
 0x6f3   :  { %10818 = vst [vmem:[#allocation284_spill] sm:$0xff] %v9169_v18  ;;  %v10861_v18 = vld [vmem:[#allocation54_spill] sm:$0xff] }
 0x6f5   :  { %4858 = vperm.xlu0 %6108, %v6619_v4   ;;  %4703 = vrot.lane.b32.xlu2 %v4560_v41, %s6235_s25  ;;  %v10848_v41 = vld [vmem:[#allocation35_spill] sm:$0xff] }
 0x6f7   :  { %v9174_v59 = vpop.permute.xlu0 %4645  ;;  %v9176_v20 = vpop.permute.xlu2 %4637 }
 0x6f8   :  { %10819 = vst [vmem:[#allocation268_spill] sm:$0xff] %v9174_v59  ;;  %4806 = vperm.xlu1 %6109, %v10820_v30  }
 0x6fa   :  { %v9179_v3 = vpop.permute.xlu1 %4623 }
 0x6fb   :  { %10821 = vst [vmem:[#allocation274_spill] sm:$0xff] %v9179_v3 }
 0x6fd   :  { %4870 = vperm.xlu0 %6108, %v6671_v57   ;;  %4810 = vperm.xlu2 %6110, %v7701_v33  }
 0x6ff   :  { %v9183_v58 = vpop.permute.xlu0 %4651  ;;  %v9185_v61 = vpop.permute.xlu2 %4643 }
 0x700   :  { %10822 = vst [vmem:[#allocation287_spill] sm:$0xff] %v9183_v58  ;;  %4814 = vperm.xlu1 %6109, %v7732_v48  }
 0x701   :  { %10823 = vst [vmem:[#allocation269_spill] sm:$0xff] %v9185_v61 }
 0x702   :  { %v9188_v4 = vpop.permute.xlu1 %4629 }
 0x703   :  { %10824 = vst [vmem:[#allocation277_spill] sm:$0xff] %v9188_v4 }
 0x705   :  { %4882 = vperm.xlu0 %6108, %v6736_v62   ;;  %4818 = vperm.xlu2 %6110, %v7623_v14  }
 0x707   :  { %v9192_v35 = vpop.permute.xlu0 %4657  ;;  %v9194_v11 = vpop.permute.xlu2 %4649 }
 0x708   :  { %10825 = vst [vmem:[#allocation271_spill] sm:$0xff] %v9194_v11  ;;  %4826 = vperm.xlu1 %6109, %v10826_v55   ;;  %v10850_v55 = vld [vmem:[#allocation39_spill] sm:$0xff] }
 0x70a   :  { %v9197_v57 = vpop.permute.xlu1 %4635 }
 0x70b   :  { %10827 = vst [vmem:[#allocation280_spill] sm:$0xff] %v9197_v57 }
 0x70d   :  { %4894 = vperm.xlu0 %6108, %v10510_v42   ;;  %4830 = vperm.xlu2 %6110, %v6496_v21  }
 0x70f   :  { %v9201_v33 = vpop.permute.xlu0 %4663  ;;  %v9203_v48 = vpop.permute.xlu2 %4655 }
 0x710   :  { %4838 = vperm.xlu1 %6109, %v6533_v60  }
 0x712   :  { %v9206_v62 = vpop.permute.xlu1 %4641 }
 0x713   :  { %10828 = vst [vmem:[#allocation273_spill] sm:$0xff] %v9206_v62 }
 0x715   :  { %4906 = vperm.xlu0 %6108, %v10515_v43   ;;  %4842 = vperm.xlu2 %6110, %v6552_v5  }
 0x717   :  { %v9210_v14 = vpop.permute.xlu0 %4669  ;;  %v9212_v27 = vpop.permute.xlu2 %4661 }
 0x718   :  { %4850 = vperm.xlu1 %6109, %v6582_v29  }
 0x71a   :  { %v9215_v42 = vpop.permute.xlu1 %4647 }
 0x71b   :  { %10829 = vst [vmem:[#allocation283_spill] sm:$0xff] %v9215_v42 }
 0x71d   :  { %4918 = vperm.xlu0 %6108, %v10521_v15   ;;  %4854 = vperm.xlu2 %6110, %v6603_v52  }
 0x71f   :  { %v9219_v21 = vpop.permute.xlu0 %4675  ;;  %v9221_v60 = vpop.permute.xlu2 %4667 }
 0x720   :  { %10830 = vst [vmem:[#allocation296_spill] sm:$0xff] %v9219_v21  ;;  %4862 = vperm.xlu1 %6109, %v6633_v17   ;;  %v10858_v21 = vld [vmem:[#allocation71_spill] sm:$0xff] }
 0x722   :  { %v9224_v43 = vpop.permute.xlu1 %4653 }
 0x723   :  { %10831 = vst [vmem:[#allocation276_spill] sm:$0xff] %v9224_v43  ;;  %v10866_v43 = vld [vmem:[#allocation293_spill] sm:$0xff] }
 0x725   :  { %4990 = vperm.xlu0 %6108, %v10758_v1   ;;  %4866 = vperm.xlu2 %6110, %v6658_v36  }
 0x727   :  { %v9228_v5 = vpop.permute.xlu0 %4681  ;;  %v9230_v29 = vpop.permute.xlu2 %4673 }
 0x728   :  { %10832 = vst [vmem:[#allocation286_spill] sm:$0xff] %v9228_v5  ;;  %4874 = vperm.xlu1 %6109, %v6694_v9  }
 0x729   :  { %10833 = vst [vmem:[#allocation279_spill] sm:$0xff] %v9230_v29 }
 0x72a   :  { %v9233_v15 = vpop.permute.xlu1 %4659 }
 0x72d   :  { %4978 = vperm.xlu0 %6108, %v10755_v51   ;;  %4878 = vperm.xlu2 %6110, %v6717_v37   ;;  %v10839_v37 = vld [vmem:[#allocation63_spill] sm:$0xff] }
 0x72f   :  { %v9237_v52 = vpop.permute.xlu0 %4687  ;;  %v9239_v17 = vpop.permute.xlu2 %4679 }
 0x730   :  { %10834 = vst [vmem:[#allocation289_spill] sm:$0xff] %v9237_v52  ;;  %4886 = vperm.xlu1 %6109, %v6765_v26  }
 0x731   :  { %10835 = vst [vmem:[#allocation282_spill] sm:$0xff] %v9239_v17  ;;  %v10860_v17 = vld [vmem:[#allocation59_spill] sm:$0xff] }
 0x732   :  { %v9242_v1 = vpop.permute.xlu1 %4665 }
 0x735   :  { %4966 = vperm.xlu0 %6108, %v10752_v13   ;;  %4890 = vperm.xlu2 %6110, %v10586_v49   ;;  %v10845_v49 = vld [vmem:[#allocation51_spill] sm:$0xff] }
 0x737   :  { %v9246_v36 = vpop.permute.xlu0 %4693  ;;  %v9248_v9 = vpop.permute.xlu2 %4685 }
 0x738   :  { %10836 = vst [vmem:[#allocation132_spill] sm:$0xff] %v9246_v36  ;;  %4898 = vperm.xlu1 %6109, %v10838_v44   ;;  %v10851_v44 = vld [vmem:[#allocation30_spill] sm:$0xff] }
 0x739   :  { %10837 = vst [vmem:[#allocation167_spill] sm:$0xff] %v9248_v9 }
 0x73a   :  { %v9251_v51 = vpop.permute.xlu1 %4671 }
 0x73d   :  { %4954 = vperm.xlu0 %6108, %v10839_v37   ;;  %4902 = vperm.xlu2 %6110, %v10840_v0  }
 0x73f   :  { %v9255_v2 = vpop.permute.xlu0 %4699  ;;  %v9257_v26 = vpop.permute.xlu2 %4691 }
 0x740   :  { %10841 = vst [vmem:[#allocation162_spill] sm:$0xff] %v9255_v2  ;;  %4910 = vperm.xlu1 %6109, %v10843_v25   ;;  %v10852_v25 = vld [vmem:[#allocation98_spill] sm:$0xff] }
 0x741   :  { %10842 = vst [vmem:[#allocation218_spill] sm:$0xff] %v9257_v26 }
 0x742   :  { %v9260_v13 = vpop.permute.xlu1 %4677 }
 0x743   :  { %10844 = vst [vmem:[#allocation143_spill] sm:$0xff] %v9260_v13 }
 0x745   :  { %4942 = vperm.xlu0 %6108, %v10845_v49   ;;  %4914 = vperm.xlu2 %6110, %v10846_v6   ;;  %v10854_v6 = vld [vmem:[#allocation92_spill] sm:$0xff] }
 0x747   :  { %v9264_v56 = vpop.permute.xlu0 %4802  ;;  %v9266_v32 = vpop.permute.xlu2 %4697 }
 0x748   :  { %10847 = vst [vmem:[#allocation94_spill] sm:$0xff] %v9266_v32  ;;  %4926 = vperm.xlu1 %6109, %v10848_v41   ;;  %v10855_v41 = vld [vmem:[#allocation83_spill] sm:$0xff]  ;;  %v10865_v32 = vld [vmem:[#allocation285_spill] sm:$0xff] }
 0x74a   :  { %v9269_v30 = vpop.permute.xlu1 %4683 }
 0x74b   :  { %10849 = vst [vmem:[#allocation173_spill] sm:$0xff] %v9269_v30  ;;  %v10863_v30 = vld [vmem:[#allocation43_spill] sm:$0xff] }
 0x74d   :  { %4930 = vperm.xlu0 %6108, %v10850_v55   ;;  %4922 = vperm.xlu2 %6110, %v10851_v44   ;;  %v10857_v55 = vld [vmem:[#allocation78_spill] sm:$0xff] }
 0x74f   :  { %v9273_v37 = vpop.permute.xlu0 %4822  ;;  %v9275_v0 = vpop.permute.xlu2 %4703 }
 0x750   :  { %4986 = vperm.xlu1 %6109, %v10852_v25  }
 0x752   :  { %v9278_v49 = vpop.permute.xlu1 %4689 }
 0x753   :  { %10853 = vst [vmem:[#allocation288_spill] sm:$0xff] %v9278_v49 }
 0x755   :  { %4982 = vperm.xlu2 %6110, %v10854_v6  }
 0x757   :  { %v9281_v28 = vpop.permute.xlu0 %4834  ;;  %v9283_v10 = vpop.permute.xlu2 %4810 }
 0x758   :  { %4974 = vperm.xlu1 %6109, %v10855_v41  }
 0x75a   :  { %v9286_v40 = vpop.permute.xlu1 %4695 }
 0x75b   :  { %10856 = vst [vmem:[#allocation171_spill] sm:$0xff] %v9286_v40  ;;  %v10864_v40 = vld [vmem:[#allocation295_spill] sm:$0xff] }
 0x75d   :  { %4970 = vperm.xlu2 %6110, %v10857_v55  }
 0x75f   :  { %v9289_v44 = vpop.permute.xlu0 %4846  ;;  %v9291_v29 = vpop.permute.xlu2 %4818 }
 0x760   :  { %4962 = vperm.xlu1 %6109, %v10858_v21  }
 0x762   :  { %v9294_v25 = vpop.permute.xlu1 %4701 }
 0x765   :  { %4958 = vperm.xlu2 %6110, %v10859_v46  }
 0x767   :  { %v4859_v6 = vpop.permute.xlu0 %4858  ;;  %v9297_v13 = vpop.permute.xlu2 %4830 }
 0x768   :  { %4950 = vperm.xlu1 %6109, %v10860_v17  }
 0x76a   :  { %v9300_v41 = vpop.permute.xlu1 %4806 }
 0x76d   :  { %4946 = vperm.xlu2 %6110, %v10861_v18  }
 0x76f   :  { %v9303_v55 = vpop.permute.xlu0 %4870  ;;  %v9305_v5 = vpop.permute.xlu2 %4842 }
 0x770   :  { %4938 = vperm.xlu1 %6109, %v10862_v23  }
 0x772   :  { %v9308_v21 = vpop.permute.xlu1 %4814 }
 0x775   :  { %4934 = vperm.xlu2 %6110, %v10863_v30  }
 0x777   :  { %v9311_v46 = vpop.permute.xlu0 %4882  ;;  %v4855_v16 = vpop.permute.xlu2 %4854 }
 0x77a   :  { %v9313_v9 = vpop.permute.xlu1 %4826 }
 0x77f   :  { %v9315_v17 = vpop.permute.xlu0 %4894  ;;  %v9317_v3 = vpop.permute.xlu2 %4866 }
 0x782   :  { %v9319_v18 = vpop.permute.xlu1 %4838 }
 0x787   :  { %v4907_v62 = vpop.permute.xlu0 %4906  ;;  %v9321_v52 = vpop.permute.xlu2 %4878 }
 0x78a   :  { %v4851_v38 = vpop.permute.xlu1 %4850 }
 0x78f   :  { %v4919_v23 = vpop.permute.xlu0 %4918  ;;  %v9323_v61 = vpop.permute.xlu2 %4890 }
 0x790   :  { %v5022_v8 = vmul.f32 %v4919_v23, %v10864_v40  ;;  %v9344_v40 = vld [vmem:[%s10191_s2 + $0xf8] sm:$0xff] }
 0x792   :  { %v4863_v49 = vpop.permute.xlu1 %4862 }
 0x797   :  { %v4991_v30 = vpop.permute.xlu0 %4990  ;;  %v4903_v31 = vpop.permute.xlu2 %4902 }
 0x798   :  { %v5040_v59 = vmul.f32 %v4991_v30, %v8884_v50 }
 0x79a   :  { %5183 = vrot.lane.b32.xlu0 %v5040_v59, %s6237_s9  ;;  %v9327_v26 = vpop.permute.xlu1 %4874 }
 0x79f   :  { %v4915_v4 = vpop.permute.xlu2 %4914 }
 0x7a0   :  { %v5021_v30 = vmul.f32 %v4915_v4, %v10865_v32  ;;  %v9371_v32 = vld [vmem:[%s10191_s2 + $0xd8] sm:$0xff] }
 0x7a2   :  { %v9329_v42 = vpop.permute.xlu1 %4886 }
 0x7a7   :  { %v4923_v36 = vpop.permute.xlu2 %4922 }
 0x7a8   :  { %v5023_v54 = vmul.f32 %v4923_v36, %v10775_v19 }
 0x7aa   :  { %5149 = vrot.lane.b32.xlu2 %v5023_v54, %s6237_s9  ;;  %v4899_v11 = vpop.permute.xlu1 %4898 }
 0x7b2   :  { %5147 = vrot.lane.b32.xlu2 %v5022_v8, %s6237_s9  ;;  %v4911_v58 = vpop.permute.xlu1 %4910  ;;  %v5008_v8 = vmul.f32 %v9344_v40, %v4863_v49 }
 0x7b3   :  { %v5020_v2 = vmul.f32 %v4911_v58, %v10866_v43  ;;  %v9355_v58 = vld [vmem:[%s10191_s2 + $0xe8] sm:$0xff] }
 0x7b4   :  { %v5007_v43 = vmul.f32 %v9355_v58, %v4859_v6  ;;  %v10868_v6 = vld [vmem:[#allocation290_spill] sm:$0xff] }
 0x7b5   :  { %v5017_v23 = vmul.f32 %v4899_v11, %v10868_v6  ;;  %v9391_v11 = vld [vmem:[%s10191_s2 + $0x178] sm:$0xff] }
 0x7ba   :  { %5145 = vrot.lane.b32.xlu2 %v5021_v30, %s6237_s9  ;;  %v4927_v59 = vpop.permute.xlu1 %4926 }
 0x7bb   :  { %v5024_v57 = vmul.f32 %v4927_v59, %v10791_v63  ;;  %v10867_v63 = vld [vmem:[#allocation292_spill] sm:$0xff] }
 0x7bc   :  { %v5019_v4 = vmul.f32 %v4907_v62, %v10867_v63 }
 0x7bd   :  { %5151 = vrot.lane.b32.xlu1 %v5024_v57, %s6237_s9  ;;  %v4983_v57 = vpop.permute.xlu2 %4982 }
 0x7be   :  { %v5038_v36 = vmul.f32 %v4983_v57, %v8876_v7  ;;  %v5006_v7 = vmul.f32 %v9371_v32, %v4855_v16 }
 0x7c2   :  { %5143 = vrot.lane.b32.xlu2 %v5020_v2, %s6237_s9  ;;  %v4987_v19 = vpop.permute.xlu1 %4986  ;;  %v4979_v2 = vpop.permute.xlu0 %4978 }
 0x7c3   :  { %v5039_v54 = vmul.f32 %v4987_v19, %v10816_v22  ;;  %v9364_v22 = vld [vmem:[%s10191_s2 + $0x198] sm:$0xff]  ;;  %v5037_v49 = vmul.f32 %v4979_v2, %v8863_v39  ;;  %v5016_v19 = vmul.f32 %v9391_v11, %v9315_v17  ;;  %v9409_v17 = vld [vmem:[%s10191_s2 + $0x168] sm:$0xff] }
 0x7c4   :  { %v5018_v62 = vmul.f32 %v9364_v22, %v4903_v31  ;;  %v9382_v31 = vld [vmem:[%s10191_s2 + $0xc8] sm:$0xff]  ;;  %v5015_v63 = vmul.f32 %v9409_v17, %v9323_v61  ;;  %v9427_v61 = vld [vmem:[%s10191_s2 + $0x158] sm:$0xff] }
 0x7c5   :  { %5119 = vrot.lane.b32.xlu1 %v5008_v8, %s6237_s9  ;;  %5181 = vrot.lane.b32.xlu0 %v5039_v54, %s6237_s9  ;;  %10869 = vst [vmem:[#allocation226_spill] sm:$0xff] %v9382_v31  ;;  %v5005_v59 = vmul.f32 %v9382_v31, %v4851_v38  ;;  %v4971_v39 = vpop.permute.xlu2 %4970  ;;  %v9399_v38 = vld [vmem:[%s10191_s2 + $0xb8] sm:$0xff] }
 0x7c6   :  { %10870 = vst [vmem:[#allocation174_spill] sm:$0xff] %v9399_v38  ;;  %v5035_v8 = vmul.f32 %v4971_v39, %v8857_v12  ;;  %v9417_v12 = vld [vmem:[%s10191_s2 + $0xa8] sm:$0xff]  ;;  %v10945_v31 = vld [vmem:[#allocation253_spill] sm:$0xff] }
 0x7c7   :  { %10871 = vst [vmem:[#allocation298_spill] sm:$0xff] %v9417_v12 }
 0x7c8   :  { %10872 = vst [vmem:[#allocation138_spill] sm:$0xff] %v9427_v61 }
 0x7ca   :  { %5141 = vrot.lane.b32.xlu2 %v5019_v4, %s6237_s9  ;;  %v4975_v30 = vpop.permute.xlu1 %4974  ;;  %v4967_v54 = vpop.permute.xlu0 %4966 }
 0x7cb   :  { %v5036_v16 = vmul.f32 %v4975_v30, %v10812_v45  ;;  %v5004_v45 = vmul.f32 %v9399_v38, %v9289_v44  ;;  %v5003_v44 = vmul.f32 %v9417_v12, %v9305_v5  ;;  %v5034_v57 = vmul.f32 %v4967_v54, %v8844_v34  ;;  %v9435_v34 = vld [vmem:[%s10191_s2 + $0x98] sm:$0xff]  ;;  %v10880_v54 = vld [vmem:[#allocation164_spill] sm:$0xff] }
 0x7cc   :  { %10873 = vst [vmem:[#allocation170_spill] sm:$0xff] %v9435_v34  ;;  %v5002_v5 = vmul.f32 %v9435_v34, %v9319_v18  ;;  %v10921_v34 = vld [vmem:[#allocation110_spill] sm:$0xff]  ;;  %v10922_v12 = vld [vmem:[#allocation113_spill] sm:$0xff] }
 0x7cd   :  { %5117 = vrot.lane.b32.xlu1 %v5007_v43, %s6237_s9  ;;  %5179 = vrot.lane.b32.xlu0 %v5038_v36, %s6237_s9  ;;  %v4959_v4 = vpop.permute.xlu2 %4958  ;;  %v5014_v43 = vmul.f32 %v9427_v61, %v9329_v42  ;;  %v9445_v42 = vld [vmem:[%s10191_s2 + $0x148] sm:$0xff]  ;;  %v10967_v61 = vld [vmem:[#allocation336_spill] sm:$0xff] }
 0x7ce   :  { %10874 = vst [vmem:[#allocation291_spill] sm:$0xff] %v9445_v42 }
 0x7d2   :  { %5139 = vrot.lane.b32.xlu2 %v5018_v62, %s6237_s9  ;;  %v4955_v36 = vpop.permute.xlu0 %4954  ;;  %v4963_v62 = vpop.permute.xlu1 %4962 }
 0x7d5   :  { %5115 = vrot.lane.b32.xlu1 %v5006_v7, %s6237_s9  ;;  %5177 = vrot.lane.b32.xlu0 %v5037_v49, %s6237_s9  ;;  %v4947_v2 = vpop.permute.xlu2 %4946  ;;  %v5033_v7 = vmul.f32 %v4963_v62, %v10809_v47  ;;  %v5013_v49 = vmul.f32 %v9445_v42, %v9311_v46  ;;  %v9455_v47 = vld [vmem:[%s10191_s2 + $0x88] sm:$0xff]  ;;  %v6151_v46 = vld [vmem:[%s10191_s2 + $0x2f0] sm:$0xff]  ;;  %v5031_v62 = vmul.f32 %v4955_v36, %v10808_v53 }
 0x7d6   :  { %10875 = vst [vmem:[#allocation172_spill] sm:$0xff] %v9455_v47  ;;  %v5001_v18 = vmul.f32 %v9455_v47, %v9281_v28  ;;  %v10885_v36 = vld [vmem:[#allocation348_spill] sm:$0xff]  ;;  %v10920_v47 = vld [vmem:[#allocation103_spill] sm:$0xff] }
 0x7da   :  { %5137 = vrot.lane.b32.xlu2 %v5017_v23, %s6237_s9  ;;  %v9449_v6 = vpop.permute.xlu0 %4942  ;;  %v10876_v23 = vld [vmem:[#allocation305_spill] sm:$0xff]  ;;  %v4951_v53 = vpop.permute.xlu1 %4950 }
 0x7db   :  { %v5032_v30 = vmul.f32 %v4959_v4, %v10876_v23  ;;  %v10881_v4 = vld [vmem:[#allocation263_spill] sm:$0xff] }
 0x7dd   :  { %5113 = vrot.lane.b32.xlu1 %v5005_v59, %s6237_s9  ;;  %5175 = vrot.lane.b32.xlu0 %v5036_v16, %s6237_s9  ;;  %v9460_v59 = vpop.permute.xlu2 %4934  ;;  %v10877_v16 = vld [vmem:[#allocation125_spill] sm:$0xff] }
 0x7de   :  { %v2112_v39 = vmul.f32 %v6151_v46, %v10877_v16  ;;  %v9508_v46 = vld [vmem:[%s10191_s2 + $0x68] sm:$0xff] }
 0x7df   :  { %10886 = vst [vmem:[#allocation294_spill] sm:$0xff] %v9508_v46  ;;  %v4999_v16 = vmul.f32 %v9508_v46, %v9313_v9  ;;  %v9525_v9 = vld [vmem:[%s10191_s2 + $0x118] sm:$0xff] }
 0x7e0   :  { %10888 = vst [vmem:[#allocation297_spill] sm:$0xff] %v9525_v9 }
 0x7e2   :  { %5135 = vrot.lane.b32.xlu2 %v5016_v19, %s6237_s9  ;;  %v9471_v19 = vld [vmem:[%s10191_s2 + $0x138] sm:$0xff] }
 0x7e3   :  { %10878 = vst [vmem:[#allocation216_spill] sm:$0xff] %v9471_v19  ;;  %v5012_v28 = vmul.f32 %v9471_v19, %v9321_v52  ;;  %v9488_v52 = vpop.permute.xlu0 %4930  ;;  %v10923_v19 = vld [vmem:[#allocation126_spill] sm:$0xff] }
 0x7e5   :  { %5111 = vrot.lane.b32.xlu1 %v5004_v45, %s6237_s9  ;;  %5173 = vrot.lane.b32.xlu0 %v5035_v8, %s6237_s9  ;;  %v10879_v45 = vld [vmem:[#allocation161_spill] sm:$0xff] }
 0x7e6   :  { %v2592_v8 = vadd.f32 %v10879_v45, %v2112_v39  ;;  %v9515_v39 = vld [vmem:[%s10191_s2 + $0x258] sm:$0xff] }
 0x7e7   :  { %10887 = vst [vmem:[#allocation303_spill] sm:$0xff] %v9515_v39 }
 0x7ea   :  { %5133 = vrot.lane.b32.xlu2 %v5015_v63, %s6237_s9  ;;  %v3072_v63 = vadd.f32 %v10880_v54, %v2592_v8  ;;  %v9533_v54 = vld [vmem:[%s10191_s2 + $0x58] sm:$0xff] }
 0x7eb   :  { %10889 = vst [vmem:[#allocation299_spill] sm:$0xff] %v9533_v54 }
 0x7ed   :  { %5109 = vrot.lane.b32.xlu1 %v5003_v44, %s6237_s9  ;;  %5171 = vrot.lane.b32.xlu0 %v5034_v57, %s6237_s9  ;;  %v3792_v44 = vmul.f32 %v10881_v4, %v8884_v50  ;;  %v9483_v57 = vld [vmem:[%s10191_s2 + $0x78] sm:$0xff]  ;;  %v9540_v4 = vld [vmem:[%s10191_s2 + $0x248] sm:$0xff] }
 0x7ee   :  { %10882 = vst [vmem:[#allocation90_spill] sm:$0xff] %v9483_v57 }
 0x7ef   :  { %10890 = vst [vmem:[#allocation302_spill] sm:$0xff] %v9540_v4 }
 0x7f2   :  { %5131 = vrot.lane.b32.xlu2 %v5014_v43, %s6237_s9  ;;  %v5000_v43 = vmul.f32 %v9483_v57, %v9297_v13  ;;  %v10918_v57 = vld [vmem:[#allocation97_spill] sm:$0xff] }
 0x7f5   :  { %5107 = vrot.lane.b32.xlu1 %v5002_v5, %s6237_s9  ;;  %5169 = vrot.lane.b32.xlu0 %v5033_v7, %s6237_s9  ;;  %v10883_v7 = vld [vmem:[#allocation213_spill] sm:$0xff] }
 0x7fa   :  { %5129 = vrot.lane.b32.xlu2 %v5013_v49, %s6237_s9  ;;  %v3552_v49 = vadd.f32 %v10883_v7, %v3072_v63  ;;  %v4998_v63 = vmul.f32 %v9533_v54, %v9273_v37  ;;  %v10892_v7 = vld [vmem:[#allocation10_spill] sm:$0xff]  ;;  %v10913_v54 = vld [vmem:[#allocation61_spill] sm:$0xff] }
 0x7fc   :  { %v3840_v50 = vadd.f32 %v3792_v44, %v3552_v49  ;;  %v5029_v44 = vmul.f32 %v9540_v4, %v4947_v2  ;;  %v6162_v49 = vld [vmem:[%s10191_s2 + $0xd0] sm:$0xff]  ;;  %v6175_v4 = vld [vmem:[%s10191_s2 + $0x1c0] sm:$0xff] }
 0x7fd   :  { %5105 = vrot.lane.b32.xlu1 %v5001_v18, %s6237_s9  ;;  %5167 = vrot.lane.b32.xlu0 %v5032_v30, %s6237_s9  ;;  %v9498_v18 = vld [vmem:[%s10191_s2 + $0x128] sm:$0xff] }
 0x7fe   :  { %10884 = vst [vmem:[#allocation300_spill] sm:$0xff] %v9498_v18  ;;  %v5011_v13 = vmul.f32 %v9498_v18, %v9327_v26  ;;  %v4320_v23 = vadd.f32 %v10885_v36, %v3840_v50  ;;  %v5030_v26 = vmul.f32 %v9515_v39, %v4951_v53  ;;  %v10893_v50 = vld [vmem:[#allocation14_spill] sm:$0xff]  ;;  %v6163_v53 = vld [vmem:[%s10191_s2 + $0xf0] sm:$0xff]  ;;  %v10894_v36 = vld [vmem:[#allocation17_spill] sm:$0xff] }
 0x800   :  { %v4800_v30 = vadd.f32 %v9275_v0, %v4320_v23  ;;  %v5010_v0 = vmul.f32 %v9525_v9, %v9303_v55  ;;  %v9550_v55 = vld [vmem:[%s10191_s2 + $0x108] sm:$0xff] }
 0x801   :  { %10891 = vst [vmem:[#allocation109_spill] sm:$0xff] %v9550_v55  ;;  %v5009_v37 = vmul.f32 %v9550_v55, %v9317_v3  ;;  %v2080_v3 = vmul.f32 %v6163_v53, %v10894_v36  ;;  %v9570_v23 = vld [vmem:[%s10191_s2 + $0x48] sm:$0xff]  ;;  %v10903_v36 = vld [vmem:[#allocation32_spill] sm:$0xff] }
 0x802   :  { %5127 = vrot.lane.b32.xlu2 %v5012_v28, %s6237_s9  ;;  %10895 = vst [vmem:[#allocation2_spill] sm:$0xff] %v9570_v23 }
 0x804   :  { %v9490_v5 = vpop.permute.xlu2 %5149 }
 0x805   :  { %5103 = vrot.lane.b32.xlu1 %v5000_v43, %s6237_s9  ;;  %5165 = vrot.lane.b32.xlu0 %v5031_v62, %s6237_s9  ;;  %v6161_v62 = vld [vmem:[%s10191_s2 + $0xe0] sm:$0xff] }
 0x806   :  { %v2079_v2 = vmul.f32 %v6161_v62, %v10892_v7  ;;  %v10900_v62 = vld [vmem:[#allocation29_spill] sm:$0xff] }
 0x80a   :  { %5125 = vrot.lane.b32.xlu2 %v5011_v13, %s6237_s9  ;;  %v2078_v13 = vmul.f32 %v6162_v49, %v10893_v50  ;;  %v10901_v49 = vld [vmem:[#allocation50_spill] sm:$0xff]  ;;  %v10902_v50 = vld [vmem:[#allocation64_spill] sm:$0xff] }
 0x80b   :  { %v2560_v53 = vadd.f32 %v10902_v50, %v2080_v3  ;;  %v10905_v3 = vld [vmem:[#allocation41_spill] sm:$0xff]  ;;  %v6172_v50 = vld [vmem:[%s10191_s2 + $0x190] sm:$0xff] }
 0x80c   :  { %v5184_v28 = vpop.permute.xlu0 %5183  ;;  %v9518_v45 = vpop.permute.xlu2 %5147 }
 0x80d   :  { %v5280_v8 = vadd.f32 %v5184_v28, %v4800_v30  ;;  %5101 = vrot.lane.b32.xlu1 %v4999_v16, %s6237_s9  ;;  %5163 = vrot.lane.b32.xlu0 %v5030_v26, %s6237_s9  ;;  %v4997_v30 = vmul.f32 %v9570_v23, %v9291_v29  ;;  %v9577_v16 = vld [vmem:[%s10191_s2 + $0x238] sm:$0xff]  ;;  %v6166_v28 = vld [vmem:[%s10191_s2 + $0xc0] sm:$0xff]  ;;  %v10909_v23 = vld [vmem:[#allocation55_spill] sm:$0xff] }
 0x80e   :  { %10896 = vst [vmem:[#allocation13_spill] sm:$0xff] %v9577_v16  ;;  %v5028_v26 = vmul.f32 %v9577_v16, %v9449_v6  ;;  %v6167_v29 = vld [vmem:[%s10191_s2 + $0x150] sm:$0xff]  ;;  %v2558_v6 = vadd.f32 %v10901_v49, %v2078_v13  ;;  %v6170_v13 = vld [vmem:[%s10191_s2 + $0x180] sm:$0xff] }
 0x80f   :  { %5325 = vmatpush.msrb.mxu3 %v5280_v8  ;;  %v10897_v8 = vld [vmem:[#allocation11_spill] sm:$0xff]  ;;  %v9594_v7 = vmul.f32 %v6167_v29, %v10900_v62  ;;  %v10906_v62 = vld [vmem:[#allocation44_spill] sm:$0xff] }
 0x812   :  { %5123 = vrot.lane.b32.xlu2 %v5010_v0, %s6237_s9  ;;  %v9585_v0 = vmul.f32 %v6166_v28, %v10897_v8  ;;  %v6169_v8 = vld [vmem:[%s10191_s2 + $0x160] sm:$0xff] }
 0x814   :  { %v9543_v43 = vpop.permute.xlu2 %5145  ;;  %10898 = vst [vmem:[#allocation63_spill] sm:$0xff] %v9585_v0 }
 0x815   :  { %5099 = vrot.lane.b32.xlu1 %v4998_v63, %s6237_s9  ;;  %5161 = vrot.lane.b32.xlu0 %v5029_v44, %s6237_s9  ;;  %v10899_v63 = vld [vmem:[#allocation60_spill] sm:$0xff] }
 0x816   :  { %v2559_v44 = vadd.f32 %v10899_v63, %v2079_v2  ;;  %v6168_v2 = vld [vmem:[%s10191_s2 + $0x170] sm:$0xff]  ;;  %v10904_v63 = vld [vmem:[#allocation33_spill] sm:$0xff] }
 0x817   :  { %v2088_v28 = vmul.f32 %v6168_v2, %v10903_v36  ;;  %v2087_v29 = vmul.f32 %v6169_v8, %v10904_v63  ;;  %v10907_v2 = vld [vmem:[#allocation45_spill] sm:$0xff]  ;;  %v6173_v8 = vld [vmem:[%s10191_s2 + $0x1b0] sm:$0xff] }
 0x818   :  { %v2090_v36 = vmul.f32 %v6172_v50, %v10907_v2  ;;  %v10908_v63 = vld [vmem:[#allocation53_spill] sm:$0xff]  ;;  %v3039_v39 = vadd.f32 %v10913_v54, %v2559_v44 }
 0x819   :  { %v2092_v16 = vmul.f32 %v6173_v8, %v10908_v63  ;;  %v10912_v50 = vld [vmem:[#allocation57_spill] sm:$0xff]  ;;  %v6176_v8 = vld [vmem:[%s10191_s2 + $0x1e0] sm:$0xff]  ;;  %v9643_v63 = vld [vmem:[%s10191_s2 + $0x208] sm:$0xff] }
 0x81a   :  { %5121 = vrot.lane.b32.xlu2 %v5009_v37, %s6237_s9  ;;  %v2093_v2 = vmul.f32 %v6175_v4, %v10912_v50  ;;  %10915 = vst [vmem:[#allocation20_spill] sm:$0xff] %v9643_v63  ;;  %v6178_v4 = vld [vmem:[%s10191_s2 + $0x1f0] sm:$0xff]  ;;  %v10916_v54 = vld [vmem:[#allocation69_spill] sm:$0xff]  ;;  %v10917_v50 = vld [vmem:[#allocation86_spill] sm:$0xff] }
 0x81b   :  { %v2096_v44 = vmul.f32 %v6178_v4, %v10916_v54  ;;  %v9652_v46 = vadd.f32 %v10917_v50, %v2087_v29  ;;  %v10924_v29 = vld [vmem:[#allocation119_spill] sm:$0xff] }
 0x81c   :  { %v9588_v37 = vpop.permute.xlu2 %5143  ;;  %v10930_v54 = vld [vmem:[#allocation159_spill] sm:$0xff] }
 0x81d   :  { %5097 = vrot.lane.b32.xlu1 %v4997_v30, %s6237_s9  ;;  %5159 = vrot.lane.b32.xlu0 %v5028_v26, %s6237_s9  ;;  %v2089_v30 = vmul.f32 %v6170_v13, %v10905_v3  ;;  %v6171_v26 = vld [vmem:[%s10191_s2 + $0x1a0] sm:$0xff]  ;;  %v9625_v13 = vadd.f32 %v10909_v23, %v2558_v6  ;;  %v6174_v3 = vld [vmem:[%s10191_s2 + $0x1d0] sm:$0xff]  ;;  %v10914_v23 = vld [vmem:[#allocation65_spill] sm:$0xff] }
 0x81e   :  { %v2091_v49 = vmul.f32 %v6171_v26, %v10906_v62  ;;  %v10911_v26 = vld [vmem:[#allocation56_spill] sm:$0xff]  ;;  %v2095_v6 = vmul.f32 %v6176_v8, %v10914_v23  ;;  %v2568_v8 = vadd.f32 %v10918_v57, %v2088_v28  ;;  %v10919_v23 = vld [vmem:[#allocation58_spill] sm:$0xff]  ;;  %v10927_v28 = vld [vmem:[#allocation101_spill] sm:$0xff] }
 0x81f   :  { %10910 = vst [vmem:[#allocation16_spill] sm:$0xff] %v9625_v13  ;;  %v2094_v62 = vmul.f32 %v6174_v3, %v10911_v26  ;;  %v5025_v3 = vmul.f32 %v9643_v63, %v9488_v52  ;;  %v4939_v26 = vpop.permute.xlu1 %4938  ;;  %v3040_v55 = vadd.f32 %v10919_v23, %v2560_v53  ;;  %v2569_v9 = vadd.f32 %v10920_v47, %v2089_v30  ;;  %v6179_v63 = vld [vmem:[%s10191_s2 + $0x2e0] sm:$0xff]  ;;  %v6180_v57 = vld [vmem:[%s10191_s2 + $0x2d0] sm:$0xff]  ;;  %v10925_v53 = vld [vmem:[#allocation123_spill] sm:$0xff] }
 0x820   :  { %v2571_v18 = vadd.f32 %v10921_v34, %v2091_v49  ;;  %v2572_v52 = vadd.f32 %v10922_v12, %v2092_v16  ;;  %v2111_v38 = vmul.f32 %v6179_v63, %v10923_v19  ;;  %v2110_v47 = vmul.f32 %v6180_v57, %v10925_v53  ;;  %v6181_v12 = vld [vmem:[%s10191_s2 + $0x38] sm:$0xff]  ;;  %v9676_v19 = vld [vmem:[%s10191_s2 + $0x228] sm:$0xff]  ;;  %v10929_v63 = vld [vmem:[#allocation122_spill] sm:$0xff] }
 0x821   :  { %v2574_v4 = vadd.f32 %v10924_v29, %v2094_v62  ;;  %v4996_v34 = vmul.f32 %v6181_v12, %v9308_v21  ;;  %10926 = vst [vmem:[#allocation51_spill] sm:$0xff] %v9676_v19  ;;  %v5027_v16 = vmul.f32 %v9676_v19, %v4939_v26  ;;  %v2570_v30 = vadd.f32 %v10927_v28, %v2090_v36  ;;  %v10928_v49 = vld [vmem:[#allocation121_spill] sm:$0xff]  ;;  %v10931_v29 = vld [vmem:[#allocation99_spill] sm:$0xff]  ;;  %v10932_v21 = vld [vmem:[#allocation112_spill] sm:$0xff] }
 0x822   :  { %5153 = vrot.lane.b32.xlu2 %v5025_v3, %s6237_s9  ;;  %v2576_v62 = vadd.f32 %v10928_v49, %v2096_v44  ;;  %v2575_v3 = vadd.f32 %v10929_v63, %v2095_v6  ;;  %v2591_v50 = vadd.f32 %v10930_v54, %v2111_v38  ;;  %v9686_v57 = vadd.f32 %v10931_v29, %v2568_v8  ;;  %v10933_v12 = vld [vmem:[#allocation27_spill] sm:$0xff]  ;;  %v10934_v36 = vld [vmem:[#allocation105_spill] sm:$0xff]  ;;  %v10935_v44 = vld [vmem:[#allocation124_spill] sm:$0xff] }
 0x823   :  { %v2573_v53 = vadd.f32 %v10932_v21, %v2093_v2  ;;  %v2590_v42 = vadd.f32 %v10933_v12, %v2110_v47  ;;  %v3050_v26 = vadd.f32 %v10934_v36, %v2570_v30  ;;  %v10936_v6 = vld [vmem:[#allocation96_spill] sm:$0xff]  ;;  %v6183_v38 = vld [vmem:[%s10191_s2 + $0x1f8] sm:$0xff]  ;;  %v10937_v8 = vld [vmem:[#allocation246_spill] sm:$0xff] }
 0x824   :  { %v9683_v23 = vpop.permute.xlu2 %5141  ;;  %v3056_v28 = vadd.f32 %v10935_v44, %v2576_v62  ;;  %v3049_v49 = vadd.f32 %v10936_v6, %v2569_v9  ;;  %v3776_v63 = vmul.f32 %v6183_v38, %v10937_v8  ;;  %v10938_v54 = vld [vmem:[#allocation111_spill] sm:$0xff]  ;;  %v10940_v21 = vld [vmem:[#allocation120_spill] sm:$0xff]  ;;  %v10942_v19 = vld [vmem:[#allocation118_spill] sm:$0xff] }
 0x825   :  { %5095 = vrot.lane.b32.xlu1 %v4996_v34, %s6237_s9  ;;  %5157 = vrot.lane.b32.xlu0 %v5027_v16, %s6237_s9  ;;  %v3051_v2 = vadd.f32 %v10938_v54, %v2571_v18  ;;  %v10939_v29 = vld [vmem:[#allocation115_spill] sm:$0xff]  ;;  %v3054_v34 = vadd.f32 %v10940_v21, %v2574_v4  ;;  %v10941_v12 = vld [vmem:[#allocation108_spill] sm:$0xff]  ;;  %v3055_v30 = vadd.f32 %v10942_v19, %v2575_v3  ;;  %v10943_v36 = vld [vmem:[#allocation205_spill] sm:$0xff] }
 0x826   :  { %v3053_v47 = vadd.f32 %v10939_v29, %v2573_v53  ;;  %v3052_v16 = vadd.f32 %v10941_v12, %v2572_v52  ;;  %v3536_v62 = vadd.f32 %v10943_v36, %v3056_v28  ;;  %v10944_v44 = vld [vmem:[#allocation12_spill] sm:$0xff]  ;;  %v6184_v6 = vld [vmem:[%s10191_s2 + $0x1e8] sm:$0xff]  ;;  %v10946_v8 = vld [vmem:[#allocation181_spill] sm:$0xff] }
 0x827   :  { %v3071_v9 = vadd.f32 %v10944_v44, %v2591_v50  ;;  %v3775_v38 = vmul.f32 %v6184_v6, %v10945_v31  ;;  %v9711_v18 = vadd.f32 %v10946_v8, %v3039_v39  ;;  %v10947_v53 = vld [vmem:[#allocation186_spill] sm:$0xff]  ;;  %v10948_v4 = vld [vmem:[#allocation193_spill] sm:$0xff]  ;;  %v10950_v19 = vld [vmem:[#allocation195_spill] sm:$0xff] }
 0x828   :  { %v3520_v54 = vadd.f32 %v10947_v53, %v3040_v55  ;;  %v3531_v29 = vadd.f32 %v10948_v4, %v3051_v2  ;;  %v10949_v52 = vld [vmem:[#allocation158_spill] sm:$0xff]  ;;  %v9719_v3 = vadd.f32 %v10950_v19, %v3049_v49  ;;  %v10951_v50 = vld [vmem:[#allocation201_spill] sm:$0xff]  ;;  %v3824_v39 = vadd.f32 %v3776_v63, %v3536_v62  ;;  %v10953_v44 = vld [vmem:[#allocation196_spill] sm:$0xff] }
 0x829   :  { %v9716_v21 = vadd.f32 %v10949_v52, %v2590_v42  ;;  %v3535_v28 = vadd.f32 %v10951_v50, %v3055_v30  ;;  %v6185_v12 = vld [vmem:[%s10191_s2 + $0x1d8] sm:$0xff]  ;;  %v3534_v6 = vadd.f32 %v10953_v44, %v3054_v34  ;;  %v10954_v55 = vld [vmem:[#allocation238_spill] sm:$0xff]  ;;  %v6186_v42 = vld [vmem:[%s10191_s2 + $0x28] sm:$0xff] }
 0x82a   :  { %v10952_v31 = vld [vmem:[#allocation245_spill] sm:$0xff]  ;;  %v3760_v2 = vmul.f32 %v9344_v40, %v10954_v55  ;;  %v4995_v49 = vmul.f32 %v6186_v42, %v9283_v10  ;;  %v10956_v63 = vld [vmem:[#allocation198_spill] sm:$0xff]  ;;  %v6188_v40 = vld [vmem:[%s10191_s2 + $0x1c8] sm:$0xff] }
 0x82b   :  { %v3774_v36 = vmul.f32 %v6185_v12, %v10952_v31  ;;  %v9736_v30 = vld [vmem:[%s10191_s2 + $0x218] sm:$0xff]  ;;  %v3532_v62 = vadd.f32 %v10956_v63, %v3052_v16  ;;  %v10957_v34 = vld [vmem:[#allocation243_spill] sm:$0xff]  ;;  %v10958_v4 = vld [vmem:[#allocation328_spill] sm:$0xff]  ;;  %v3823_v19 = vadd.f32 %v3775_v38, %v3535_v28 }
 0x82c   :  { %10955 = vst [vmem:[#allocation24_spill] sm:$0xff] %v9736_v30  ;;  %v5026_v8 = vmul.f32 %v9736_v30, %v9460_v59  ;;  %v3773_v53 = vmul.f32 %v6188_v40, %v10957_v34  ;;  %v4304_v52 = vadd.f32 %v10958_v4, %v3824_v39  ;;  %v9746_v10 = vpop.permute.xlu2 %5139  ;;  %v10959_v50 = vld [vmem:[#allocation203_spill] sm:$0xff]  ;;  %v10960_v59 = vld [vmem:[#allocation242_spill] sm:$0xff]  ;;  %v6190_v16 = vld [vmem:[%s10191_s2 + $0x1b8] sm:$0xff] }
 0x82d   :  { %v3533_v12 = vadd.f32 %v10959_v50, %v3053_v47  ;;  %v6189_v31 = vld [vmem:[%s10191_s2 + $0x1a8] sm:$0xff]  ;;  %v10961_v55 = vld [vmem:[#allocation250_spill] sm:$0xff]  ;;  %5093 = vrot.lane.b32.xlu1 %v4995_v49, %s6237_s9  ;;  %v10962_v38 = vld [vmem:[#allocation261_spill] sm:$0xff]  ;;  %v3822_v40 = vadd.f32 %v3774_v36, %v3534_v6 }
 0x82e   :  { %v3771_v44 = vmul.f32 %v6189_v31, %v10960_v59  ;;  %v3772_v42 = vmul.f32 %v6190_v16, %v10961_v55  ;;  %5155 = vrot.lane.b32.xlu0 %v5026_v8, %s6237_s9  ;;  %v6191_v47 = vld [vmem:[%s10191_s2 + $0x2e8] sm:$0xff]  ;;  %v10963_v39 = vld [vmem:[#allocation329_spill] sm:$0xff]  ;;  %v4784_v34 = vadd.f32 %v9251_v51, %v4304_v52  ;;  %v10964_v4 = vld [vmem:[#allocation200_spill] sm:$0xff]  ;;  %v3808_v55 = vadd.f32 %v3760_v2, %v3520_v54 }
 0x82f   :  { %v3791_v28 = vmul.f32 %v6191_v47, %v10962_v38  ;;  %v4303_v63 = vadd.f32 %v10963_v39, %v3823_v19  ;;  %v3530_v50 = vadd.f32 %v10964_v4, %v3050_v26  ;;  %v10965_v31 = vld [vmem:[#allocation220_spill] sm:$0xff]  ;;  %v10966_v16 = vld [vmem:[#allocation230_spill] sm:$0xff]  ;;  %v5152_v8 = vpop.permute.xlu1 %5151  ;;  %v3821_v30 = vadd.f32 %v3773_v53, %v3533_v12  ;;  %v10968_v38 = vld [vmem:[#allocation239_spill] sm:$0xff] }
 0x830   :  { %v3551_v59 = vadd.f32 %v10965_v31, %v3071_v9  ;;  %v3759_v49 = vmul.f32 %v9355_v58, %v10966_v16  ;;  %v4302_v0 = vadd.f32 %v10967_v61, %v3822_v40  ;;  %v5264_v47 = vadd.f32 %v5152_v8, %v4784_v34  ;;  %v10969_v6 = vld [vmem:[#allocation240_spill] sm:$0xff]  ;;  %v10970_v9 = vld [vmem:[#allocation325_spill] sm:$0xff]  ;;  %v10971_v61 = vld [vmem:[#allocation247_spill] sm:$0xff] }
 0x831   :  { %v4783_v13 = vadd.f32 %v9210_v14, %v4303_v63  ;;  %v3768_v36 = vmul.f32 %v9391_v11, %v10968_v38  ;;  %v3770_v51 = vmul.f32 %v9364_v22, %v10969_v6  ;;  %v3820_v26 = vadd.f32 %v3772_v42, %v3532_v62  ;;  %v6192_v14 = vld [vmem:[%s10191_s2 + $0x188] sm:$0xff]  ;;  %v10972_v11 = vld [vmem:[#allocation314_spill] sm:$0xff]  ;;  %v10976_v34 = vld [vmem:[#allocation333_spill] sm:$0xff] }
 0x832   :  { %v3819_v52 = vadd.f32 %v3771_v44, %v3531_v29  ;;  %v4301_v19 = vadd.f32 %v10970_v9, %v3821_v30  ;;  %v3839_v39 = vadd.f32 %v3791_v28, %v3551_v59  ;;  %v4782_v58 = vadd.f32 %v9221_v60, %v4302_v0  ;;  %5305 = vmatpush.msrb.mxu2 %v5264_v47  ;;  %v6193_v22 = vld [vmem:[%s10191_s2 + $0x8] sm:$0xff]  ;;  %v9790_v60 = vld [vmem:[%s10191_s2 + $0x18] sm:$0xff]  ;;  %v10973_v0 = vld [vmem:[#allocation326_spill] sm:$0xff] }
 0x833   :  { %v5263_v54 = vadd.f32 %v9490_v5, %v4783_v13  ;;  %v3769_v2 = vmul.f32 %v6192_v14, %v10971_v61  ;;  %v4288_v53 = vadd.f32 %v10972_v11, %v3808_v55  ;;  %v4993_v29 = vmul.f32 %v6193_v22, %v9264_v56  ;;  %v10974_v30 = vld [vmem:[#allocation343_spill] sm:$0xff]  ;;  %v6195_v56 = vld [vmem:[%s10191_s2 + $0x2d8] sm:$0xff]  ;;  %v10977_v59 = vld [vmem:[#allocation190_spill] sm:$0xff] }
 0x834   :  { %v4994_v5 = vmul.f32 %v9790_v60, %v9300_v41  ;;  %v4300_v13 = vadd.f32 %v10973_v0, %v3820_v26  ;;  %v4319_v62 = vadd.f32 %v10974_v30, %v3839_v39  ;;  %v4781_v12 = vadd.f32 %v9242_v1, %v4301_v19  ;;  %v5138_v42 = vpop.permute.xlu2 %5137  ;;  %v10975_v28 = vld [vmem:[#allocation265_spill] sm:$0xff]  ;;  %v10979_v8 = vld [vmem:[#allocation322_spill] sm:$0xff]  ;;  %v10983_v14 = vld [vmem:[#allocation156_spill] sm:$0xff] }
 0x835   :  { %v5262_v44 = vadd.f32 %v9518_v45, %v4782_v58  ;;  %5306 = vmatpush.msrb.mxu2 %v5263_v54  ;;  %v3790_v63 = vmul.f32 %v6195_v56, %v10975_v28  ;;  %v3818_v40 = vadd.f32 %v3770_v51, %v3530_v50  ;;  %v4299_v4 = vadd.f32 %v10976_v34, %v3819_v52  ;;  %v10978_v50 = vld [vmem:[#allocation215_spill] sm:$0xff]  ;;  %v10987_v22 = vld [vmem:[#allocation344_spill] sm:$0xff] }
 0x836   :  { %5091 = vrot.lane.b32.xlu1 %v4994_v5, %s6237_s9  ;;  %5089 = vrot.lane.b32.xlu0 %v4993_v29, %s6237_s9  ;;  %v4768_v41 = vadd.f32 %v9164_v24, %v4288_v53  ;;  %v4780_v1 = vadd.f32 %v9201_v33, %v4300_v13  ;;  %v4799_v45 = vadd.f32 %v9294_v25, %v4319_v62  ;;  %v10985_v53 = vld [vmem:[#allocation321_spill] sm:$0xff]  ;;  %v10988_v0 = vld [vmem:[#allocation19_spill] sm:$0xff]  ;;  %v10990_v62 = vld [vmem:[#allocation228_spill] sm:$0xff] }
 0x837   :  { %v5261_v31 = vadd.f32 %v9543_v43, %v4781_v12  ;;  %5307 = vmatpush.msrb.mxu2 %v5262_v44  ;;  %v3528_v16 = vadd.f32 %v10977_v59, %v9686_v57  ;;  %v3550_v55 = vadd.f32 %v10978_v50, %v9716_v21  ;;  %v4298_v47 = vadd.f32 %v10979_v8, %v3818_v40  ;;  %v5182_v6 = vpop.permute.xlu0 %5181  ;;  %v5120_v51 = vpop.permute.xlu1 %5119  ;;  %v6196_v43 = vld [vmem:[%s10191_s2 + $0x2c0] sm:$0xff]  ;;  %v10980_v57 = vld [vmem:[#allocation116_spill] sm:$0xff]  ;;  %v10989_v13 = vld [vmem:[#allocation197_spill] sm:$0xff] }
 0x838   :  { %v3817_v38 = vadd.f32 %v3769_v2, %v9719_v3  ;;  %v4779_v24 = vadd.f32 %v9212_v27, %v4299_v4  ;;  %v5260_v33 = vadd.f32 %v9588_v37, %v4780_v1  ;;  %v5279_v25 = vadd.f32 %v5182_v6, %v4799_v45  ;;  %v10981_v3 = vld [vmem:[#allocation323_spill] sm:$0xff]  ;;  %v10984_v2 = vld [vmem:[#allocation237_spill] sm:$0xff]  ;;  %v10991_v44 = vld [vmem:[#allocation260_spill] sm:$0xff] }
 0x839   :  { %v5248_v26 = vadd.f32 %v5120_v51, %v4768_v41  ;;  %5308 = vmatpush.msrb.mxu2 %v5261_v31  ;;  %v2109_v52 = vmul.f32 %v6196_v43, %v10980_v57  ;;  %v3807_v21 = vadd.f32 %v3759_v49, %v9711_v18  ;;  %v3816_v9 = vadd.f32 %v3768_v36, %v3528_v16  ;;  %v10982_v37 = vld [vmem:[#allocation91_spill] sm:$0xff]  ;;  %v10986_v49 = vld [vmem:[#allocation330_spill] sm:$0xff]  ;;  %v10993_v34 = vld [vmem:[#allocation88_spill] sm:$0xff] }
 0x83a   :  { %v3838_v19 = vadd.f32 %v3790_v63, %v3550_v55  ;;  %v4297_v39 = vadd.f32 %v10981_v3, %v3817_v38  ;;  %v4778_v58 = vadd.f32 %v9233_v15, %v4298_v47  ;;  %v5259_v27 = vadd.f32 %v9683_v23, %v4779_v24  ;;  %5326 = vmatpush.msrb.mxu3 %v5279_v25  ;;  %v6197_v12 = vld [vmem:[%s10191_s2 + $0x2c8] sm:$0xff]  ;;  %v10994_v41 = vld [vmem:[#allocation117_spill] sm:$0xff]  ;;  %v10995_v45 = vld [vmem:[#allocation16_spill] sm:$0xff] }
 0x83b   :  { %5285 = vmatpush.msrb.mxu1 %v5248_v26  ;;  %5309 = vmatpush.msrb.mxu2 %v5260_v33  ;;  %v3047_v54 = vadd.f32 %v10982_v37, %v9652_v46  ;;  %v2589_v61 = vadd.f32 %v10983_v14, %v2109_v52  ;;  %v3767_v11 = vmul.f32 %v9409_v17, %v10984_v2  ;;  %v10996_v31 = vld [vmem:[#allocation188_spill] sm:$0xff]  ;;  %v10998_v38 = vld [vmem:[#allocation63_spill] sm:$0xff]  ;;  %v11000_v51 = vld [vmem:[#allocation153_spill] sm:$0xff] }
 0x83c   :  { %v4287_v18 = vadd.f32 %v10985_v53, %v3807_v21  ;;  %v4296_v36 = vadd.f32 %v10986_v49, %v3816_v9  ;;  %v4318_v29 = vadd.f32 %v10987_v22, %v3838_v19  ;;  %v4777_v15 = vadd.f32 %v9192_v35, %v4297_v39  ;;  %v5136_v5 = vpop.permute.xlu2 %5135  ;;  %v11001_v33 = vld [vmem:[#allocation319_spill] sm:$0xff]  ;;  %v11002_v57 = vld [vmem:[#allocation82_spill] sm:$0xff]  ;;  %v11003_v21 = vld [vmem:[#allocation244_spill] sm:$0xff] }
 0x83d   :  { %v5258_v23 = vadd.f32 %v9746_v10, %v4778_v58  ;;  %5310 = vmatpush.msrb.mxu2 %v5259_v27  ;;  %v3069_v46 = vadd.f32 %v10988_v0, %v2589_v61  ;;  %v3527_v30 = vadd.f32 %v10989_v13, %v3047_v54  ;;  %v3758_v17 = vmul.f32 %v9371_v32, %v10990_v62  ;;  %v10992_v10 = vld [vmem:[#allocation162_spill] sm:$0xff]  ;;  %v6198_v32 = vld [vmem:[%s10191_s2 + $0x2b0] sm:$0xff]  ;;  %v11006_v27 = vld [vmem:[#allocation21_spill] sm:$0xff] }
 0x83e   :  { %v3789_v56 = vmul.f32 %v6197_v12, %v10991_v44  ;;  %v4767_v28 = vadd.f32 %v9176_v20, %v4287_v18  ;;  %v4776_v35 = vadd.f32 %v9203_v48, %v4296_v36  ;;  %v4798_v63 = vadd.f32 %v10992_v10, %v4318_v29  ;;  %v10997_v48 = vld [vmem:[#allocation210_spill] sm:$0xff]  ;;  %v11005_v3 = vld [vmem:[#allocation276_spill] sm:$0xff]  ;;  %v11008_v61 = vld [vmem:[#allocation347_spill] sm:$0xff] }
 0x83f   :  { %v5257_v40 = vadd.f32 %v5138_v42, %v4777_v15  ;;  %5311 = vmatpush.msrb.mxu2 %v5258_v23  ;;  %v2566_v4 = vadd.f32 %v10993_v34, %v9594_v7  ;;  %v2108_v1 = vmul.f32 %v6198_v32, %v10994_v41  ;;  %v3518_v59 = vadd.f32 %v10996_v31, %v10995_v45  ;;  %v5180_v20 = vpop.permute.xlu0 %5179  ;;  %v5118_v50 = vpop.permute.xlu1 %5117  ;;  %v10999_v7 = vld [vmem:[#allocation52_spill] sm:$0xff]  ;;  %v11004_v9 = vld [vmem:[#allocation138_spill] sm:$0xff]  ;;  %v11012_v23 = vld [vmem:[#allocation235_spill] sm:$0xff] }
 0x840   :  { %v3815_v16 = vadd.f32 %v3767_v11, %v3527_v30  ;;  %v3549_v55 = vadd.f32 %v10997_v48, %v3069_v46  ;;  %v5256_v8 = vadd.f32 %v5136_v5, %v4776_v35  ;;  %v5278_v42 = vadd.f32 %v5180_v20, %v4798_v63  ;;  %v6199_v58 = vld [vmem:[%s10191_s2 + $0x140] sm:$0xff]  ;;  %v11010_v49 = vld [vmem:[#allocation192_spill] sm:$0xff]  ;;  %v6200_v46 = vld [vmem:[%s10191_s2 + $0x2b8] sm:$0xff] }
 0x841   :  { %v5247_v47 = vadd.f32 %v5118_v50, %v4767_v28  ;;  %5312 = vmatpush.msrb.mxu2 %v5257_v40  ;;  %v2557_v6 = vadd.f32 %v10999_v7, %v10998_v38  ;;  %v2588_v24 = vadd.f32 %v11000_v51, %v2108_v1  ;;  %v3806_v26 = vadd.f32 %v3758_v17, %v3518_v59  ;;  %v11007_v54 = vld [vmem:[#allocation310_spill] sm:$0xff]  ;;  %v11015_v62 = vld [vmem:[#allocation280_spill] sm:$0xff]  ;;  %v11020_v45 = vld [vmem:[#allocation183_spill] sm:$0xff] }
 0x842   :  { %v4295_v25 = vadd.f32 %v11001_v33, %v3815_v16  ;;  %v3837_v43 = vadd.f32 %v3789_v56, %v3549_v55  ;;  %v3046_v52 = vadd.f32 %v11002_v57, %v2566_v4  ;;  %v3766_v19 = vmul.f32 %v11004_v9, %v11003_v21  ;;  %5327 = vmatpush.msrb.mxu3 %v5278_v42  ;;  %v11009_v53 = vld [vmem:[#allocation46_spill] sm:$0xff]  ;;  %v6201_v56 = vld [vmem:[%s10191_s2 + $0xb0] sm:$0xff]  ;;  %v11021_v59 = vld [vmem:[#allocation217_spill] sm:$0xff] }
 0x843   :  { %5286 = vmatpush.msrb.mxu1 %v5247_v47  ;;  %5313 = vmatpush.msrb.mxu2 %v5256_v8  ;;  %v2085_v37 = vmul.f32 %v6199_v58, %v11006_v27  ;;  %v4286_v14 = vadd.f32 %v11007_v54, %v3806_v26  ;;  %v3037_v18 = vadd.f32 %v11009_v53, %v2557_v6  ;;  %v11011_v22 = vld [vmem:[#allocation154_spill] sm:$0xff]  ;;  %v11018_v10 = vld [vmem:[#allocation84_spill] sm:$0xff]  ;;  %v11023_v8 = vld [vmem:[#allocation157_spill] sm:$0xff] }
 0x844   :  { %v4775_v39 = vadd.f32 %v11005_v3, %v4295_v25  ;;  %v4317_v2 = vadd.f32 %v11008_v61, %v3837_v43  ;;  %v5134_v11 = vpop.permute.xlu2 %5133  ;;  %v3526_v36 = vadd.f32 %v11010_v49, %v3046_v52  ;;  %v3068_v29 = vadd.f32 %v11011_v22, %v2588_v24  ;;  %v11013_v5 = vld [vmem:[#allocation226_spill] sm:$0xff]  ;;  %v11022_v48 = vld [vmem:[#allocation48_spill] sm:$0xff]  ;;  %v11025_v51 = vld [vmem:[#allocation85_spill] sm:$0xff] }
 0x845   :  { %v3757_v0 = vmul.f32 %v11013_v5, %v11012_v23  ;;  %v11014_v13 = vld [vmem:[#allocation258_spill] sm:$0xff]  ;;  %v4766_v17 = vadd.f32 %v11015_v62, %v4286_v14  ;;  %v2565_v63 = vadd.f32 %v11018_v10, %v2085_v37  ;;  %v3517_v31 = vadd.f32 %v11020_v45, %v3037_v18  ;;  %v11024_v47 = vld [vmem:[#allocation320_spill] sm:$0xff]  ;;  %v11027_v25 = vld [vmem:[#allocation291_spill] sm:$0xff] }
 0x846   :  { %v5255_v15 = vadd.f32 %v5134_v11, %v4775_v39  ;;  %v3788_v30 = vmul.f32 %v6200_v46, %v11014_v13  ;;  %v11016_v12 = vld [vmem:[#allocation94_spill] sm:$0xff]  ;;  %v3814_v32 = vadd.f32 %v3766_v19, %v3526_v36  ;;  %v3548_v16 = vadd.f32 %v11021_v59, %v3068_v29  ;;  %v11026_v33 = vld [vmem:[#allocation236_spill] sm:$0xff]  ;;  %v11028_v43 = vld [vmem:[#allocation287_spill] sm:$0xff] }
 0x847   :  { %v4797_v44 = vadd.f32 %v11016_v12, %v4317_v2  ;;  %v11017_v28 = vld [vmem:[#allocation6_spill] sm:$0xff]  ;;  %v5178_v41 = vpop.permute.xlu0 %5177  ;;  %v5116_v1 = vpop.permute.xlu1 %5115  ;;  %v3805_v7 = vadd.f32 %v3757_v0, %v3517_v31  ;;  %v3045_v24 = vadd.f32 %v11025_v51, %v2565_v63  ;;  %v3765_v26 = vmul.f32 %v11027_v25, %v11026_v33  ;;  %v11029_v52 = vld [vmem:[#allocation311_spill] sm:$0xff]  ;;  %v11030_v9 = vld [vmem:[#allocation340_spill] sm:$0xff] }
 0x848   :  { %v2076_v35 = vmul.f32 %v6201_v56, %v11017_v28  ;;  %v6202_v40 = vld [vmem:[%s10191_s2 + $0x2a0] sm:$0xff]  ;;  %5314 = vmatpush.msrb.mxu2 %v5255_v15  ;;  %v5246_v50 = vadd.f32 %v5116_v1, %v4766_v17  ;;  %v4294_v38 = vadd.f32 %v11024_v47, %v3814_v32  ;;  %v3836_v6 = vadd.f32 %v3788_v30, %v3548_v16  ;;  %v11031_v39 = vld [vmem:[#allocation49_spill] sm:$0xff]  ;;  %v11032_v27 = vld [vmem:[#allocation187_spill] sm:$0xff] }
 0x849   :  { %v11019_v34 = vld [vmem:[#allocation114_spill] sm:$0xff]  ;;  %v5277_v20 = vadd.f32 %v5178_v41, %v4797_v44  ;;  %v4285_v21 = vadd.f32 %v11029_v52, %v3805_v7  ;;  %v3525_v37 = vadd.f32 %v11032_v27, %v3045_v24  ;;  %v11033_v54 = vld [vmem:[#allocation152_spill] sm:$0xff]  ;;  %v11034_v2 = vld [vmem:[#allocation227_spill] sm:$0xff] }
 0x84a   :  { %v2107_v4 = vmul.f32 %v6202_v40, %v11019_v34  ;;  %v2556_v55 = vadd.f32 %v11022_v48, %v2076_v35  ;;  %5287 = vmatpush.msrb.mxu1 %v5246_v50  ;;  %v4774_v57 = vadd.f32 %v11028_v43, %v4294_v38  ;;  %v4316_v19 = vadd.f32 %v11030_v9, %v3836_v6  ;;  %v11035_v11 = vld [vmem:[#allocation174_spill] sm:$0xff]  ;;  %v6203_v18 = vld [vmem:[%s10191_s2 + $0x2a8] sm:$0xff]  ;;  %v11036_v49 = vld [vmem:[#allocation264_spill] sm:$0xff] }
 0x84b   :  { %5328 = vmatpush.msrb.mxu3 %v5277_v20  ;;  %v3756_v53 = vmul.f32 %v11035_v11, %v11034_v2  ;;  %v3787_v36 = vmul.f32 %v6203_v18, %v11036_v49  ;;  %v11037_v22 = vld [vmem:[#allocation270_spill] sm:$0xff]  ;;  %v11038_v15 = vld [vmem:[#allocation171_spill] sm:$0xff]  ;;  %v11039_v0 = vld [vmem:[#allocation8_spill] sm:$0xff]  ;;  %v3813_v17 = vadd.f32 %v3765_v26, %v3525_v37 }
 0x84c   :  { %v2587_v42 = vadd.f32 %v11023_v8, %v2107_v4  ;;  %v5132_v3 = vpop.permute.xlu2 %5131  ;;  %v3036_v58 = vadd.f32 %v11031_v39, %v2556_v55  ;;  %v4765_v29 = vadd.f32 %v11037_v22, %v4285_v21  ;;  %v4796_v23 = vadd.f32 %v11038_v15, %v4316_v19  ;;  %v6204_v5 = vld [vmem:[%s10191_s2 + $0xa0] sm:$0xff]  ;;  %v6205_v13 = vld [vmem:[%s10191_s2 + $0x130] sm:$0xff]  ;;  %v11040_v30 = vld [vmem:[#allocation25_spill] sm:$0xff] }
 0x84d   :  { %v5254_v61 = vadd.f32 %v5132_v3, %v4774_v57  ;;  %v2075_v46 = vmul.f32 %v6204_v5, %v11039_v0  ;;  %v2084_v62 = vmul.f32 %v6205_v13, %v11040_v30  ;;  %v11041_v56 = vld [vmem:[#allocation178_spill] sm:$0xff]  ;;  %v11042_v35 = vld [vmem:[#allocation212_spill] sm:$0xff]  ;;  %v11045_v45 = vld [vmem:[#allocation327_spill] sm:$0xff] }
 0x84e   :  { %v3067_v14 = vadd.f32 %v11033_v54, %v2587_v42  ;;  %v3516_v28 = vadd.f32 %v11041_v56, %v3036_v58  ;;  %v11043_v34 = vld [vmem:[#allocation74_spill] sm:$0xff]  ;;  %v6206_v32 = vld [vmem:[%s10191_s2 + $0x290] sm:$0xff]  ;;  %v4293_v31 = vadd.f32 %v11045_v45, %v3813_v17  ;;  %v11047_v48 = vld [vmem:[#allocation79_spill] sm:$0xff] }
 0x84f   :  { %v5176_v12 = vpop.permute.xlu0 %5175  ;;  %5315 = vmatpush.msrb.mxu2 %v5254_v61  ;;  %v5114_v44 = vpop.permute.xlu1 %5113  ;;  %v2564_v4 = vadd.f32 %v11043_v34, %v2084_v62  ;;  %v11044_v41 = vld [vmem:[#allocation106_spill] sm:$0xff]  ;;  %v11050_v38 = vld [vmem:[#allocation216_spill] sm:$0xff]  ;;  %v11051_v6 = vld [vmem:[#allocation271_spill] sm:$0xff] }
 0x850   :  { %v3547_v10 = vadd.f32 %v11042_v35, %v3067_v14  ;;  %v5276_v63 = vadd.f32 %v5176_v12, %v4796_v23  ;;  %v5245_v40 = vadd.f32 %v5114_v44, %v4765_v29  ;;  %v2106_v1 = vmul.f32 %v6206_v32, %v11044_v41  ;;  %v11046_v59 = vld [vmem:[#allocation38_spill] sm:$0xff]  ;;  %v11054_v57 = vld [vmem:[#allocation341_spill] sm:$0xff]  ;;  %v11056_v3 = vld [vmem:[#allocation155_spill] sm:$0xff] }
 0x851   :  { %v2555_v16 = vadd.f32 %v11046_v59, %v2075_v46  ;;  %v3804_v20 = vadd.f32 %v3756_v53, %v3516_v28  ;;  %v3044_v55 = vadd.f32 %v11047_v48, %v2564_v4  ;;  %v11048_v8 = vld [vmem:[#allocation150_spill] sm:$0xff]  ;;  %v4773_v51 = vadd.f32 %v11051_v6, %v4293_v31  ;;  %v11058_v54 = vld [vmem:[#allocation225_spill] sm:$0xff]  ;;  %v11061_v18 = vld [vmem:[#allocation272_spill] sm:$0xff] }
 0x852   :  { %v3835_v50 = vadd.f32 %v3787_v36, %v3547_v10  ;;  %5288 = vmatpush.msrb.mxu1 %v5245_v40  ;;  %5329 = vmatpush.msrb.mxu3 %v5276_v63  ;;  %v2586_v42 = vadd.f32 %v11048_v8, %v2106_v1  ;;  %v11049_v47 = vld [vmem:[#allocation234_spill] sm:$0xff]  ;;  %v6208_v2 = vld [vmem:[%s10191_s2 + $0x298] sm:$0xff]  ;;  %v11062_v36 = vld [vmem:[#allocation132_spill] sm:$0xff] }
 0x853   :  { %v3764_v7 = vmul.f32 %v11050_v38, %v11049_v47  ;;  %v6207_v24 = vld [vmem:[%s10191_s2 + $0x120] sm:$0xff]  ;;  %v11060_v11 = vld [vmem:[#allocation257_spill] sm:$0xff]  ;;  %v6209_v29 = vld [vmem:[%s10191_s2 + $0x90] sm:$0xff] }
 0x854   :  { %v11052_v33 = vld [vmem:[#allocation22_spill] sm:$0xff]  ;;  %v4315_v52 = vadd.f32 %v11054_v57, %v3835_v50  ;;  %v5130_v21 = vpop.permute.xlu2 %5129  ;;  %v3066_v39 = vadd.f32 %v11056_v3, %v2586_v42  ;;  %v3786_v53 = vmul.f32 %v6208_v2, %v11060_v11  ;;  %v11063_v15 = vld [vmem:[#allocation7_spill] sm:$0xff]  ;;  %v11064_v5 = vld [vmem:[#allocation76_spill] sm:$0xff] }
 0x855   :  { %v2083_v25 = vmul.f32 %v6207_v24, %v11052_v33  ;;  %v11053_v26 = vld [vmem:[#allocation318_spill] sm:$0xff]  ;;  %v5253_v37 = vadd.f32 %v5130_v21, %v4773_v51  ;;  %v2074_v23 = vmul.f32 %v6209_v29, %v11063_v15  ;;  %v11065_v13 = vld [vmem:[#allocation107_spill] sm:$0xff]  ;;  %v11066_v44 = vld [vmem:[#allocation185_spill] sm:$0xff] }
 0x856   :  { %v4284_v43 = vadd.f32 %v11053_v26, %v3804_v20  ;;  %v11055_v9 = vld [vmem:[#allocation42_spill] sm:$0xff]  ;;  %v4795_v22 = vadd.f32 %v11062_v36, %v4315_v52  ;;  %v11067_v28 = vld [vmem:[#allocation207_spill] sm:$0xff]  ;;  %v11068_v40 = vld [vmem:[#allocation40_spill] sm:$0xff] }
 0x857   :  { %v3035_v19 = vadd.f32 %v11055_v9, %v2555_v16  ;;  %v11057_v58 = vld [vmem:[#allocation194_spill] sm:$0xff]  ;;  %v2563_v0 = vadd.f32 %v11064_v5, %v2083_v25  ;;  %v5174_v17 = vpop.permute.xlu0 %5173  ;;  %5316 = vmatpush.msrb.mxu2 %v5253_v37  ;;  %v5112_v12 = vpop.permute.xlu1 %5111  ;;  %v3546_v35 = vadd.f32 %v11067_v28, %v3066_v39  ;;  %v2554_v34 = vadd.f32 %v11068_v40, %v2074_v23  ;;  %v11069_v4 = vld [vmem:[#allocation148_spill] sm:$0xff]  ;;  %v11072_v20 = vld [vmem:[#allocation241_spill] sm:$0xff] }
 0x858   :  { %v3524_v27 = vadd.f32 %v11057_v58, %v3044_v55  ;;  %v11059_v14 = vld [vmem:[#allocation298_spill] sm:$0xff]  ;;  %v4764_v49 = vadd.f32 %v11061_v18, %v4284_v43  ;;  %v5275_v10 = vadd.f32 %v5174_v17, %v4795_v22  ;;  %v11070_v41 = vld [vmem:[#allocation316_spill] sm:$0xff]  ;;  %v11074_v55 = vld [vmem:[#allocation283_spill] sm:$0xff] }
 0x859   :  { %v3755_v61 = vmul.f32 %v11059_v14, %v11058_v54  ;;  %v6210_v46 = vld [vmem:[%s10191_s2 + $0x280] sm:$0xff]  ;;  %v3515_v56 = vadd.f32 %v11066_v44, %v3035_v19  ;;  %v3834_v31 = vadd.f32 %v3786_v53, %v3546_v35  ;;  %v11073_v50 = vld [vmem:[#allocation300_spill] sm:$0xff]  ;;  %v11075_v47 = vld [vmem:[#allocation15_spill] sm:$0xff] }
 0x85a   :  { %v2105_v30 = vmul.f32 %v6210_v46, %v11065_v13  ;;  %v3812_v62 = vadd.f32 %v3764_v7, %v3524_v27  ;;  %v5244_v63 = vadd.f32 %v5112_v12, %v4764_v49  ;;  %5330 = vmatpush.msrb.mxu3 %v5275_v10  ;;  %v11071_v59 = vld [vmem:[#allocation70_spill] sm:$0xff]  ;;  %v3763_v48 = vmul.f32 %v11073_v50, %v11072_v20  ;;  %v6211_v42 = vld [vmem:[%s10191_s2 + $0x110] sm:$0xff]  ;;  %v11079_v43 = vld [vmem:[#allocation189_spill] sm:$0xff] }
 0x85b   :  { %v3803_v45 = vadd.f32 %v3755_v61, %v3515_v56  ;;  %v3043_v16 = vadd.f32 %v11071_v59, %v2563_v0  ;;  %v2082_v38 = vmul.f32 %v6211_v42, %v11075_v47  ;;  %v11076_v7 = vld [vmem:[#allocation308_spill] sm:$0xff]  ;;  %v11077_v51 = vld [vmem:[#allocation346_spill] sm:$0xff]  ;;  %v11080_v52 = vld [vmem:[#allocation147_spill] sm:$0xff] }
 0x85c   :  { %v2585_v32 = vadd.f32 %v11069_v4, %v2105_v30  ;;  %v4292_v1 = vadd.f32 %v11070_v41, %v3812_v62  ;;  %5289 = vmatpush.msrb.mxu1 %v5244_v63  ;;  %v4314_v24 = vadd.f32 %v11077_v51, %v3834_v31  ;;  %v5128_v33 = vpop.permute.xlu2 %5127  ;;  %v11078_v25 = vld [vmem:[#allocation34_spill] sm:$0xff]  ;;  %v11081_v19 = vld [vmem:[#allocation232_spill] sm:$0xff]  ;;  %v6212_v58 = vld [vmem:[%s10191_s2 + $0x288] sm:$0xff] }
 0x85d   :  { %v4283_v6 = vadd.f32 %v11076_v7, %v3803_v45  ;;  %v3034_v26 = vadd.f32 %v11078_v25, %v2554_v34  ;;  %v3523_v57 = vadd.f32 %v11079_v43, %v3043_v16  ;;  %v11082_v3 = vld [vmem:[#allocation170_spill] sm:$0xff]  ;;  %v11083_v27 = vld [vmem:[#allocation255_spill] sm:$0xff]  ;;  %v11084_v54 = vld [vmem:[#allocation277_spill] sm:$0xff] }
 0x85e   :  { %v4772_v8 = vadd.f32 %v11074_v55, %v4292_v1  ;;  %v3065_v21 = vadd.f32 %v11080_v52, %v2585_v32  ;;  %v3754_v39 = vmul.f32 %v11082_v3, %v11081_v19  ;;  %v3785_v37 = vmul.f32 %v6212_v58, %v11083_v27  ;;  %v11085_v61 = vld [vmem:[#allocation218_spill] sm:$0xff]  ;;  %v11086_v53 = vld [vmem:[#allocation3_spill] sm:$0xff]  ;;  %v11087_v49 = vld [vmem:[#allocation72_spill] sm:$0xff] }
 0x85f   :  { %v4763_v14 = vadd.f32 %v11084_v54, %v4283_v6  ;;  %v4794_v2 = vadd.f32 %v11085_v61, %v4314_v24  ;;  %v6213_v11 = vld [vmem:[%s10191_s2 + $0x80] sm:$0xff]  ;;  %v2562_v36 = vadd.f32 %v11087_v49, %v2082_v38  ;;  %v6214_v22 = vld [vmem:[%s10191_s2 + $0x270] sm:$0xff]  ;;  %v3811_v23 = vadd.f32 %v3763_v48, %v3523_v57  ;;  %v5172_v5 = vpop.permute.xlu0 %5171  ;;  %v5110_v0 = vpop.permute.xlu1 %5109  ;;  %v11092_v28 = vld [vmem:[#allocation151_spill] sm:$0xff] }
 0x860   :  { %v5252_v9 = vadd.f32 %v5128_v33, %v4772_v8  ;;  %v2073_v18 = vmul.f32 %v6213_v11, %v11086_v53  ;;  %v11088_v29 = vld [vmem:[#allocation104_spill] sm:$0xff]  ;;  %v11090_v30 = vld [vmem:[#allocation214_spill] sm:$0xff]  ;;  %v11093_v10 = vld [vmem:[#allocation317_spill] sm:$0xff] }
 0x861   :  { %v2104_v15 = vmul.f32 %v6214_v22, %v11088_v29  ;;  %v11089_v46 = vld [vmem:[#allocation180_spill] sm:$0xff]  ;;  %v3545_v62 = vadd.f32 %v11090_v30, %v3065_v21  ;;  %v5274_v17 = vadd.f32 %v5172_v5, %v4794_v2  ;;  %v5243_v12 = vadd.f32 %v5110_v0, %v4763_v14  ;;  %v11094_v4 = vld [vmem:[#allocation73_spill] sm:$0xff]  ;;  %v11102_v7 = vld [vmem:[#allocation146_spill] sm:$0xff] }
 0x862   :  { %5317 = vmatpush.msrb.mxu2 %v5252_v9  ;;  %v3514_v13 = vadd.f32 %v11089_v46, %v3034_v26  ;;  %v11091_v44 = vld [vmem:[#allocation36_spill] sm:$0xff]  ;;  %v4291_v63 = vadd.f32 %v11093_v10, %v3811_v23  ;;  %v3042_v32 = vadd.f32 %v11094_v4, %v2562_v36  ;;  %v11095_v41 = vld [vmem:[#allocation233_spill] sm:$0xff]  ;;  %v11105_v43 = vld [vmem:[#allocation262_spill] sm:$0xff] }
 0x863   :  { %v2553_v56 = vadd.f32 %v11091_v44, %v2073_v18  ;;  %v2584_v35 = vadd.f32 %v11092_v28, %v2104_v15  ;;  %v3833_v34 = vadd.f32 %v3785_v37, %v3545_v62  ;;  %5290 = vmatpush.msrb.mxu1 %v5243_v12  ;;  %5331 = vmatpush.msrb.mxu3 %v5274_v17  ;;  %v11096_v1 = vld [vmem:[#allocation297_spill] sm:$0xff]  ;;  %v11097_v31 = vld [vmem:[#allocation268_spill] sm:$0xff]  ;;  %v11106_v52 = vld [vmem:[#allocation102_spill] sm:$0xff] }
 0x864   :  { %v3802_v40 = vadd.f32 %v3754_v39, %v3514_v13  ;;  %v3762_v45 = vmul.f32 %v11096_v1, %v11095_v41  ;;  %v4771_v59 = vadd.f32 %v11097_v31, %v4291_v63  ;;  %v11098_v16 = vld [vmem:[#allocation309_spill] sm:$0xff]  ;;  %v5126_v55 = vpop.permute.xlu2 %5125  ;;  %v11101_v47 = vld [vmem:[#allocation184_spill] sm:$0xff]  ;;  %v6217_v27 = vld [vmem:[%s10191_s2 + $0x100] sm:$0xff] }
 0x865   :  { %v11099_v50 = vld [vmem:[#allocation337_spill] sm:$0xff]  ;;  %v3522_v38 = vadd.f32 %v11101_v47, %v3042_v32  ;;  %v3064_v6 = vadd.f32 %v11102_v7, %v2584_v35  ;;  %v11103_v24 = vld [vmem:[#allocation224_spill] sm:$0xff]  ;;  %v11109_v37 = vld [vmem:[#allocation18_spill] sm:$0xff] }
 0x866   :  { %v4282_v20 = vadd.f32 %v11098_v16, %v3802_v40  ;;  %v4313_v48 = vadd.f32 %v11099_v50, %v3833_v34  ;;  %v11100_v8 = vld [vmem:[#allocation37_spill] sm:$0xff]  ;;  %v5251_v51 = vadd.f32 %v5126_v55, %v4771_v59  ;;  %v11104_v33 = vld [vmem:[#allocation172_spill] sm:$0xff]  ;;  %v2081_v54 = vmul.f32 %v6217_v27, %v11109_v37  ;;  %v11110_v11 = vld [vmem:[#allocation175_spill] sm:$0xff] }
 0x867   :  { %v3033_v42 = vadd.f32 %v11100_v8, %v2553_v56  ;;  %v3753_v25 = vmul.f32 %v11104_v33, %v11103_v24  ;;  %v6215_v26 = vld [vmem:[%s10191_s2 + $0x278] sm:$0xff]  ;;  %v11107_v9 = vld [vmem:[#allocation288_spill] sm:$0xff]  ;;  %v3810_v14 = vadd.f32 %v3762_v45, %v3522_v38  ;;  %v5170_v61 = vpop.permute.xlu0 %5169  ;;  %v5108_v2 = vpop.permute.xlu1 %5107  ;;  %v11112_v29 = vld [vmem:[#allocation62_spill] sm:$0xff] }
 0x868   :  { %v3784_v57 = vmul.f32 %v6215_v26, %v11105_v43  ;;  %v4762_v21 = vadd.f32 %v11106_v52, %v4282_v20  ;;  %v4793_v19 = vadd.f32 %v11107_v9, %v4313_v48  ;;  %v6216_v3 = vld [vmem:[%s10191_s2 + $0x70] sm:$0xff]  ;;  %v11108_v39 = vld [vmem:[#allocation5_spill] sm:$0xff]  ;;  %5318 = vmatpush.msrb.mxu2 %v5251_v51  ;;  %v2561_v15 = vadd.f32 %v11112_v29, %v2081_v54  ;;  %v6218_v23 = vld [vmem:[%s10191_s2 + $0x260] sm:$0xff] }
 0x869   :  { %v2072_v58 = vmul.f32 %v6216_v3, %v11108_v39  ;;  %v3513_v53 = vadd.f32 %v11110_v11, %v3033_v42  ;;  %v11111_v18 = vld [vmem:[#allocation209_spill] sm:$0xff]  ;;  %v11114_v46 = vld [vmem:[#allocation324_spill] sm:$0xff]  ;;  %v11115_v30 = vld [vmem:[#allocation26_spill] sm:$0xff] }
 0x86a   :  { %v3544_v49 = vadd.f32 %v11111_v18, %v3064_v6  ;;  %v5273_v36 = vadd.f32 %v5170_v61, %v4793_v19  ;;  %v5242_v22 = vadd.f32 %v5108_v2, %v4762_v21  ;;  %v11113_v5 = vld [vmem:[#allocation93_spill] sm:$0xff]  ;;  %v4290_v13 = vadd.f32 %v11114_v46, %v3810_v14  ;;  %v11116_v44 = vld [vmem:[#allocation66_spill] sm:$0xff]  ;;  %v11118_v10 = vld [vmem:[#allocation231_spill] sm:$0xff] }
 0x86b   :  { %v2103_v0 = vmul.f32 %v6218_v23, %v11113_v5  ;;  %v2552_v62 = vadd.f32 %v11115_v30, %v2072_v58  ;;  %v3801_v17 = vadd.f32 %v3753_v25, %v3513_v53  ;;  %v3041_v56 = vadd.f32 %v11116_v44, %v2561_v15  ;;  %v11117_v28 = vld [vmem:[#allocation145_spill] sm:$0xff]  ;;  %v11121_v32 = vld [vmem:[#allocation315_spill] sm:$0xff]  ;;  %v11122_v1 = vld [vmem:[#allocation338_spill] sm:$0xff] }
 0x86c   :  { %v3832_v12 = vadd.f32 %v3784_v57, %v3544_v49  ;;  %5291 = vmatpush.msrb.mxu1 %v5242_v22  ;;  %5332 = vmatpush.msrb.mxu3 %v5273_v36  ;;  %v11119_v63 = vld [vmem:[#allocation109_spill] sm:$0xff]  ;;  %v5124_v31 = vpop.permute.xlu2 %5123  ;;  %v11123_v59 = vld [vmem:[#allocation31_spill] sm:$0xff]  ;;  %v11126_v42 = vld [vmem:[#allocation222_spill] sm:$0xff] }
 0x86d   :  { %v2583_v35 = vadd.f32 %v11117_v28, %v2103_v0  ;;  %v3761_v40 = vmul.f32 %v11119_v63, %v11118_v10  ;;  %v11120_v34 = vld [vmem:[#allocation269_spill] sm:$0xff]  ;;  %v4281_v41 = vadd.f32 %v11121_v32, %v3801_v17  ;;  %v3032_v16 = vadd.f32 %v11123_v59, %v2552_v62  ;;  %v11125_v48 = vld [vmem:[#allocation191_spill] sm:$0xff]  ;;  %v11127_v47 = vld [vmem:[#allocation90_spill] sm:$0xff] }
 0x86e   :  { %v4770_v4 = vadd.f32 %v11120_v34, %v4290_v13  ;;  %v4312_v45 = vadd.f32 %v11122_v1, %v3832_v12  ;;  %v11124_v20 = vld [vmem:[#allocation149_spill] sm:$0xff]  ;;  %v3521_v55 = vadd.f32 %v11125_v48, %v3041_v56  ;;  %v3752_v38 = vmul.f32 %v11127_v47, %v11126_v42  ;;  %v6219_v7 = vld [vmem:[%s10191_s2 + $0x268] sm:$0xff]  ;;  %v11128_v6 = vld [vmem:[#allocation254_spill] sm:$0xff] }
 0x86f   :  { %v3063_v50 = vadd.f32 %v11124_v20, %v2583_v35  ;;  %v3783_v51 = vmul.f32 %v6219_v7, %v11128_v6  ;;  %v11129_v24 = vld [vmem:[#allocation281_spill] sm:$0xff]  ;;  %v6220_v43 = vld [vmem:[%s10191_s2 + $0x60] sm:$0xff]  ;;  %v11131_v57 = vld [vmem:[#allocation4_spill] sm:$0xff]  ;;  %v5168_v9 = vpop.permute.xlu0 %5167  ;;  %v5106_v19 = vpop.permute.xlu1 %5105 }
 0x870   :  { %v5250_v8 = vadd.f32 %v5124_v31, %v4770_v4  ;;  %v4761_v33 = vadd.f32 %v11129_v24, %v4281_v41  ;;  %v11130_v25 = vld [vmem:[#allocation289_spill] sm:$0xff]  ;;  %v2071_v52 = vmul.f32 %v6220_v43, %v11131_v57  ;;  %v3809_v21 = vadd.f32 %v3761_v40, %v3521_v55  ;;  %v11132_v3 = vld [vmem:[#allocation182_spill] sm:$0xff]  ;;  %v11133_v58 = vld [vmem:[#allocation204_spill] sm:$0xff] }
 0x871   :  { %v4792_v26 = vadd.f32 %v11130_v25, %v4312_v45  ;;  %v3512_v39 = vadd.f32 %v11132_v3, %v3032_v16  ;;  %v3543_v27 = vadd.f32 %v11133_v58, %v3063_v50  ;;  %v11134_v14 = vld [vmem:[#allocation28_spill] sm:$0xff]  ;;  %v11135_v11 = vld [vmem:[#allocation95_spill] sm:$0xff]  ;;  %v11136_v18 = vld [vmem:[#allocation313_spill] sm:$0xff] }
 0x872   :  { %5319 = vmatpush.msrb.mxu2 %v5250_v8  ;;  %v5241_v54 = vadd.f32 %v5106_v19, %v4761_v33  ;;  %v2551_v61 = vadd.f32 %v11134_v14, %v2071_v52  ;;  %v6221_v2 = vld [vmem:[%s10191_s2 + $0x250] sm:$0xff]  ;;  %v4289_v49 = vadd.f32 %v11136_v18, %v3809_v21  ;;  %v11137_v29 = vld [vmem:[#allocation142_spill] sm:$0xff]  ;;  %v11138_v23 = vld [vmem:[#allocation273_spill] sm:$0xff] }
 0x873   :  { %v5272_v37 = vadd.f32 %v5168_v9, %v4792_v26  ;;  %v2102_v53 = vmul.f32 %v6221_v2, %v11135_v11  ;;  %v3800_v36 = vadd.f32 %v3752_v38, %v3512_v39  ;;  %v3831_v22 = vadd.f32 %v3783_v51, %v3543_v27  ;;  %v11139_v0 = vld [vmem:[#allocation306_spill] sm:$0xff]  ;;  %v11140_v13 = vld [vmem:[#allocation345_spill] sm:$0xff]  ;;  %v11141_v17 = vld [vmem:[#allocation144_spill] sm:$0xff] }
 0x874   :  { %5292 = vmatpush.msrb.mxu1 %v5241_v54  ;;  %v4769_v5 = vadd.f32 %v11138_v23, %v4289_v49  ;;  %v5122_v62 = vpop.permute.xlu2 %5121  ;;  %v11142_v44 = vld [vmem:[#allocation23_spill] sm:$0xff]  ;;  %v11143_v35 = vld [vmem:[#allocation229_spill] sm:$0xff]  ;;  %v11144_v10 = vld [vmem:[#allocation294_spill] sm:$0xff] }
 0x875   :  { %5333 = vmatpush.msrb.mxu3 %v5272_v37  ;;  %v2582_v15 = vadd.f32 %v11137_v29, %v2102_v53  ;;  %v4280_v46 = vadd.f32 %v11139_v0, %v3800_v36  ;;  %v4311_v30 = vadd.f32 %v11140_v13, %v3831_v22  ;;  %v3031_v56 = vadd.f32 %v11142_v44, %v2551_v61  ;;  %v11145_v40 = vld [vmem:[#allocation252_spill] sm:$0xff]  ;;  %v11146_v34 = vld [vmem:[#allocation303_spill] sm:$0xff]  ;;  %v11147_v32 = vld [vmem:[#allocation274_spill] sm:$0xff] }
 0x876   :  { %v5249_v28 = vadd.f32 %v5122_v62, %v4769_v5  ;;  %v3751_v63 = vmul.f32 %v11144_v10, %v11143_v35  ;;  %v3782_v4 = vmul.f32 %v11146_v34, %v11145_v40  ;;  %v11148_v1 = vld [vmem:[#allocation167_spill] sm:$0xff]  ;;  %v6222_v31 = vld [vmem:[%s10191_s2 + $0x240] sm:$0xff]  ;;  %v11149_v59 = vld [vmem:[#allocation89_spill] sm:$0xff] }
 0x877   :  { %v3062_v12 = vadd.f32 %v11141_v17, %v2582_v15  ;;  %v4760_v41 = vadd.f32 %v11147_v32, %v4280_v46  ;;  %v4791_v45 = vadd.f32 %v11148_v1, %v4311_v30  ;;  %v2101_v16 = vmul.f32 %v6222_v31, %v11149_v59  ;;  %v5166_v20 = vpop.permute.xlu0 %5165  ;;  %v5104_v50 = vpop.permute.xlu1 %5103  ;;  %v11150_v48 = vld [vmem:[#allocation177_spill] sm:$0xff]  ;;  %v11151_v8 = vld [vmem:[#allocation211_spill] sm:$0xff]  ;;  %v6223_v7 = vld [vmem:[%s10191_s2 + $0x50] sm:$0xff] }
 0x878   :  { %5320 = vmatpush.msrb.mxu2 %v5249_v28  ;;  %v3511_v55 = vadd.f32 %v11150_v48, %v3031_v56  ;;  %v11152_v6 = vld [vmem:[#allocation135_spill] sm:$0xff]  ;;  %v11153_v24 = vld [vmem:[#allocation141_spill] sm:$0xff]  ;;  %v11154_v43 = vld [vmem:[#allocation166_spill] sm:$0xff] }
 0x879   :  { %v3542_v42 = vadd.f32 %v11151_v8, %v3062_v12  ;;  %v5271_v47 = vadd.f32 %v5166_v20, %v4791_v45  ;;  %v5240_v38 = vadd.f32 %v5104_v50, %v4760_v41  ;;  %v2070_v51 = vmul.f32 %v6223_v7, %v11152_v6  ;;  %v11155_v52 = vld [vmem:[#allocation307_spill] sm:$0xff]  ;;  %v11156_v9 = vld [vmem:[#allocation334_spill] sm:$0xff]  ;;  %v11157_v3 = vld [vmem:[#allocation169_spill] sm:$0xff] }
 0x87a   :  { %v2581_v33 = vadd.f32 %v11153_v24, %v2101_v16  ;;  %v3799_v25 = vadd.f32 %v3751_v63, %v3511_v55  ;;  %v11158_v58 = vld [vmem:[#allocation140_spill] sm:$0xff]  ;;  %v11159_v37 = vld [vmem:[#allocation221_spill] sm:$0xff]  ;;  %v11160_v54 = vld [vmem:[#allocation299_spill] sm:$0xff] }
 0x87b   :  { %v3830_v26 = vadd.f32 %v3782_v4, %v3542_v42  ;;  %5293 = vmatpush.msrb.mxu1 %v5240_v38  ;;  %5334 = vmatpush.msrb.mxu3 %v5271_v47  ;;  %v2550_v57 = vadd.f32 %v11154_v43, %v2070_v51  ;;  %v3750_v14 = vmul.f32 %v11160_v54, %v11159_v37  ;;  %v11161_v61 = vld [vmem:[#allocation259_spill] sm:$0xff]  ;;  %v11162_v2 = vld [vmem:[#allocation302_spill] sm:$0xff]  ;;  %v11164_v49 = vld [vmem:[#allocation173_spill] sm:$0xff] }
 0x87c   :  { %v4279_v21 = vadd.f32 %v11155_v52, %v3799_v25  ;;  %v3061_v27 = vadd.f32 %v11158_v58, %v2581_v33  ;;  %v3781_v11 = vmul.f32 %v11162_v2, %v11161_v61  ;;  %v11163_v53 = vld [vmem:[#allocation87_spill] sm:$0xff]  ;;  %v6224_v22 = vld [vmem:[%s10191_s2 + $0x230] sm:$0xff]  ;;  %v6225_v23 = vld [vmem:[%s10191_s2 + $0x40] sm:$0xff] }
 0x87d   :  { %v4310_v19 = vadd.f32 %v11156_v9, %v3830_v26  ;;  %v3030_v39 = vadd.f32 %v11157_v3, %v2550_v57  ;;  %v11165_v29 = vld [vmem:[#allocation80_spill] sm:$0xff]  ;;  %v11166_v5 = vld [vmem:[#allocation130_spill] sm:$0xff]  ;;  %v11169_v28 = vld [vmem:[#allocation139_spill] sm:$0xff] }
 0x87e   :  { %v4759_v18 = vadd.f32 %v11163_v53, %v4279_v21  ;;  %v2100_v15 = vmul.f32 %v6224_v22, %v11165_v29  ;;  %v2069_v0 = vmul.f32 %v6225_v23, %v11166_v5  ;;  %v11167_v30 = vld [vmem:[#allocation100_spill] sm:$0xff]  ;;  %v11168_v17 = vld [vmem:[#allocation206_spill] sm:$0xff]  ;;  %v11172_v41 = vld [vmem:[#allocation335_spill] sm:$0xff] }
 0x87f   :  { %v4790_v36 = vadd.f32 %v11164_v49, %v4310_v19  ;;  %v5164_v46 = vpop.permute.xlu0 %5163  ;;  %v5102_v13 = vpop.permute.xlu1 %5101  ;;  %v3510_v62 = vadd.f32 %v11167_v30, %v3030_v39  ;;  %v3541_v12 = vadd.f32 %v11168_v17, %v3061_v27  ;;  %v11170_v10 = vld [vmem:[#allocation160_spill] sm:$0xff]  ;;  %v11173_v45 = vld [vmem:[#allocation163_spill] sm:$0xff]  ;;  %v11174_v59 = vld [vmem:[#allocation137_spill] sm:$0xff] }
 0x880   :  { %v5239_v56 = vadd.f32 %v5102_v13, %v4759_v18  ;;  %v2580_v35 = vadd.f32 %v11169_v28, %v2100_v15  ;;  %v2549_v63 = vadd.f32 %v11170_v10, %v2069_v0  ;;  %v11171_v4 = vld [vmem:[#allocation312_spill] sm:$0xff]  ;;  %v11175_v20 = vld [vmem:[#allocation219_spill] sm:$0xff]  ;;  %v11176_v50 = vld [vmem:[#allocation2_spill] sm:$0xff] }
 0x881   :  { %v5270_v44 = vadd.f32 %v5164_v46, %v4790_v36  ;;  %v3798_v40 = vadd.f32 %v3750_v14, %v3510_v62  ;;  %v3829_v34 = vadd.f32 %v3781_v11, %v3541_v12  ;;  %v3749_v48 = vmul.f32 %v11176_v50, %v11175_v20  ;;  %v11177_v55 = vld [vmem:[#allocation251_spill] sm:$0xff]  ;;  %v11178_v8 = vld [vmem:[#allocation13_spill] sm:$0xff]  ;;  %v11179_v47 = vld [vmem:[#allocation266_spill] sm:$0xff] }
 0x882   :  { %5294 = vmatpush.msrb.mxu1 %v5239_v56  ;;  %v3029_v31 = vadd.f32 %v11173_v45, %v2549_v63  ;;  %v3060_v16 = vadd.f32 %v11174_v59, %v2580_v35  ;;  %v3780_v42 = vmul.f32 %v11178_v8, %v11177_v55  ;;  %v11180_v7 = vld [vmem:[#allocation286_spill] sm:$0xff]  ;;  %v11181_v33 = vld [vmem:[#allocation179_spill] sm:$0xff]  ;;  %v11183_v19 = vld [vmem:[#allocation81_spill] sm:$0xff] }
 0x883   :  { %5335 = vmatpush.msrb.mxu3 %v5270_v44  ;;  %v4278_v32 = vadd.f32 %v11171_v4, %v3798_v40  ;;  %v4309_v1 = vadd.f32 %v11172_v41, %v3829_v34  ;;  %v11182_v26 = vld [vmem:[#allocation202_spill] sm:$0xff]  ;;  %v5282_v21 = vld [vmem:[%s10192_s3 + $0x8] sm:$0xff]  ;;  %v11184_v27 = vld [vmem:[#allocation133_spill] sm:$0xff] }
 0x884   :  { %v3509_v25 = vadd.f32 %v11181_v33, %v3029_v31  ;;  %v3540_v43 = vadd.f32 %v11182_v26, %v3060_v16  ;;  %v6226_v9 = vld [vmem:[%s10191_s2 + $0x220] sm:$0xff]  ;;  %5321 = vmatmul.f32.vlgmr.msrb.gmra.mxu2 %v5282_v21  ;;  %v11185_v54 = vld [vmem:[#allocation304_spill] sm:$0xff]  ;;  %v11188_v18 = vld [vmem:[#allocation249_spill] sm:$0xff] }
 0x885   :  { %v4758_v38 = vadd.f32 %v11179_v47, %v4278_v32  ;;  %v4789_v6 = vadd.f32 %v11180_v7, %v4309_v1  ;;  %v2099_v3 = vmul.f32 %v6226_v9, %v11183_v19  ;;  %v11186_v61 = vld [vmem:[#allocation342_spill] sm:$0xff]  ;;  %v11189_v49 = vld [vmem:[#allocation51_spill] sm:$0xff]  ;;  %v11190_v22 = vld [vmem:[#allocation284_spill] sm:$0xff] }
 0x886   :  { %v3797_v39 = vadd.f32 %v3749_v48, %v3509_v25  ;;  %v3828_v58 = vadd.f32 %v3780_v42, %v3540_v43  ;;  %v11187_v11 = vld [vmem:[#allocation134_spill] sm:$0xff]  ;;  %v3779_v36 = vmul.f32 %v11189_v49, %v11188_v18  ;;  %v6227_v46 = vld [vmem:[%s10191_s2 + $0x210] sm:$0xff]  ;;  %v11192_v13 = vld [vmem:[#allocation77_spill] sm:$0xff]  ;;  %v5154_v49 = vpop.permute.xlu2 %5153 }
 0x887   :  { %v5162_v51 = vpop.permute.xlu0 %5161  ;;  %v5100_v24 = vpop.permute.xlu1 %5099  ;;  %v2579_v37 = vadd.f32 %v11184_v27, %v2099_v3  ;;  %v11191_v15 = vld [vmem:[#allocation282_spill] sm:$0xff]  ;;  %v2098_v30 = vmul.f32 %v6227_v46, %v11192_v13  ;;  %v11193_v62 = vld [vmem:[#allocation208_spill] sm:$0xff]  ;;  %v11195_v10 = vld [vmem:[#allocation131_spill] sm:$0xff] }
 0x888   :  { %v5269_v57 = vadd.f32 %v5162_v51, %v4789_v6  ;;  %v5238_v52 = vadd.f32 %v5100_v24, %v4758_v38  ;;  %v4277_v14 = vadd.f32 %v11185_v54, %v3797_v39  ;;  %v4308_v2 = vadd.f32 %v11186_v61, %v3828_v58  ;;  %v6228_v56 = vld [vmem:[%s10191_s2 + $0x200] sm:$0xff]  ;;  %v11194_v28 = vld [vmem:[#allocation68_spill] sm:$0xff]  ;;  %v11197_v32 = vld [vmem:[#allocation331_spill] sm:$0xff] }
 0x889   :  { %v3059_v53 = vadd.f32 %v11187_v11, %v2579_v37  ;;  %v2097_v35 = vmul.f32 %v6228_v56, %v11194_v28  ;;  %v2578_v63 = vadd.f32 %v11195_v10, %v2098_v30  ;;  %v11196_v34 = vld [vmem:[#allocation128_spill] sm:$0xff]  ;;  %v11198_v1 = vld [vmem:[#allocation127_spill] sm:$0xff]  ;;  %v11202_v48 = vld [vmem:[#allocation129_spill] sm:$0xff] }
 0x88a   :  { %5295 = vmatpush.msrb.mxu1 %v5238_v52  ;;  %5336 = vmatpush.msrb.mxu3 %v5269_v57  ;;  %v4757_v29 = vadd.f32 %v11190_v22, %v4277_v14  ;;  %v4788_v23 = vadd.f32 %v11191_v15, %v4308_v2  ;;  %v11199_v31 = vld [vmem:[#allocation256_spill] sm:$0xff]  ;;  %v11201_v20 = vld [vmem:[#allocation143_spill] sm:$0xff]  ;;  %v11203_v47 = vld [vmem:[#allocation9_spill] sm:$0xff] }
 0x88b   :  { %v3539_v17 = vadd.f32 %v11193_v62, %v3059_v53  ;;  %v2577_v4 = vadd.f32 %v11196_v34, %v2097_v35  ;;  %v3058_v45 = vadd.f32 %v11198_v1, %v2578_v63  ;;  %v11200_v59 = vld [vmem:[#allocation24_spill] sm:$0xff]  ;;  %v11206_v33 = vld [vmem:[#allocation275_spill] sm:$0xff]  ;;  %v11209_v19 = vld [vmem:[#allocation165_spill] sm:$0xff] }
 0x88c   :  { %v3778_v16 = vmul.f32 %v11200_v59, %v11199_v31  ;;  %v11204_v7 = vld [vmem:[#allocation248_spill] sm:$0xff]  ;;  %v11208_v52 = vld [vmem:[#allocation199_spill] sm:$0xff]  ;;  %v11217_v46 = vld [vmem:[#allocation278_spill] sm:$0xff] }
 0x88d   :  { %v3827_v40 = vadd.f32 %v3779_v36, %v3539_v17  ;;  %v3057_v55 = vadd.f32 %v11202_v48, %v2577_v4  ;;  %v3538_v38 = vadd.f32 %v11203_v47, %v3058_v45  ;;  %v11205_v6 = vld [vmem:[#allocation20_spill] sm:$0xff]  ;;  %v11212_v14 = vld [vmem:[#allocation223_spill] sm:$0xff]  ;;  %v11218_v17 = vld [vmem:[#allocation301_spill] sm:$0xff] }
 0x88e   :  { %v3777_v51 = vmul.f32 %v11205_v6, %v11204_v7  ;;  %v6229_v26 = vld [vmem:[%s10191_s2 + $0x10] sm:$0xff]  ;;  %v3746_v61 = vmul.f32 %v9790_v60, %v11212_v14  ;;  %v11213_v2 = vld [vmem:[#allocation339_spill] sm:$0xff]  ;;  %v5281_v34 = vld [vmem:[%s10192_s3] sm:$0xff] }
 0x88f   :  { %v5160_v5 = vpop.permute.xlu0 %5159  ;;  %v5098_v0 = vpop.permute.xlu1 %5097  ;;  %v4307_v41 = vadd.f32 %v11197_v32, %v3827_v40  ;;  %v11207_v43 = vld [vmem:[#allocation136_spill] sm:$0xff]  ;;  %v3537_v21 = vadd.f32 %v11208_v52, %v3057_v55  ;;  %v3826_v9 = vadd.f32 %v3778_v16, %v3538_v38  ;;  %v11220_v63 = vld [vmem:[#allocation75_spill] sm:$0xff]  ;;  %v6230_v4 = vld [vmem:[%s10190_s4] sm:$0xff] }
 0x890   :  { %v5268_v12 = vadd.f32 %v5160_v5, %v4788_v23  ;;  %v5237_v44 = vadd.f32 %v5098_v0, %v4757_v29  ;;  %v2066_v57 = vmul.f32 %v6229_v26, %v11207_v43  ;;  %v11210_v39 = vld [vmem:[#allocation332_spill] sm:$0xff]  ;;  %v11216_v23 = vld [vmem:[#allocation279_spill] sm:$0xff]  ;;  %v5284_v32 = vperm.slane %v6230_v4, 1 }
 0x891   :  { %v4787_v50 = vadd.f32 %v11201_v20, %v4307_v41  ;;  %v4306_v58 = vadd.f32 %v11210_v39, %v3826_v9  ;;  %v3825_v27 = vadd.f32 %v3777_v51, %v3537_v21  ;;  %v11211_v37 = vld [vmem:[#allocation168_spill] sm:$0xff] }
 0x892   :  { %5296 = vmatpush.msrb.mxu1 %v5237_v44  ;;  %5337 = vmatpush.msrb.mxu3 %v5268_v12  ;;  %v2546_v3 = vadd.f32 %v11209_v19, %v2066_v57  ;;  %v11214_v53 = vld [vmem:[#allocation296_spill] sm:$0xff]  ;;  %v11219_v44 = vld [vmem:[#allocation267_spill] sm:$0xff] }
 0x893   :  { %v4305_v11 = vadd.f32 %v11213_v2, %v3825_v27  ;;  %v4786_v18 = vadd.f32 %v11214_v53, %v4306_v58  ;;  %v11215_v29 = vld [vmem:[#allocation176_spill] sm:$0xff] }
 0x894   :  { %v3026_v54 = vadd.f32 %v11211_v37, %v2546_v3  ;;  %v5283_v60 = vld [vmem:[%s10192_s3 + $0x10] sm:$0xff] }
 0x895   :  { %v4785_v5 = vadd.f32 %v11216_v23, %v4305_v11 }
 0x896   :  { %v3506_v15 = vadd.f32 %v11215_v29, %v3026_v54 }
 0x897   :  { %v5158_v8 = vpop.permute.xlu0 %5157  ;;  %v5096_v42 = vpop.permute.xlu1 %5095  ;;  %v5265_v62 = vadd.f32 %v5154_v49, %v4785_v5 }
 0x898   :  { %v5267_v24 = vadd.f32 %v5158_v8, %v4787_v50  ;;  %v5236_v25 = vadd.f32 %v5096_v42, %v11206_v33  ;;  %v3794_v30 = vadd.f32 %v3746_v61, %v3506_v15 }
 0x89a   :  { %5297 = vmatpush.msrb.mxu1 %v5236_v25  ;;  %5338 = vmatpush.msrb.mxu3 %v5267_v24  ;;  %v4274_v12 = vadd.f32 %v11218_v17, %v3794_v30 }
 0x89c   :  { %v4754_v56 = vadd.f32 %v11219_v44, %v4274_v12 }
 0x89f   :  { %v5094_v22 = vpop.permute.xlu1 %5093 }
 0x8a0   :  { %v5156_v36 = vpop.permute.xlu0 %5155  ;;  %v5235_v13 = vadd.f32 %v5094_v22, %v11217_v46 }
 0x8a1   :  { %v5266_v0 = vadd.f32 %v5156_v36, %v4786_v18 }
 0x8a2   :  { %5298 = vmatpush.msrb.mxu1 %v5235_v13 }
 0x8a3   :  { %5339 = vmatpush.msrb.mxu3 %v5266_v0 }
 0x8a5   :  { %5340 = vmatpush.msrb.mxu3 %v5265_v62 }
 0x8a6   :  { %5341 = vmatmul.f32.vlgmr.msrb.gmra.mxu3 %v5283_v60 }
 0x8a8   :  { %v5090_v28 = vpop.permute.xlu0 %5089  ;;  %v5092_v35 = vpop.permute.xlu1 %5091 }
 0x8a9   :  { %v5234_v10 = vadd.f32 %v5092_v35, %v4754_v56  ;;  %v5233_v40 = vadd.f32 %v5090_v28, %v11220_v63 }
 0x8ab   :  { %5299 = vmatpush.msrb.mxu1 %v5234_v10 }
 0x8ad   :  { %5300 = vmatpush.msrb.mxu1 %v5233_v40 }
 0x8ae   :  { %5301 = vmatmul.f32.vlgmr.msrb.gmra.mxu1 %v5281_v34 }
 0x907   :  { %v5322_v1 = vpop.f32.mrf.mxu2 }
 0x929   :  { %v5342_v31 = vpop.f32.mrf.mxu3 }
 0x92b   :  { %v5302_v41 = vpop.f32.mrf.mxu1 }
 0x92c   :  { %v5303_v45 = vadd.f32 %v5302_v41, %v5284_v32 }
 0x92e   :  { %v5323_v59 = vadd.f32 %v5322_v1, %v5303_v45 }
 0x930   :  { %v5343_v16 = vadd.f32 %v5342_v31, %v5323_v59 }
 0x932   :  { %v5345_v20 = vmax.f32 %v5343_v16, 0.0 }
 0x934   :  { %v5346_v50 = vsel %vm709_vm0, %v5345_v20, 0.0 }
 0x935   :  { %5347 = vst [vmem:[%s10193_s5] sm:$0xff] %v5346_v50 }

// kernel: _forward_core.7
= control target key start
LH: loop header
LB: loop body
LE: loop exit
PB: predicated region body
PF: predicated region fallthrough
CT: control target
= control target key end

     0   :  { %s279_s12 = smov [#allocation3]   ;;  %s304_s0 = inlined_call_operand.vmem [shape: s32[1,2], index: 0, kind: input, shape index: {}]   ;;  %s305_s1 = inlined_call_operand.vmem [shape: f32[1,8,128], index: 1, kind: input, shape index: {}]   ;;  %s306_s2 = inlined_call_operand.vmem [shape: f32[1,8,128], index: 2, kind: output, shape index: {}]  }
   0x1   :  { %s8_s11 = sshll.u32 %s304_s0, 4  ;;  %s9_s11 = int_to_ptr.vmem [resolvable:$true] %s8_s11 }
   0x2   :  { %11 = dma.vmem_to_smem %s9_s11, 16, %s279_s12, [#allocation2] }
   0x3   :  { %277 = dma.done.wait [#allocation2], 16 }
   0x4   :  { %278 = vsyncadd [#allocation2], 4294967280 }
   0x5   :  { %14 = sfence }
   0x6   :  { %s18_s13 = sld [smem:[#allocation3]]  ;;  %v21_v0 = vlaneseq  ;;  %v30_v5 = vld [vmem:[%s305_s1] sm:$0xff] }
   0x7   :  { %s223_s14 = sld [smem:[#allocation3 + $0x1]] }
   0x8   :  { %v22_v1 = vshrl.u32 %v21_v0, 7  ;;  %v24_v2 = vand.u32 127, %v21_v0 }
   0xc   :  { %v25_v3 = vstv %s18_s13 }
   0xd   :  { %vm26_vm0 = vcmp.lt.s32.totalorder %v22_v1, %v25_v3  ;;  %v27_v4 = vstv %s223_s14 }
   0xe   :  { %vm28_vm1 = vcmp.lt.s32.totalorder %v24_v2, %v27_v4 }
   0xf   :  { %vm29_vm2 = vmand %vm26_vm0, %vm28_vm1 }
  0x10   :  { %v31_v6 = vsel %vm29_vm2, %v30_v5, 0.0 }
  0x11   :  { %32 = vadd.xlane.f32.xlu0 %v31_v6 }
  0x84   :  { %v33_v7 = vpop.xlane.xlu0 %32 }
  0x85   :  { %vm34_vm3 = vcmp.gt.f32.partialorder %v33_v7, 0.0 }
  0x86   :  { %v35_v8 = vsel %vm34_vm3, %v33_v7, 1.0 }
  0x87   :  { %225 = vrcp.f32 %v35_v8 }
  0x8d   :  { %v226_v9 = vpop.eup %225 }
  0x8e   :  { %v37_v10 = vmul.f32 %v226_v9, %v31_v6 }
  0x90   :  { %v38_v11 = vrot.slane %v37_v10, 4 }
  0x92   :  { %v39_v12 = vadd.f32 %v38_v11, %v37_v10 }
  0x94   :  { %v40_v13 = vrot.slane %v39_v12, 2 }
  0x96   :  { %v41_v14 = vadd.f32 %v40_v13, %v39_v12 }
  0x98   :  { %v42_v15 = vrot.slane %v41_v14, 1 }
  0x9a   :  { %v43_v16 = vadd.f32 %v42_v15, %v41_v14 }
  0x9c   :  { %vm44_vm4 = vcmp.gt.f32.partialorder %v43_v16, 0.0 }
  0x9d   :  { %v45_v17 = vsel %vm44_vm4, %v43_v16, 1.0 }
  0x9e   :  { %227 = vrcp.f32 %v45_v17 }
  0xa4   :  { %v228_v18 = vpop.eup %227 }
  0xa5   :  { %v47_v19 = vmul.f32 %v228_v18, %v37_v10 }
  0xa7   :  { %48 = vadd.xlane.f32.xlu0 %v47_v19 }
 0x11a   :  { %v49_v20 = vpop.xlane.xlu0 %48 }
 0x11b   :  { %vm50_vm5 = vcmp.gt.f32.partialorder %v49_v20, 0.0 }
 0x11c   :  { %v51_v21 = vsel %vm50_vm5, %v49_v20, 1.0 }
 0x11d   :  { %229 = vrcp.f32 %v51_v21 }
 0x123   :  { %v230_v22 = vpop.eup %229 }
 0x124   :  { %v53_v23 = vmul.f32 %v230_v22, %v47_v19 }
 0x126   :  { %v54_v24 = vrot.slane %v53_v23, 4 }
 0x128   :  { %v55_v25 = vadd.f32 %v54_v24, %v53_v23 }
 0x12a   :  { %v56_v26 = vrot.slane %v55_v25, 2 }
 0x12c   :  { %v57_v27 = vadd.f32 %v56_v26, %v55_v25 }
 0x12e   :  { %v58_v28 = vrot.slane %v57_v27, 1 }
 0x130   :  { %v59_v29 = vadd.f32 %v58_v28, %v57_v27 }
 0x132   :  { %vm60_vm6 = vcmp.gt.f32.partialorder %v59_v29, 0.0 }
 0x133   :  { %v61_v30 = vsel %vm60_vm6, %v59_v29, 1.0 }
 0x134   :  { %231 = vrcp.f32 %v61_v30 }
 0x13a   :  { %v232_v31 = vpop.eup %231 }
 0x13b   :  { %v63_v32 = vmul.f32 %v232_v31, %v53_v23 }
 0x13d   :  { %64 = vadd.xlane.f32.xlu1 %v63_v32 }
 0x1b0   :  { %v65_v33 = vpop.xlane.xlu1 %64 }
 0x1b1   :  { %vm66_vm7 = vcmp.gt.f32.partialorder %v65_v33, 0.0 }
 0x1b2   :  { %v67_v34 = vsel %vm66_vm7, %v65_v33, 1.0 }
 0x1b3   :  { %233 = vrcp.f32 %v67_v34 }
 0x1b9   :  { %v234_v35 = vpop.eup %233 }
 0x1ba   :  { %v69_v36 = vmul.f32 %v234_v35, %v63_v32 }
 0x1bc   :  { %v70_v37 = vrot.slane %v69_v36, 4 }
 0x1be   :  { %v71_v38 = vadd.f32 %v70_v37, %v69_v36 }
 0x1c0   :  { %v72_v39 = vrot.slane %v71_v38, 2 }
 0x1c2   :  { %v73_v40 = vadd.f32 %v72_v39, %v71_v38 }
 0x1c4   :  { %v74_v41 = vrot.slane %v73_v40, 1 }
 0x1c6   :  { %v75_v42 = vadd.f32 %v74_v41, %v73_v40 }
 0x1c8   :  { %vm76_vm8 = vcmp.gt.f32.partialorder %v75_v42, 0.0 }
 0x1c9   :  { %v77_v43 = vsel %vm76_vm8, %v75_v42, 1.0 }
 0x1ca   :  { %235 = vrcp.f32 %v77_v43 }
 0x1d0   :  { %v236_v44 = vpop.eup %235 }
 0x1d1   :  { %v79_v45 = vmul.f32 %v236_v44, %v69_v36 }
 0x1d3   :  { %80 = vadd.xlane.f32.xlu1 %v79_v45 }
 0x246   :  { %v81_v46 = vpop.xlane.xlu1 %80 }
 0x247   :  { %vm82_vm9 = vcmp.gt.f32.partialorder %v81_v46, 0.0 }
 0x248   :  { %v83_v47 = vsel %vm82_vm9, %v81_v46, 1.0 }
 0x249   :  { %237 = vrcp.f32 %v83_v47 }
 0x24f   :  { %v238_v48 = vpop.eup %237 }
 0x250   :  { %v85_v49 = vmul.f32 %v238_v48, %v79_v45 }
 0x252   :  { %v86_v50 = vrot.slane %v85_v49, 4 }
 0x254   :  { %v87_v51 = vadd.f32 %v86_v50, %v85_v49 }
 0x256   :  { %v88_v52 = vrot.slane %v87_v51, 2 }
 0x258   :  { %v89_v53 = vadd.f32 %v88_v52, %v87_v51 }
 0x25a   :  { %v90_v54 = vrot.slane %v89_v53, 1 }
 0x25c   :  { %v91_v55 = vadd.f32 %v90_v54, %v89_v53 }
 0x25e   :  { %vm92_vm10 = vcmp.gt.f32.partialorder %v91_v55, 0.0 }
 0x25f   :  { %v93_v56 = vsel %vm92_vm10, %v91_v55, 1.0 }
 0x260   :  { %239 = vrcp.f32 %v93_v56 }
 0x266   :  { %v240_v57 = vpop.eup %239 }
 0x267   :  { %v95_v58 = vmul.f32 %v240_v57, %v85_v49 }
 0x269   :  { %96 = vadd.xlane.f32.xlu2 %v95_v58 }
 0x2dc   :  { %v97_v59 = vpop.xlane.xlu2 %96 }
 0x2dd   :  { %vm98_vm11 = vcmp.gt.f32.partialorder %v97_v59, 0.0 }
 0x2de   :  { %v99_v60 = vsel %vm98_vm11, %v97_v59, 1.0 }
 0x2df   :  { %241 = vrcp.f32 %v99_v60 }
 0x2e5   :  { %v242_v61 = vpop.eup %241 }
 0x2e6   :  { %v101_v62 = vmul.f32 %v242_v61, %v95_v58 }
 0x2e8   :  { %v102_v63 = vrot.slane %v101_v62, 4 }
 0x2ea   :  { %v103_v0 = vadd.f32 %v102_v63, %v101_v62 }
 0x2ec   :  { %v104_v1 = vrot.slane %v103_v0, 2 }
 0x2ee   :  { %v105_v2 = vadd.f32 %v104_v1, %v103_v0 }
 0x2f0   :  { %v106_v3 = vrot.slane %v105_v2, 1 }
 0x2f2   :  { %v107_v4 = vadd.f32 %v106_v3, %v105_v2 }
 0x2f4   :  { %vm108_vm12 = vcmp.gt.f32.partialorder %v107_v4, 0.0 }
 0x2f5   :  { %v109_v5 = vsel %vm108_vm12, %v107_v4, 1.0 }
 0x2f6   :  { %243 = vrcp.f32 %v109_v5 }
 0x2fc   :  { %v244_v6 = vpop.eup %243 }
 0x2fd   :  { %v111_v7 = vmul.f32 %v244_v6, %v101_v62 }
 0x2ff   :  { %112 = vadd.xlane.f32.xlu2 %v111_v7 }
 0x372   :  { %v113_v8 = vpop.xlane.xlu2 %112 }
 0x373   :  { %vm114_vm13 = vcmp.gt.f32.partialorder %v113_v8, 0.0 }
 0x374   :  { %v115_v9 = vsel %vm114_vm13, %v113_v8, 1.0 }
 0x375   :  { %245 = vrcp.f32 %v115_v9 }
 0x37b   :  { %v246_v10 = vpop.eup %245 }
 0x37c   :  { %v117_v11 = vmul.f32 %v246_v10, %v111_v7 }
 0x37e   :  { %v118_v12 = vrot.slane %v117_v11, 4 }
 0x380   :  { %v119_v13 = vadd.f32 %v118_v12, %v117_v11 }
 0x382   :  { %v120_v14 = vrot.slane %v119_v13, 2 }
 0x384   :  { %v121_v15 = vadd.f32 %v120_v14, %v119_v13 }
 0x386   :  { %v122_v16 = vrot.slane %v121_v15, 1 }
 0x388   :  { %v123_v17 = vadd.f32 %v122_v16, %v121_v15 }
 0x38a   :  { %vm124_vm14 = vcmp.gt.f32.partialorder %v123_v17, 0.0 }
 0x38b   :  { %v125_v18 = vsel %vm124_vm14, %v123_v17, 1.0 }
 0x38c   :  { %247 = vrcp.f32 %v125_v18 }
 0x392   :  { %v248_v19 = vpop.eup %247 }
 0x393   :  { %v127_v20 = vmul.f32 %v248_v19, %v117_v11 }
 0x395   :  { %128 = vadd.xlane.f32.xlu0 %v127_v20 }
 0x408   :  { %v129_v21 = vpop.xlane.xlu0 %128 }
 0x409   :  { %vm130_vm15 = vcmp.gt.f32.partialorder %v129_v21, 0.0 }
 0x40a   :  { %v131_v22 = vsel %vm130_vm15, %v129_v21, 1.0 }
 0x40b   :  { %249 = vrcp.f32 %v131_v22 }
 0x411   :  { %v250_v23 = vpop.eup %249 }
 0x412   :  { %v133_v24 = vmul.f32 %v250_v23, %v127_v20 }
 0x414   :  { %v134_v25 = vrot.slane %v133_v24, 4 }
 0x416   :  { %v135_v26 = vadd.f32 %v134_v25, %v133_v24 }
 0x418   :  { %v136_v27 = vrot.slane %v135_v26, 2 }
 0x41a   :  { %v137_v28 = vadd.f32 %v136_v27, %v135_v26 }
 0x41c   :  { %v138_v29 = vrot.slane %v137_v28, 1 }
 0x41e   :  { %v139_v30 = vadd.f32 %v138_v29, %v137_v28 }
 0x420   :  { %vm140_vm0 = vcmp.gt.f32.partialorder %v139_v30, 0.0 }
 0x421   :  { %v141_v31 = vsel %vm140_vm0, %v139_v30, 1.0 }
 0x422   :  { %251 = vrcp.f32 %v141_v31 }
 0x428   :  { %v252_v32 = vpop.eup %251 }
 0x429   :  { %v143_v33 = vmul.f32 %v252_v32, %v133_v24 }
 0x42b   :  { %144 = vadd.xlane.f32.xlu1 %v143_v33 }
 0x49e   :  { %v145_v34 = vpop.xlane.xlu1 %144 }
 0x49f   :  { %vm146_vm1 = vcmp.gt.f32.partialorder %v145_v34, 0.0 }
 0x4a0   :  { %v147_v35 = vsel %vm146_vm1, %v145_v34, 1.0 }
 0x4a1   :  { %253 = vrcp.f32 %v147_v35 }
 0x4a7   :  { %v254_v36 = vpop.eup %253 }
 0x4a8   :  { %v149_v37 = vmul.f32 %v254_v36, %v143_v33 }
 0x4aa   :  { %v150_v38 = vrot.slane %v149_v37, 4 }
 0x4ac   :  { %v151_v39 = vadd.f32 %v150_v38, %v149_v37 }
 0x4ae   :  { %v152_v40 = vrot.slane %v151_v39, 2 }
 0x4b0   :  { %v153_v41 = vadd.f32 %v152_v40, %v151_v39 }
 0x4b2   :  { %v154_v42 = vrot.slane %v153_v41, 1 }
 0x4b4   :  { %v155_v43 = vadd.f32 %v154_v42, %v153_v41 }
 0x4b6   :  { %vm156_vm2 = vcmp.gt.f32.partialorder %v155_v43, 0.0 }
 0x4b7   :  { %v157_v44 = vsel %vm156_vm2, %v155_v43, 1.0 }
 0x4b8   :  { %255 = vrcp.f32 %v157_v44 }
 0x4be   :  { %v256_v45 = vpop.eup %255 }
 0x4bf   :  { %v159_v46 = vmul.f32 %v256_v45, %v149_v37 }
 0x4c1   :  { %160 = vadd.xlane.f32.xlu2 %v159_v46 }
 0x534   :  { %v161_v47 = vpop.xlane.xlu2 %160 }
 0x535   :  { %vm162_vm3 = vcmp.gt.f32.partialorder %v161_v47, 0.0 }
 0x536   :  { %v163_v48 = vsel %vm162_vm3, %v161_v47, 1.0 }
 0x537   :  { %257 = vrcp.f32 %v163_v48 }
 0x53d   :  { %v258_v49 = vpop.eup %257 }
 0x53e   :  { %v165_v50 = vmul.f32 %v258_v49, %v159_v46 }
 0x540   :  { %v166_v51 = vrot.slane %v165_v50, 4 }
 0x542   :  { %v167_v52 = vadd.f32 %v166_v51, %v165_v50 }
 0x544   :  { %v168_v53 = vrot.slane %v167_v52, 2 }
 0x546   :  { %v169_v54 = vadd.f32 %v168_v53, %v167_v52 }
 0x548   :  { %v170_v55 = vrot.slane %v169_v54, 1 }
 0x54a   :  { %v171_v56 = vadd.f32 %v170_v55, %v169_v54 }
 0x54c   :  { %vm172_vm4 = vcmp.gt.f32.partialorder %v171_v56, 0.0 }
 0x54d   :  { %v173_v57 = vsel %vm172_vm4, %v171_v56, 1.0 }
 0x54e   :  { %259 = vrcp.f32 %v173_v57 }
 0x554   :  { %v260_v58 = vpop.eup %259 }
 0x555   :  { %v175_v59 = vmul.f32 %v260_v58, %v165_v50 }
 0x557   :  { %176 = vadd.xlane.f32.xlu0 %v175_v59 }
 0x5ca   :  { %v177_v60 = vpop.xlane.xlu0 %176 }
 0x5cb   :  { %vm178_vm5 = vcmp.gt.f32.partialorder %v177_v60, 0.0 }
 0x5cc   :  { %v179_v61 = vsel %vm178_vm5, %v177_v60, 1.0 }
 0x5cd   :  { %261 = vrcp.f32 %v179_v61  ;;  %v191_v1 = vand.u32 2147483648, %v179_v61  ;;  %v189_v3 = vand.u32 2147483647, %v179_v61  ;;  %vm185_vm7 = vweird.f32 %v179_v61 }
 0x5cf   :  { %v192_v5 = vor.u32 1.1754944e-38, %v191_v1  ;;  %vm190_vm9 = vcmp.eq.f32.partialorder %v189_v3, 8.507059e+37 }
 0x5d3   :  { %v262_v62 = vpop.eup %261 }
 0x5d4   :  { %v181_v63 = vmul.f32 %v262_v62, %v179_v61  ;;  %vm186_vm6 = vweird.f32 %v262_v62 }
 0x5d5   :  { %vm187_vm8 = vmor %vm185_vm7, %vm186_vm6 }
 0x5d6   :  { %v182_v0 = vsub.f32 1.0, %v181_v63 }
 0x5d8   :  { %v183_v2 = vmul.f32 %v262_v62, %v182_v0 }
 0x5da   :  { %v184_v4 = vadd.f32 %v262_v62, %v183_v2 }
 0x5dc   :  { %v188_v6 = vsel %vm187_vm8, %v262_v62, %v184_v4 }
 0x5dd   :  { %v193_v7 = vsel %vm190_vm9, %v192_v5, %v188_v6 }
 0x5de   :  { %v194_v8 = vmul.f32 %v193_v7, %v175_v59 }
 0x5e0   :  { %v195_v9 = vrot.slane %v194_v8, 4 }
 0x5e2   :  { %v196_v10 = vadd.f32 %v195_v9, %v194_v8 }
 0x5e4   :  { %v197_v11 = vrot.slane %v196_v10, 2 }
 0x5e6   :  { %v198_v12 = vadd.f32 %v197_v11, %v196_v10 }
 0x5e8   :  { %v199_v13 = vrot.slane %v198_v12, 1 }
 0x5ea   :  { %v200_v14 = vadd.f32 %v199_v13, %v198_v12 }
 0x5ec   :  { %vm201_vm10 = vcmp.gt.f32.partialorder %v200_v14, 0.0 }
 0x5ed   :  { %v202_v15 = vsel %vm201_vm10, %v200_v14, 1.0 }
 0x5ee   :  { %263 = vrcp.f32 %v202_v15  ;;  %v214_v19 = vand.u32 2147483648, %v202_v15  ;;  %v212_v21 = vand.u32 2147483647, %v202_v15  ;;  %vm208_vm12 = vweird.f32 %v202_v15 }
 0x5f0   :  { %v215_v23 = vor.u32 1.1754944e-38, %v214_v19  ;;  %vm213_vm14 = vcmp.eq.f32.partialorder %v212_v21, 8.507059e+37 }
 0x5f4   :  { %v264_v16 = vpop.eup %263 }
 0x5f5   :  { %v204_v17 = vmul.f32 %v264_v16, %v202_v15  ;;  %vm209_vm11 = vweird.f32 %v264_v16 }
 0x5f6   :  { %vm210_vm13 = vmor %vm208_vm12, %vm209_vm11 }
 0x5f7   :  { %v205_v18 = vsub.f32 1.0, %v204_v17 }
 0x5f9   :  { %v206_v20 = vmul.f32 %v264_v16, %v205_v18 }
 0x5fb   :  { %v207_v22 = vadd.f32 %v264_v16, %v206_v20 }
 0x5fd   :  { %v211_v24 = vsel %vm210_vm13, %v264_v16, %v207_v22 }
 0x5fe   :  { %v216_v25 = vsel %vm213_vm14, %v215_v23, %v211_v24 }
 0x5ff   :  { %v217_v26 = vmul.f32 %v216_v25, %v194_v8 }
 0x601   :  { %218 = vst [vmem:[%s306_s2] sm:$0xff] %v217_v26 }

</bundles_post_ra>
